<compile_context>
chip_gen: v7x
topology: tpu7x:2x2x1
jax: 0.10.0
libtpu: 0.0.40
codegen_flags: <defaults>
</compile_context>

<pallas_src>
import numpy as np

import jax
import jax.numpy as jnp
from jax.experimental import pallas as pl
from jax.experimental.pallas import tpu as pltpu

ROW, COL = 6, 7
NPOS = ROW * COL                  # 42 board cells
C1, C2, F1 = 32, 64, 128          # conv1 / conv2 / fc1 widths
D1 = NPOS * C1                    # 1344 conv1-output lanes (j1 = s*32 + c1)
D2 = C2 * NPOS                    # 2688 conv2-output lanes (j2 = c2*42 + s, PyTorch flatten)


def _round_up(x, m):
    return (x + m - 1) // m * m


# ---------------------------------------------------------------------------
# Fused kernel: one (bt, 42) batch tile per grid step; everything stays in VMEM.
# ---------------------------------------------------------------------------
def _fused_kernel(x_ref, w1_ref, b1_ref, w2_ref, b2_ref,
                  wf1_ref, bf1_ref, wf2_ref, bf2_ref, o_ref):
    w1 = w1_ref[...]                       # (42, 1344), bf16
    cdt = w1.dtype                         # matmul compute dtype
    x = x_ref[...].astype(cdt)             # (bt, 42)

    # conv1 + ReLU: one MXU matmul (3x3 taps unrolled into W1big at pack time).
    a1 = jnp.dot(x, w1, preferred_element_type=jnp.float32)
    a1 = jnp.maximum(a1 + b1_ref[...], 0.0)                       # (bt, 1344) f32

    # conv2 + ReLU: single K=1344 matmul; output lanes are already in PyTorch's
    # flatten order (c2*42 + s), so no reshape/relayout is needed before fc1.
    a2 = jnp.dot(a1.astype(cdt), w2_ref[...], preferred_element_type=jnp.float32)
    a2 = jnp.maximum(a2 + b2_ref[...], 0.0)                       # (bt, 2688) f32

    # fc1 + ReLU: single K=2688 matmul.
    h1 = jnp.dot(a2.astype(cdt), wf1_ref[...], preferred_element_type=jnp.float32)
    h1 = jnp.maximum(h1 + bf1_ref[...], 0.0)                      # (bt, 128) f32

    # fc2 folded in as a 128-lane reduction epilogue (no lane-sparse N=1 matmul).
    o_ref[...] = (jnp.sum(h1 * wf2_ref[...], axis=1, keepdims=True)
                  + bf2_ref[...])                                 # (bt, 1) f32


# ---------------------------------------------------------------------------
# One-time weight packing (PyTorch layout -> kernel-native matmul matrices).
# ---------------------------------------------------------------------------
def pack_params(p, param_dtype=jnp.bfloat16):
    w1 = np.asarray(p["conv1_w"], np.float32)             # (32, 1, 3, 3)
    w2 = np.asarray(p["conv2_w"], np.float32)             # (64, 32, 3, 3)

    w1big = np.zeros((NPOS, D1), np.float32)              # x[s_src]        -> a1[s*32 + c1]
    w2big = np.zeros((D1, D2), np.float32)                # a1[s_src*32+c1] -> a2[c2*42 + s]
    for i in range(ROW):
        for j in range(COL):
            s = i * COL + j
            for di in range(3):
                for dj in range(3):
                    ii, jj = i + di - 1, j + dj - 1
                    if 0 <= ii < ROW and 0 <= jj < COL:     # "same" padding validity
                        ssrc = ii * COL + jj
                        w1big[ssrc, s * C1:(s + 1) * C1] += w1[:, 0, di, dj]
                        w2big[ssrc * C1:(ssrc + 1) * C1, s::NPOS] += w2[:, :, di, dj].T

    return {
        "w1":  jnp.asarray(w1big, param_dtype),                                   # (42, 1344)
        "b1":  jnp.asarray(np.tile(np.asarray(p["conv1_b"], np.float32), NPOS)[None, :]),    # (1, 1344)
        "w2":  jnp.asarray(w2big, param_dtype),                                   # (1344, 2688)
        "b2":  jnp.asarray(np.repeat(np.asarray(p["conv2_b"], np.float32), NPOS)[None, :]),  # (1, 2688)
        "wf1": jnp.asarray(np.asarray(p["fc1_w"], np.float32).T, param_dtype),    # (2688, 128)
        "bf1": jnp.asarray(np.asarray(p["fc1_b"], np.float32)[None, :]),          # (1, 128)
        "wf2": jnp.asarray(np.asarray(p["fc2_w"], np.float32).reshape(1, F1)),    # (1, 128)
        "bf2": jnp.asarray(np.asarray(p["fc2_b"], np.float32).reshape(1, 1)),     # (1, 1)
    }


# ---------------------------------------------------------------------------
# Forward pass (matches ConnectFourCNN.forward).
# ---------------------------------------------------------------------------
def _choose_bt(batch, batch_tile):
    batch_tile = max(8, _round_up(int(batch_tile), 8))
    if batch >= 2 * batch_tile:
        return batch_tile
    # Small batch: split into (up to) two tiles so both v7x TensorCores get
    # work from the "parallel" grid axis (no effect on single-TC v5e/v6e).
    return max(8, _round_up(-(-batch // 2), 8))


def connect_four_cnn_forward(packed, x, *, batch_tile=256):
    """x: (B, 6, 7) float32 -> (B, 1) float32."""
    B = x.shape[0]
    bt = _choose_bt(B, batch_tile)
    b_pad = _round_up(B, bt)
    num_tiles = b_pad // bt

    xf = x.reshape(B, NPOS).astype(jnp.float32)            # row-major s = i*7 + j
    if b_pad != B:
        xf = jnp.pad(xf, ((0, b_pad - B), (0, 0)))

    flops = 2 * b_pad * (NPOS * D1 + D1 * D2 + D2 * F1 + F1)
    bytes_accessed = (xf.size * 4 + b_pad * 4
                      + sum(int(v.size) * v.dtype.itemsize for v in packed.values()))

    const2d = lambda i: (0, 0)
    out = pl.pallas_call(
        _fused_kernel,
        out_shape=jax.ShapeDtypeStruct((b_pad, 1), jnp.float32),
        grid=(num_tiles,),
        in_specs=[
            pl.BlockSpec((bt, NPOS), lambda i: (i, 0)),     # x, batch-tiled, lane-dense-ish
            pl.BlockSpec((NPOS, D1), const2d),              # conv1 as matrix (VMEM-resident)
            pl.BlockSpec((1, D1), const2d),                 # conv1 bias
            pl.BlockSpec((D1, D2), const2d),                # conv2 as matrix
            pl.BlockSpec((1, D2), const2d),                 # conv2 bias
            pl.BlockSpec((D2, F1), const2d),                # fc1 weight (transposed)
            pl.BlockSpec((1, F1), const2d),                 # fc1 bias
            pl.BlockSpec((1, F1), const2d),                 # fc2 weight
            pl.BlockSpec((1, 1), const2d),                  # fc2 bias
        ],
        out_specs=pl.BlockSpec((bt, 1), lambda i: (i, 0)),
        compiler_params=pltpu.CompilerParams(
            dimension_semantics=("parallel",),
            vmem_limit_bytes=32 * 1024 * 1024),
        cost_estimate=pl.CostEstimate(
            flops=int(flops), transcendentals=0,
            bytes_accessed=int(bytes_accessed)),
    )(xf, packed["w1"], packed["b1"], packed["w2"], packed["b2"],
      packed["wf1"], packed["bf1"], packed["wf2"], packed["bf2"])
    return out[:B]


# ---------------------------------------------------------------------------
# Deterministic PyTorch-layout parameter init + pure-JAX reference (f32).
# ---------------------------------------------------------------------------
def init_params(key):
    ks = jax.random.split(key, 8)

    def u(k, shape, fan_in):
        bound = 1.0 / jnp.sqrt(jnp.float32(fan_in))
        return jax.random.uniform(k, shape, jnp.float32, -bound, bound)

    fc_in = C2 * ROW * COL
    return {
        "conv1_w": u(ks[0], (C1, 1, 3, 3), 1 * 9),
        "conv1_b": u(ks[1], (C1,), 1 * 9),
        "conv2_w": u(ks[2], (C2, C1, 3, 3), C1 * 9),
        "conv2_b": u(ks[3], (C2,), C1 * 9),
        "fc1_w":   u(ks[4], (F1, fc_in), fc_in),
        "fc1_b":   u(ks[5], (F1,), fc_in),
        "fc2_w":   u(ks[6], (1, F1), F1),
        "fc2_b":   u(ks[7], (1,), F1),
    }


def reference_forward(params, x):
    x = x[:, None, :, :]
    y = jax.lax.conv_general_dilated(
        x, params["conv1_w"], (1, 1), ((1, 1), (1, 1)),
        dimension_numbers=("NCHW", "OIHW", "NCHW"))
    y = jax.nn.relu(y + params["conv1_b"][None, :, None, None])
    y = jax.lax.conv_general_dilated(
        y, params["conv2_w"], (1, 1), ((1, 1), (1, 1)),
        dimension_numbers=("NCHW", "OIHW", "NCHW"))
    y = jax.nn.relu(y + params["conv2_b"][None, :, None, None])
    y = y.reshape(y.shape[0], -1)
    y = jax.nn.relu(y @ params["fc1_w"].T + params["fc1_b"])
    y = y @ params["fc2_w"].T + params["fc2_b"]
    return y


if __name__ == "__main__":
    key = jax.random.PRNGKey(0)
    pkey, xkey = jax.random.split(key)
    params = init_params(pkey)
    packed = pack_params(params)           # one-time weight re-layout (bf16 matmul operands)

    fwd = jax.jit(connect_four_cnn_forward)

    # Small deterministic test batch: connect-four boards with entries in {-1, 0, 1}.
    batch = 2
    x = jax.random.randint(xkey, (batch, ROW, COL), -1, 2).astype(jnp.float32)
    out = jax.block_until_ready(fwd(packed, x))
    assert out.shape == (batch, 1), out.shape
    ref = jax.block_until_ready(reference_forward(params, x))
    # bf16 matmul operands (f32 accumulation) -> loosened tolerance vs f32 reference.
    assert jnp.allclose(out, ref, rtol=2e-2, atol=2e-2), (out, ref)

    # Also exercise the multi-tile path (two grid steps / both v7x TensorCores).
    x2 = jax.random.randint(jax.random.PRNGKey(1), (16, ROW, COL), -1, 2).astype(jnp.float32)
    out2 = jax.block_until_ready(fwd(packed, x2))
    ref2 = jax.block_until_ready(reference_forward(params, x2))
    assert out2.shape == (16, 1), out2.shape
    assert jnp.allclose(out2, ref2, rtol=2e-2, atol=2e-2), (out2, ref2)

    print("KERNEL_OK")
</pallas_src>

<mosaic_0001>
module attributes {stable_mosaic.version = 11 : i64} {
  func.func @_fused_kernel(%arg0: i32, %arg1: memref<8x42xf32, #tpu.memory_space<vmem>>, %arg2: memref<42x1344xbf16, #tpu.memory_space<vmem>>, %arg3: memref<1x1344xf32, #tpu.memory_space<vmem>>, %arg4: memref<1344x2688xbf16, #tpu.memory_space<vmem>>, %arg5: memref<1x2688xf32, #tpu.memory_space<vmem>>, %arg6: memref<2688x128xbf16, #tpu.memory_space<vmem>>, %arg7: memref<1x128xf32, #tpu.memory_space<vmem>>, %arg8: memref<1x128xf32, #tpu.memory_space<vmem>>, %arg9: memref<1x1xf32, #tpu.memory_space<vmem>>, %arg10: memref<8x1xf32, #tpu.memory_space<vmem>>) attributes {dimension_semantics = [#tpu.dimension_semantics<parallel>], iteration_bounds = array<i64: 1>, scalar_prefetch = 0 : i64, scratch_operands = 0 : i64, tpu.core_type = #tpu.core_type<tc>, window_params = [{transform_indices = @transform_0, window_bounds = array<i64: 8, 42>}, {pipeline_mode = #tpu.pipeline_mode<synchronous>, transform_indices = @transform_1, window_bounds = array<i64: 42, 1344>}, {pipeline_mode = #tpu.pipeline_mode<synchronous>, transform_indices = @transform_2, window_bounds = array<i64: 1, 1344>}, {pipeline_mode = #tpu.pipeline_mode<synchronous>, transform_indices = @transform_3, window_bounds = array<i64: 1344, 2688>}, {pipeline_mode = #tpu.pipeline_mode<synchronous>, transform_indices = @transform_4, window_bounds = array<i64: 1, 2688>}, {pipeline_mode = #tpu.pipeline_mode<synchronous>, transform_indices = @transform_5, window_bounds = array<i64: 2688, 128>}, {pipeline_mode = #tpu.pipeline_mode<synchronous>, transform_indices = @transform_6, window_bounds = array<i64: 1, 128>}, {pipeline_mode = #tpu.pipeline_mode<synchronous>, transform_indices = @transform_7, window_bounds = array<i64: 1, 128>}, {pipeline_mode = #tpu.pipeline_mode<synchronous>, transform_indices = @transform_8, window_bounds = array<i64: 1, 1>}, {transform_indices = @transform_9, window_bounds = array<i64: 8, 1>}]} {
    %c0 = arith.constant 0 : index
    %c0_0 = arith.constant 0 : index
    %0 = vector.load %arg2[%c0, %c0_0] : memref<42x1344xbf16, #tpu.memory_space<vmem>>, vector<42x1344xbf16>
    %c0_1 = arith.constant 0 : index
    %c0_2 = arith.constant 0 : index
    %1 = vector.load %arg1[%c0_1, %c0_2] : memref<8x42xf32, #tpu.memory_space<vmem>>, vector<8x42xf32>
    %2 = arith.truncf %1 : vector<8x42xf32> to vector<8x42xbf16>
    %cst = arith.constant dense<0.000000e+00> : vector<8x1344xf32>
    %3 = tpu.matmul %2, %0, %cst {dimension_numbers = #tpu.dot_dimension_numbers<[1], [0], [0], [1], [0, 0, 1, 1], [], []>} : vector<8x42xbf16>, vector<42x1344xbf16>, vector<8x1344xf32> -> vector<8x1344xf32>
    %c0_3 = arith.constant 0 : index
    %c0_4 = arith.constant 0 : index
    %4 = vector.load %arg3[%c0_3, %c0_4] : memref<1x1344xf32, #tpu.memory_space<vmem>>, vector<1x1344xf32>
    %5 = vector.broadcast %4 : vector<1x1344xf32> to vector<8x1344xf32>
    %6 = arith.addf %3, %5 : vector<8x1344xf32>
    %cst_5 = arith.constant 0.000000e+00 : f32
    %7 = vector.broadcast %cst_5 : f32 to vector<8x1344xf32>
    %8 = arith.maximumf %6, %7 : vector<8x1344xf32>
    %9 = arith.truncf %8 : vector<8x1344xf32> to vector<8x1344xbf16>
    %c0_6 = arith.constant 0 : index
    %c0_7 = arith.constant 0 : index
    %10 = vector.load %arg4[%c0_6, %c0_7] : memref<1344x2688xbf16, #tpu.memory_space<vmem>>, vector<1344x2688xbf16>
    %cst_8 = arith.constant dense<0.000000e+00> : vector<8x2688xf32>
    %11 = tpu.matmul %9, %10, %cst_8 {dimension_numbers = #tpu.dot_dimension_numbers<[1], [0], [0], [1], [0, 0, 1, 1], [], []>} : vector<8x1344xbf16>, vector<1344x2688xbf16>, vector<8x2688xf32> -> vector<8x2688xf32>
    %c0_9 = arith.constant 0 : index
    %c0_10 = arith.constant 0 : index
    %12 = vector.load %arg5[%c0_9, %c0_10] : memref<1x2688xf32, #tpu.memory_space<vmem>>, vector<1x2688xf32>
    %13 = vector.broadcast %12 : vector<1x2688xf32> to vector<8x2688xf32>
    %14 = arith.addf %11, %13 : vector<8x2688xf32>
    %cst_11 = arith.constant 0.000000e+00 : f32
    %15 = vector.broadcast %cst_11 : f32 to vector<8x2688xf32>
    %16 = arith.maximumf %14, %15 : vector<8x2688xf32>
    %17 = arith.truncf %16 : vector<8x2688xf32> to vector<8x2688xbf16>
    %c0_12 = arith.constant 0 : index
    %c0_13 = arith.constant 0 : index
    %18 = vector.load %arg6[%c0_12, %c0_13] : memref<2688x128xbf16, #tpu.memory_space<vmem>>, vector<2688x128xbf16>
    %cst_14 = arith.constant dense<0.000000e+00> : vector<8x128xf32>
    %19 = tpu.matmul %17, %18, %cst_14 {dimension_numbers = #tpu.dot_dimension_numbers<[1], [0], [0], [1], [0, 0, 1, 1], [], []>} : vector<8x2688xbf16>, vector<2688x128xbf16>, vector<8x128xf32> -> vector<8x128xf32>
    %c0_15 = arith.constant 0 : index
    %c0_16 = arith.constant 0 : index
    %20 = vector.load %arg7[%c0_15, %c0_16] : memref<1x128xf32, #tpu.memory_space<vmem>>, vector<1x128xf32>
    %21 = vector.broadcast %20 : vector<1x128xf32> to vector<8x128xf32>
    %22 = arith.addf %19, %21 : vector<8x128xf32>
    %cst_17 = arith.constant 0.000000e+00 : f32
    %23 = vector.broadcast %cst_17 : f32 to vector<8x128xf32>
    %24 = arith.maximumf %22, %23 : vector<8x128xf32>
    %c0_18 = arith.constant 0 : index
    %c0_19 = arith.constant 0 : index
    %25 = vector.load %arg8[%c0_18, %c0_19] : memref<1x128xf32, #tpu.memory_space<vmem>>, vector<1x128xf32>
    %26 = vector.broadcast %25 : vector<1x128xf32> to vector<8x128xf32>
    %27 = arith.mulf %24, %26 : vector<8x128xf32>
    %cst_20 = arith.constant dense<0.000000e+00> : vector<8xf32>
    %28 = vector.multi_reduction <add>, %27, %cst_20 [1] : vector<8x128xf32> to vector<8xf32>
    %29 = vector.shape_cast %28 : vector<8xf32> to vector<8x1xf32>
    %c0_21 = arith.constant 0 : index
    %c0_22 = arith.constant 0 : index
    %30 = vector.load %arg9[%c0_21, %c0_22] : memref<1x1xf32, #tpu.memory_space<vmem>>, vector<1x1xf32>
    %31 = vector.broadcast %30 : vector<1x1xf32> to vector<8x1xf32>
    %32 = arith.addf %29, %31 : vector<8x1xf32>
    %c0_23 = arith.constant 0 : index
    %c0_24 = arith.constant 0 : index
    %33 = vector.load %arg10[%c0_23, %c0_24] : memref<8x1xf32, #tpu.memory_space<vmem>>, vector<8x1xf32>
    tpu.vector_store %arg10[%c0_23, %c0_24], %32 {strides = array<i32>} : memref<8x1xf32, #tpu.memory_space<vmem>>, vector<8x1xf32>,
    return
  }
  func.func @transform_0(%arg0: i32) -> (i32, i32) {
    %c0_i32 = arith.constant 0 : i32
    %c0_i32_0 = arith.constant 0 : i32
    return %arg0, %c0_i32 : i32, i32
  }
  func.func @transform_1(%arg0: i32) -> (i32, i32) {
    %c0_i32 = arith.constant 0 : i32
    %c0_i32_0 = arith.constant 0 : i32
    %c0_i32_1 = arith.constant 0 : i32
    return %c0_i32, %c0_i32_0 : i32, i32
  }
  func.func @transform_2(%arg0: i32) -> (i32, i32) {
    %c0_i32 = arith.constant 0 : i32
    %c0_i32_0 = arith.constant 0 : i32
    %c0_i32_1 = arith.constant 0 : i32
    return %c0_i32, %c0_i32_0 : i32, i32
  }
  func.func @transform_3(%arg0: i32) -> (i32, i32) {
    %c0_i32 = arith.constant 0 : i32
    %c0_i32_0 = arith.constant 0 : i32
    %c0_i32_1 = arith.constant 0 : i32
    return %c0_i32, %c0_i32_0 : i32, i32
  }
  func.func @transform_4(%arg0: i32) -> (i32, i32) {
    %c0_i32 = arith.constant 0 : i32
    %c0_i32_0 = arith.constant 0 : i32
    %c0_i32_1 = arith.constant 0 : i32
    return %c0_i32, %c0_i32_0 : i32, i32
  }
  func.func @transform_5(%arg0: i32) -> (i32, i32) {
    %c0_i32 = arith.constant 0 : i32
    %c0_i32_0 = arith.constant 0 : i32
    %c0_i32_1 = arith.constant 0 : i32
    return %c0_i32, %c0_i32_0 : i32, i32
  }
  func.func @transform_6(%arg0: i32) -> (i32, i32) {
    %c0_i32 = arith.constant 0 : i32
    %c0_i32_0 = arith.constant 0 : i32
    %c0_i32_1 = arith.constant 0 : i32
    return %c0_i32, %c0_i32_0 : i32, i32
  }
  func.func @transform_7(%arg0: i32) -> (i32, i32) {
    %c0_i32 = arith.constant 0 : i32
    %c0_i32_0 = arith.constant 0 : i32
    %c0_i32_1 = arith.constant 0 : i32
    return %c0_i32, %c0_i32_0 : i32, i32
  }
  func.func @transform_8(%arg0: i32) -> (i32, i32) {
    %c0_i32 = arith.constant 0 : i32
    %c0_i32_0 = arith.constant 0 : i32
    %c0_i32_1 = arith.constant 0 : i32
    return %c0_i32, %c0_i32_0 : i32, i32
  }
  func.func @transform_9(%arg0: i32) -> (i32, i32) {
    %c0_i32 = arith.constant 0 : i32
    %c0_i32_0 = arith.constant 0 : i32
    return %arg0, %c0_i32 : i32, i32
  }
}

</mosaic_0001>

<bundles_post_ra>
// kernel: connect_four_cnn_forward.1
= control target key start
LH: loop header
LB: loop body
LE: loop exit
PB: predicated region body
PF: predicated region fallthrough
CT: control target
= control target key end

     0   :  { %s22267_s0 = inlined_call_operand.vmem [shape: f32[8,42], index: 0, kind: input, shape index: {}]   ;;  %s22268_s1 = inlined_call_operand.hbm [shape: bf16[42,1344], index: 1, kind: input, shape index: {}]   ;;  %s22269_s2 = inlined_call_operand.hbm [shape: f32[1,1344], index: 2, kind: input, shape index: {}]   ;;  %s22270_s3 = inlined_call_operand.hbm [shape: bf16[1344,2688], index: 3, kind: input, shape index: {}]   ;;  %s22271_s4 = inlined_call_operand.hbm [shape: f32[1,2688], index: 4, kind: input, shape index: {}]   ;;  %s22272_s5 = inlined_call_operand.hbm [shape: bf16[2688,128], index: 5, kind: input, shape index: {}]   ;;  %s22273_s6 = inlined_call_operand.hbm [shape: f32[1,128], index: 6, kind: input, shape index: {}]   ;;  %s22274_s7 = inlined_call_operand.hbm [shape: f32[1,128], index: 7, kind: input, shape index: {}]   ;;  %s22275_s8 = inlined_call_operand.<no memory space> [shape: f32[1,1], index: 8, kind: input, shape index: {}]   ;;  %s22276_s9 = inlined_call_operand.vmem [shape: f32[8,1], index: 9, kind: output, shape index: {}]  }
   0x1   :  { %v14_v0 = vstv %s22275_s8 }
   0x2   :  { %15 = vst [vmem:[#allocation2] sm:$0x1] %v14_v0 }
   0x3   :  { %16 = vsyncpa [#allocation4], 0 }
   0x4   :  { %17 = vsyncpa [#allocation6], 0 }
   0x5   :  { %18 = vsyncpa [#allocation9], 0 }
   0x6   :  { %19 = vsyncpa [#allocation12], 0  ;;  %s21710_s11 = smov [#allocation5]   ;;  %s21711_s13 = smov [#allocation8]  }
   0x7   :  { %s40_s12 = sshll.u32 %s21710_s11, 4  ;;  %s62_s14 = sshll.u32 %s21711_s13, 4  ;;  %s41_s12 = int_to_ptr.vmem [resolvable:$true] %s40_s12  ;;  %s63_s14 = int_to_ptr.vmem [resolvable:$true] %s62_s14 }
   0x8   :  { %s21548_s17 = scalar_lea.hbm %s22269_s2, 176 }
   0x9   :  { %p21549_p0 = scmp.ne.s32.totalorder %s22269_s2, %s21548_s17  ;;  %p21552_p1 = scmp.lt.u32.totalorder %s21548_s17, %s22269_s2 }
   0xb   :  { %p21554_p2 = pnand %p21552_p1, %p21549_p0 }
   0xd   :  { %21557 = shalt.err (!%p21554_p2)
}
   0xe   :  { %s21558_s21 = scalar_lea.vmem %s41_s12, 176  ;;  %s21562_s22 = scalar_lea.vmem %s41_s12, 192 }
   0xf   :  { %p21559_p3 = scmp.ne.s32.totalorder %s41_s12, %s21558_s21  ;;  %p21563_p4 = scmp.lt.s32.totalorder %s41_s12, %s41_s12 }
  0x10   :  { %p21564_p5 = scmp.lt.s32.totalorder %s21562_s22, %s21558_s21 }
  0x12   :  { %p21565_p6 = por %p21564_p5, %p21563_p4 }
  0x14   :  { %p21566_p7 = pnand %p21565_p6, %p21559_p3 }
  0x16   :  { %21569 = shalt.err (!%p21566_p7)
}
  0x17   :  { %43 = dma.hbm_to_vmem [thread:$0]  %s22269_s2, 176, %s41_s12, [#allocation6]  }
  0x18   :  { %s21570_s27 = scalar_lea.hbm %s22271_s4, 336 }
  0x19   :  { %p21571_p8 = scmp.ne.s32.totalorder %s22271_s4, %s21570_s27  ;;  %p21574_p9 = scmp.lt.u32.totalorder %s21570_s27, %s22271_s4 }
  0x1b   :  { %p21576_p10 = pnand %p21574_p9, %p21571_p8 }
  0x1d   :  { %21579 = shalt.err (!%p21576_p10)
}
  0x1e   :  { %s21580_s11 = scalar_lea.vmem %s63_s14, 336  ;;  %s21584_s13 = scalar_lea.vmem %s63_s14, 352 }
  0x1f   :  { %p21581_p11 = scmp.ne.s32.totalorder %s63_s14, %s21580_s11  ;;  %p21585_p12 = scmp.lt.s32.totalorder %s63_s14, %s63_s14 }
  0x20   :  { %p21586_p13 = scmp.lt.s32.totalorder %s21584_s13, %s21580_s11 }
  0x22   :  { %p21587_p0 = por %p21586_p13, %p21585_p12 }
  0x24   :  { %p21588_p1 = pnand %p21587_p0, %p21581_p11 }
  0x26   :  { %21591 = shalt.err (!%p21588_p1)
}
  0x27   :  { %65 = dma.hbm_to_vmem [thread:$0]  %s22271_s4, 336, %s63_s14, [#allocation9]  }
  0x28   :  { %s21712_s15 = smov [#allocation11]   ;;  %s21713_s17 = smov [#allocation3]  }
  0x29   :  { %s84_s16 = sshll.u32 %s21712_s15, 4  ;;  %s27_s18 = sshll.u32 %s21713_s17, 4  ;;  %s85_s16 = int_to_ptr.vmem [resolvable:$true] %s84_s16  ;;  %s21803_s18 = int_to_ptr.vmem [resolvable:$true] %s27_s18 }
  0x2a   :  { %s21592_s20 = scalar_lea.hbm %s22273_s6, 16 }
  0x2b   :  { %p21593_p2 = scmp.ne.s32.totalorder %s22273_s6, %s21592_s20  ;;  %p21596_p3 = scmp.lt.u32.totalorder %s21592_s20, %s22273_s6 }
  0x2d   :  { %p21598_p4 = pnand %p21596_p3, %p21593_p2 }
  0x2f   :  { %21601 = shalt.err (!%p21598_p4)
}
  0x30   :  { %s21602_s4 = scalar_lea.vmem %s85_s16, 16  ;;  %s21606_s14 = scalar_lea.vmem %s85_s16, 32 }
  0x31   :  { %p21603_p5 = scmp.ne.s32.totalorder %s85_s16, %s21602_s4  ;;  %p21607_p6 = scmp.lt.s32.totalorder %s85_s16, %s85_s16 }
  0x32   :  { %p21608_p7 = scmp.lt.s32.totalorder %s21606_s14, %s21602_s4 }
  0x34   :  { %p21609_p8 = por %p21608_p7, %p21607_p6 }
  0x36   :  { %p21610_p9 = pnand %p21609_p8, %p21603_p5 }
  0x38   :  { %21613 = shalt.err (!%p21610_p9)
}
  0x39   :  { %87 = dma.hbm_to_vmem [thread:$0]  %s22273_s6, 16, %s85_s16, [#allocation12]  }
  0x3a   :  { %s21614_s29 = scalar_lea.hbm %s22268_s1, 4224 }
  0x3b   :  { %p21615_p10 = scmp.ne.s32.totalorder %s22268_s1, %s21614_s29  ;;  %p21618_p11 = scmp.lt.u32.totalorder %s21614_s29, %s22268_s1 }
  0x3d   :  { %p21620_p12 = pnand %p21618_p11, %p21615_p10 }
  0x3f   :  { %21623 = shalt.err (!%p21620_p12)
}
  0x40   :  { %s21624_s2 = scalar_lea.vmem %s21803_s18, 4224  ;;  %p21629_p0 = scmp.lt.s32.totalorder %s21803_s18, %s21803_s18 }
  0x41   :  { %p21625_p13 = scmp.ne.s32.totalorder %s21803_s18, %s21624_s2  ;;  %p21630_p1 = scmp.lt.s32.totalorder %s21624_s2, %s21624_s2 }
  0x43   :  { %p21631_p2 = por %p21630_p1, %p21629_p0 }
  0x45   :  { %p21632_p3 = pnand %p21631_p2, %p21625_p13 }
  0x47   :  { %21635 = shalt.err (!%p21632_p3)
}
  0x48   :  { %s21714_s6 = smov 704   ;;  %s21715_s12 = smov 44  }
  0x49   :  { %33 = dma.hbm_to_vmem [thread:$0]  %s22268_s1, 4224, %s21803_s18, [#allocation4], %s21714_s6, %s21714_s6, %s21715_s12  }
  0x4a   :  { %s21716_s17 = smov [#allocation7]   ;;  %s21636_s21 = scalar_lea.hbm %s22270_s3, 225792 }
  0x4b   :  { %s49_s19 = sshll.u32 %s21716_s17, 4  ;;  %p21637_p4 = scmp.ne.s32.totalorder %s22270_s3, %s21636_s21  ;;  %s50_s19 = int_to_ptr.vmem [resolvable:$true] %s49_s19 }
  0x4c   :  { %p21640_p5 = scmp.lt.u32.totalorder %s21636_s21, %s22270_s3 }
  0x4e   :  { %p21642_p6 = pnand %p21640_p5, %p21637_p4 }
  0x50   :  { %21645 = shalt.err (!%p21642_p6)
}
  0x51   :  { %s21646_s14 = scalar_lea.vmem %s50_s19, 225792  ;;  %p21651_p8 = scmp.lt.s32.totalorder %s50_s19, %s50_s19 }
  0x52   :  { %p21647_p7 = scmp.ne.s32.totalorder %s50_s19, %s21646_s14  ;;  %p21652_p9 = scmp.lt.s32.totalorder %s21646_s14, %s21646_s14 }
  0x54   :  { %p21653_p10 = por %p21652_p9, %p21651_p8 }
  0x56   :  { %p21654_p11 = pnand %p21653_p10, %p21647_p7 }
  0x58   :  { %21657 = shalt.err (!%p21654_p11)
}
  0x59   :  { %s21717_s1 = smov 1344   ;;  %s21718_s18 = smov 84  }
  0x5a   :  { %55 = dma.hbm_to_vmem [thread:$0]  %s22270_s3, 225792, %s50_s19, [#allocation6], %s21717_s1, %s21717_s1, %s21718_s18  }
  0x5b   :  { %s21719_s27 = smov [#allocation10]   ;;  %s21658_s10 = scalar_lea.hbm %s22272_s5, 21504 }
  0x5c   :  { %s71_s28 = sshll.u32 %s21719_s27, 4  ;;  %p21659_p12 = scmp.ne.s32.totalorder %s22272_s5, %s21658_s10  ;;  %s72_s28 = int_to_ptr.vmem [resolvable:$true] %s71_s28 }
  0x5d   :  { %p21662_p13 = scmp.lt.u32.totalorder %s21658_s10, %s22272_s5 }
  0x5f   :  { %p21664_p0 = pnand %p21662_p13, %p21659_p12 }
  0x61   :  { %21667 = shalt.err (!%p21664_p0)
}
  0x62   :  { %s21668_s12 = scalar_lea.vmem %s72_s28, 21504  ;;  %p21673_p2 = scmp.lt.s32.totalorder %s72_s28, %s72_s28 }
  0x63   :  { %p21669_p1 = scmp.ne.s32.totalorder %s72_s28, %s21668_s12  ;;  %p21674_p3 = scmp.lt.s32.totalorder %s21668_s12, %s21668_s12 }
  0x65   :  { %p21675_p4 = por %p21674_p3, %p21673_p2 }
  0x67   :  { %p21676_p5 = pnand %p21675_p4, %p21669_p1 }
  0x69   :  { %21679 = shalt.err (!%p21676_p5)
}
  0x6a   :  { %s21720_s3 = smov 64   ;;  %s21721_s15 = smov 4  }
  0x6b   :  { %77 = dma.hbm_to_vmem [thread:$0]  %s22272_s5, 21504, %s72_s28, [#allocation9], %s21720_s3, %s21720_s3, %s21721_s15  }
  0x6c   :  { %s21722_s19 = smov [#allocation13]   ;;  %s21680_s22 = scalar_lea.hbm %s22274_s7, 16 }
  0x6d   :  { %s94_s8 = sshll.u32 %s21722_s19, 4  ;;  %p21681_p6 = scmp.ne.s32.totalorder %s22274_s7, %s21680_s22  ;;  %s95_s8 = int_to_ptr.vmem [resolvable:$true] %s94_s8 }
  0x6e   :  { %p21684_p7 = scmp.lt.u32.totalorder %s21680_s22, %s22274_s7 }
  0x70   :  { %p21686_p8 = pnand %p21684_p7, %p21681_p6 }
  0x72   :  { %21689 = shalt.err (!%p21686_p8)
}
  0x73   :  { %s21690_s1 = scalar_lea.vmem %s95_s8, 16  ;;  %s21694_s5 = scalar_lea.vmem %s95_s8, 32 }
  0x74   :  { %p21691_p9 = scmp.ne.s32.totalorder %s95_s8, %s21690_s1  ;;  %p21695_p10 = scmp.lt.s32.totalorder %s95_s8, %s95_s8 }
  0x75   :  { %p21696_p11 = scmp.lt.s32.totalorder %s21694_s5, %s21690_s1 }
  0x77   :  { %p21697_p12 = por %p21696_p11, %p21695_p10 }
  0x79   :  { %p21698_p13 = pnand %p21697_p12, %p21691_p9 }
  0x7b   :  { %21701 = shalt.err (!%p21698_p13)
}
  0x7c   :  { %97 = dma.hbm_to_vmem [thread:$0]  %s22274_s7, 16, %s95_s8, [#allocation12]  }
  0x7d   :  { %21702 = dma.done.wait [#allocation4], 4224  }
  0x7e   :  { %21703 = vsyncadd [#allocation4], 4294963072 }
  0x7f   :  { %21704 = dma.done.wait [#allocation6], 225968  }
  0x80   :  { %21705 = vsyncadd [#allocation6], 4294741328 }
  0x81   :  { %21706 = dma.done.wait [#allocation9], 21840  }
  0x82   :  { %21707 = vsyncadd [#allocation9], 4294945456 }
  0x83   :  { %21708 = dma.done.wait [#allocation12], 32  }
  0x84   :  { %21709 = vsyncadd [#allocation12], 4294967264  ;;  %v21723_v1 = vmov 0   ;;  %v18726_v2 = vld [vmem:[#allocation3 + $0x4] ss:$44 sps:$4 sm:$0xff]   ;;  %vm380_vm0 = vcmask 1044480  }
  0x85   :  { %446 = vmatprep.mubr.bf16.mxu0 %v21723_v1  ;;  %569 = vmatprep.mubr.bf16.mxu1 %v21723_v1  ;;  %v18728_v3 = vld [vmem:[#allocation3] ss:$44 sps:$4 sm:$0xff]   ;;  %v18729_v4 = vld [vmem:[#allocation3 + $0x5c] ss:$44 sps:$4 sm:$0xff]   ;;  %v18731_v5 = vld [vmem:[#allocation3 + $0x58] ss:$44 sps:$4 sm:$0xff]  }
  0x86   :  { %414 = vmatprep.subr.bf16.mxu0 %v18726_v2  ;;  %v18732_v6 = vld [vmem:[#allocation3 + $0xb4] ss:$44 sps:$4 sm:$0x1f]   ;;  %v18734_v7 = vld [vmem:[#allocation3 + $0xb0] ss:$44 sps:$4 sm:$0x1f]  }
  0x87   :  { %415 = vmatpush1.bf16.msra.mxu0 %v18728_v3  ;;  %v158_v8 = vld [vmem:[%s22267_s0] sm:$0xff]  ;;  %v382_v9 = vsel %vm380_vm0, %v18734_v7, 0  ;;  %v18737_v10 = vld [vmem:[#allocation3 + $0xc] ss:$44 sps:$4 sm:$0xff]   ;;  %vm376_vm1 = vcmask 343040   ;;  %v21724_v30 = vmov 0.0  }
  0x88   :  { %416 = vmatprep.subr.bf16.mxu0 %v18729_v4  ;;  %v21877_v11 = vpack.c.bf16 %v158_v8, %v158_v8  ;;  %v18735_v12 = vld [vmem:[#allocation3 + $0x8] ss:$44 sps:$4 sm:$0xff]   ;;  %v18740_v13 = vld [vmem:[#allocation3 + $0x64] ss:$44 sps:$4 sm:$0xff]   ;;  %v18738_v14 = vld [vmem:[#allocation3 + $0x60] ss:$44 sps:$4 sm:$0xff]  }
  0x89   :  { %v18753_v15 = vld [vmem:[#allocation3 + $0x1c] ss:$44 sps:$4 sm:$0xff]   ;;  %v18755_v16 = vld [vmem:[#allocation3 + $0x18] ss:$44 sps:$4 sm:$0xff]   ;;  %v18756_v18 = vld [vmem:[#allocation3 + $0x74] ss:$44 sps:$4 sm:$0xff]  }
  0x8a   :  { %v18741_v17 = vld [vmem:[#allocation3 + $0xbc] ss:$44 sps:$4 sm:$0x1f]   ;;  %v18743_v19 = vld [vmem:[#allocation3 + $0xb8] ss:$44 sps:$4 sm:$0x1f]   ;;  %537 = vmatprep.subr.bf16.mxu1 %v18753_v15 }
  0x8b   :  { %417 = vmatpush1.bf16.msra.mxu0 %v18731_v5  ;;  %v18758_v20 = vld [vmem:[#allocation3 + $0x70] ss:$44 sps:$4 sm:$0xff]   ;;  %538 = vmatpush1.bf16.msra.mxu1 %v18755_v16  ;;  %v18759_v21 = vld [vmem:[#allocation3 + $0xcc] ss:$44 sps:$4 sm:$0x1f]   ;;  %v388_v24 = vsel %vm380_vm0, %v18743_v19, 0 }
  0x8c   :  { %16143 = vmatprep.subr.msk.bf16.mxu0 %vm380_vm0, %v18732_v6  ;;  %539 = vmatprep.subr.bf16.mxu1 %v18756_v18  ;;  %v18761_v22 = vld [vmem:[#allocation3 + $0xc8] ss:$44 sps:$4 sm:$0x1f]   ;;  %v18744_v26 = vld [vmem:[#allocation3 + $0x10] ss:$44 sps:$4 sm:$0xff]   ;;  %vm21725_vm2 = vmmov 0  }
  0x8d   :  { %v18746_v23 = vld [vmem:[#allocation3 + $0x14] ss:$44 sps:$4 sm:$0xff]   ;;  %v400_v25 = vsel %vm380_vm0, %v18761_v22, 0  ;;  %v18749_v27 = vld [vmem:[#allocation3 + $0x6c] ss:$44 sps:$4 sm:$0xff]   ;;  %vm11544_vm3 = vcmask 523264  }
  0x8e   :  { %v18765_v28 = vld [vmem:[#allocation3 + $0x28] ss:$44 sps:$4 sm:$0xff]   ;;  %v18750_v31 = vld [vmem:[#allocation3 + $0xc4] ss:$44 sps:$4 sm:$0x1f]   ;;  %vm16100_vm4 = vcmask 7168  }
  0x8f   :  { %419 = vmatpush1.bf16.msra.mxu0 %v382_v9  ;;  %540 = vmatpush1.bf16.msra.mxu1 %v18758_v20  ;;  %v18747_v29 = vld [vmem:[#allocation3 + $0x68] ss:$44 sps:$4 sm:$0xff]   ;;  %v18752_v32 = vld [vmem:[#allocation3 + $0xc0] ss:$44 sps:$4 sm:$0x1f]  }
  0x90   :  { %455 = vmatprep.subr.bf16.mxu0 %v18737_v10  ;;  %16149 = vmatprep.subr.msk.bf16.mxu1 %vm380_vm0, %v18759_v21  ;;  %v18769_v33 = vld [vmem:[#allocation3 + $0x80] ss:$44 sps:$4 sm:$0xff]   ;;  %v18773_v34 = vld [vmem:[#allocation3 + $0xd8] ss:$44 sps:$4 sm:$0x1f]   ;;  %v394_v35 = vsel %vm380_vm0, %v18752_v32, 0 }
  0x91   :  { %v18764_v36 = vld [vmem:[#allocation3 + $0x24] ss:$44 sps:$4 sm:$0xff]   ;;  %v412_v37 = vsel %vm380_vm0, %v18773_v34, 0  ;;  %v18779_v38 = vld [vmem:[#allocation7 + $0xc] ss:$84 sps:$4 sm:$0xff]  }
  0x92   :  { %16144 = vmatmul.mubr.msk.bf16.vlgmr.msra.gmra.mrb[0].mxu0 %vm376_vm1, %v21877_v11  ;;  %v18762_v39 = vld [vmem:[#allocation3 + $0x20] ss:$44 sps:$4 sm:$0xff]   ;;  %v18768_v40 = vld [vmem:[#allocation3 + $0x7c] ss:$44 sps:$4 sm:$0xff]   ;;  %v18766_v41 = vld [vmem:[#allocation3 + $0x78] ss:$44 sps:$4 sm:$0xff]  }
  0x93   :  { %456 = vmatpush1.bf16.msra.mxu0 %v18735_v12  ;;  %487 = vmatprep.mubr.bf16.mxu0 %v21723_v1  ;;  %v18777_v42 = vld [vmem:[#allocation7 + $0x8] ss:$84 sps:$4 sm:$0xff]   ;;  %v18770_v44 = vld [vmem:[#allocation3 + $0xd4] ss:$44 sps:$4 sm:$0x1f]  }
  0x94   :  { %457 = vmatprep.subr.bf16.mxu0 %v18740_v13  ;;  %542 = vmatpush1.bf16.msra.mxu1 %v400_v25  ;;  %v18785_v43 = vld [vmem:[#allocation7 + $0xb4] ss:$84 sps:$4 sm:$0xff]   ;;  %v18783_v46 = vld [vmem:[#allocation7 + $0xb0] ss:$84 sps:$4 sm:$0xff]   ;;  %v18789_v50 = vld [vmem:[#allocation7 + $0x158] ss:$84 sps:$4 sm:$0xff]  }
  0x95   :  { %18448 = vmatprep.subr.bf16.mxu1 %v21724_v30  ;;  %v18772_v45 = vld [vmem:[#allocation3 + $0xd0] ss:$44 sps:$4 sm:$0x1f]   ;;  %v18776_v49 = vld [vmem:[#allocation7 + $0x4] ss:$84 sps:$4 sm:$0xff]  }
  0x96   :  { %v18791_v47 = vld [vmem:[#allocation7 + $0x15c] ss:$84 sps:$4 sm:$0xff]   ;;  %v406_v48 = vsel %vm380_vm0, %v18772_v45, 0  ;;  %v18797_v51 = vld [vmem:[#allocation7 + $0x204] ss:$84 sps:$4 sm:$0xff]  }
  0x97   :  { %458 = vmatpush1.bf16.msra.mxu0 %v18738_v14  ;;  %16150 = vmatmul.mubr.msk.bf16.vlgmr.msra.gmra.mrb[0].mxu1 %vm376_vm1, %v21877_v11  ;;  %v18774_v52 = vld [vmem:[#allocation7] ss:$84 sps:$4 sm:$0xff]   ;;  %v18780_v56 = vld [vmem:[#allocation7 + $0xa8] ss:$84 sps:$4 sm:$0xff]   ;;  %v18786_v60 = vld [vmem:[#allocation7 + $0x150] ss:$84 sps:$4 sm:$0xff]  }
  0x98   :  { %16145 = vmatprep.subr.msk.bf16.mxu0 %vm380_vm0, %v18741_v17  ;;  %18449 = vmatpush3.bf16.msra.mxu1 %v18765_v28  ;;  %v18782_v53 = vld [vmem:[#allocation7 + $0xac] ss:$84 sps:$4 sm:$0xff]   ;;  %v18788_v57 = vld [vmem:[#allocation7 + $0x154] ss:$84 sps:$4 sm:$0xff]   ;;  %v18794_v61 = vld [vmem:[#allocation7 + $0x1fc] ss:$84 sps:$4 sm:$0xff]  }
  0x99   :  { %18454 = vmatprep.mubr.msk.bf16.mxu1 %vm21725_vm2, %v21724_v30  ;;  %18450 = vmatprep.subr.bf16.mxu1 %v21724_v30  ;;  %v18795_v54 = vld [vmem:[#allocation7 + $0x200] ss:$84 sps:$4 sm:$0xff]   ;;  %v18801_v58 = vld [vmem:[#allocation7 + $0x2a8] ss:$84 sps:$4 sm:$0xff]   ;;  %v18807_v62 = vld [vmem:[#allocation7 + $0x350] ss:$84 sps:$4 sm:$0xff]  }
  0x9a   :  { %v18803_v55 = vld [vmem:[#allocation7 + $0x2ac] ss:$84 sps:$4 sm:$0xff]   ;;  %v18809_v59 = vld [vmem:[#allocation7 + $0x354] ss:$84 sps:$4 sm:$0xff]   ;;  %v18815_v63 = vld [vmem:[#allocation7 + $0x3fc] ss:$84 sps:$4 sm:$0xff]  }
  0x9b   :  { %460 = vmatpush1.bf16.msra.mxu0 %v388_v24  ;;  %v18792_v0 = vld [vmem:[#allocation7 + $0x1f8] ss:$84 sps:$4 sm:$0xff]   ;;  %v18798_v5 = vld [vmem:[#allocation7 + $0x2a0] ss:$84 sps:$4 sm:$0xff]   ;;  %v18804_v9 = vld [vmem:[#allocation7 + $0x348] ss:$84 sps:$4 sm:$0xff]  }
  0x9c   :  { %496 = vmatprep.subr.bf16.mxu0 %v18746_v23  ;;  %18451 = vmatpush3.bf16.msra.mxu1 %v18769_v33  ;;  %v18800_v2 = vld [vmem:[#allocation7 + $0x2a4] ss:$84 sps:$4 sm:$0xff]   ;;  %v18806_v6 = vld [vmem:[#allocation7 + $0x34c] ss:$84 sps:$4 sm:$0xff]   ;;  %v18812_v10 = vld [vmem:[#allocation7 + $0x3f4] ss:$84 sps:$4 sm:$0xff]  }
  0x9d   :  { %18452 = vmatprep.subr.bf16.mxu1 %v21724_v30  ;;  %v18813_v3 = vld [vmem:[#allocation7 + $0x3f8] ss:$84 sps:$4 sm:$0xff]   ;;  %v18819_v7 = vld [vmem:[#allocation7 + $0x4a0] ss:$84 sps:$4 sm:$0xff]   ;;  %v18810_v13 = vld [vmem:[#allocation7 + $0x3f0] ss:$84 sps:$4 sm:$0xff]  }
  0x9e   :  { %16146 = vmatmul.mubr.msk.bf16.vlgmr.msra.gmra.mrb[4].mxu0 %vm376_vm1, %v21877_v11  ;;  %v18821_v4 = vld [vmem:[#allocation7 + $0x4a4] ss:$84 sps:$4 sm:$0xff]   ;;  %v18827_v8 = vld [vmem:[#allocation7 + $0x54c] ss:$84 sps:$4 sm:$0xff]   ;;  %v18833_v12 = vld [vmem:[#allocation7 + $0x5f4] ss:$84 sps:$4 sm:$0xff]  }
  0x9f   :  { %497 = vmatpush1.bf16.msra.mxu0 %v18744_v26  ;;  %528 = vmatprep.mubr.bf16.mxu0 %v21723_v1  ;;  %v18818_v14 = vld [vmem:[#allocation7 + $0x49c] ss:$84 sps:$4 sm:$0xff]   ;;  %v18816_v17 = vld [vmem:[#allocation7 + $0x498] ss:$84 sps:$4 sm:$0xff]   ;;  %v18822_v21 = vld [vmem:[#allocation7 + $0x540] ss:$84 sps:$4 sm:$0xff]  }
  0xa0   :  { %498 = vmatprep.subr.bf16.mxu0 %v18749_v27  ;;  %18453 = vmatpush3.bf16.msra.mxu1 %v412_v37  ;;  %v18831_v15 = vld [vmem:[#allocation7 + $0x5f0] ss:$84 sps:$4 sm:$0xff]   ;;  %v18837_v19 = vld [vmem:[#allocation7 + $0x698] ss:$84 sps:$4 sm:$0xff]   ;;  %v18843_v23 = vld [vmem:[#allocation7 + $0x740] ss:$84 sps:$4 sm:$0xff]  }
  0xa1   :  { %11794 = vmatprep.subr.bf16.mxu1 %v18779_v38  ;;  %v18839_v16 = vld [vmem:[#allocation7 + $0x69c] ss:$84 sps:$4 sm:$0xff]   ;;  %v18824_v18 = vld [vmem:[#allocation7 + $0x544] ss:$84 sps:$4 sm:$0xff]   ;;  %v18830_v22 = vld [vmem:[#allocation7 + $0x5ec] ss:$84 sps:$4 sm:$0xff]  }
  0xa2   :  { %v18845_v20 = vld [vmem:[#allocation7 + $0x744] ss:$84 sps:$4 sm:$0xff]   ;;  %v18851_v24 = vld [vmem:[#allocation7 + $0x7ec] ss:$84 sps:$4 sm:$0xff]   ;;  %v18828_v25 = vld [vmem:[#allocation7 + $0x5e8] ss:$84 sps:$4 sm:$0xff]  }
  0xa3   :  { %499 = vmatpush1.bf16.msra.mxu0 %v18747_v29  ;;  %18455 = vmatmul.mubr.msk.bf16.vlgmr.msra.gmra.mrb[4].mxu1 %vm376_vm1, %v21877_v11  ;;  %v18836_v26 = vld [vmem:[#allocation7 + $0x694] ss:$84 sps:$4 sm:$0xff]   ;;  %v18834_v29 = vld [vmem:[#allocation7 + $0x690] ss:$84 sps:$4 sm:$0xff]   ;;  %v18840_v33 = vld [vmem:[#allocation7 + $0x738] ss:$84 sps:$4 sm:$0xff]  }
  0xa4   :  { %16147 = vmatprep.subr.msk.bf16.mxu0 %vm380_vm0, %v18750_v31  ;;  %11795 = vmatpush1.bf16.msra.mxu1 %v18777_v42  ;;  %v18849_v27 = vld [vmem:[#allocation7 + $0x7e8] ss:$84 sps:$4 sm:$0xff]   ;;  %v18855_v32 = vld [vmem:[#allocation7 + $0x890] ss:$84 sps:$4 sm:$0xff]   ;;  %v18854_v37 = vld [vmem:[#allocation7 + $0x88c] ss:$84 sps:$4 sm:$0xff]  }
  0xa5   :  { %11796 = vmatprep.subr.bf16.mxu1 %v18785_v43  ;;  %v18857_v28 = vld [vmem:[#allocation7 + $0x894] ss:$84 sps:$4 sm:$0xff]   ;;  %v18842_v31 = vld [vmem:[#allocation7 + $0x73c] ss:$84 sps:$4 sm:$0xff]   ;;  %v18848_v34 = vld [vmem:[#allocation7 + $0x7e4] ss:$84 sps:$4 sm:$0xff]  }
  0xa6   :  { %v18861_v38 = vld [vmem:[#allocation7 + $0x938] ss:$84 sps:$4 sm:$0xff]   ;;  %v18867_v42 = vld [vmem:[#allocation7 + $0x9e0] ss:$84 sps:$4 sm:$0xff]   ;;  %v18858_v43 = vld [vmem:[#allocation7 + $0x930] ss:$84 sps:$4 sm:$0xff]  }
  0xa7   :  { %501 = vmatpush1.bf16.msra.mxu0 %v394_v35  ;;  %v18846_v35 = vld [vmem:[#allocation7 + $0x7e0] ss:$84 sps:$4 sm:$0xff]   ;;  %v18866_v45 = vld [vmem:[#allocation7 + $0x9dc] ss:$84 sps:$4 sm:$0xff]  }
  0xa8   :  { %578 = vmatprep.subr.bf16.mxu0 %v18764_v36  ;;  %11797 = vmatpush1.bf16.msra.mxu1 %v18783_v46  ;;  %v18863_v36 = vld [vmem:[#allocation7 + $0x93c] ss:$84 sps:$4 sm:$0xff]   ;;  %v18864_v46 = vld [vmem:[#allocation7 + $0x9d8] ss:$84 sps:$4 sm:$0xff]  }
  0xa9   :  { %11798 = vmatprep.subr.bf16.mxu1 %v18791_v47  ;;  %v18872_v47 = vld [vmem:[#allocation7 + $0xa84] ss:$84 sps:$4 sm:$0xff]  }
  0xaa   :  { %16148 = vmatmul.mubr.msk.bf16.vlgmr.msra.gmra.mrb[8].mxu0 %vm376_vm1, %v21877_v11 }
  0xab   :  { %579 = vmatpush1.bf16.msra.mxu0 %v18762_v39  ;;  %610 = vmatprep.mubr.bf16.mxu0 %v21723_v1  ;;  %v18852_v39 = vld [vmem:[#allocation7 + $0x888] ss:$84 sps:$4 sm:$0xff]  }
  0xac   :  { %580 = vmatprep.subr.bf16.mxu0 %v18768_v40  ;;  %11799 = vmatpush1.bf16.msra.mxu1 %v18789_v50  ;;  %v18869_v40 = vld [vmem:[#allocation7 + $0x9e4] ss:$84 sps:$4 sm:$0xff]  }
  0xad   :  { %11800 = vmatprep.subr.bf16.mxu1 %v18797_v51  ;;  %v21913_v51 = vld [vmem:[#allocation5] sm:$0xff] }
  0xaf   :  { %581 = vmatpush1.bf16.msra.mxu0 %v18766_v41  ;;  %v18860_v41 = vld [vmem:[#allocation7 + $0x934] ss:$84 sps:$4 sm:$0xff]  }
  0xb0   :  { %16151 = vmatprep.subr.msk.bf16.mxu0 %vm380_vm0, %v18770_v44  ;;  %11801 = vmatpush1.bf16.msra.mxu1 %v18795_v54  ;;  %v18875_v44 = vld [vmem:[#allocation7 + $0xa8c] ss:$84 sps:$4 sm:$0xff]  }
  0xb1   :  { %11802 = vmatprep.subr.bf16.mxu1 %v18803_v55 }
  0xb3   :  { %583 = vmatpush1.bf16.msra.mxu0 %v406_v48  ;;  %v164_v48 = vlaneseq }
  0xb4   :  { %11548 = vmatprep.subr.bf16.mxu0 %v18776_v49  ;;  %11803 = vmatpush1.bf16.msra.mxu1 %v18801_v58 }
  0xb5   :  { %11804 = vmatprep.subr.bf16.mxu1 %v18809_v59  ;;  %v21908_v49 = vshrl.u32 %v164_v48, 7  ;;  %v18923_v48 = vld [vmem:[#allocation7 + $0xfcc] ss:$84 sps:$4 sm:$0xff]  }
  0xb6   :  { %16152 = vmatmul.mubr.msk.bf16.vlgmr.msra.gmra.mrb[12].mxu0 %vm376_vm1, %v21877_v11  ;;  %v18825_v11 = vld [vmem:[#allocation7 + $0x548] ss:$84 sps:$4 sm:$0xff]  }
  0xb7   :  { %11549 = vmatpush1.bf16.msra.mxu0 %v18774_v52  ;;  %v21911_v50 = vsub.s32 0, %v21908_v49  ;;  %v21916_v52 = vsub.s32 1, %v21908_v49 }
  0xb8   :  { %11550 = vmatprep.subr.bf16.mxu0 %v18782_v53  ;;  %11805 = vmatpush1.bf16.msra.mxu1 %v18807_v62 }
  0xb9   :  { %11806 = vmatprep.subr.bf16.mxu1 %v18815_v63  ;;  %v167_v53 = vrot.slane %v21913_v51, %v21911_v50  ;;  %v171_v54 = vrot.slane %v21913_v51, %v21916_v52  ;;  %v18870_v63 = vld [vmem:[#allocation7 + $0xa80] ss:$84 sps:$4 sm:$0xff]  }
  0xbb   :  { %11551 = vmatpush1.bf16.msra.mxu0 %v18780_v56 }
  0xbc   :  { %11552 = vmatprep.subr.bf16.mxu0 %v18788_v57  ;;  %11807 = vmatpush1.bf16.msra.mxu1 %v18813_v3  ;;  %v21925_v3 = vsub.s32 3, %v21908_v49 }
  0xbd   :  { %11808 = vmatprep.subr.bf16.mxu1 %v18821_v4 }
  0xbf   :  { %11553 = vmatpush1.bf16.msra.mxu0 %v18786_v60 }
  0xc0   :  { %11554 = vmatprep.subr.bf16.mxu0 %v18794_v61  ;;  %11809 = vmatpush1.bf16.msra.mxu1 %v18819_v7  ;;  %v18876_v7 = vld [vmem:[#allocation7 + $0xb28] ss:$84 sps:$4 sm:$0xff]  }
  0xc1   :  { %11810 = vmatprep.subr.bf16.mxu1 %v18827_v8  ;;  %v18879_v8 = vld [vmem:[#allocation7 + $0xb30] ss:$84 sps:$4 sm:$0xff]  }
  0xc3   :  { %11555 = vmatpush1.bf16.msra.mxu0 %v18792_v0  ;;  %v18873_v0 = vld [vmem:[#allocation7 + $0xa88] ss:$84 sps:$4 sm:$0xff]  }
  0xc4   :  { %11556 = vmatprep.subr.bf16.mxu0 %v18800_v2  ;;  %11811 = vmatpush1.bf16.msra.mxu1 %v18825_v11  ;;  %v18887_v11 = vld [vmem:[#allocation7 + $0xbdc] ss:$84 sps:$4 sm:$0xff]  }
  0xc5   :  { %11812 = vmatprep.subr.bf16.mxu1 %v18833_v12 }
  0xc7   :  { %11557 = vmatpush1.bf16.msra.mxu0 %v18798_v5  ;;  %v18878_v5 = vld [vmem:[#allocation7 + $0xb2c] ss:$84 sps:$4 sm:$0xff]  }
  0xc8   :  { %11558 = vmatprep.subr.bf16.mxu0 %v18806_v6  ;;  %11813 = vmatpush1.bf16.msra.mxu1 %v18831_v15  ;;  %v18881_v6 = vld [vmem:[#allocation7 + $0xb34] ss:$84 sps:$4 sm:$0xff]   ;;  %v18885_v15 = vld [vmem:[#allocation7 + $0xbd8] ss:$84 sps:$4 sm:$0xff]  }
  0xc9   :  { %11814 = vmatprep.subr.bf16.mxu1 %v18839_v16 }
  0xcb   :  { %11559 = vmatpush1.bf16.msra.mxu0 %v18804_v9  ;;  %v179_v9 = vrot.slane %v21913_v51, %v21925_v3 }
  0xcc   :  { %11560 = vmatprep.subr.bf16.mxu0 %v18812_v10  ;;  %11815 = vmatpush1.bf16.msra.mxu1 %v18837_v19  ;;  %v18884_v10 = vld [vmem:[#allocation7 + $0xbd4] ss:$84 sps:$4 sm:$0xff]   ;;  %v18893_v19 = vld [vmem:[#allocation7 + $0xc84] ss:$84 sps:$4 sm:$0xff]  }
  0xcd   :  { %11816 = vmatprep.subr.bf16.mxu1 %v18845_v20 }
  0xcf   :  { %11561 = vmatpush1.bf16.msra.mxu0 %v18810_v13 }
  0xd0   :  { %11562 = vmatprep.subr.bf16.mxu0 %v18818_v14  ;;  %11817 = vmatpush1.bf16.msra.mxu1 %v18843_v23  ;;  %v18882_v14 = vld [vmem:[#allocation7 + $0xbd0] ss:$84 sps:$4 sm:$0xff]   ;;  %v18891_v23 = vld [vmem:[#allocation7 + $0xc80] ss:$84 sps:$4 sm:$0xff]  }
  0xd1   :  { %11818 = vmatprep.subr.bf16.mxu1 %v18851_v24 }
  0xd3   :  { %11563 = vmatpush1.bf16.msra.mxu0 %v18816_v17 }
  0xd4   :  { %11564 = vmatprep.subr.bf16.mxu0 %v18824_v18  ;;  %11819 = vmatpush1.bf16.msra.mxu1 %v18849_v27  ;;  %v18890_v18 = vld [vmem:[#allocation7 + $0xc7c] ss:$84 sps:$4 sm:$0xff]   ;;  %v18894_v27 = vld [vmem:[#allocation7 + $0xd20] ss:$84 sps:$4 sm:$0xff]  }
  0xd5   :  { %11820 = vmatprep.subr.bf16.mxu1 %v18857_v28  ;;  %v18897_v28 = vld [vmem:[#allocation7 + $0xd28] ss:$84 sps:$4 sm:$0xff]  }
  0xd7   :  { %11565 = vmatpush1.bf16.msra.mxu0 %v18822_v21 }
  0xd8   :  { %11566 = vmatprep.subr.bf16.mxu0 %v18830_v22  ;;  %11821 = vmatpush1.bf16.msra.mxu1 %v18855_v32  ;;  %v18888_v22 = vld [vmem:[#allocation7 + $0xc78] ss:$84 sps:$4 sm:$0xff]  }
  0xd9   :  { %11822 = vmatprep.subr.bf16.mxu1 %v18863_v36 }
  0xdb   :  { %11567 = vmatpush1.bf16.msra.mxu0 %v18828_v25  ;;  %v18896_v25 = vld [vmem:[#allocation7 + $0xd24] ss:$84 sps:$4 sm:$0xff]  }
  0xdc   :  { %11568 = vmatprep.subr.bf16.mxu0 %v18836_v26  ;;  %11823 = vmatpush1.bf16.msra.mxu1 %v18861_v38  ;;  %v18899_v26 = vld [vmem:[#allocation7 + $0xd2c] ss:$84 sps:$4 sm:$0xff]   ;;  %v18911_v38 = vld [vmem:[#allocation7 + $0xe7c] ss:$84 sps:$4 sm:$0xff]  }
  0xdd   :  { %11824 = vmatprep.subr.bf16.mxu1 %v18869_v40  ;;  %v18906_v40 = vld [vmem:[#allocation7 + $0xe70] ss:$84 sps:$4 sm:$0xff]  }
  0xdf   :  { %11569 = vmatpush1.bf16.msra.mxu0 %v18834_v29  ;;  %v18902_v29 = vld [vmem:[#allocation7 + $0xdcc] ss:$84 sps:$4 sm:$0xff]  }
  0xe0   :  { %11570 = vmatprep.subr.bf16.mxu0 %v18842_v31  ;;  %11825 = vmatpush1.bf16.msra.mxu1 %v18867_v42  ;;  %v18905_v31 = vld [vmem:[#allocation7 + $0xdd4] ss:$84 sps:$4 sm:$0xff]   ;;  %v18914_v42 = vld [vmem:[#allocation7 + $0xf1c] ss:$84 sps:$4 sm:$0xff]  }
  0xe1   :  { %11835 = vmatprep.subr.bf16.mxu1 %v18875_v44  ;;  %v18912_v44 = vld [vmem:[#allocation7 + $0xf18] ss:$84 sps:$4 sm:$0xff]  }
  0xe3   :  { %11571 = vmatpush1.bf16.msra.mxu0 %v18840_v33 }
  0xe4   :  { %11572 = vmatprep.subr.bf16.mxu0 %v18848_v34  ;;  %v18900_v34 = vld [vmem:[#allocation7 + $0xdc8] ss:$84 sps:$4 sm:$0xff]  }
  0xe7   :  { %11573 = vmatpush1.bf16.msra.mxu0 %v18846_v35  ;;  %v18903_v35 = vld [vmem:[#allocation7 + $0xdd0] ss:$84 sps:$4 sm:$0xff]  }
  0xe8   :  { %11574 = vmatprep.subr.bf16.mxu0 %v18854_v37  ;;  %v18908_v37 = vld [vmem:[#allocation7 + $0xe74] ss:$84 sps:$4 sm:$0xff]  }
  0xeb   :  { %11575 = vmatpush1.bf16.msra.mxu0 %v18852_v39 }
  0xec   :  { %11576 = vmatprep.subr.bf16.mxu0 %v18860_v41  ;;  %v18909_v41 = vld [vmem:[#allocation7 + $0xe78] ss:$84 sps:$4 sm:$0xff]  }
  0xef   :  { %11577 = vmatpush1.bf16.msra.mxu0 %v18858_v43  ;;  %v18917_v43 = vld [vmem:[#allocation7 + $0xf24] ss:$84 sps:$4 sm:$0xff]  }
  0xf0   :  { %11578 = vmatprep.subr.bf16.mxu0 %v18866_v45  ;;  %v18915_v45 = vld [vmem:[#allocation7 + $0xf20] ss:$84 sps:$4 sm:$0xff]  }
  0xf3   :  { %11579 = vmatpush1.bf16.msra.mxu0 %v18864_v46 }
  0xf4   :  { %11589 = vmatprep.subr.bf16.mxu0 %v18872_v47  ;;  %v18920_v47 = vld [vmem:[#allocation7 + $0xfc4] ss:$84 sps:$4 sm:$0xff]  }
 0x165   :  { %v448_v55 = vpop.f32.mrb[0].mxu0 }
 0x166   :  { %v449_v56 = vadd.f32 %v448_v55, %v167_v53  ;;  %v450_v57 = vpop.f32.mrb[1].mxu0 }
 0x167   :  { %v451_v58 = vadd.f32 %v450_v57, %v171_v54  ;;  %v452_v59 = vpop.f32.mrb[2].mxu0 }
 0x168   :  { %v659_v60 = vmax.f32 %v449_v56, 0.0  ;;  %v453_v61 = vpop.f32.mrb[3].mxu0  ;;  %v18921_v59 = vld [vmem:[#allocation7 + $0xfc8] ss:$84 sps:$4 sm:$0xff]  }
 0x169   :  { %v660_v62 = vmax.f32 %v451_v58, 0.0  ;;  %v18918_v58 = vld [vmem:[#allocation7 + $0xfc0] ss:$84 sps:$4 sm:$0xff]  }
 0x16a   :  { %v21927_v4 = vpack.c.bf16 %v659_v60, %v659_v60  ;;  %v21945_v46 = vpop.f32.mrb[0].mxu1  ;;  %v18926_v61 = vld [vmem:[#allocation7 + $0x106c] ss:$84 sps:$4 sm:$0xff]  }
 0x16b   :  { %v21922_v2 = vpack.c.bf16 %v660_v62, %v660_v62  ;;  %v21947_v53 = vpop.f32.mrb[1].mxu1  ;;  %v18929_v62 = vld [vmem:[#allocation7 + $0x1074] ss:$84 sps:$4 sm:$0xff]  }
 0x16c   :  { %v575_v55 = vpop.f32.mrb[2].mxu1 }
 0x16d   :  { %11580 = vmatprep.mubr.bf16.mxu0 %v21922_v2  ;;  %11826 = vmatprep.mubr.bf16.mxu1 %v21922_v2  ;;  %v576_v57 = vpop.f32.mrb[3].mxu1  ;;  %v18963_v55 = vld [vmem:[#allocation7 + $0x1460] ss:$84 sps:$4 sm:$0xff]  }
 0x16e   :  { %11581 = vmatmul.mubr.bf16.vlgmr.msra.gmra.mrb[16].mxu0 %v21927_v4  ;;  %11827 = vmatmul.mubr.bf16.vlgmr.msra.gmra.mrb[8].mxu1 %v21927_v4  ;;  %v18971_v57 = vld [vmem:[#allocation7 + $0x150c] ss:$84 sps:$4 sm:$0xff]  }
 0x16f   :  { %11590 = vmatpush1.bf16.msra.mxu0 %v18870_v63  ;;  %11836 = vmatpush1.bf16.msra.mxu1 %v18873_v0  ;;  %v18924_v0 = vld [vmem:[#allocation7 + $0x1068] ss:$84 sps:$4 sm:$0xff]  }
 0x170   :  { %11591 = vmatprep.subr.bf16.mxu0 %v18878_v5  ;;  %11837 = vmatprep.subr.bf16.mxu1 %v18881_v6  ;;  %v18927_v5 = vld [vmem:[#allocation7 + $0x1070] ss:$84 sps:$4 sm:$0xff]   ;;  %v18932_v6 = vld [vmem:[#allocation7 + $0x1114] ss:$84 sps:$4 sm:$0xff]  }
 0x171   :  { %v21935_v12 = vpop.f32.mrb[4].mxu0 }
 0x172   :  { %v491_v13 = vpop.f32.mrb[5].mxu0 }
 0x173   :  { %11592 = vmatpush1.bf16.msra.mxu0 %v18876_v7  ;;  %11838 = vmatpush1.bf16.msra.mxu1 %v18879_v8  ;;  %v492_v16 = vadd.f32 %v491_v13, %v179_v9  ;;  %v493_v17 = vpop.f32.mrb[6].mxu0  ;;  %v18935_v7 = vld [vmem:[#allocation7 + $0x111c] ss:$84 sps:$4 sm:$0xff]   ;;  %v21954_v9 = vsub.s32 2, %v21908_v49 }
 0x174   :  { %11593 = vmatprep.subr.bf16.mxu0 %v18884_v10  ;;  %11839 = vmatprep.subr.bf16.mxu1 %v18887_v11  ;;  %v494_v20 = vpop.f32.mrb[7].mxu0  ;;  %v161_v8 = vld [vmem:[#allocation5 + $0x8] sm:$0x7]  ;;  %v18930_v10 = vld [vmem:[#allocation7 + $0x1110] ss:$84 sps:$4 sm:$0xff]  }
 0x175   :  { %v662_v21 = vmax.f32 %v492_v16, 0.0  ;;  %v18933_v11 = vld [vmem:[#allocation7 + $0x1118] ss:$84 sps:$4 sm:$0xff]   ;;  %v207_v13 = vrot.slane %v161_v8, %v21954_v9 }
 0x176   :  { %v18941_v16 = vld [vmem:[#allocation7 + $0x11c4] ss:$84 sps:$4 sm:$0xff]  }
 0x177   :  { %11594 = vmatpush1.bf16.msra.mxu0 %v18882_v14  ;;  %11840 = vmatpush1.bf16.msra.mxu1 %v18885_v15  ;;  %v21937_v24 = vpack.c.bf16 %v662_v21, %v662_v21  ;;  %v653_v14 = vpop.f32.mrb[4].mxu1  ;;  %v18938_v15 = vld [vmem:[#allocation7 + $0x11bc] ss:$84 sps:$4 sm:$0xff]   ;;  %v18936_v21 = vld [vmem:[#allocation7 + $0x11b8] ss:$84 sps:$4 sm:$0xff]  }
 0x178   :  { %11595 = vmatprep.subr.bf16.mxu0 %v18890_v18  ;;  %11841 = vmatprep.subr.bf16.mxu1 %v18893_v19  ;;  %v18456_v17 = vpop.f32.mrb[5].mxu1  ;;  %v21957_v18 = vadd.f32 %v653_v14, %v207_v13  ;;  %v18981_v8 = vld [vmem:[#allocation7 + $0x1658] ss:$84 sps:$4 sm:$0xff]   ;;  %v18987_v14 = vld [vmem:[#allocation7 + $0x1700] ss:$84 sps:$4 sm:$0xff]  }
 0x179   :  { %11621 = vmatprep.mubr.bf16.mxu0 %v21937_v24  ;;  %11867 = vmatprep.mubr.bf16.mxu1 %v21937_v24  ;;  %v656_v19 = vpop.f32.mrb[6].mxu1  ;;  %v18984_v13 = vld [vmem:[#allocation7 + $0x16f8] ss:$84 sps:$4 sm:$0xff]   ;;  %v18990_v17 = vld [vmem:[#allocation7 + $0x17a0] ss:$84 sps:$4 sm:$0xff]  }
 0x17a   :  { %v18457_v20 = vpop.f32.mrb[7].mxu1  ;;  %v18993_v19 = vld [vmem:[#allocation7 + $0x17a8] ss:$84 sps:$4 sm:$0xff]  }
 0x17b   :  { %11596 = vmatpush1.bf16.msra.mxu0 %v18888_v22  ;;  %11842 = vmatpush1.bf16.msra.mxu1 %v18891_v23  ;;  %v18939_v22 = vld [vmem:[#allocation7 + $0x11c0] ss:$84 sps:$4 sm:$0xff]   ;;  %v18944_v23 = vld [vmem:[#allocation7 + $0x1264] ss:$84 sps:$4 sm:$0xff]  }
 0x17c   :  { %11597 = vmatprep.subr.bf16.mxu0 %v18896_v25  ;;  %11843 = vmatprep.subr.bf16.mxu1 %v18899_v26  ;;  %v18947_v25 = vld [vmem:[#allocation7 + $0x126c] ss:$84 sps:$4 sm:$0xff]  }
 0x17d   :  { %v21941_v32 = vpop.f32.mrb[8].mxu0  ;;  %v18942_v26 = vld [vmem:[#allocation7 + $0x1260] ss:$84 sps:$4 sm:$0xff]  }
 0x17e   :  { %v21943_v33 = vpop.f32.mrb[9].mxu0  ;;  %v18998_v20 = vld [vmem:[#allocation7 + $0x184c] ss:$84 sps:$4 sm:$0xff]  }
 0x17f   :  { %11598 = vmatpush1.bf16.msra.mxu0 %v18894_v27  ;;  %11844 = vmatpush1.bf16.msra.mxu1 %v18897_v28  ;;  %v534_v36 = vpop.f32.mrb[10].mxu0  ;;  %v18945_v27 = vld [vmem:[#allocation7 + $0x1268] ss:$84 sps:$4 sm:$0xff]   ;;  %v18950_v28 = vld [vmem:[#allocation7 + $0x130c] ss:$84 sps:$4 sm:$0xff]  }
 0x180   :  { %11599 = vmatprep.subr.bf16.mxu0 %v18902_v29  ;;  %11845 = vmatprep.subr.bf16.mxu1 %v18905_v31  ;;  %v535_v39 = vpop.f32.mrb[11].mxu0  ;;  %v18953_v29 = vld [vmem:[#allocation7 + $0x1314] ss:$84 sps:$4 sm:$0xff]   ;;  %v21960_v31 = vsub.s32 5, %v21908_v49  ;;  %v18951_v36 = vld [vmem:[#allocation7 + $0x1310] ss:$84 sps:$4 sm:$0xff]  }
 0x182   :  { %v187_v39 = vrot.slane %v21913_v51, %v21960_v31 }
 0x183   :  { %11600 = vmatpush1.bf16.msra.mxu0 %v18900_v34  ;;  %11846 = vmatpush1.bf16.msra.mxu1 %v18903_v35  ;;  %v175_v34 = vrot.slane %v21913_v51, %v21954_v9  ;;  %v18948_v35 = vld [vmem:[#allocation7 + $0x1308] ss:$84 sps:$4 sm:$0xff]   ;;  %v18968_v51 = vld [vmem:[#allocation7 + $0x1504] ss:$84 sps:$4 sm:$0xff]  }
 0x184   :  { %11601 = vmatprep.subr.bf16.mxu0 %v18908_v37  ;;  %11847 = vmatprep.subr.bf16.mxu1 %v18911_v38  ;;  %v18956_v37 = vld [vmem:[#allocation7 + $0x13b4] ss:$84 sps:$4 sm:$0xff]   ;;  %v18959_v38 = vld [vmem:[#allocation7 + $0x13bc] ss:$84 sps:$4 sm:$0xff]  }
 0x187   :  { %11602 = vmatpush1.bf16.msra.mxu0 %v18906_v40  ;;  %11848 = vmatpush1.bf16.msra.mxu1 %v18909_v41  ;;  %v490_v40 = vadd.f32 %v21935_v12, %v175_v34  ;;  %v18954_v41 = vld [vmem:[#allocation7 + $0x13b0] ss:$84 sps:$4 sm:$0xff]   ;;  %v18966_v12 = vld [vmem:[#allocation7 + $0x1500] ss:$84 sps:$4 sm:$0xff]  }
 0x188   :  { %11603 = vmatprep.subr.bf16.mxu0 %v18914_v42  ;;  %11849 = vmatprep.subr.bf16.mxu1 %v18917_v43  ;;  %v18957_v42 = vld [vmem:[#allocation7 + $0x13b8] ss:$84 sps:$4 sm:$0xff]   ;;  %v18962_v43 = vld [vmem:[#allocation7 + $0x145c] ss:$84 sps:$4 sm:$0xff]  }
 0x189   :  { %v21949_v54 = vpop.f32.mrb[12].mxu0  ;;  %v19013_v34 = vld [vmem:[#allocation7 + $0x19a4] ss:$84 sps:$4 sm:$0xff]  }
 0x18a   :  { %v21951_v56 = vpop.f32.mrb[13].mxu0 }
 0x18b   :  { %11604 = vmatpush1.bf16.msra.mxu0 %v18912_v44  ;;  %11850 = vmatpush1.bf16.msra.mxu1 %v18915_v45  ;;  %v616_v60 = vpop.f32.mrb[14].mxu0  ;;  %v18965_v44 = vld [vmem:[#allocation7 + $0x1464] ss:$84 sps:$4 sm:$0xff]   ;;  %v533_v45 = vadd.f32 %v21943_v33, %v187_v39  ;;  %v18977_v33 = vld [vmem:[#allocation7 + $0x15b4] ss:$84 sps:$4 sm:$0xff]  }
 0x18c   :  { %11605 = vmatprep.subr.bf16.mxu0 %v18920_v47  ;;  %11851 = vmatprep.subr.bf16.mxu1 %v18923_v48  ;;  %v617_v63 = vpop.f32.mrb[15].mxu0  ;;  %v661_v47 = vmax.f32 %v490_v40, 0.0  ;;  %v18960_v48 = vld [vmem:[#allocation7 + $0x1458] ss:$84 sps:$4 sm:$0xff]   ;;  %v19014_v39 = vld [vmem:[#allocation7 + $0x1a40] ss:$84 sps:$4 sm:$0xff]  }
 0x18d   :  { %v18975_v63 = vld [vmem:[#allocation7 + $0x15b0] ss:$84 sps:$4 sm:$0xff]   ;;  %v19017_v40 = vld [vmem:[#allocation7 + $0x1a48] ss:$84 sps:$4 sm:$0xff]  }
 0x18e   :  { %v21968_v60 = vpack.c.bf16 %v661_v47, %v661_v47  ;;  %v19031_v47 = vld [vmem:[#allocation7 + $0x1b9c] ss:$84 sps:$4 sm:$0xff]  }
 0x18f   :  { %11606 = vmatpush1.bf16.msra.mxu0 %v18918_v58  ;;  %11852 = vmatpush1.bf16.msra.mxu1 %v18921_v59  ;;  %v18969_v58 = vld [vmem:[#allocation7 + $0x1508] ss:$84 sps:$4 sm:$0xff]   ;;  %v664_v59 = vmax.f32 %v533_v45, 0.0 }
 0x190   :  { %11607 = vmatprep.subr.bf16.mxu0 %v18926_v61  ;;  %11853 = vmatprep.subr.bf16.mxu1 %v18929_v62  ;;  %v18974_v61 = vld [vmem:[#allocation7 + $0x15ac] ss:$84 sps:$4 sm:$0xff]   ;;  %v18972_v62 = vld [vmem:[#allocation7 + $0x15a8] ss:$84 sps:$4 sm:$0xff]  }
 0x191   :  { %v19028_v45 = vld [vmem:[#allocation7 + $0x1b94] ss:$84 sps:$4 sm:$0xff]  }
 0x193   :  { %11608 = vmatpush1.bf16.msra.mxu0 %v18924_v0  ;;  %11854 = vmatpush1.bf16.msra.mxu1 %v18927_v5  ;;  %v21970_v0 = vpack.c.bf16 %v664_v59, %v664_v59  ;;  %v18980_v5 = vld [vmem:[#allocation7 + $0x1654] ss:$84 sps:$4 sm:$0xff]   ;;  %v19040_v59 = vld [vmem:[#allocation7 + $0x1ce4] ss:$84 sps:$4 sm:$0xff]  }
 0x194   :  { %11609 = vmatprep.subr.bf16.mxu0 %v18932_v6  ;;  %11855 = vmatprep.subr.bf16.mxu1 %v18935_v7  ;;  %v18983_v6 = vld [vmem:[#allocation7 + $0x165c] ss:$84 sps:$4 sm:$0xff]  }
 0x195   :  { %v18978_v7 = vld [vmem:[#allocation7 + $0x1650] ss:$84 sps:$4 sm:$0xff]  }
 0x197   :  { %11610 = vmatpush1.bf16.msra.mxu0 %v18930_v10  ;;  %11856 = vmatpush1.bf16.msra.mxu1 %v18933_v11  ;;  %v18986_v10 = vld [vmem:[#allocation7 + $0x16fc] ss:$84 sps:$4 sm:$0xff]   ;;  %v18989_v11 = vld [vmem:[#allocation7 + $0x1704] ss:$84 sps:$4 sm:$0xff]  }
 0x198   :  { %11611 = vmatprep.subr.bf16.mxu0 %v18938_v15  ;;  %11857 = vmatprep.subr.bf16.mxu1 %v18941_v16  ;;  %v18992_v15 = vld [vmem:[#allocation7 + $0x17a4] ss:$84 sps:$4 sm:$0xff]   ;;  %v18995_v16 = vld [vmem:[#allocation7 + $0x17ac] ss:$84 sps:$4 sm:$0xff]  }
 0x19b   :  { %11612 = vmatpush1.bf16.msra.mxu0 %v18936_v21  ;;  %11858 = vmatpush1.bf16.msra.mxu1 %v18939_v22  ;;  %v19001_v21 = vld [vmem:[#allocation7 + $0x1854] ss:$84 sps:$4 sm:$0xff]  }
 0x19c   :  { %11613 = vmatprep.subr.bf16.mxu0 %v18944_v23  ;;  %11859 = vmatprep.subr.bf16.mxu1 %v18947_v25  ;;  %v18996_v22 = vld [vmem:[#allocation7 + $0x1848] ss:$84 sps:$4 sm:$0xff]   ;;  %v18999_v23 = vld [vmem:[#allocation7 + $0x1850] ss:$84 sps:$4 sm:$0xff]  }
 0x19d   :  { %v19004_v25 = vld [vmem:[#allocation7 + $0x18f4] ss:$84 sps:$4 sm:$0xff]  }
 0x19f   :  { %11614 = vmatpush1.bf16.msra.mxu0 %v18942_v26  ;;  %11860 = vmatpush1.bf16.msra.mxu1 %v18945_v27  ;;  %v19007_v26 = vld [vmem:[#allocation7 + $0x18fc] ss:$84 sps:$4 sm:$0xff]  }
 0x1a0   :  { %11615 = vmatprep.subr.bf16.mxu0 %v18950_v28  ;;  %11861 = vmatprep.subr.bf16.mxu1 %v18953_v29  ;;  %v19002_v27 = vld [vmem:[#allocation7 + $0x18f0] ss:$84 sps:$4 sm:$0xff]   ;;  %v19005_v28 = vld [vmem:[#allocation7 + $0x18f8] ss:$84 sps:$4 sm:$0xff]  }
 0x1a1   :  { %v19010_v29 = vld [vmem:[#allocation7 + $0x199c] ss:$84 sps:$4 sm:$0xff]  }
 0x1a3   :  { %11616 = vmatpush1.bf16.msra.mxu0 %v18948_v35  ;;  %11862 = vmatpush1.bf16.msra.mxu1 %v18951_v36  ;;  %v19008_v35 = vld [vmem:[#allocation7 + $0x1998] ss:$84 sps:$4 sm:$0xff]   ;;  %v19011_v36 = vld [vmem:[#allocation7 + $0x19a0] ss:$84 sps:$4 sm:$0xff]  }
 0x1a4   :  { %11617 = vmatprep.subr.bf16.mxu0 %v18956_v37  ;;  %11863 = vmatprep.subr.bf16.mxu1 %v18959_v38  ;;  %v19016_v37 = vld [vmem:[#allocation7 + $0x1a44] ss:$84 sps:$4 sm:$0xff]   ;;  %v19019_v38 = vld [vmem:[#allocation7 + $0x1a4c] ss:$84 sps:$4 sm:$0xff]  }
 0x1a7   :  { %11618 = vmatpush1.bf16.msra.mxu0 %v18954_v41  ;;  %11864 = vmatpush1.bf16.msra.mxu1 %v18957_v42  ;;  %v19022_v41 = vld [vmem:[#allocation7 + $0x1aec] ss:$84 sps:$4 sm:$0xff]   ;;  %v19025_v42 = vld [vmem:[#allocation7 + $0x1af4] ss:$84 sps:$4 sm:$0xff]  }
 0x1a8   :  { %11619 = vmatprep.subr.bf16.mxu0 %v18962_v43  ;;  %11865 = vmatprep.subr.bf16.mxu1 %v18965_v44  ;;  %v19020_v43 = vld [vmem:[#allocation7 + $0x1ae8] ss:$84 sps:$4 sm:$0xff]   ;;  %v19023_v44 = vld [vmem:[#allocation7 + $0x1af0] ss:$84 sps:$4 sm:$0xff]  }
 0x1ab   :  { %11620 = vmatpush1.bf16.msra.mxu0 %v18960_v48  ;;  %11866 = vmatpush1.bf16.msra.mxu1 %v18963_v55  ;;  %v19026_v48 = vld [vmem:[#allocation7 + $0x1b90] ss:$84 sps:$4 sm:$0xff]   ;;  %v19029_v55 = vld [vmem:[#allocation7 + $0x1b98] ss:$84 sps:$4 sm:$0xff]  }
 0x1ac   :  { %11630 = vmatprep.subr.bf16.mxu0 %v18968_v51  ;;  %11876 = vmatprep.subr.bf16.mxu1 %v18971_v57  ;;  %v19034_v51 = vld [vmem:[#allocation7 + $0x1c3c] ss:$84 sps:$4 sm:$0xff]   ;;  %v19037_v57 = vld [vmem:[#allocation7 + $0x1c44] ss:$84 sps:$4 sm:$0xff]  }
 0x1ae   :  { %11622 = vmatmul.mubr.bf16.vlgmr.msra.gmra.mrb[16].mxu0 %v21968_v60  ;;  %11868 = vmatmul.mubr.bf16.vlgmr.msra.gmra.mrb[8].mxu1 %v21968_v60 }
 0x1af   :  { %11631 = vmatpush1.bf16.msra.mxu0 %v18966_v12  ;;  %11877 = vmatpush1.bf16.msra.mxu1 %v18969_v58  ;;  %v19032_v12 = vld [vmem:[#allocation7 + $0x1c38] ss:$84 sps:$4 sm:$0xff]   ;;  %v19035_v58 = vld [vmem:[#allocation7 + $0x1c40] ss:$84 sps:$4 sm:$0xff]  }
 0x1b0   :  { %11632 = vmatprep.subr.bf16.mxu0 %v18974_v61  ;;  %11878 = vmatprep.subr.bf16.mxu1 %v18977_v33  ;;  %v19043_v61 = vld [vmem:[#allocation7 + $0x1cec] ss:$84 sps:$4 sm:$0xff]  }
 0x1b1   :  { %11662 = vmatprep.mubr.bf16.mxu0 %v21970_v0  ;;  %11908 = vmatprep.mubr.bf16.mxu1 %v21970_v0  ;;  %v19038_v33 = vld [vmem:[#allocation7 + $0x1ce0] ss:$84 sps:$4 sm:$0xff]  }
 0x1b3   :  { %11633 = vmatpush1.bf16.msra.mxu0 %v18972_v62  ;;  %11879 = vmatpush1.bf16.msra.mxu1 %v18975_v63  ;;  %v19041_v62 = vld [vmem:[#allocation7 + $0x1ce8] ss:$84 sps:$4 sm:$0xff]   ;;  %v21977_v63 = vsub.s32 4, %v21908_v49 }
 0x1b4   :  { %11634 = vmatprep.subr.bf16.mxu0 %v18980_v5  ;;  %11880 = vmatprep.subr.bf16.mxu1 %v18983_v6  ;;  %v19046_v5 = vld [vmem:[#allocation7 + $0x1d8c] ss:$84 sps:$4 sm:$0xff]   ;;  %v19049_v6 = vld [vmem:[#allocation7 + $0x1d94] ss:$84 sps:$4 sm:$0xff]  }
 0x1b7   :  { %11635 = vmatpush1.bf16.msra.mxu0 %v18978_v7  ;;  %11881 = vmatpush1.bf16.msra.mxu1 %v18981_v8  ;;  %v19044_v7 = vld [vmem:[#allocation7 + $0x1d88] ss:$84 sps:$4 sm:$0xff]   ;;  %v19047_v8 = vld [vmem:[#allocation7 + $0x1d90] ss:$84 sps:$4 sm:$0xff]  }
 0x1b8   :  { %11636 = vmatprep.subr.bf16.mxu0 %v18986_v10  ;;  %11882 = vmatprep.subr.bf16.mxu1 %v18989_v11  ;;  %v21980_v10 = vsub.s32 7, %v21908_v49  ;;  %v21982_v11 = vld [vmem:[#allocation5] sm:$0xff] }
 0x1bb   :  { %11637 = vmatpush1.bf16.msra.mxu0 %v18984_v13  ;;  %11883 = vmatpush1.bf16.msra.mxu1 %v18987_v14  ;;  %v183_v13 = vrot.slane %v21982_v11, %v21977_v63  ;;  %v19052_v14 = vld [vmem:[#allocation7 + $0x1e34] ss:$84 sps:$4 sm:$0xff]  }
 0x1bc   :  { %11638 = vmatprep.subr.bf16.mxu0 %v18992_v15  ;;  %11884 = vmatprep.subr.bf16.mxu1 %v18995_v16  ;;  %v19055_v15 = vld [vmem:[#allocation7 + $0x1e3c] ss:$84 sps:$4 sm:$0xff]  }
 0x1bd   :  { %v19050_v16 = vld [vmem:[#allocation7 + $0x1e30] ss:$84 sps:$4 sm:$0xff]  }
 0x1bf   :  { %11639 = vmatpush1.bf16.msra.mxu0 %v18990_v17  ;;  %11885 = vmatpush1.bf16.msra.mxu1 %v18993_v19  ;;  %v19053_v17 = vld [vmem:[#allocation7 + $0x1e38] ss:$84 sps:$4 sm:$0xff]   ;;  %v195_v19 = vrot.slane %v21982_v11, %v21980_v10 }
 0x1c0   :  { %11640 = vmatprep.subr.bf16.mxu0 %v18998_v20  ;;  %11886 = vmatprep.subr.bf16.mxu1 %v19001_v21  ;;  %v531_v20 = vadd.f32 %v21941_v32, %v183_v13  ;;  %v19058_v21 = vld [vmem:[#allocation7 + $0x1edc] ss:$84 sps:$4 sm:$0xff]  }
 0x1c1   :  { %v19106_v13 = vld [vmem:[#allocation7 + $0x241c] ss:$84 sps:$4 sm:$0xff]  }
 0x1c3   :  { %11641 = vmatpush1.bf16.msra.mxu0 %v18996_v22  ;;  %11887 = vmatpush1.bf16.msra.mxu1 %v18999_v23  ;;  %v19061_v22 = vld [vmem:[#allocation7 + $0x1ee4] ss:$84 sps:$4 sm:$0xff]  }
 0x1c4   :  { %11642 = vmatprep.subr.bf16.mxu0 %v19004_v25  ;;  %11888 = vmatprep.subr.bf16.mxu1 %v19007_v26  ;;  %v19056_v23 = vld [vmem:[#allocation7 + $0x1ed8] ss:$84 sps:$4 sm:$0xff]   ;;  %v19059_v25 = vld [vmem:[#allocation7 + $0x1ee0] ss:$84 sps:$4 sm:$0xff]   ;;  %v574_v26 = vadd.f32 %v21947_v53, %v195_v19  ;;  %v19068_v53 = vld [vmem:[#allocation7 + $0x2028] ss:$84 sps:$4 sm:$0xff]  }
 0x1c5   :  { %v19115_v19 = vld [vmem:[#allocation7 + $0x24cc] ss:$84 sps:$4 sm:$0xff]  }
 0x1c6   :  { %v666_v32 = vmax.f32 %v574_v26, 0.0  ;;  %v19119_v26 = vld [vmem:[#allocation7 + $0x2570] ss:$84 sps:$4 sm:$0xff]  }
 0x1c7   :  { %11643 = vmatpush1.bf16.msra.mxu0 %v19002_v27  ;;  %11889 = vmatpush1.bf16.msra.mxu1 %v19005_v28  ;;  %v663_v27 = vmax.f32 %v531_v20, 0.0  ;;  %v19064_v28 = vld [vmem:[#allocation7 + $0x1f84] ss:$84 sps:$4 sm:$0xff]   ;;  %v19110_v20 = vld [vmem:[#allocation7 + $0x24c0] ss:$84 sps:$4 sm:$0xff]  }
 0x1c8   :  { %11644 = vmatprep.subr.bf16.mxu0 %v19010_v29  ;;  %11890 = vmatprep.subr.bf16.mxu1 %v19013_v34  ;;  %v19067_v29 = vld [vmem:[#allocation7 + $0x1f8c] ss:$84 sps:$4 sm:$0xff]  }
 0x1c9   :  { %v19062_v34 = vld [vmem:[#allocation7 + $0x1f80] ss:$84 sps:$4 sm:$0xff]  }
 0x1cb   :  { %11645 = vmatpush1.bf16.msra.mxu0 %v19008_v35  ;;  %11891 = vmatpush1.bf16.msra.mxu1 %v19011_v36  ;;  %v19065_v35 = vld [vmem:[#allocation7 + $0x1f88] ss:$84 sps:$4 sm:$0xff]   ;;  %v21990_v36 = vpack.c.bf16 %v663_v27, %v663_v27 }
 0x1cc   :  { %11646 = vmatprep.subr.bf16.mxu0 %v19016_v37  ;;  %11892 = vmatprep.subr.bf16.mxu1 %v19019_v38  ;;  %v19070_v37 = vld [vmem:[#allocation7 + $0x202c] ss:$84 sps:$4 sm:$0xff]   ;;  %v19073_v38 = vld [vmem:[#allocation7 + $0x2034] ss:$84 sps:$4 sm:$0xff]  }
 0x1cd   :  { %v19124_v27 = vld [vmem:[#allocation7 + $0x2614] ss:$84 sps:$4 sm:$0xff]  }
 0x1cf   :  { %11647 = vmatpush1.bf16.msra.mxu0 %v19014_v39  ;;  %11893 = vmatpush1.bf16.msra.mxu1 %v19017_v40  ;;  %v21992_v39 = vpack.c.bf16 %v666_v32, %v666_v32  ;;  %v19071_v40 = vld [vmem:[#allocation7 + $0x2030] ss:$84 sps:$4 sm:$0xff]  }
 0x1d0   :  { %11648 = vmatprep.subr.bf16.mxu0 %v19022_v41  ;;  %11894 = vmatprep.subr.bf16.mxu1 %v19025_v42  ;;  %v19076_v41 = vld [vmem:[#allocation7 + $0x20d4] ss:$84 sps:$4 sm:$0xff]   ;;  %v19079_v42 = vld [vmem:[#allocation7 + $0x20dc] ss:$84 sps:$4 sm:$0xff]   ;;  %v19133_v32 = vld [vmem:[#allocation7 + $0x26c4] ss:$84 sps:$4 sm:$0xff]  }
 0x1d3   :  { %11649 = vmatpush1.bf16.msra.mxu0 %v19020_v43  ;;  %11895 = vmatpush1.bf16.msra.mxu1 %v19023_v44  ;;  %v19074_v43 = vld [vmem:[#allocation7 + $0x20d0] ss:$84 sps:$4 sm:$0xff]   ;;  %v19077_v44 = vld [vmem:[#allocation7 + $0x20d8] ss:$84 sps:$4 sm:$0xff]  }
 0x1d4   :  { %11650 = vmatprep.subr.bf16.mxu0 %v19028_v45  ;;  %11896 = vmatprep.subr.bf16.mxu1 %v19031_v47  ;;  %v19082_v45 = vld [vmem:[#allocation7 + $0x217c] ss:$84 sps:$4 sm:$0xff]   ;;  %v19085_v47 = vld [vmem:[#allocation7 + $0x2184] ss:$84 sps:$4 sm:$0xff]  }
 0x1d7   :  { %11651 = vmatpush1.bf16.msra.mxu0 %v19026_v48  ;;  %11897 = vmatpush1.bf16.msra.mxu1 %v19029_v55  ;;  %v19080_v48 = vld [vmem:[#allocation7 + $0x2178] ss:$84 sps:$4 sm:$0xff]   ;;  %v19083_v55 = vld [vmem:[#allocation7 + $0x2180] ss:$84 sps:$4 sm:$0xff]  }
 0x1d8   :  { %11652 = vmatprep.subr.bf16.mxu0 %v19034_v51  ;;  %11898 = vmatprep.subr.bf16.mxu1 %v19037_v57  ;;  %v19088_v51 = vld [vmem:[#allocation7 + $0x2224] ss:$84 sps:$4 sm:$0xff]   ;;  %v19091_v57 = vld [vmem:[#allocation7 + $0x222c] ss:$84 sps:$4 sm:$0xff]  }
 0x1db   :  { %11653 = vmatpush1.bf16.msra.mxu0 %v19032_v12  ;;  %11899 = vmatpush1.bf16.msra.mxu1 %v19035_v58  ;;  %v19086_v12 = vld [vmem:[#allocation7 + $0x2220] ss:$84 sps:$4 sm:$0xff]   ;;  %v19089_v58 = vld [vmem:[#allocation7 + $0x2228] ss:$84 sps:$4 sm:$0xff]  }
 0x1dc   :  { %11654 = vmatprep.subr.bf16.mxu0 %v19040_v59  ;;  %11900 = vmatprep.subr.bf16.mxu1 %v19043_v61  ;;  %v19094_v59 = vld [vmem:[#allocation7 + $0x22cc] ss:$84 sps:$4 sm:$0xff]   ;;  %v19097_v61 = vld [vmem:[#allocation7 + $0x22d4] ss:$84 sps:$4 sm:$0xff]  }
 0x1df   :  { %11655 = vmatpush1.bf16.msra.mxu0 %v19038_v33  ;;  %11901 = vmatpush1.bf16.msra.mxu1 %v19041_v62  ;;  %v19092_v33 = vld [vmem:[#allocation7 + $0x22c8] ss:$84 sps:$4 sm:$0xff]   ;;  %v19095_v62 = vld [vmem:[#allocation7 + $0x22d0] ss:$84 sps:$4 sm:$0xff]  }
 0x1e0   :  { %11656 = vmatprep.subr.bf16.mxu0 %v19046_v5  ;;  %11902 = vmatprep.subr.bf16.mxu1 %v19049_v6  ;;  %v19100_v5 = vld [vmem:[#allocation7 + $0x2374] ss:$84 sps:$4 sm:$0xff]   ;;  %v19103_v6 = vld [vmem:[#allocation7 + $0x237c] ss:$84 sps:$4 sm:$0xff]  }
 0x1e3   :  { %11657 = vmatpush1.bf16.msra.mxu0 %v19044_v7  ;;  %11903 = vmatpush1.bf16.msra.mxu1 %v19047_v8  ;;  %v19098_v7 = vld [vmem:[#allocation7 + $0x2370] ss:$84 sps:$4 sm:$0xff]   ;;  %v19101_v8 = vld [vmem:[#allocation7 + $0x2378] ss:$84 sps:$4 sm:$0xff]  }
 0x1e4   :  { %11658 = vmatprep.subr.bf16.mxu0 %v19052_v14  ;;  %11904 = vmatprep.subr.bf16.mxu1 %v19055_v15  ;;  %v19109_v14 = vld [vmem:[#allocation7 + $0x2424] ss:$84 sps:$4 sm:$0xff]  }
 0x1e5   :  { %v19104_v15 = vld [vmem:[#allocation7 + $0x2418] ss:$84 sps:$4 sm:$0xff]  }
 0x1e7   :  { %11659 = vmatpush1.bf16.msra.mxu0 %v19050_v16  ;;  %11905 = vmatpush1.bf16.msra.mxu1 %v19053_v17  ;;  %v19107_v16 = vld [vmem:[#allocation7 + $0x2420] ss:$84 sps:$4 sm:$0xff]   ;;  %v19112_v17 = vld [vmem:[#allocation7 + $0x24c4] ss:$84 sps:$4 sm:$0xff]  }
 0x1e8   :  { %11660 = vmatprep.subr.bf16.mxu0 %v19058_v21  ;;  %11906 = vmatprep.subr.bf16.mxu1 %v19061_v22  ;;  %v19113_v21 = vld [vmem:[#allocation7 + $0x24c8] ss:$84 sps:$4 sm:$0xff]   ;;  %v19118_v22 = vld [vmem:[#allocation7 + $0x256c] ss:$84 sps:$4 sm:$0xff]  }
 0x1eb   :  { %11661 = vmatpush1.bf16.msra.mxu0 %v19056_v23  ;;  %11907 = vmatpush1.bf16.msra.mxu1 %v19059_v25  ;;  %v19121_v23 = vld [vmem:[#allocation7 + $0x2574] ss:$84 sps:$4 sm:$0xff]  }
 0x1ec   :  { %11671 = vmatprep.subr.bf16.mxu0 %v19064_v28  ;;  %11917 = vmatprep.subr.bf16.mxu1 %v19067_v29  ;;  %v19116_v25 = vld [vmem:[#allocation7 + $0x2568] ss:$84 sps:$4 sm:$0xff]   ;;  %v19122_v29 = vld [vmem:[#allocation7 + $0x2610] ss:$84 sps:$4 sm:$0xff]  }
 0x1ed   :  { %v19127_v28 = vld [vmem:[#allocation7 + $0x261c] ss:$84 sps:$4 sm:$0xff]  }
 0x1ee   :  { %11663 = vmatmul.mubr.bf16.vlgmr.msra.gmra.mrb[16].mxu0 %v21990_v36  ;;  %11909 = vmatmul.mubr.bf16.vlgmr.msra.gmra.mrb[8].mxu1 %v21990_v36 }
 0x1ef   :  { %11672 = vmatpush1.bf16.msra.mxu0 %v19062_v34  ;;  %11918 = vmatpush1.bf16.msra.mxu1 %v19065_v35  ;;  %v19125_v34 = vld [vmem:[#allocation7 + $0x2618] ss:$84 sps:$4 sm:$0xff]   ;;  %v19130_v35 = vld [vmem:[#allocation7 + $0x26bc] ss:$84 sps:$4 sm:$0xff]  }
 0x1f0   :  { %11673 = vmatprep.subr.bf16.mxu0 %v19070_v37  ;;  %11919 = vmatprep.subr.bf16.mxu1 %v19073_v38  ;;  %v19128_v37 = vld [vmem:[#allocation7 + $0x26b8] ss:$84 sps:$4 sm:$0xff]   ;;  %v19131_v38 = vld [vmem:[#allocation7 + $0x26c0] ss:$84 sps:$4 sm:$0xff]  }
 0x1f1   :  { %11703 = vmatprep.mubr.bf16.mxu0 %v21992_v39  ;;  %11949 = vmatprep.mubr.bf16.mxu1 %v21992_v39 }
 0x1f3   :  { %11674 = vmatpush1.bf16.msra.mxu0 %v19068_v53  ;;  %11920 = vmatpush1.bf16.msra.mxu1 %v19071_v40  ;;  %v19136_v53 = vld [vmem:[#allocation7 + $0x2764] ss:$84 sps:$4 sm:$0xff]   ;;  %v19139_v40 = vld [vmem:[#allocation7 + $0x276c] ss:$84 sps:$4 sm:$0xff]  }
 0x1f4   :  { %11675 = vmatprep.subr.bf16.mxu0 %v19076_v41  ;;  %11921 = vmatprep.subr.bf16.mxu1 %v19079_v42  ;;  %v19134_v41 = vld [vmem:[#allocation7 + $0x2760] ss:$84 sps:$4 sm:$0xff]   ;;  %v19137_v42 = vld [vmem:[#allocation7 + $0x2768] ss:$84 sps:$4 sm:$0xff]  }
 0x1f7   :  { %11676 = vmatpush1.bf16.msra.mxu0 %v19074_v43  ;;  %11922 = vmatpush1.bf16.msra.mxu1 %v19077_v44  ;;  %v21999_v43 = vsub.s32 6, %v21908_v49  ;;  %v19142_v44 = vld [vmem:[#allocation7 + $0x280c] ss:$84 sps:$4 sm:$0xff]  }
 0x1f8   :  { %11677 = vmatprep.subr.bf16.mxu0 %v19082_v45  ;;  %11923 = vmatprep.subr.bf16.mxu1 %v19085_v47  ;;  %v19145_v45 = vld [vmem:[#allocation7 + $0x2814] ss:$84 sps:$4 sm:$0xff]  }
 0x1f9   :  { %v19140_v47 = vld [vmem:[#allocation7 + $0x2808] ss:$84 sps:$4 sm:$0xff]  }
 0x1fb   :  { %11678 = vmatpush1.bf16.msra.mxu0 %v19080_v48  ;;  %11924 = vmatpush1.bf16.msra.mxu1 %v19083_v55  ;;  %v19143_v48 = vld [vmem:[#allocation7 + $0x2810] ss:$84 sps:$4 sm:$0xff]   ;;  %v191_v55 = vrot.slane %v21982_v11, %v21999_v43 }
 0x1fc   :  { %11679 = vmatprep.subr.bf16.mxu0 %v19088_v51  ;;  %11925 = vmatprep.subr.bf16.mxu1 %v19091_v57  ;;  %v19148_v51 = vld [vmem:[#allocation7 + $0x28b4] ss:$84 sps:$4 sm:$0xff]   ;;  %v19151_v57 = vld [vmem:[#allocation7 + $0x28bc] ss:$84 sps:$4 sm:$0xff]  }
 0x1ff   :  { %11680 = vmatpush1.bf16.msra.mxu0 %v19086_v12  ;;  %11926 = vmatpush1.bf16.msra.mxu1 %v19089_v58  ;;  %v22003_v12 = vld [vmem:[#allocation5 + $0x8] sm:$0x7]  ;;  %v19146_v58 = vld [vmem:[#allocation7 + $0x28b0] ss:$84 sps:$4 sm:$0xff]  }
 0x200   :  { %11681 = vmatprep.subr.bf16.mxu0 %v19094_v59  ;;  %11927 = vmatprep.subr.bf16.mxu1 %v19097_v61  ;;  %v203_v49 = vrot.slane %v22003_v12, %v21916_v52  ;;  %v19149_v59 = vld [vmem:[#allocation7 + $0x28b8] ss:$84 sps:$4 sm:$0xff]   ;;  %v572_v61 = vadd.f32 %v21945_v46, %v191_v55  ;;  %v19202_v55 = vld [vmem:[#allocation7 + $0x2e9c] ss:$84 sps:$4 sm:$0xff]  }
 0x202   :  { %v615_v11 = vadd.f32 %v21951_v56, %v203_v49  ;;  %v19203_v49 = vld [vmem:[#allocation7 + $0x2ea0] ss:$84 sps:$4 sm:$0xff]  }
 0x203   :  { %11682 = vmatpush1.bf16.msra.mxu0 %v19092_v33  ;;  %11928 = vmatpush1.bf16.msra.mxu1 %v19095_v62  ;;  %v19154_v33 = vld [vmem:[#allocation7 + $0x295c] ss:$84 sps:$4 sm:$0xff]   ;;  %v19157_v62 = vld [vmem:[#allocation7 + $0x2964] ss:$84 sps:$4 sm:$0xff]  }
 0x204   :  { %11683 = vmatprep.subr.bf16.mxu0 %v19100_v5  ;;  %11929 = vmatprep.subr.bf16.mxu1 %v19103_v6  ;;  %v19152_v5 = vld [vmem:[#allocation7 + $0x2958] ss:$84 sps:$4 sm:$0xff]   ;;  %v19155_v6 = vld [vmem:[#allocation7 + $0x2960] ss:$84 sps:$4 sm:$0xff]  }
 0x207   :  { %11684 = vmatpush1.bf16.msra.mxu0 %v19098_v7  ;;  %11930 = vmatpush1.bf16.msra.mxu1 %v19101_v8  ;;  %v665_v7 = vmax.f32 %v572_v61, 0.0  ;;  %v19160_v8 = vld [vmem:[#allocation7 + $0x2a04] ss:$84 sps:$4 sm:$0xff]   ;;  %v19211_v61 = vld [vmem:[#allocation7 + $0x2f4c] ss:$84 sps:$4 sm:$0xff]  }
 0x208   :  { %11685 = vmatprep.subr.bf16.mxu0 %v19106_v13  ;;  %11931 = vmatprep.subr.bf16.mxu1 %v19109_v14  ;;  %v19163_v13 = vld [vmem:[#allocation7 + $0x2a0c] ss:$84 sps:$4 sm:$0xff]   ;;  %v668_v14 = vmax.f32 %v615_v11, 0.0  ;;  %v19212_v11 = vld [vmem:[#allocation7 + $0x2fe8] ss:$84 sps:$4 sm:$0xff]  }
 0x209   :  { %v22009_v46 = vpack.c.bf16 %v665_v7, %v665_v7  ;;  %v19220_v7 = vld [vmem:[#allocation7 + $0x3094] ss:$84 sps:$4 sm:$0xff]  }
 0x20a   :  { %v22011_v56 = vpack.c.bf16 %v668_v14, %v668_v14  ;;  %v19221_v14 = vld [vmem:[#allocation7 + $0x3098] ss:$84 sps:$4 sm:$0xff]  }
 0x20b   :  { %11686 = vmatpush1.bf16.msra.mxu0 %v19104_v15  ;;  %11932 = vmatpush1.bf16.msra.mxu1 %v19107_v16  ;;  %v19158_v15 = vld [vmem:[#allocation7 + $0x2a00] ss:$84 sps:$4 sm:$0xff]   ;;  %v19161_v16 = vld [vmem:[#allocation7 + $0x2a08] ss:$84 sps:$4 sm:$0xff]  }
 0x20c   :  { %11687 = vmatprep.subr.bf16.mxu0 %v19112_v17  ;;  %11933 = vmatprep.subr.bf16.mxu1 %v19115_v19  ;;  %v19166_v17 = vld [vmem:[#allocation7 + $0x2aac] ss:$84 sps:$4 sm:$0xff]   ;;  %v19164_v19 = vld [vmem:[#allocation7 + $0x2aa8] ss:$84 sps:$4 sm:$0xff]  }
 0x20f   :  { %11688 = vmatpush1.bf16.msra.mxu0 %v19110_v20  ;;  %11934 = vmatpush1.bf16.msra.mxu1 %v19113_v21  ;;  %v19169_v20 = vld [vmem:[#allocation7 + $0x2ab4] ss:$84 sps:$4 sm:$0xff]   ;;  %v19167_v21 = vld [vmem:[#allocation7 + $0x2ab0] ss:$84 sps:$4 sm:$0xff]  }
 0x210   :  { %11689 = vmatprep.subr.bf16.mxu0 %v19118_v22  ;;  %11935 = vmatprep.subr.bf16.mxu1 %v19121_v23  ;;  %v19172_v22 = vld [vmem:[#allocation7 + $0x2b54] ss:$84 sps:$4 sm:$0xff]   ;;  %v19170_v23 = vld [vmem:[#allocation7 + $0x2b50] ss:$84 sps:$4 sm:$0xff]  }
 0x213   :  { %11690 = vmatpush1.bf16.msra.mxu0 %v19116_v25  ;;  %11936 = vmatpush1.bf16.msra.mxu1 %v19119_v26  ;;  %v19175_v25 = vld [vmem:[#allocation7 + $0x2b5c] ss:$84 sps:$4 sm:$0xff]   ;;  %v19173_v26 = vld [vmem:[#allocation7 + $0x2b58] ss:$84 sps:$4 sm:$0xff]  }
 0x214   :  { %11691 = vmatprep.subr.bf16.mxu0 %v19124_v27  ;;  %11937 = vmatprep.subr.bf16.mxu1 %v19127_v28  ;;  %v19178_v27 = vld [vmem:[#allocation7 + $0x2bfc] ss:$84 sps:$4 sm:$0xff]   ;;  %v19176_v28 = vld [vmem:[#allocation7 + $0x2bf8] ss:$84 sps:$4 sm:$0xff]  }
 0x217   :  { %11692 = vmatpush1.bf16.msra.mxu0 %v19122_v29  ;;  %11938 = vmatpush1.bf16.msra.mxu1 %v19125_v34  ;;  %v19181_v29 = vld [vmem:[#allocation7 + $0x2c04] ss:$84 sps:$4 sm:$0xff]   ;;  %v19179_v34 = vld [vmem:[#allocation7 + $0x2c00] ss:$84 sps:$4 sm:$0xff]  }
 0x218   :  { %11693 = vmatprep.subr.bf16.mxu0 %v19130_v35  ;;  %11939 = vmatprep.subr.bf16.mxu1 %v19133_v32  ;;  %v19184_v35 = vld [vmem:[#allocation7 + $0x2ca4] ss:$84 sps:$4 sm:$0xff]   ;;  %v19182_v32 = vld [vmem:[#allocation7 + $0x2ca0] ss:$84 sps:$4 sm:$0xff]  }
 0x21b   :  { %11694 = vmatpush1.bf16.msra.mxu0 %v19128_v37  ;;  %11940 = vmatpush1.bf16.msra.mxu1 %v19131_v38  ;;  %v19187_v37 = vld [vmem:[#allocation7 + $0x2cac] ss:$84 sps:$4 sm:$0xff]   ;;  %v19185_v38 = vld [vmem:[#allocation7 + $0x2ca8] ss:$84 sps:$4 sm:$0xff]  }
 0x21c   :  { %11695 = vmatprep.subr.bf16.mxu0 %v19136_v53  ;;  %11941 = vmatprep.subr.bf16.mxu1 %v19139_v40  ;;  %v19190_v53 = vld [vmem:[#allocation7 + $0x2d4c] ss:$84 sps:$4 sm:$0xff]   ;;  %v19193_v40 = vld [vmem:[#allocation7 + $0x2d54] ss:$84 sps:$4 sm:$0xff]  }
 0x21f   :  { %11696 = vmatpush1.bf16.msra.mxu0 %v19134_v41  ;;  %11942 = vmatpush1.bf16.msra.mxu1 %v19137_v42  ;;  %v19188_v41 = vld [vmem:[#allocation7 + $0x2d48] ss:$84 sps:$4 sm:$0xff]   ;;  %v19191_v42 = vld [vmem:[#allocation7 + $0x2d50] ss:$84 sps:$4 sm:$0xff]  }
 0x220   :  { %11697 = vmatprep.subr.bf16.mxu0 %v19142_v44  ;;  %11943 = vmatprep.subr.bf16.mxu1 %v19145_v45  ;;  %v19196_v44 = vld [vmem:[#allocation7 + $0x2df4] ss:$84 sps:$4 sm:$0xff]   ;;  %v19199_v45 = vld [vmem:[#allocation7 + $0x2dfc] ss:$84 sps:$4 sm:$0xff]  }
 0x223   :  { %11698 = vmatpush1.bf16.msra.mxu0 %v19140_v47  ;;  %11944 = vmatpush1.bf16.msra.mxu1 %v19143_v48  ;;  %v19194_v47 = vld [vmem:[#allocation7 + $0x2df0] ss:$84 sps:$4 sm:$0xff]   ;;  %v19197_v48 = vld [vmem:[#allocation7 + $0x2df8] ss:$84 sps:$4 sm:$0xff]  }
 0x224   :  { %11699 = vmatprep.subr.bf16.mxu0 %v19148_v51  ;;  %11945 = vmatprep.subr.bf16.mxu1 %v19151_v57  ;;  %v19200_v51 = vld [vmem:[#allocation7 + $0x2e98] ss:$84 sps:$4 sm:$0xff]  }
 0x225   :  { %v19205_v57 = vld [vmem:[#allocation7 + $0x2ea4] ss:$84 sps:$4 sm:$0xff]  }
 0x227   :  { %11700 = vmatpush1.bf16.msra.mxu0 %v19146_v58  ;;  %11946 = vmatpush1.bf16.msra.mxu1 %v19149_v59  ;;  %v19208_v58 = vld [vmem:[#allocation7 + $0x2f44] ss:$84 sps:$4 sm:$0xff]   ;;  %v19206_v59 = vld [vmem:[#allocation7 + $0x2f40] ss:$84 sps:$4 sm:$0xff]  }
 0x228   :  { %11701 = vmatprep.subr.bf16.mxu0 %v19154_v33  ;;  %11947 = vmatprep.subr.bf16.mxu1 %v19157_v62  ;;  %v19209_v33 = vld [vmem:[#allocation7 + $0x2f48] ss:$84 sps:$4 sm:$0xff]   ;;  %v19214_v62 = vld [vmem:[#allocation7 + $0x2fec] ss:$84 sps:$4 sm:$0xff]  }
 0x22b   :  { %11702 = vmatpush1.bf16.msra.mxu0 %v19152_v5  ;;  %11948 = vmatpush1.bf16.msra.mxu1 %v19155_v6  ;;  %v19217_v5 = vld [vmem:[#allocation7 + $0x2ff4] ss:$84 sps:$4 sm:$0xff]   ;;  %v19215_v6 = vld [vmem:[#allocation7 + $0x2ff0] ss:$84 sps:$4 sm:$0xff]  }
 0x22c   :  { %11712 = vmatprep.subr.bf16.mxu0 %v19160_v8  ;;  %11958 = vmatprep.subr.bf16.mxu1 %v19163_v13  ;;  %v19218_v8 = vld [vmem:[#allocation7 + $0x3090] ss:$84 sps:$4 sm:$0xff]  }
 0x22d   :  { %v19223_v13 = vld [vmem:[#allocation7 + $0x309c] ss:$84 sps:$4 sm:$0xff]  }
 0x22e   :  { %11704 = vmatmul.mubr.bf16.vlgmr.msra.gmra.mrb[16].mxu0 %v22009_v46  ;;  %11950 = vmatmul.mubr.bf16.vlgmr.msra.gmra.mrb[8].mxu1 %v22009_v46 }
 0x22f   :  { %11713 = vmatpush1.bf16.msra.mxu0 %v19158_v15  ;;  %11744 = vmatprep.mubr.bf16.mxu0 %v22011_v56  ;;  %v19226_v15 = vld [vmem:[#allocation7 + $0x313c] ss:$84 sps:$4 sm:$0xff]  }
 0x230   :  { %11959 = vmatpush1.bf16.msra.mxu1 %v19161_v16  ;;  %11990 = vmatprep.mubr.bf16.mxu1 %v22011_v56  ;;  %v19224_v16 = vld [vmem:[#allocation7 + $0x3138] ss:$84 sps:$4 sm:$0xff]  }
 0x231   :  { %11714 = vmatprep.subr.bf16.mxu0 %v19166_v17  ;;  %11960 = vmatprep.subr.bf16.mxu1 %v19169_v20  ;;  %v19229_v17 = vld [vmem:[#allocation7 + $0x3144] ss:$84 sps:$4 sm:$0xff]  }
 0x232   :  { %v19232_v20 = vld [vmem:[#allocation7 + $0x31e4] ss:$84 sps:$4 sm:$0xff]  }
 0x233   :  { %11715 = vmatpush1.bf16.msra.mxu0 %v19164_v19  ;;  %v19227_v19 = vld [vmem:[#allocation7 + $0x3140] ss:$84 sps:$4 sm:$0xff]  }
 0x234   :  { %11961 = vmatpush1.bf16.msra.mxu1 %v19167_v21  ;;  %11716 = vmatprep.subr.bf16.mxu0 %v19172_v22  ;;  %v19230_v21 = vld [vmem:[#allocation7 + $0x31e0] ss:$84 sps:$4 sm:$0xff]  }
 0x235   :  { %11962 = vmatprep.subr.bf16.mxu1 %v19175_v25  ;;  %v19235_v22 = vld [vmem:[#allocation7 + $0x31ec] ss:$84 sps:$4 sm:$0xff]  }
 0x236   :  { %v19238_v25 = vld [vmem:[#allocation7 + $0x328c] ss:$84 sps:$4 sm:$0xff]  }
 0x237   :  { %11717 = vmatpush1.bf16.msra.mxu0 %v19170_v23  ;;  %v19233_v23 = vld [vmem:[#allocation7 + $0x31e8] ss:$84 sps:$4 sm:$0xff]  }
 0x238   :  { %11963 = vmatpush1.bf16.msra.mxu1 %v19173_v26  ;;  %11718 = vmatprep.subr.bf16.mxu0 %v19178_v27  ;;  %v19236_v26 = vld [vmem:[#allocation7 + $0x3288] ss:$84 sps:$4 sm:$0xff]  }
 0x239   :  { %11964 = vmatprep.subr.bf16.mxu1 %v19181_v29  ;;  %v19241_v27 = vld [vmem:[#allocation7 + $0x3294] ss:$84 sps:$4 sm:$0xff]   ;;  %v19239_v29 = vld [vmem:[#allocation7 + $0x3290] ss:$84 sps:$4 sm:$0xff]  }
 0x23b   :  { %11719 = vmatpush1.bf16.msra.mxu0 %v19176_v28  ;;  %v199_v28 = vrot.slane %v22003_v12, %v21911_v50  ;;  %v19251_v12 = vld [vmem:[#allocation7 + $0x33e0] ss:$84 sps:$4 sm:$0xff]  }
 0x23c   :  { %11965 = vmatpush1.bf16.msra.mxu1 %v19179_v34  ;;  %11720 = vmatprep.subr.bf16.mxu0 %v19184_v35  ;;  %v19244_v34 = vld [vmem:[#allocation7 + $0x3334] ss:$84 sps:$4 sm:$0xff]   ;;  %v19242_v35 = vld [vmem:[#allocation7 + $0x3330] ss:$84 sps:$4 sm:$0xff]  }
 0x23d   :  { %11966 = vmatprep.subr.bf16.mxu1 %v19187_v37  ;;  %v613_v37 = vadd.f32 %v21949_v54, %v199_v28  ;;  %v19257_v54 = vld [vmem:[#allocation7 + $0x3488] ss:$84 sps:$4 sm:$0xff]  }
 0x23e   :  { %v19301_v28 = vld [vmem:[#allocation7 + $0x214] ss:$84 sps:$4 sm:$0xff]  }
 0x23f   :  { %11721 = vmatpush1.bf16.msra.mxu0 %v19182_v32  ;;  %v19247_v32 = vld [vmem:[#allocation7 + $0x333c] ss:$84 sps:$4 sm:$0xff]  }
 0x240   :  { %11967 = vmatpush1.bf16.msra.mxu1 %v19185_v38  ;;  %11722 = vmatprep.subr.bf16.mxu0 %v19190_v53  ;;  %v19245_v38 = vld [vmem:[#allocation7 + $0x3338] ss:$84 sps:$4 sm:$0xff]   ;;  %v19250_v53 = vld [vmem:[#allocation7 + $0x33dc] ss:$84 sps:$4 sm:$0xff]  }
 0x241   :  { %11968 = vmatprep.subr.bf16.mxu1 %v19193_v40  ;;  %v19248_v40 = vld [vmem:[#allocation7 + $0x33d8] ss:$84 sps:$4 sm:$0xff]  }
 0x243   :  { %11723 = vmatpush1.bf16.msra.mxu0 %v19188_v41  ;;  %v19253_v41 = vld [vmem:[#allocation7 + $0x33e4] ss:$84 sps:$4 sm:$0xff]  }
 0x244   :  { %11969 = vmatpush1.bf16.msra.mxu1 %v19191_v42  ;;  %11724 = vmatprep.subr.bf16.mxu0 %v19196_v44  ;;  %v667_v42 = vmax.f32 %v613_v37, 0.0  ;;  %v19256_v44 = vld [vmem:[#allocation7 + $0x3484] ss:$84 sps:$4 sm:$0xff]  }
 0x245   :  { %11970 = vmatprep.subr.bf16.mxu1 %v19199_v45  ;;  %v19259_v45 = vld [vmem:[#allocation7 + $0x348c] ss:$84 sps:$4 sm:$0xff]  }
 0x246   :  { %v19305_v37 = vld [vmem:[#allocation7 + $0x2b8] ss:$84 sps:$4 sm:$0xff]  }
 0x247   :  { %11725 = vmatpush1.bf16.msra.mxu0 %v19194_v47  ;;  %v19254_v47 = vld [vmem:[#allocation7 + $0x3480] ss:$84 sps:$4 sm:$0xff]  }
 0x248   :  { %11971 = vmatpush1.bf16.msra.mxu1 %v19197_v48  ;;  %11726 = vmatprep.subr.bf16.mxu0 %v19202_v55  ;;  %v22020_v48 = vpack.c.bf16 %v667_v42, %v667_v42  ;;  %v19262_v55 = vld [vmem:[#allocation7 + $0x352c] ss:$84 sps:$4 sm:$0xff]   ;;  %v19316_v42 = vld [vmem:[#allocation7 + $0x404] ss:$84 sps:$4 sm:$0xff]  }
 0x249   :  { %11972 = vmatprep.subr.bf16.mxu1 %v19205_v57  ;;  %v19265_v57 = vld [vmem:[#allocation7 + $0x3534] ss:$84 sps:$4 sm:$0xff]  }
 0x24b   :  { %11727 = vmatpush1.bf16.msra.mxu0 %v19200_v51  ;;  %v19260_v51 = vld [vmem:[#allocation7 + $0x3528] ss:$84 sps:$4 sm:$0xff]  }
 0x24c   :  { %11973 = vmatpush1.bf16.msra.mxu1 %v19203_v49  ;;  %11728 = vmatprep.subr.bf16.mxu0 %v19208_v58  ;;  %v19263_v49 = vld [vmem:[#allocation7 + $0x3530] ss:$84 sps:$4 sm:$0xff]   ;;  %v19268_v58 = vld [vmem:[#allocation7 + $0x35d4] ss:$84 sps:$4 sm:$0xff]  }
 0x24d   :  { %11974 = vmatprep.subr.bf16.mxu1 %v19211_v61  ;;  %v19271_v61 = vld [vmem:[#allocation7 + $0x35dc] ss:$84 sps:$4 sm:$0xff]  }
 0x24f   :  { %11729 = vmatpush1.bf16.msra.mxu0 %v19206_v59  ;;  %v19266_v59 = vld [vmem:[#allocation7 + $0x35d0] ss:$84 sps:$4 sm:$0xff]  }
 0x250   :  { %11975 = vmatpush1.bf16.msra.mxu1 %v19209_v33  ;;  %11730 = vmatprep.subr.bf16.mxu0 %v19214_v62  ;;  %v19269_v33 = vld [vmem:[#allocation7 + $0x35d8] ss:$84 sps:$4 sm:$0xff]   ;;  %v19274_v62 = vld [vmem:[#allocation7 + $0x367c] ss:$84 sps:$4 sm:$0xff]  }
 0x251   :  { %11976 = vmatprep.subr.bf16.mxu1 %v19217_v5  ;;  %v19277_v5 = vld [vmem:[#allocation7 + $0x3684] ss:$84 sps:$4 sm:$0xff]  }
 0x253   :  { %11731 = vmatpush1.bf16.msra.mxu0 %v19212_v11  ;;  %v19272_v11 = vld [vmem:[#allocation7 + $0x3678] ss:$84 sps:$4 sm:$0xff]  }
 0x254   :  { %11977 = vmatpush1.bf16.msra.mxu1 %v19215_v6  ;;  %11732 = vmatprep.subr.bf16.mxu0 %v19220_v7  ;;  %v669_v6 = vmax.f32 %v21957_v18, 0.0  ;;  %v19275_v7 = vld [vmem:[#allocation7 + $0x3680] ss:$84 sps:$4 sm:$0xff]   ;;  %v19284_v18 = vld [vmem:[#allocation7 + $0xb8] ss:$84 sps:$4 sm:$0xff]  }
 0x255   :  { %11978 = vmatprep.subr.bf16.mxu1 %v19223_v13  ;;  %v19283_v13 = vld [vmem:[#allocation7 + $0x1c] ss:$84 sps:$4 sm:$0xff]  }
 0x257   :  { %11733 = vmatpush1.bf16.msra.mxu0 %v19218_v8  ;;  %v19280_v8 = vld [vmem:[#allocation7 + $0x14] ss:$84 sps:$4 sm:$0xff]  }
 0x258   :  { %11979 = vmatpush1.bf16.msra.mxu1 %v19221_v14  ;;  %11734 = vmatprep.subr.bf16.mxu0 %v19226_v15  ;;  %v19278_v14 = vld [vmem:[#allocation7 + $0x10] ss:$84 sps:$4 sm:$0xff]   ;;  %v19281_v15 = vld [vmem:[#allocation7 + $0x18] ss:$84 sps:$4 sm:$0xff]  }
 0x259   :  { %11980 = vmatprep.subr.bf16.mxu1 %v19229_v17  ;;  %v22027_v17 = vpack.c.bf16 %v669_v6, %v669_v6  ;;  %v19338_v6 = vld [vmem:[#allocation7 + $0x6a0] ss:$84 sps:$4 sm:$0xff]  }
 0x25b   :  { %11735 = vmatpush1.bf16.msra.mxu0 %v19224_v16  ;;  %v19286_v16 = vld [vmem:[#allocation7 + $0xbc] ss:$84 sps:$4 sm:$0xff]  }
 0x25c   :  { %11981 = vmatpush1.bf16.msra.mxu1 %v19227_v19  ;;  %11736 = vmatprep.subr.bf16.mxu0 %v19232_v20  ;;  %v19287_v19 = vld [vmem:[#allocation7 + $0xc0] ss:$84 sps:$4 sm:$0xff]   ;;  %v19289_v20 = vld [vmem:[#allocation7 + $0xc4] ss:$84 sps:$4 sm:$0xff]  }
 0x25d   :  { %11982 = vmatprep.subr.bf16.mxu1 %v19235_v22  ;;  %v19295_v22 = vld [vmem:[#allocation7 + $0x16c] ss:$84 sps:$4 sm:$0xff]  }
 0x25f   :  { %11737 = vmatpush1.bf16.msra.mxu0 %v19230_v21  ;;  %v19292_v21 = vld [vmem:[#allocation7 + $0x164] ss:$84 sps:$4 sm:$0xff]  }
 0x260   :  { %11983 = vmatpush1.bf16.msra.mxu1 %v19233_v23  ;;  %11738 = vmatprep.subr.bf16.mxu0 %v19238_v25  ;;  %v19290_v23 = vld [vmem:[#allocation7 + $0x160] ss:$84 sps:$4 sm:$0xff]   ;;  %v19293_v25 = vld [vmem:[#allocation7 + $0x168] ss:$84 sps:$4 sm:$0xff]  }
 0x261   :  { %11984 = vmatprep.subr.bf16.mxu1 %v19241_v27  ;;  %v19296_v27 = vld [vmem:[#allocation7 + $0x208] ss:$84 sps:$4 sm:$0xff]  }
 0x263   :  { %11739 = vmatpush1.bf16.msra.mxu0 %v19236_v26  ;;  %v19298_v26 = vld [vmem:[#allocation7 + $0x20c] ss:$84 sps:$4 sm:$0xff]  }
 0x264   :  { %11985 = vmatpush1.bf16.msra.mxu1 %v19239_v29  ;;  %11740 = vmatprep.subr.bf16.mxu0 %v19244_v34  ;;  %v19299_v29 = vld [vmem:[#allocation7 + $0x210] ss:$84 sps:$4 sm:$0xff]   ;;  %v19304_v34 = vld [vmem:[#allocation7 + $0x2b4] ss:$84 sps:$4 sm:$0xff]  }
 0x265   :  { %11986 = vmatprep.subr.bf16.mxu1 %v19247_v32  ;;  %v19307_v32 = vld [vmem:[#allocation7 + $0x2bc] ss:$84 sps:$4 sm:$0xff]  }
 0x267   :  { %11741 = vmatpush1.bf16.msra.mxu0 %v19242_v35  ;;  %v19302_v35 = vld [vmem:[#allocation7 + $0x2b0] ss:$84 sps:$4 sm:$0xff]  }
 0x268   :  { %11987 = vmatpush1.bf16.msra.mxu1 %v19245_v38  ;;  %11742 = vmatprep.subr.bf16.mxu0 %v19250_v53  ;;  %v19310_v38 = vld [vmem:[#allocation7 + $0x35c] ss:$84 sps:$4 sm:$0xff]   ;;  %v19308_v53 = vld [vmem:[#allocation7 + $0x358] ss:$84 sps:$4 sm:$0xff]  }
 0x269   :  { %11988 = vmatprep.subr.bf16.mxu1 %v19253_v41  ;;  %v19311_v41 = vld [vmem:[#allocation7 + $0x360] ss:$84 sps:$4 sm:$0xff]  }
 0x26b   :  { %11743 = vmatpush1.bf16.msra.mxu0 %v19248_v40  ;;  %v19313_v40 = vld [vmem:[#allocation7 + $0x364] ss:$84 sps:$4 sm:$0xff]  }
 0x26c   :  { %11989 = vmatpush1.bf16.msra.mxu1 %v19251_v12  ;;  %11753 = vmatprep.subr.bf16.mxu0 %v19256_v44  ;;  %v19314_v12 = vld [vmem:[#allocation7 + $0x400] ss:$84 sps:$4 sm:$0xff]  }
 0x26d   :  { %11999 = vmatprep.subr.bf16.mxu1 %v19259_v45  ;;  %v19319_v44 = vld [vmem:[#allocation7 + $0x40c] ss:$84 sps:$4 sm:$0xff]   ;;  %v19317_v45 = vld [vmem:[#allocation7 + $0x408] ss:$84 sps:$4 sm:$0xff]  }
 0x26e   :  { %11745 = vmatmul.mubr.bf16.vlgmr.msra.gmra.mrb[16].mxu0 %v22020_v48 }
 0x26f   :  { %11991 = vmatmul.mubr.bf16.vlgmr.msra.gmra.mrb[8].mxu1 %v22020_v48  ;;  %11754 = vmatpush1.bf16.msra.mxu0 %v19254_v47  ;;  %v19322_v47 = vld [vmem:[#allocation7 + $0x4ac] ss:$84 sps:$4 sm:$0xff]  }
 0x270   :  { %12000 = vmatpush1.bf16.msra.mxu1 %v19257_v54  ;;  %11755 = vmatprep.subr.bf16.mxu0 %v19262_v55  ;;  %v19320_v54 = vld [vmem:[#allocation7 + $0x4a8] ss:$84 sps:$4 sm:$0xff]  }
 0x271   :  { %12001 = vmatprep.subr.bf16.mxu1 %v19265_v57  ;;  %11785 = vmatprep.mubr.bf16.mxu0 %v21723_v1  ;;  %v19325_v55 = vld [vmem:[#allocation7 + $0x4b4] ss:$84 sps:$4 sm:$0xff]  }
 0x272   :  { %12031 = vmatprep.mubr.bf16.mxu1 %v21723_v1  ;;  %v19328_v57 = vld [vmem:[#allocation7 + $0x554] ss:$84 sps:$4 sm:$0xff]  }
 0x273   :  { %11756 = vmatpush1.bf16.msra.mxu0 %v19260_v51  ;;  %v19323_v51 = vld [vmem:[#allocation7 + $0x4b0] ss:$84 sps:$4 sm:$0xff]  }
 0x274   :  { %12002 = vmatpush1.bf16.msra.mxu1 %v19263_v49  ;;  %11757 = vmatprep.subr.bf16.mxu0 %v19268_v58  ;;  %v19326_v49 = vld [vmem:[#allocation7 + $0x550] ss:$84 sps:$4 sm:$0xff]  }
 0x275   :  { %12003 = vmatprep.subr.bf16.mxu1 %v19271_v61  ;;  %v19331_v58 = vld [vmem:[#allocation7 + $0x55c] ss:$84 sps:$4 sm:$0xff]  }
 0x276   :  { %v19334_v61 = vld [vmem:[#allocation7 + $0x5fc] ss:$84 sps:$4 sm:$0xff]  }
 0x277   :  { %11758 = vmatpush1.bf16.msra.mxu0 %v19266_v59  ;;  %v19329_v59 = vld [vmem:[#allocation7 + $0x558] ss:$84 sps:$4 sm:$0xff]  }
 0x278   :  { %12004 = vmatpush1.bf16.msra.mxu1 %v19269_v33  ;;  %11759 = vmatprep.subr.bf16.mxu0 %v19274_v62  ;;  %v19332_v33 = vld [vmem:[#allocation7 + $0x5f8] ss:$84 sps:$4 sm:$0xff]  }
 0x279   :  { %12005 = vmatprep.subr.bf16.mxu1 %v19277_v5  ;;  %v19337_v62 = vld [vmem:[#allocation7 + $0x604] ss:$84 sps:$4 sm:$0xff]  }
 0x27a   :  { %v19340_v5 = vld [vmem:[#allocation7 + $0x6a4] ss:$84 sps:$4 sm:$0xff]  }
 0x27b   :  { %11760 = vmatpush1.bf16.msra.mxu0 %v19272_v11  ;;  %v19335_v11 = vld [vmem:[#allocation7 + $0x600] ss:$84 sps:$4 sm:$0xff]  }
 0x27c   :  { %12006 = vmatpush1.bf16.msra.mxu1 %v19275_v7  ;;  %12040 = vmatprep.subr.bf16.mxu0 %v19280_v8  ;;  %v19343_v7 = vld [vmem:[#allocation7 + $0x6ac] ss:$84 sps:$4 sm:$0xff]   ;;  %v19341_v8 = vld [vmem:[#allocation7 + $0x6a8] ss:$84 sps:$4 sm:$0xff]  }
 0x27d   :  { %12286 = vmatprep.subr.bf16.mxu1 %v19283_v13  ;;  %v19346_v13 = vld [vmem:[#allocation7 + $0x74c] ss:$84 sps:$4 sm:$0xff]  }
 0x27e   :  { %17918 = vmatmul.mubr.msk.bf16.vlgmr.msra.gmra.mrb[16].mxu0 %vm11544_vm3, %v22027_v17 }
 0x27f   :  { %17919 = vmatmul.mubr.msk.bf16.vlgmr.msra.gmra.mrb[8].mxu1 %vm11544_vm3, %v22027_v17  ;;  %12041 = vmatpush1.bf16.msra.mxu0 %v19278_v14  ;;  %v19344_v14 = vld [vmem:[#allocation7 + $0x748] ss:$84 sps:$4 sm:$0xff]  }
 0x280   :  { %12072 = vmatprep.mubr.bf16.mxu0 %v21922_v2  ;;  %12287 = vmatpush1.bf16.msra.mxu1 %v19281_v15  ;;  %v19349_v15 = vld [vmem:[#allocation7 + $0x754] ss:$84 sps:$4 sm:$0xff]  }
 0x281   :  { %12318 = vmatprep.mubr.bf16.mxu1 %v21922_v2  ;;  %12042 = vmatprep.subr.bf16.mxu0 %v19286_v16  ;;  %v19347_v16 = vld [vmem:[#allocation7 + $0x750] ss:$84 sps:$4 sm:$0xff]  }
 0x282   :  { %12288 = vmatprep.subr.bf16.mxu1 %v19289_v20  ;;  %v19355_v20 = vld [vmem:[#allocation7 + $0x7fc] ss:$84 sps:$4 sm:$0xff]  }
 0x283   :  { %12043 = vmatpush1.bf16.msra.mxu0 %v19284_v18  ;;  %v19352_v18 = vld [vmem:[#allocation7 + $0x7f4] ss:$84 sps:$4 sm:$0xff]  }
 0x284   :  { %12289 = vmatpush1.bf16.msra.mxu1 %v19287_v19  ;;  %12044 = vmatprep.subr.bf16.mxu0 %v19292_v21  ;;  %v19350_v19 = vld [vmem:[#allocation7 + $0x7f0] ss:$84 sps:$4 sm:$0xff]   ;;  %v19353_v21 = vld [vmem:[#allocation7 + $0x7f8] ss:$84 sps:$4 sm:$0xff]  }
 0x285   :  { %12290 = vmatprep.subr.bf16.mxu1 %v19295_v22  ;;  %v19358_v22 = vld [vmem:[#allocation7 + $0x89c] ss:$84 sps:$4 sm:$0xff]  }
 0x287   :  { %12045 = vmatpush1.bf16.msra.mxu0 %v19290_v23  ;;  %v19356_v23 = vld [vmem:[#allocation7 + $0x898] ss:$84 sps:$4 sm:$0xff]  }
 0x288   :  { %12291 = vmatpush1.bf16.msra.mxu1 %v19293_v25  ;;  %12046 = vmatprep.subr.bf16.mxu0 %v19298_v26  ;;  %v19361_v25 = vld [vmem:[#allocation7 + $0x8a4] ss:$84 sps:$4 sm:$0xff]   ;;  %v19359_v26 = vld [vmem:[#allocation7 + $0x8a0] ss:$84 sps:$4 sm:$0xff]  }
 0x289   :  { %12292 = vmatprep.subr.bf16.mxu1 %v19301_v28  ;;  %v19362_v28 = vld [vmem:[#allocation7 + $0x940] ss:$84 sps:$4 sm:$0xff]  }
 0x28b   :  { %12047 = vmatpush1.bf16.msra.mxu0 %v19296_v27  ;;  %v19364_v27 = vld [vmem:[#allocation7 + $0x944] ss:$84 sps:$4 sm:$0xff]  }
 0x28c   :  { %12293 = vmatpush1.bf16.msra.mxu1 %v19299_v29  ;;  %12048 = vmatprep.subr.bf16.mxu0 %v19304_v34  ;;  %v19367_v29 = vld [vmem:[#allocation7 + $0x94c] ss:$84 sps:$4 sm:$0xff]   ;;  %v19365_v34 = vld [vmem:[#allocation7 + $0x948] ss:$84 sps:$4 sm:$0xff]  }
 0x28d   :  { %12294 = vmatprep.subr.bf16.mxu1 %v19307_v32  ;;  %v19368_v32 = vld [vmem:[#allocation7 + $0x9e8] ss:$84 sps:$4 sm:$0xff]  }
 0x28f   :  { %12049 = vmatpush1.bf16.msra.mxu0 %v19302_v35  ;;  %v19370_v35 = vld [vmem:[#allocation7 + $0x9ec] ss:$84 sps:$4 sm:$0xff]  }
 0x290   :  { %12295 = vmatpush1.bf16.msra.mxu1 %v19305_v37  ;;  %12050 = vmatprep.subr.bf16.mxu0 %v19310_v38  ;;  %v19373_v37 = vld [vmem:[#allocation7 + $0x9f4] ss:$84 sps:$4 sm:$0xff]   ;;  %v19371_v38 = vld [vmem:[#allocation7 + $0x9f0] ss:$84 sps:$4 sm:$0xff]  }
 0x291   :  { %12296 = vmatprep.subr.bf16.mxu1 %v19313_v40  ;;  %v19374_v40 = vld [vmem:[#allocation7 + $0xa90] ss:$84 sps:$4 sm:$0xff]  }
 0x293   :  { %12051 = vmatpush1.bf16.msra.mxu0 %v19308_v53  ;;  %v19376_v53 = vld [vmem:[#allocation7 + $0xa94] ss:$84 sps:$4 sm:$0xff]  }
 0x294   :  { %12297 = vmatpush1.bf16.msra.mxu1 %v19311_v41  ;;  %12052 = vmatprep.subr.bf16.mxu0 %v19316_v42  ;;  %v19379_v41 = vld [vmem:[#allocation7 + $0xa9c] ss:$84 sps:$4 sm:$0xff]   ;;  %v19377_v42 = vld [vmem:[#allocation7 + $0xa98] ss:$84 sps:$4 sm:$0xff]  }
 0x295   :  { %12298 = vmatprep.subr.bf16.mxu1 %v19319_v44  ;;  %v19380_v44 = vld [vmem:[#allocation7 + $0xb38] ss:$84 sps:$4 sm:$0xff]  }
 0x297   :  { %12053 = vmatpush1.bf16.msra.mxu0 %v19314_v12  ;;  %v19382_v12 = vld [vmem:[#allocation7 + $0xb3c] ss:$84 sps:$4 sm:$0xff]  }
 0x298   :  { %12299 = vmatpush1.bf16.msra.mxu1 %v19317_v45  ;;  %12054 = vmatprep.subr.bf16.mxu0 %v19322_v47  ;;  %v19383_v45 = vld [vmem:[#allocation7 + $0xb40] ss:$84 sps:$4 sm:$0xff]   ;;  %v19385_v47 = vld [vmem:[#allocation7 + $0xb44] ss:$84 sps:$4 sm:$0xff]  }
 0x299   :  { %12300 = vmatprep.subr.bf16.mxu1 %v19325_v55  ;;  %v19391_v55 = vld [vmem:[#allocation7 + $0xbec] ss:$84 sps:$4 sm:$0xff]  }
 0x29b   :  { %12055 = vmatpush1.bf16.msra.mxu0 %v19320_v54  ;;  %v19388_v54 = vld [vmem:[#allocation7 + $0xbe4] ss:$84 sps:$4 sm:$0xff]  }
 0x29c   :  { %12301 = vmatpush1.bf16.msra.mxu1 %v19323_v51  ;;  %12056 = vmatprep.subr.bf16.mxu0 %v19328_v57  ;;  %v19386_v51 = vld [vmem:[#allocation7 + $0xbe0] ss:$84 sps:$4 sm:$0xff]   ;;  %v19389_v57 = vld [vmem:[#allocation7 + $0xbe8] ss:$84 sps:$4 sm:$0xff]  }
 0x29d   :  { %12302 = vmatprep.subr.bf16.mxu1 %v19331_v58  ;;  %v19392_v58 = vld [vmem:[#allocation7 + $0xc88] ss:$84 sps:$4 sm:$0xff]  }
 0x29f   :  { %12057 = vmatpush1.bf16.msra.mxu0 %v19326_v49  ;;  %v19394_v49 = vld [vmem:[#allocation7 + $0xc8c] ss:$84 sps:$4 sm:$0xff]  }
 0x2a0   :  { %12303 = vmatpush1.bf16.msra.mxu1 %v19329_v59  ;;  %12058 = vmatprep.subr.bf16.mxu0 %v19334_v61  ;;  %v19397_v59 = vld [vmem:[#allocation7 + $0xc94] ss:$84 sps:$4 sm:$0xff]   ;;  %v19395_v61 = vld [vmem:[#allocation7 + $0xc90] ss:$84 sps:$4 sm:$0xff]  }
 0x2a1   :  { %12304 = vmatprep.subr.bf16.mxu1 %v19337_v62  ;;  %v19398_v62 = vld [vmem:[#allocation7 + $0xd30] ss:$84 sps:$4 sm:$0xff]  }
 0x2a3   :  { %12059 = vmatpush1.bf16.msra.mxu0 %v19332_v33  ;;  %v19400_v33 = vld [vmem:[#allocation7 + $0xd34] ss:$84 sps:$4 sm:$0xff]  }
 0x2a4   :  { %12305 = vmatpush1.bf16.msra.mxu1 %v19335_v11  ;;  %12060 = vmatprep.subr.bf16.mxu0 %v19340_v5  ;;  %v19403_v11 = vld [vmem:[#allocation7 + $0xd3c] ss:$84 sps:$4 sm:$0xff]   ;;  %v19401_v5 = vld [vmem:[#allocation7 + $0xd38] ss:$84 sps:$4 sm:$0xff]  }
 0x2a5   :  { %12306 = vmatprep.subr.bf16.mxu1 %v19343_v7  ;;  %v19404_v7 = vld [vmem:[#allocation7 + $0xdd8] ss:$84 sps:$4 sm:$0xff]  }
 0x2a7   :  { %12061 = vmatpush1.bf16.msra.mxu0 %v19338_v6  ;;  %v19406_v6 = vld [vmem:[#allocation7 + $0xddc] ss:$84 sps:$4 sm:$0xff]  }
 0x2a8   :  { %12307 = vmatpush1.bf16.msra.mxu1 %v19341_v8  ;;  %12062 = vmatprep.subr.bf16.mxu0 %v19346_v13  ;;  %v19409_v8 = vld [vmem:[#allocation7 + $0xde4] ss:$84 sps:$4 sm:$0xff]   ;;  %v19407_v13 = vld [vmem:[#allocation7 + $0xde0] ss:$84 sps:$4 sm:$0xff]  }
 0x2a9   :  { %12308 = vmatprep.subr.bf16.mxu1 %v19349_v15  ;;  %v19415_v15 = vld [vmem:[#allocation7 + $0xe8c] ss:$84 sps:$4 sm:$0xff]  }
 0x2ab   :  { %12063 = vmatpush1.bf16.msra.mxu0 %v19344_v14  ;;  %v19412_v14 = vld [vmem:[#allocation7 + $0xe84] ss:$84 sps:$4 sm:$0xff]  }
 0x2ac   :  { %12309 = vmatpush1.bf16.msra.mxu1 %v19347_v16  ;;  %12064 = vmatprep.subr.bf16.mxu0 %v19352_v18  ;;  %v19410_v16 = vld [vmem:[#allocation7 + $0xe80] ss:$84 sps:$4 sm:$0xff]   ;;  %v19413_v18 = vld [vmem:[#allocation7 + $0xe88] ss:$84 sps:$4 sm:$0xff]  }
 0x2ad   :  { %12310 = vmatprep.subr.bf16.mxu1 %v19355_v20  ;;  %v19421_v20 = vld [vmem:[#allocation7 + $0xf34] ss:$84 sps:$4 sm:$0xff]  }
 0x2af   :  { %12065 = vmatpush1.bf16.msra.mxu0 %v19350_v19  ;;  %v19418_v19 = vld [vmem:[#allocation7 + $0xf2c] ss:$84 sps:$4 sm:$0xff]  }
 0x2b0   :  { %12311 = vmatpush1.bf16.msra.mxu1 %v19353_v21  ;;  %12066 = vmatprep.subr.bf16.mxu0 %v19358_v22  ;;  %v19416_v21 = vld [vmem:[#allocation7 + $0xf28] ss:$84 sps:$4 sm:$0xff]   ;;  %v19419_v22 = vld [vmem:[#allocation7 + $0xf30] ss:$84 sps:$4 sm:$0xff]  }
 0x2b1   :  { %12312 = vmatprep.subr.bf16.mxu1 %v19361_v25  ;;  %v19422_v25 = vld [vmem:[#allocation7 + $0xfd0] ss:$84 sps:$4 sm:$0xff]  }
 0x2b3   :  { %12067 = vmatpush1.bf16.msra.mxu0 %v19356_v23  ;;  %v19424_v23 = vld [vmem:[#allocation7 + $0xfd4] ss:$84 sps:$4 sm:$0xff]  }
 0x2b4   :  { %12313 = vmatpush1.bf16.msra.mxu1 %v19359_v26  ;;  %12068 = vmatprep.subr.bf16.mxu0 %v19364_v27  ;;  %v19427_v26 = vld [vmem:[#allocation7 + $0xfdc] ss:$84 sps:$4 sm:$0xff]   ;;  %v19425_v27 = vld [vmem:[#allocation7 + $0xfd8] ss:$84 sps:$4 sm:$0xff]  }
 0x2b5   :  { %12314 = vmatprep.subr.bf16.mxu1 %v19367_v29  ;;  %v19428_v29 = vld [vmem:[#allocation7 + $0x1078] ss:$84 sps:$4 sm:$0xff]  }
 0x2b7   :  { %12069 = vmatpush1.bf16.msra.mxu0 %v19362_v28  ;;  %v19430_v28 = vld [vmem:[#allocation7 + $0x107c] ss:$84 sps:$4 sm:$0xff]  }
 0x2b8   :  { %12315 = vmatpush1.bf16.msra.mxu1 %v19365_v34  ;;  %12070 = vmatprep.subr.bf16.mxu0 %v19370_v35  ;;  %v19433_v34 = vld [vmem:[#allocation7 + $0x1084] ss:$84 sps:$4 sm:$0xff]   ;;  %v19431_v35 = vld [vmem:[#allocation7 + $0x1080] ss:$84 sps:$4 sm:$0xff]  }
 0x2b9   :  { %12316 = vmatprep.subr.bf16.mxu1 %v19373_v37  ;;  %v19434_v37 = vld [vmem:[#allocation7 + $0x1120] ss:$84 sps:$4 sm:$0xff]  }
 0x2bb   :  { %12071 = vmatpush1.bf16.msra.mxu0 %v19368_v32  ;;  %v19436_v32 = vld [vmem:[#allocation7 + $0x1124] ss:$84 sps:$4 sm:$0xff]  }
 0x2bc   :  { %12317 = vmatpush1.bf16.msra.mxu1 %v19371_v38  ;;  %12081 = vmatprep.subr.bf16.mxu0 %v19376_v53  ;;  %v19439_v38 = vld [vmem:[#allocation7 + $0x112c] ss:$84 sps:$4 sm:$0xff]   ;;  %v19437_v53 = vld [vmem:[#allocation7 + $0x1128] ss:$84 sps:$4 sm:$0xff]  }
 0x2bd   :  { %12327 = vmatprep.subr.bf16.mxu1 %v19379_v41  ;;  %v19440_v41 = vld [vmem:[#allocation7 + $0x11c8] ss:$84 sps:$4 sm:$0xff]  }
 0x2be   :  { %12073 = vmatmul.mubr.bf16.vlgmr.msra.gmra.mrb[20].mxu0 %v21927_v4 }
 0x2bf   :  { %12319 = vmatmul.mubr.bf16.vlgmr.msra.gmra.mrb[12].mxu1 %v21927_v4  ;;  %12082 = vmatpush1.bf16.msra.mxu0 %v19374_v40  ;;  %v19442_v40 = vld [vmem:[#allocation7 + $0x11cc] ss:$84 sps:$4 sm:$0xff]  }
 0x2c0   :  { %12113 = vmatprep.mubr.bf16.mxu0 %v21937_v24  ;;  %12328 = vmatpush1.bf16.msra.mxu1 %v19377_v42  ;;  %v19445_v42 = vld [vmem:[#allocation7 + $0x11d4] ss:$84 sps:$4 sm:$0xff]  }
 0x2c1   :  { %12359 = vmatprep.mubr.bf16.mxu1 %v21937_v24  ;;  %12083 = vmatprep.subr.bf16.mxu0 %v19382_v12  ;;  %v19443_v12 = vld [vmem:[#allocation7 + $0x11d0] ss:$84 sps:$4 sm:$0xff]  }
 0x2c2   :  { %12329 = vmatprep.subr.bf16.mxu1 %v19385_v47  ;;  %v19451_v47 = vld [vmem:[#allocation7 + $0x127c] ss:$84 sps:$4 sm:$0xff]  }
 0x2c3   :  { %12084 = vmatpush1.bf16.msra.mxu0 %v19380_v44  ;;  %v19448_v44 = vld [vmem:[#allocation7 + $0x1274] ss:$84 sps:$4 sm:$0xff]  }
 0x2c4   :  { %12330 = vmatpush1.bf16.msra.mxu1 %v19383_v45  ;;  %12085 = vmatprep.subr.bf16.mxu0 %v19388_v54  ;;  %v19446_v45 = vld [vmem:[#allocation7 + $0x1270] ss:$84 sps:$4 sm:$0xff]   ;;  %v19449_v54 = vld [vmem:[#allocation7 + $0x1278] ss:$84 sps:$4 sm:$0xff]  }
 0x2c5   :  { %12331 = vmatprep.subr.bf16.mxu1 %v19391_v55  ;;  %v19454_v55 = vld [vmem:[#allocation7 + $0x131c] ss:$84 sps:$4 sm:$0xff]  }
 0x2c7   :  { %12086 = vmatpush1.bf16.msra.mxu0 %v19386_v51  ;;  %v19452_v51 = vld [vmem:[#allocation7 + $0x1318] ss:$84 sps:$4 sm:$0xff]  }
 0x2c8   :  { %12332 = vmatpush1.bf16.msra.mxu1 %v19389_v57  ;;  %12087 = vmatprep.subr.bf16.mxu0 %v19394_v49  ;;  %v19457_v57 = vld [vmem:[#allocation7 + $0x1324] ss:$84 sps:$4 sm:$0xff]   ;;  %v19455_v49 = vld [vmem:[#allocation7 + $0x1320] ss:$84 sps:$4 sm:$0xff]  }
 0x2c9   :  { %12333 = vmatprep.subr.bf16.mxu1 %v19397_v59  ;;  %v19458_v59 = vld [vmem:[#allocation7 + $0x13c0] ss:$84 sps:$4 sm:$0xff]  }
 0x2cb   :  { %12088 = vmatpush1.bf16.msra.mxu0 %v19392_v58  ;;  %v19460_v58 = vld [vmem:[#allocation7 + $0x13c4] ss:$84 sps:$4 sm:$0xff]  }
 0x2cc   :  { %12334 = vmatpush1.bf16.msra.mxu1 %v19395_v61  ;;  %12089 = vmatprep.subr.bf16.mxu0 %v19400_v33  ;;  %v19463_v61 = vld [vmem:[#allocation7 + $0x13cc] ss:$84 sps:$4 sm:$0xff]   ;;  %v19461_v33 = vld [vmem:[#allocation7 + $0x13c8] ss:$84 sps:$4 sm:$0xff]  }
 0x2cd   :  { %12335 = vmatprep.subr.bf16.mxu1 %v19403_v11  ;;  %v19464_v11 = vld [vmem:[#allocation7 + $0x1468] ss:$84 sps:$4 sm:$0xff]  }
 0x2cf   :  { %12090 = vmatpush1.bf16.msra.mxu0 %v19398_v62  ;;  %v19466_v62 = vld [vmem:[#allocation7 + $0x146c] ss:$84 sps:$4 sm:$0xff]  }
 0x2d0   :  { %12336 = vmatpush1.bf16.msra.mxu1 %v19401_v5  ;;  %12091 = vmatprep.subr.bf16.mxu0 %v19406_v6  ;;  %v19469_v5 = vld [vmem:[#allocation7 + $0x1474] ss:$84 sps:$4 sm:$0xff]   ;;  %v19467_v6 = vld [vmem:[#allocation7 + $0x1470] ss:$84 sps:$4 sm:$0xff]  }
 0x2d1   :  { %12337 = vmatprep.subr.bf16.mxu1 %v19409_v8  ;;  %v19470_v8 = vld [vmem:[#allocation7 + $0x1510] ss:$84 sps:$4 sm:$0xff]  }
 0x2d3   :  { %12092 = vmatpush1.bf16.msra.mxu0 %v19404_v7  ;;  %v19472_v7 = vld [vmem:[#allocation7 + $0x1514] ss:$84 sps:$4 sm:$0xff]  }
 0x2d4   :  { %12338 = vmatpush1.bf16.msra.mxu1 %v19407_v13  ;;  %12093 = vmatprep.subr.bf16.mxu0 %v19412_v14  ;;  %v19475_v13 = vld [vmem:[#allocation7 + $0x151c] ss:$84 sps:$4 sm:$0xff]   ;;  %v19473_v14 = vld [vmem:[#allocation7 + $0x1518] ss:$84 sps:$4 sm:$0xff]  }
 0x2d5   :  { %12339 = vmatprep.subr.bf16.mxu1 %v19415_v15  ;;  %v19478_v15 = vld [vmem:[#allocation7 + $0x15bc] ss:$84 sps:$4 sm:$0xff]  }
 0x2d7   :  { %12094 = vmatpush1.bf16.msra.mxu0 %v19410_v16  ;;  %v19476_v16 = vld [vmem:[#allocation7 + $0x15b8] ss:$84 sps:$4 sm:$0xff]  }
 0x2d8   :  { %12340 = vmatpush1.bf16.msra.mxu1 %v19413_v18  ;;  %12095 = vmatprep.subr.bf16.mxu0 %v19418_v19  ;;  %v19479_v18 = vld [vmem:[#allocation7 + $0x15c0] ss:$84 sps:$4 sm:$0xff]   ;;  %v19481_v19 = vld [vmem:[#allocation7 + $0x15c4] ss:$84 sps:$4 sm:$0xff]  }
 0x2d9   :  { %12341 = vmatprep.subr.bf16.mxu1 %v19421_v20  ;;  %v19484_v20 = vld [vmem:[#allocation7 + $0x1664] ss:$84 sps:$4 sm:$0xff]  }
 0x2db   :  { %12096 = vmatpush1.bf16.msra.mxu0 %v19416_v21  ;;  %v19487_v21 = vld [vmem:[#allocation7 + $0x166c] ss:$84 sps:$4 sm:$0xff]  }
 0x2dc   :  { %12342 = vmatpush1.bf16.msra.mxu1 %v19419_v22  ;;  %12097 = vmatprep.subr.bf16.mxu0 %v19424_v23  ;;  %v19482_v22 = vld [vmem:[#allocation7 + $0x1660] ss:$84 sps:$4 sm:$0xff]   ;;  %v19485_v23 = vld [vmem:[#allocation7 + $0x1668] ss:$84 sps:$4 sm:$0xff]  }
 0x2dd   :  { %12343 = vmatprep.subr.bf16.mxu1 %v19427_v26  ;;  %v19488_v26 = vld [vmem:[#allocation7 + $0x1708] ss:$84 sps:$4 sm:$0xff]  }
 0x2df   :  { %12098 = vmatpush1.bf16.msra.mxu0 %v19422_v25  ;;  %v19490_v25 = vld [vmem:[#allocation7 + $0x170c] ss:$84 sps:$4 sm:$0xff]  }
 0x2e0   :  { %12344 = vmatpush1.bf16.msra.mxu1 %v19425_v27  ;;  %12099 = vmatprep.subr.bf16.mxu0 %v19430_v28  ;;  %v19493_v27 = vld [vmem:[#allocation7 + $0x1714] ss:$84 sps:$4 sm:$0xff]   ;;  %v19491_v28 = vld [vmem:[#allocation7 + $0x1710] ss:$84 sps:$4 sm:$0xff]  }
 0x2e1   :  { %12345 = vmatprep.subr.bf16.mxu1 %v19433_v34  ;;  %v19494_v34 = vld [vmem:[#allocation7 + $0x17b0] ss:$84 sps:$4 sm:$0xff]  }
 0x2e3   :  { %12100 = vmatpush1.bf16.msra.mxu0 %v19428_v29  ;;  %v19496_v29 = vld [vmem:[#allocation7 + $0x17b4] ss:$84 sps:$4 sm:$0xff]  }
 0x2e4   :  { %12346 = vmatpush1.bf16.msra.mxu1 %v19431_v35  ;;  %12101 = vmatprep.subr.bf16.mxu0 %v19436_v32  ;;  %v19499_v35 = vld [vmem:[#allocation7 + $0x17bc] ss:$84 sps:$4 sm:$0xff]   ;;  %v19497_v32 = vld [vmem:[#allocation7 + $0x17b8] ss:$84 sps:$4 sm:$0xff]  }
 0x2e5   :  { %12347 = vmatprep.subr.bf16.mxu1 %v19439_v38  ;;  %v19500_v38 = vld [vmem:[#allocation7 + $0x1858] ss:$84 sps:$4 sm:$0xff]  }
 0x2e7   :  { %12102 = vmatpush1.bf16.msra.mxu0 %v19434_v37  ;;  %v19502_v37 = vld [vmem:[#allocation7 + $0x185c] ss:$84 sps:$4 sm:$0xff]  }
 0x2e8   :  { %12348 = vmatpush1.bf16.msra.mxu1 %v19437_v53  ;;  %12103 = vmatprep.subr.bf16.mxu0 %v19442_v40  ;;  %v19505_v53 = vld [vmem:[#allocation7 + $0x1864] ss:$84 sps:$4 sm:$0xff]   ;;  %v19503_v40 = vld [vmem:[#allocation7 + $0x1860] ss:$84 sps:$4 sm:$0xff]  }
 0x2e9   :  { %12349 = vmatprep.subr.bf16.mxu1 %v19445_v42  ;;  %v19506_v42 = vld [vmem:[#allocation7 + $0x1900] ss:$84 sps:$4 sm:$0xff]  }
 0x2eb   :  { %12104 = vmatpush1.bf16.msra.mxu0 %v19440_v41  ;;  %v19508_v41 = vld [vmem:[#allocation7 + $0x1904] ss:$84 sps:$4 sm:$0xff]  }
 0x2ec   :  { %12350 = vmatpush1.bf16.msra.mxu1 %v19443_v12  ;;  %12105 = vmatprep.subr.bf16.mxu0 %v19448_v44  ;;  %v19511_v12 = vld [vmem:[#allocation7 + $0x190c] ss:$84 sps:$4 sm:$0xff]   ;;  %v19509_v44 = vld [vmem:[#allocation7 + $0x1908] ss:$84 sps:$4 sm:$0xff]  }
 0x2ed   :  { %12351 = vmatprep.subr.bf16.mxu1 %v19451_v47  ;;  %v19512_v47 = vld [vmem:[#allocation7 + $0x19a8] ss:$84 sps:$4 sm:$0xff]  }
 0x2ef   :  { %12106 = vmatpush1.bf16.msra.mxu0 %v19446_v45  ;;  %v19514_v45 = vld [vmem:[#allocation7 + $0x19ac] ss:$84 sps:$4 sm:$0xff]  }
 0x2f0   :  { %12352 = vmatpush1.bf16.msra.mxu1 %v19449_v54  ;;  %12107 = vmatprep.subr.bf16.mxu0 %v19454_v55  ;;  %v19517_v54 = vld [vmem:[#allocation7 + $0x19b4] ss:$84 sps:$4 sm:$0xff]   ;;  %v19515_v55 = vld [vmem:[#allocation7 + $0x19b0] ss:$84 sps:$4 sm:$0xff]  }
 0x2f1   :  { %12353 = vmatprep.subr.bf16.mxu1 %v19457_v57  ;;  %v19518_v57 = vld [vmem:[#allocation7 + $0x1a50] ss:$84 sps:$4 sm:$0xff]  }
 0x2f3   :  { %12108 = vmatpush1.bf16.msra.mxu0 %v19452_v51  ;;  %v19520_v51 = vld [vmem:[#allocation7 + $0x1a54] ss:$84 sps:$4 sm:$0xff]  }
 0x2f4   :  { %12354 = vmatpush1.bf16.msra.mxu1 %v19455_v49  ;;  %12109 = vmatprep.subr.bf16.mxu0 %v19460_v58  ;;  %v19523_v49 = vld [vmem:[#allocation7 + $0x1a5c] ss:$84 sps:$4 sm:$0xff]   ;;  %v19521_v58 = vld [vmem:[#allocation7 + $0x1a58] ss:$84 sps:$4 sm:$0xff]  }
 0x2f5   :  { %12355 = vmatprep.subr.bf16.mxu1 %v19463_v61  ;;  %v19524_v61 = vld [vmem:[#allocation7 + $0x1af8] ss:$84 sps:$4 sm:$0xff]  }
 0x2f7   :  { %12110 = vmatpush1.bf16.msra.mxu0 %v19458_v59  ;;  %v19526_v59 = vld [vmem:[#allocation7 + $0x1afc] ss:$84 sps:$4 sm:$0xff]  }
 0x2f8   :  { %12356 = vmatpush1.bf16.msra.mxu1 %v19461_v33  ;;  %12111 = vmatprep.subr.bf16.mxu0 %v19466_v62  ;;  %v19529_v33 = vld [vmem:[#allocation7 + $0x1b04] ss:$84 sps:$4 sm:$0xff]   ;;  %v19527_v62 = vld [vmem:[#allocation7 + $0x1b00] ss:$84 sps:$4 sm:$0xff]  }
 0x2f9   :  { %12357 = vmatprep.subr.bf16.mxu1 %v19469_v5  ;;  %v19530_v5 = vld [vmem:[#allocation7 + $0x1ba0] ss:$84 sps:$4 sm:$0xff]  }
 0x2fb   :  { %12112 = vmatpush1.bf16.msra.mxu0 %v19464_v11  ;;  %v19532_v11 = vld [vmem:[#allocation7 + $0x1ba4] ss:$84 sps:$4 sm:$0xff]  }
 0x2fc   :  { %12358 = vmatpush1.bf16.msra.mxu1 %v19467_v6  ;;  %12122 = vmatprep.subr.bf16.mxu0 %v19472_v7  ;;  %v19535_v6 = vld [vmem:[#allocation7 + $0x1bac] ss:$84 sps:$4 sm:$0xff]   ;;  %v19533_v7 = vld [vmem:[#allocation7 + $0x1ba8] ss:$84 sps:$4 sm:$0xff]  }
 0x2fd   :  { %12368 = vmatprep.subr.bf16.mxu1 %v19475_v13  ;;  %v19536_v13 = vld [vmem:[#allocation7 + $0x1c48] ss:$84 sps:$4 sm:$0xff]  }
 0x2fe   :  { %12114 = vmatmul.mubr.bf16.vlgmr.msra.gmra.mrb[20].mxu0 %v21968_v60 }
 0x2ff   :  { %12360 = vmatmul.mubr.bf16.vlgmr.msra.gmra.mrb[12].mxu1 %v21968_v60  ;;  %12123 = vmatpush1.bf16.msra.mxu0 %v19470_v8  ;;  %v19538_v8 = vld [vmem:[#allocation7 + $0x1c4c] ss:$84 sps:$4 sm:$0xff]  }
 0x300   :  { %12154 = vmatprep.mubr.bf16.mxu0 %v21970_v0  ;;  %12369 = vmatpush1.bf16.msra.mxu1 %v19473_v14  ;;  %v19541_v14 = vld [vmem:[#allocation7 + $0x1c54] ss:$84 sps:$4 sm:$0xff]  }
 0x301   :  { %12400 = vmatprep.mubr.bf16.mxu1 %v21970_v0  ;;  %12124 = vmatprep.subr.bf16.mxu0 %v19478_v15  ;;  %v19539_v15 = vld [vmem:[#allocation7 + $0x1c50] ss:$84 sps:$4 sm:$0xff]  }
 0x302   :  { %12370 = vmatprep.subr.bf16.mxu1 %v19481_v19  ;;  %v19547_v19 = vld [vmem:[#allocation7 + $0x1cfc] ss:$84 sps:$4 sm:$0xff]  }
 0x303   :  { %12125 = vmatpush1.bf16.msra.mxu0 %v19476_v16  ;;  %v19544_v16 = vld [vmem:[#allocation7 + $0x1cf4] ss:$84 sps:$4 sm:$0xff]  }
 0x304   :  { %12371 = vmatpush1.bf16.msra.mxu1 %v19479_v18  ;;  %12126 = vmatprep.subr.bf16.mxu0 %v19484_v20  ;;  %v19542_v18 = vld [vmem:[#allocation7 + $0x1cf0] ss:$84 sps:$4 sm:$0xff]   ;;  %v19545_v20 = vld [vmem:[#allocation7 + $0x1cf8] ss:$84 sps:$4 sm:$0xff]  }
 0x305   :  { %12372 = vmatprep.subr.bf16.mxu1 %v19487_v21  ;;  %v19550_v21 = vld [vmem:[#allocation7 + $0x1d9c] ss:$84 sps:$4 sm:$0xff]  }
 0x307   :  { %12127 = vmatpush1.bf16.msra.mxu0 %v19482_v22  ;;  %v19548_v22 = vld [vmem:[#allocation7 + $0x1d98] ss:$84 sps:$4 sm:$0xff]  }
 0x308   :  { %12373 = vmatpush1.bf16.msra.mxu1 %v19485_v23  ;;  %12128 = vmatprep.subr.bf16.mxu0 %v19490_v25  ;;  %v19553_v23 = vld [vmem:[#allocation7 + $0x1da4] ss:$84 sps:$4 sm:$0xff]   ;;  %v19551_v25 = vld [vmem:[#allocation7 + $0x1da0] ss:$84 sps:$4 sm:$0xff]  }
 0x309   :  { %12374 = vmatprep.subr.bf16.mxu1 %v19493_v27  ;;  %v19554_v27 = vld [vmem:[#allocation7 + $0x1e40] ss:$84 sps:$4 sm:$0xff]  }
 0x30b   :  { %12129 = vmatpush1.bf16.msra.mxu0 %v19488_v26  ;;  %v19556_v26 = vld [vmem:[#allocation7 + $0x1e44] ss:$84 sps:$4 sm:$0xff]  }
 0x30c   :  { %12375 = vmatpush1.bf16.msra.mxu1 %v19491_v28  ;;  %12130 = vmatprep.subr.bf16.mxu0 %v19496_v29  ;;  %v19559_v28 = vld [vmem:[#allocation7 + $0x1e4c] ss:$84 sps:$4 sm:$0xff]   ;;  %v19557_v29 = vld [vmem:[#allocation7 + $0x1e48] ss:$84 sps:$4 sm:$0xff]  }
 0x30d   :  { %12376 = vmatprep.subr.bf16.mxu1 %v19499_v35  ;;  %v19560_v35 = vld [vmem:[#allocation7 + $0x1ee8] ss:$84 sps:$4 sm:$0xff]  }
 0x30f   :  { %12131 = vmatpush1.bf16.msra.mxu0 %v19494_v34  ;;  %v19562_v34 = vld [vmem:[#allocation7 + $0x1eec] ss:$84 sps:$4 sm:$0xff]  }
 0x310   :  { %12377 = vmatpush1.bf16.msra.mxu1 %v19497_v32  ;;  %12132 = vmatprep.subr.bf16.mxu0 %v19502_v37  ;;  %v19565_v32 = vld [vmem:[#allocation7 + $0x1ef4] ss:$84 sps:$4 sm:$0xff]   ;;  %v19563_v37 = vld [vmem:[#allocation7 + $0x1ef0] ss:$84 sps:$4 sm:$0xff]  }
 0x311   :  { %12378 = vmatprep.subr.bf16.mxu1 %v19505_v53  ;;  %v19566_v53 = vld [vmem:[#allocation7 + $0x1f90] ss:$84 sps:$4 sm:$0xff]  }
 0x313   :  { %12133 = vmatpush1.bf16.msra.mxu0 %v19500_v38  ;;  %v19568_v38 = vld [vmem:[#allocation7 + $0x1f94] ss:$84 sps:$4 sm:$0xff]  }
 0x314   :  { %12379 = vmatpush1.bf16.msra.mxu1 %v19503_v40  ;;  %12134 = vmatprep.subr.bf16.mxu0 %v19508_v41  ;;  %v19571_v40 = vld [vmem:[#allocation7 + $0x1f9c] ss:$84 sps:$4 sm:$0xff]   ;;  %v19569_v41 = vld [vmem:[#allocation7 + $0x1f98] ss:$84 sps:$4 sm:$0xff]  }
 0x315   :  { %12380 = vmatprep.subr.bf16.mxu1 %v19511_v12  ;;  %v19577_v12 = vld [vmem:[#allocation7 + $0x2044] ss:$84 sps:$4 sm:$0xff]  }
 0x317   :  { %12135 = vmatpush1.bf16.msra.mxu0 %v19506_v42  ;;  %v19574_v42 = vld [vmem:[#allocation7 + $0x203c] ss:$84 sps:$4 sm:$0xff]  }
 0x318   :  { %12381 = vmatpush1.bf16.msra.mxu1 %v19509_v44  ;;  %12136 = vmatprep.subr.bf16.mxu0 %v19514_v45  ;;  %v19572_v44 = vld [vmem:[#allocation7 + $0x2038] ss:$84 sps:$4 sm:$0xff]   ;;  %v19575_v45 = vld [vmem:[#allocation7 + $0x2040] ss:$84 sps:$4 sm:$0xff]  }
 0x319   :  { %12382 = vmatprep.subr.bf16.mxu1 %v19517_v54  ;;  %v19578_v54 = vld [vmem:[#allocation7 + $0x20e0] ss:$84 sps:$4 sm:$0xff]  }
 0x31b   :  { %12137 = vmatpush1.bf16.msra.mxu0 %v19512_v47  ;;  %v19580_v47 = vld [vmem:[#allocation7 + $0x20e4] ss:$84 sps:$4 sm:$0xff]  }
 0x31c   :  { %12383 = vmatpush1.bf16.msra.mxu1 %v19515_v55  ;;  %12138 = vmatprep.subr.bf16.mxu0 %v19520_v51  ;;  %v19583_v55 = vld [vmem:[#allocation7 + $0x20ec] ss:$84 sps:$4 sm:$0xff]   ;;  %v19581_v51 = vld [vmem:[#allocation7 + $0x20e8] ss:$84 sps:$4 sm:$0xff]  }
 0x31d   :  { %12384 = vmatprep.subr.bf16.mxu1 %v19523_v49  ;;  %v19584_v49 = vld [vmem:[#allocation7 + $0x2188] ss:$84 sps:$4 sm:$0xff]  }
 0x31f   :  { %12139 = vmatpush1.bf16.msra.mxu0 %v19518_v57  ;;  %v19586_v57 = vld [vmem:[#allocation7 + $0x218c] ss:$84 sps:$4 sm:$0xff]  }
 0x320   :  { %12385 = vmatpush1.bf16.msra.mxu1 %v19521_v58  ;;  %12140 = vmatprep.subr.bf16.mxu0 %v19526_v59  ;;  %v19589_v58 = vld [vmem:[#allocation7 + $0x2194] ss:$84 sps:$4 sm:$0xff]   ;;  %v19587_v59 = vld [vmem:[#allocation7 + $0x2190] ss:$84 sps:$4 sm:$0xff]  }
 0x321   :  { %12386 = vmatprep.subr.bf16.mxu1 %v19529_v33  ;;  %v19590_v33 = vld [vmem:[#allocation7 + $0x2230] ss:$84 sps:$4 sm:$0xff]  }
 0x323   :  { %12141 = vmatpush1.bf16.msra.mxu0 %v19524_v61  ;;  %v19592_v61 = vld [vmem:[#allocation7 + $0x2234] ss:$84 sps:$4 sm:$0xff]  }
 0x324   :  { %12387 = vmatpush1.bf16.msra.mxu1 %v19527_v62  ;;  %12142 = vmatprep.subr.bf16.mxu0 %v19532_v11  ;;  %v19595_v62 = vld [vmem:[#allocation7 + $0x223c] ss:$84 sps:$4 sm:$0xff]   ;;  %v19593_v11 = vld [vmem:[#allocation7 + $0x2238] ss:$84 sps:$4 sm:$0xff]  }
 0x325   :  { %12388 = vmatprep.subr.bf16.mxu1 %v19535_v6  ;;  %v19601_v6 = vld [vmem:[#allocation7 + $0x22e4] ss:$84 sps:$4 sm:$0xff]  }
 0x327   :  { %12143 = vmatpush1.bf16.msra.mxu0 %v19530_v5  ;;  %v19598_v5 = vld [vmem:[#allocation7 + $0x22dc] ss:$84 sps:$4 sm:$0xff]  }
 0x328   :  { %12389 = vmatpush1.bf16.msra.mxu1 %v19533_v7  ;;  %12144 = vmatprep.subr.bf16.mxu0 %v19538_v8  ;;  %v19596_v7 = vld [vmem:[#allocation7 + $0x22d8] ss:$84 sps:$4 sm:$0xff]   ;;  %v19599_v8 = vld [vmem:[#allocation7 + $0x22e0] ss:$84 sps:$4 sm:$0xff]  }
 0x329   :  { %12390 = vmatprep.subr.bf16.mxu1 %v19541_v14 }
 0x32b   :  { %12145 = vmatpush1.bf16.msra.mxu0 %v19536_v13  ;;  %v19604_v13 = vld [vmem:[#allocation7 + $0x2384] ss:$84 sps:$4 sm:$0xff]  }
 0x32c   :  { %12391 = vmatpush1.bf16.msra.mxu1 %v19539_v15  ;;  %12146 = vmatprep.subr.bf16.mxu0 %v19544_v16  ;;  %v19607_v15 = vld [vmem:[#allocation7 + $0x238c] ss:$84 sps:$4 sm:$0xff]  }
 0x32d   :  { %12392 = vmatprep.subr.bf16.mxu1 %v19547_v19  ;;  %v19602_v19 = vld [vmem:[#allocation7 + $0x2380] ss:$84 sps:$4 sm:$0xff]  }
 0x32f   :  { %12147 = vmatpush1.bf16.msra.mxu0 %v19542_v18 }
 0x330   :  { %12393 = vmatpush1.bf16.msra.mxu1 %v19545_v20  ;;  %12148 = vmatprep.subr.bf16.mxu0 %v19550_v21  ;;  %v19605_v20 = vld [vmem:[#allocation7 + $0x2388] ss:$84 sps:$4 sm:$0xff]  }
 0x331   :  { %12394 = vmatprep.subr.bf16.mxu1 %v19553_v23 }
 0x333   :  { %12149 = vmatpush1.bf16.msra.mxu0 %v19548_v22 }
 0x334   :  { %12395 = vmatpush1.bf16.msra.mxu1 %v19551_v25  ;;  %12150 = vmatprep.subr.bf16.mxu0 %v19556_v26  ;;  %v19610_v26 = vld [vmem:[#allocation7 + $0x242c] ss:$84 sps:$4 sm:$0xff]  }
 0x335   :  { %12396 = vmatprep.subr.bf16.mxu1 %v19559_v28  ;;  %v19613_v28 = vld [vmem:[#allocation7 + $0x2434] ss:$84 sps:$4 sm:$0xff]  }
 0x337   :  { %12151 = vmatpush1.bf16.msra.mxu0 %v19554_v27 }
 0x338   :  { %12397 = vmatpush1.bf16.msra.mxu1 %v19557_v29  ;;  %12152 = vmatprep.subr.bf16.mxu0 %v19562_v34  ;;  %v19608_v29 = vld [vmem:[#allocation7 + $0x2428] ss:$84 sps:$4 sm:$0xff]   ;;  %v19611_v34 = vld [vmem:[#allocation7 + $0x2430] ss:$84 sps:$4 sm:$0xff]  }
 0x339   :  { %12398 = vmatprep.subr.bf16.mxu1 %v19565_v32  ;;  %v19614_v32 = vld [vmem:[#allocation7 + $0x24d0] ss:$84 sps:$4 sm:$0xff]  }
 0x33b   :  { %12153 = vmatpush1.bf16.msra.mxu0 %v19560_v35  ;;  %v19616_v35 = vld [vmem:[#allocation7 + $0x24d4] ss:$84 sps:$4 sm:$0xff]  }
 0x33c   :  { %12399 = vmatpush1.bf16.msra.mxu1 %v19563_v37  ;;  %12163 = vmatprep.subr.bf16.mxu0 %v19568_v38  ;;  %v19619_v37 = vld [vmem:[#allocation7 + $0x24dc] ss:$84 sps:$4 sm:$0xff]   ;;  %v19617_v38 = vld [vmem:[#allocation7 + $0x24d8] ss:$84 sps:$4 sm:$0xff]  }
 0x33d   :  { %12409 = vmatprep.subr.bf16.mxu1 %v19571_v40  ;;  %v19620_v40 = vld [vmem:[#allocation7 + $0x2578] ss:$84 sps:$4 sm:$0xff]  }
 0x33e   :  { %12155 = vmatmul.mubr.bf16.vlgmr.msra.gmra.mrb[20].mxu0 %v21990_v36 }
 0x33f   :  { %12401 = vmatmul.mubr.bf16.vlgmr.msra.gmra.mrb[12].mxu1 %v21990_v36  ;;  %12164 = vmatpush1.bf16.msra.mxu0 %v19566_v53  ;;  %v19622_v53 = vld [vmem:[#allocation7 + $0x257c] ss:$84 sps:$4 sm:$0xff]  }
 0x340   :  { %12195 = vmatprep.mubr.bf16.mxu0 %v21992_v39  ;;  %12410 = vmatpush1.bf16.msra.mxu1 %v19569_v41  ;;  %v19625_v41 = vld [vmem:[#allocation7 + $0x2584] ss:$84 sps:$4 sm:$0xff]  }
 0x341   :  { %12441 = vmatprep.mubr.bf16.mxu1 %v21992_v39  ;;  %12165 = vmatprep.subr.bf16.mxu0 %v19574_v42  ;;  %v19623_v42 = vld [vmem:[#allocation7 + $0x2580] ss:$84 sps:$4 sm:$0xff]  }
 0x342   :  { %12411 = vmatprep.subr.bf16.mxu1 %v19577_v12  ;;  %v19628_v12 = vld [vmem:[#allocation7 + $0x2624] ss:$84 sps:$4 sm:$0xff]  }
 0x343   :  { %12166 = vmatpush1.bf16.msra.mxu0 %v19572_v44  ;;  %v19626_v44 = vld [vmem:[#allocation7 + $0x2620] ss:$84 sps:$4 sm:$0xff]  }
 0x344   :  { %12412 = vmatpush1.bf16.msra.mxu1 %v19575_v45  ;;  %12167 = vmatprep.subr.bf16.mxu0 %v19580_v47  ;;  %v19631_v45 = vld [vmem:[#allocation7 + $0x262c] ss:$84 sps:$4 sm:$0xff]   ;;  %v19629_v47 = vld [vmem:[#allocation7 + $0x2628] ss:$84 sps:$4 sm:$0xff]  }
 0x345   :  { %12413 = vmatprep.subr.bf16.mxu1 %v19583_v55  ;;  %v19632_v55 = vld [vmem:[#allocation7 + $0x26c8] ss:$84 sps:$4 sm:$0xff]  }
 0x347   :  { %12168 = vmatpush1.bf16.msra.mxu0 %v19578_v54  ;;  %v19634_v54 = vld [vmem:[#allocation7 + $0x26cc] ss:$84 sps:$4 sm:$0xff]  }
 0x348   :  { %12414 = vmatpush1.bf16.msra.mxu1 %v19581_v51  ;;  %12169 = vmatprep.subr.bf16.mxu0 %v19586_v57  ;;  %v19637_v51 = vld [vmem:[#allocation7 + $0x26d4] ss:$84 sps:$4 sm:$0xff]   ;;  %v19635_v57 = vld [vmem:[#allocation7 + $0x26d0] ss:$84 sps:$4 sm:$0xff]  }
 0x349   :  { %12415 = vmatprep.subr.bf16.mxu1 %v19589_v58  ;;  %v19638_v58 = vld [vmem:[#allocation7 + $0x2770] ss:$84 sps:$4 sm:$0xff]  }
 0x34b   :  { %12170 = vmatpush1.bf16.msra.mxu0 %v19584_v49  ;;  %v19640_v49 = vld [vmem:[#allocation7 + $0x2774] ss:$84 sps:$4 sm:$0xff]  }
 0x34c   :  { %12416 = vmatpush1.bf16.msra.mxu1 %v19587_v59  ;;  %12171 = vmatprep.subr.bf16.mxu0 %v19592_v61  ;;  %v19643_v59 = vld [vmem:[#allocation7 + $0x277c] ss:$84 sps:$4 sm:$0xff]   ;;  %v19641_v61 = vld [vmem:[#allocation7 + $0x2778] ss:$84 sps:$4 sm:$0xff]  }
 0x34d   :  { %12417 = vmatprep.subr.bf16.mxu1 %v19595_v62  ;;  %v19644_v62 = vld [vmem:[#allocation7 + $0x2818] ss:$84 sps:$4 sm:$0xff]  }
 0x34f   :  { %12172 = vmatpush1.bf16.msra.mxu0 %v19590_v33  ;;  %v19646_v33 = vld [vmem:[#allocation7 + $0x281c] ss:$84 sps:$4 sm:$0xff]  }
 0x350   :  { %12418 = vmatpush1.bf16.msra.mxu1 %v19593_v11  ;;  %12173 = vmatprep.subr.bf16.mxu0 %v19598_v5  ;;  %v19649_v11 = vld [vmem:[#allocation7 + $0x2824] ss:$84 sps:$4 sm:$0xff]   ;;  %v19647_v5 = vld [vmem:[#allocation7 + $0x2820] ss:$84 sps:$4 sm:$0xff]  }
 0x351   :  { %v22047_v14 = vpop.f32.mrb[16].mxu0  ;;  %12419 = vmatprep.subr.bf16.mxu1 %v19601_v6  ;;  %v19652_v6 = vld [vmem:[#allocation7 + $0x28c4] ss:$84 sps:$4 sm:$0xff]  }
 0x352   :  { %v22049_v16 = vpop.f32.mrb[8].mxu1  ;;  %v22051_v18 = vpop.f32.mrb[17].mxu0 }
 0x353   :  { %v22053_v21 = vpop.f32.mrb[9].mxu1  ;;  %v11791_v22 = vpop.f32.mrb[18].mxu0  ;;  %12174 = vmatpush1.bf16.msra.mxu0 %v19596_v7  ;;  %v19650_v7 = vld [vmem:[#allocation7 + $0x28c0] ss:$84 sps:$4 sm:$0xff]  }
 0x354   :  { %v12037_v23 = vpop.f32.mrb[10].mxu1  ;;  %12420 = vmatpush1.bf16.msra.mxu1 %v19599_v8  ;;  %v11792_v25 = vpop.f32.mrb[19].mxu0  ;;  %12175 = vmatprep.subr.bf16.mxu0 %v19604_v13  ;;  %v19655_v8 = vld [vmem:[#allocation7 + $0x28cc] ss:$84 sps:$4 sm:$0xff]   ;;  %v19653_v13 = vld [vmem:[#allocation7 + $0x28c8] ss:$84 sps:$4 sm:$0xff]  }
 0x355   :  { %v12038_v27 = vpop.f32.mrb[11].mxu1  ;;  %12421 = vmatprep.subr.bf16.mxu1 %v19607_v15  ;;  %v19658_v15 = vld [vmem:[#allocation7 + $0x296c] ss:$84 sps:$4 sm:$0xff]   ;;  %v19659_v22 = vld [vmem:[#allocation7 + $0x2970] ss:$84 sps:$4 sm:$0xff]  }
 0x356   :  { %v19664_v23 = vld [vmem:[#allocation7 + $0x2a14] ss:$84 sps:$4 sm:$0xff]   ;;  %v19662_v25 = vld [vmem:[#allocation7 + $0x2a10] ss:$84 sps:$4 sm:$0xff]   ;;  %v19665_v27 = vld [vmem:[#allocation7 + $0x2a18] ss:$84 sps:$4 sm:$0xff]  }
 0x357   :  { %12176 = vmatpush1.bf16.msra.mxu0 %v19602_v19  ;;  %v19656_v19 = vld [vmem:[#allocation7 + $0x2968] ss:$84 sps:$4 sm:$0xff]  }
 0x358   :  { %12422 = vmatpush1.bf16.msra.mxu1 %v19605_v20  ;;  %12177 = vmatprep.subr.bf16.mxu0 %v19610_v26  ;;  %v19661_v20 = vld [vmem:[#allocation7 + $0x2974] ss:$84 sps:$4 sm:$0xff]   ;;  %v19667_v26 = vld [vmem:[#allocation7 + $0x2a1c] ss:$84 sps:$4 sm:$0xff]  }
 0x359   :  { %12423 = vmatprep.subr.bf16.mxu1 %v19613_v28  ;;  %v19670_v28 = vld [vmem:[#allocation7 + $0x2abc] ss:$84 sps:$4 sm:$0xff]  }
 0x35b   :  { %12178 = vmatpush1.bf16.msra.mxu0 %v19608_v29  ;;  %v19668_v29 = vld [vmem:[#allocation7 + $0x2ab8] ss:$84 sps:$4 sm:$0xff]  }
 0x35c   :  { %12424 = vmatpush1.bf16.msra.mxu1 %v19611_v34  ;;  %12179 = vmatprep.subr.bf16.mxu0 %v19616_v35  ;;  %v19673_v34 = vld [vmem:[#allocation7 + $0x2ac4] ss:$84 sps:$4 sm:$0xff]   ;;  %v19671_v35 = vld [vmem:[#allocation7 + $0x2ac0] ss:$84 sps:$4 sm:$0xff]  }
 0x35d   :  { %12425 = vmatprep.subr.bf16.mxu1 %v19619_v37  ;;  %v19674_v37 = vld [vmem:[#allocation7 + $0x2b60] ss:$84 sps:$4 sm:$0xff]  }
 0x35f   :  { %12180 = vmatpush1.bf16.msra.mxu0 %v19614_v32  ;;  %v19676_v32 = vld [vmem:[#allocation7 + $0x2b64] ss:$84 sps:$4 sm:$0xff]  }
 0x360   :  { %12426 = vmatpush1.bf16.msra.mxu1 %v19617_v38  ;;  %12181 = vmatprep.subr.bf16.mxu0 %v19622_v53  ;;  %v19679_v38 = vld [vmem:[#allocation7 + $0x2b6c] ss:$84 sps:$4 sm:$0xff]   ;;  %v19677_v53 = vld [vmem:[#allocation7 + $0x2b68] ss:$84 sps:$4 sm:$0xff]  }
 0x361   :  { %12427 = vmatprep.subr.bf16.mxu1 %v19625_v41  ;;  %v19680_v41 = vld [vmem:[#allocation7 + $0x2c08] ss:$84 sps:$4 sm:$0xff]  }
 0x363   :  { %12182 = vmatpush1.bf16.msra.mxu0 %v19620_v40  ;;  %v19682_v40 = vld [vmem:[#allocation7 + $0x2c0c] ss:$84 sps:$4 sm:$0xff]  }
 0x364   :  { %12428 = vmatpush1.bf16.msra.mxu1 %v19623_v42  ;;  %12183 = vmatprep.subr.bf16.mxu0 %v19628_v12  ;;  %v19685_v42 = vld [vmem:[#allocation7 + $0x2c14] ss:$84 sps:$4 sm:$0xff]   ;;  %v19683_v12 = vld [vmem:[#allocation7 + $0x2c10] ss:$84 sps:$4 sm:$0xff]  }
 0x365   :  { %12429 = vmatprep.subr.bf16.mxu1 %v19631_v45  ;;  %v19686_v45 = vld [vmem:[#allocation7 + $0x2cb0] ss:$84 sps:$4 sm:$0xff]  }
 0x367   :  { %12184 = vmatpush1.bf16.msra.mxu0 %v19626_v44  ;;  %v19688_v44 = vld [vmem:[#allocation7 + $0x2cb4] ss:$84 sps:$4 sm:$0xff]  }
 0x368   :  { %12430 = vmatpush1.bf16.msra.mxu1 %v19629_v47  ;;  %12185 = vmatprep.subr.bf16.mxu0 %v19634_v54  ;;  %v19691_v47 = vld [vmem:[#allocation7 + $0x2cbc] ss:$84 sps:$4 sm:$0xff]   ;;  %v19689_v54 = vld [vmem:[#allocation7 + $0x2cb8] ss:$84 sps:$4 sm:$0xff]  }
 0x369   :  { %12431 = vmatprep.subr.bf16.mxu1 %v19637_v51  ;;  %v19697_v51 = vld [vmem:[#allocation7 + $0x2d64] ss:$84 sps:$4 sm:$0xff]  }
 0x36b   :  { %12186 = vmatpush1.bf16.msra.mxu0 %v19632_v55  ;;  %v19694_v55 = vld [vmem:[#allocation7 + $0x2d5c] ss:$84 sps:$4 sm:$0xff]  }
 0x36c   :  { %12432 = vmatpush1.bf16.msra.mxu1 %v19635_v57  ;;  %12187 = vmatprep.subr.bf16.mxu0 %v19640_v49  ;;  %v19692_v57 = vld [vmem:[#allocation7 + $0x2d58] ss:$84 sps:$4 sm:$0xff]   ;;  %v19695_v49 = vld [vmem:[#allocation7 + $0x2d60] ss:$84 sps:$4 sm:$0xff]  }
 0x36d   :  { %12433 = vmatprep.subr.bf16.mxu1 %v19643_v59  ;;  %v19703_v59 = vld [vmem:[#allocation7 + $0x2e0c] ss:$84 sps:$4 sm:$0xff]  }
 0x36f   :  { %12188 = vmatpush1.bf16.msra.mxu0 %v19638_v58  ;;  %v19700_v58 = vld [vmem:[#allocation7 + $0x2e04] ss:$84 sps:$4 sm:$0xff]  }
 0x370   :  { %12434 = vmatpush1.bf16.msra.mxu1 %v19641_v61  ;;  %12189 = vmatprep.subr.bf16.mxu0 %v19646_v33  ;;  %v19698_v61 = vld [vmem:[#allocation7 + $0x2e00] ss:$84 sps:$4 sm:$0xff]   ;;  %v19701_v33 = vld [vmem:[#allocation7 + $0x2e08] ss:$84 sps:$4 sm:$0xff]  }
 0x371   :  { %12435 = vmatprep.subr.bf16.mxu1 %v19649_v11  ;;  %v19704_v11 = vld [vmem:[#allocation7 + $0x2ea8] ss:$84 sps:$4 sm:$0xff]  }
 0x373   :  { %12190 = vmatpush1.bf16.msra.mxu0 %v19644_v62  ;;  %v19706_v62 = vld [vmem:[#allocation7 + $0x2eac] ss:$84 sps:$4 sm:$0xff]  }
 0x374   :  { %12436 = vmatpush1.bf16.msra.mxu1 %v19647_v5  ;;  %12191 = vmatprep.subr.bf16.mxu0 %v19652_v6  ;;  %v19709_v5 = vld [vmem:[#allocation7 + $0x2eb4] ss:$84 sps:$4 sm:$0xff]   ;;  %v19707_v6 = vld [vmem:[#allocation7 + $0x2eb0] ss:$84 sps:$4 sm:$0xff]  }
 0x375   :  { %12437 = vmatprep.subr.bf16.mxu1 %v19655_v8  ;;  %v19710_v8 = vld [vmem:[#allocation7 + $0x2f50] ss:$84 sps:$4 sm:$0xff]  }
 0x377   :  { %12192 = vmatpush1.bf16.msra.mxu0 %v19650_v7  ;;  %v19712_v7 = vld [vmem:[#allocation7 + $0x2f54] ss:$84 sps:$4 sm:$0xff]  }
 0x378   :  { %12438 = vmatpush1.bf16.msra.mxu1 %v19653_v13  ;;  %12193 = vmatprep.subr.bf16.mxu0 %v19658_v15  ;;  %v19715_v13 = vld [vmem:[#allocation7 + $0x2f5c] ss:$84 sps:$4 sm:$0xff]   ;;  %v19713_v15 = vld [vmem:[#allocation7 + $0x2f58] ss:$84 sps:$4 sm:$0xff]  }
 0x379   :  { %12439 = vmatprep.subr.bf16.mxu1 %v19661_v20  ;;  %v19716_v20 = vld [vmem:[#allocation7 + $0x2ff8] ss:$84 sps:$4 sm:$0xff]  }
 0x37b   :  { %12194 = vmatpush1.bf16.msra.mxu0 %v19656_v19  ;;  %v19718_v19 = vld [vmem:[#allocation7 + $0x2ffc] ss:$84 sps:$4 sm:$0xff]  }
 0x37c   :  { %12440 = vmatpush1.bf16.msra.mxu1 %v19659_v22  ;;  %12204 = vmatprep.subr.bf16.mxu0 %v19664_v23  ;;  %v19721_v22 = vld [vmem:[#allocation7 + $0x3004] ss:$84 sps:$4 sm:$0xff]   ;;  %v19719_v23 = vld [vmem:[#allocation7 + $0x3000] ss:$84 sps:$4 sm:$0xff]  }
 0x37d   :  { %12450 = vmatprep.subr.bf16.mxu1 %v19667_v26  ;;  %v19722_v26 = vld [vmem:[#allocation7 + $0x30a0] ss:$84 sps:$4 sm:$0xff]  }
 0x37e   :  { %12196 = vmatmul.mubr.bf16.vlgmr.msra.gmra.mrb[20].mxu0 %v22009_v46 }
 0x37f   :  { %12442 = vmatmul.mubr.bf16.vlgmr.msra.gmra.mrb[12].mxu1 %v22009_v46  ;;  %12205 = vmatpush1.bf16.msra.mxu0 %v19662_v25  ;;  %v19724_v25 = vld [vmem:[#allocation7 + $0x30a4] ss:$84 sps:$4 sm:$0xff]  }
 0x380   :  { %12236 = vmatprep.mubr.bf16.mxu0 %v22011_v56  ;;  %12451 = vmatpush1.bf16.msra.mxu1 %v19665_v27  ;;  %v19727_v27 = vld [vmem:[#allocation7 + $0x30ac] ss:$84 sps:$4 sm:$0xff]  }
 0x381   :  { %12482 = vmatprep.mubr.bf16.mxu1 %v22011_v56  ;;  %12206 = vmatprep.subr.bf16.mxu0 %v19670_v28  ;;  %v19725_v28 = vld [vmem:[#allocation7 + $0x30a8] ss:$84 sps:$4 sm:$0xff]  }
 0x382   :  { %12452 = vmatprep.subr.bf16.mxu1 %v19673_v34  ;;  %v19728_v34 = vld [vmem:[#allocation7 + $0x3148] ss:$84 sps:$4 sm:$0xff]  }
 0x383   :  { %12207 = vmatpush1.bf16.msra.mxu0 %v19668_v29  ;;  %v19730_v29 = vld [vmem:[#allocation7 + $0x314c] ss:$84 sps:$4 sm:$0xff]  }
 0x384   :  { %12453 = vmatpush1.bf16.msra.mxu1 %v19671_v35  ;;  %12208 = vmatprep.subr.bf16.mxu0 %v19676_v32  ;;  %v19733_v35 = vld [vmem:[#allocation7 + $0x3154] ss:$84 sps:$4 sm:$0xff]   ;;  %v19731_v32 = vld [vmem:[#allocation7 + $0x3150] ss:$84 sps:$4 sm:$0xff]  }
 0x385   :  { %12454 = vmatprep.subr.bf16.mxu1 %v19679_v38  ;;  %v19734_v38 = vld [vmem:[#allocation7 + $0x31f0] ss:$84 sps:$4 sm:$0xff]  }
 0x387   :  { %12209 = vmatpush1.bf16.msra.mxu0 %v19674_v37  ;;  %v19736_v37 = vld [vmem:[#allocation7 + $0x31f4] ss:$84 sps:$4 sm:$0xff]  }
 0x388   :  { %12455 = vmatpush1.bf16.msra.mxu1 %v19677_v53  ;;  %12210 = vmatprep.subr.bf16.mxu0 %v19682_v40  ;;  %v19739_v53 = vld [vmem:[#allocation7 + $0x31fc] ss:$84 sps:$4 sm:$0xff]   ;;  %v19737_v40 = vld [vmem:[#allocation7 + $0x31f8] ss:$84 sps:$4 sm:$0xff]  }
 0x389   :  { %12456 = vmatprep.subr.bf16.mxu1 %v19685_v42  ;;  %v19740_v42 = vld [vmem:[#allocation7 + $0x3298] ss:$84 sps:$4 sm:$0xff]  }
 0x38b   :  { %12211 = vmatpush1.bf16.msra.mxu0 %v19680_v41  ;;  %v19742_v41 = vld [vmem:[#allocation7 + $0x329c] ss:$84 sps:$4 sm:$0xff]  }
 0x38c   :  { %12457 = vmatpush1.bf16.msra.mxu1 %v19683_v12  ;;  %12212 = vmatprep.subr.bf16.mxu0 %v19688_v44  ;;  %v19745_v12 = vld [vmem:[#allocation7 + $0x32a4] ss:$84 sps:$4 sm:$0xff]   ;;  %v19743_v44 = vld [vmem:[#allocation7 + $0x32a0] ss:$84 sps:$4 sm:$0xff]  }
 0x38d   :  { %12458 = vmatprep.subr.bf16.mxu1 %v19691_v47  ;;  %v19746_v47 = vld [vmem:[#allocation7 + $0x3340] ss:$84 sps:$4 sm:$0xff]  }
 0x38f   :  { %12213 = vmatpush1.bf16.msra.mxu0 %v19686_v45  ;;  %v19748_v45 = vld [vmem:[#allocation7 + $0x3344] ss:$84 sps:$4 sm:$0xff]  }
 0x390   :  { %12459 = vmatpush1.bf16.msra.mxu1 %v19689_v54  ;;  %12214 = vmatprep.subr.bf16.mxu0 %v19694_v55  ;;  %v19751_v54 = vld [vmem:[#allocation7 + $0x334c] ss:$84 sps:$4 sm:$0xff]   ;;  %v19749_v55 = vld [vmem:[#allocation7 + $0x3348] ss:$84 sps:$4 sm:$0xff]  }
 0x391   :  { %12460 = vmatprep.subr.bf16.mxu1 %v19697_v51  ;;  %v19754_v51 = vld [vmem:[#allocation7 + $0x33ec] ss:$84 sps:$4 sm:$0xff]  }
 0x393   :  { %12215 = vmatpush1.bf16.msra.mxu0 %v19692_v57  ;;  %v19752_v57 = vld [vmem:[#allocation7 + $0x33e8] ss:$84 sps:$4 sm:$0xff]  }
 0x394   :  { %12461 = vmatpush1.bf16.msra.mxu1 %v19695_v49  ;;  %12216 = vmatprep.subr.bf16.mxu0 %v19700_v58  ;;  %v19757_v49 = vld [vmem:[#allocation7 + $0x33f4] ss:$84 sps:$4 sm:$0xff]   ;;  %v19755_v58 = vld [vmem:[#allocation7 + $0x33f0] ss:$84 sps:$4 sm:$0xff]  }
 0x395   :  { %12462 = vmatprep.subr.bf16.mxu1 %v19703_v59  ;;  %v19760_v59 = vld [vmem:[#allocation7 + $0x3494] ss:$84 sps:$4 sm:$0xff]  }
 0x397   :  { %12217 = vmatpush1.bf16.msra.mxu0 %v19698_v61  ;;  %v19758_v61 = vld [vmem:[#allocation7 + $0x3490] ss:$84 sps:$4 sm:$0xff]  }
 0x398   :  { %12463 = vmatpush1.bf16.msra.mxu1 %v19701_v33  ;;  %12218 = vmatprep.subr.bf16.mxu0 %v19706_v62  ;;  %v19763_v33 = vld [vmem:[#allocation7 + $0x349c] ss:$84 sps:$4 sm:$0xff]   ;;  %v19761_v62 = vld [vmem:[#allocation7 + $0x3498] ss:$84 sps:$4 sm:$0xff]  }
 0x399   :  { %12464 = vmatprep.subr.bf16.mxu1 %v19709_v5  ;;  %v19764_v5 = vld [vmem:[#allocation7 + $0x3538] ss:$84 sps:$4 sm:$0xff]  }
 0x39b   :  { %12219 = vmatpush1.bf16.msra.mxu0 %v19704_v11  ;;  %v19766_v11 = vld [vmem:[#allocation7 + $0x353c] ss:$84 sps:$4 sm:$0xff]  }
 0x39c   :  { %12465 = vmatpush1.bf16.msra.mxu1 %v19707_v6  ;;  %12220 = vmatprep.subr.bf16.mxu0 %v19712_v7  ;;  %v19769_v6 = vld [vmem:[#allocation7 + $0x3544] ss:$84 sps:$4 sm:$0xff]   ;;  %v19767_v7 = vld [vmem:[#allocation7 + $0x3540] ss:$84 sps:$4 sm:$0xff]  }
 0x39d   :  { %12466 = vmatprep.subr.bf16.mxu1 %v19715_v13  ;;  %v19770_v13 = vld [vmem:[#allocation7 + $0x35e0] ss:$84 sps:$4 sm:$0xff]  }
 0x39f   :  { %12221 = vmatpush1.bf16.msra.mxu0 %v19710_v8  ;;  %v19772_v8 = vld [vmem:[#allocation7 + $0x35e4] ss:$84 sps:$4 sm:$0xff]  }
 0x3a0   :  { %12467 = vmatpush1.bf16.msra.mxu1 %v19713_v15  ;;  %12222 = vmatprep.subr.bf16.mxu0 %v19718_v19  ;;  %v19775_v15 = vld [vmem:[#allocation7 + $0x35ec] ss:$84 sps:$4 sm:$0xff]   ;;  %v19773_v19 = vld [vmem:[#allocation7 + $0x35e8] ss:$84 sps:$4 sm:$0xff]  }
 0x3a1   :  { %12468 = vmatprep.subr.bf16.mxu1 %v19721_v22  ;;  %v19776_v22 = vld [vmem:[#allocation7 + $0x3688] ss:$84 sps:$4 sm:$0xff]  }
 0x3a3   :  { %12223 = vmatpush1.bf16.msra.mxu0 %v19716_v20  ;;  %v19778_v20 = vld [vmem:[#allocation7 + $0x368c] ss:$84 sps:$4 sm:$0xff]  }
 0x3a4   :  { %12469 = vmatpush1.bf16.msra.mxu1 %v19719_v23  ;;  %12224 = vmatprep.subr.bf16.mxu0 %v19724_v25  ;;  %v19781_v23 = vld [vmem:[#allocation7 + $0x3694] ss:$84 sps:$4 sm:$0xff]   ;;  %v19779_v25 = vld [vmem:[#allocation7 + $0x3690] ss:$84 sps:$4 sm:$0xff]  }
 0x3a5   :  { %12470 = vmatprep.subr.bf16.mxu1 %v19727_v27  ;;  %v19787_v27 = vld [vmem:[#allocation7 + $0x2c] ss:$84 sps:$4 sm:$0xff]  }
 0x3a7   :  { %12225 = vmatpush1.bf16.msra.mxu0 %v19722_v26  ;;  %v19784_v26 = vld [vmem:[#allocation7 + $0x24] ss:$84 sps:$4 sm:$0xff]  }
 0x3a8   :  { %12471 = vmatpush1.bf16.msra.mxu1 %v19725_v28  ;;  %12226 = vmatprep.subr.bf16.mxu0 %v19730_v29  ;;  %v19782_v28 = vld [vmem:[#allocation7 + $0x20] ss:$84 sps:$4 sm:$0xff]   ;;  %v19785_v29 = vld [vmem:[#allocation7 + $0x28] ss:$84 sps:$4 sm:$0xff]  }
 0x3a9   :  { %12472 = vmatprep.subr.bf16.mxu1 %v19733_v35  ;;  %v19788_v35 = vld [vmem:[#allocation7 + $0xc8] ss:$84 sps:$4 sm:$0xff]  }
 0x3ab   :  { %12227 = vmatpush1.bf16.msra.mxu0 %v19728_v34  ;;  %v19790_v34 = vld [vmem:[#allocation7 + $0xcc] ss:$84 sps:$4 sm:$0xff]  }
 0x3ac   :  { %12473 = vmatpush1.bf16.msra.mxu1 %v19731_v32  ;;  %12228 = vmatprep.subr.bf16.mxu0 %v19736_v37  ;;  %v19791_v32 = vld [vmem:[#allocation7 + $0xd0] ss:$84 sps:$4 sm:$0xff]   ;;  %v19793_v37 = vld [vmem:[#allocation7 + $0xd4] ss:$84 sps:$4 sm:$0xff]  }
 0x3ad   :  { %12474 = vmatprep.subr.bf16.mxu1 %v19739_v53  ;;  %v19799_v53 = vld [vmem:[#allocation7 + $0x17c] ss:$84 sps:$4 sm:$0xff]  }
 0x3af   :  { %12229 = vmatpush1.bf16.msra.mxu0 %v19734_v38  ;;  %v19796_v38 = vld [vmem:[#allocation7 + $0x174] ss:$84 sps:$4 sm:$0xff]  }
 0x3b0   :  { %12475 = vmatpush1.bf16.msra.mxu1 %v19737_v40  ;;  %12230 = vmatprep.subr.bf16.mxu0 %v19742_v41  ;;  %v19794_v40 = vld [vmem:[#allocation7 + $0x170] ss:$84 sps:$4 sm:$0xff]   ;;  %v19797_v41 = vld [vmem:[#allocation7 + $0x178] ss:$84 sps:$4 sm:$0xff]  }
 0x3b1   :  { %12476 = vmatprep.subr.bf16.mxu1 %v19745_v12  ;;  %v19800_v12 = vld [vmem:[#allocation7 + $0x218] ss:$84 sps:$4 sm:$0xff]  }
 0x3b3   :  { %12231 = vmatpush1.bf16.msra.mxu0 %v19740_v42  ;;  %v19802_v42 = vld [vmem:[#allocation7 + $0x21c] ss:$84 sps:$4 sm:$0xff]  }
 0x3b4   :  { %12477 = vmatpush1.bf16.msra.mxu1 %v19743_v44  ;;  %12232 = vmatprep.subr.bf16.mxu0 %v19748_v45  ;;  %v19805_v44 = vld [vmem:[#allocation7 + $0x224] ss:$84 sps:$4 sm:$0xff]   ;;  %v19803_v45 = vld [vmem:[#allocation7 + $0x220] ss:$84 sps:$4 sm:$0xff]  }
 0x3b5   :  { %12478 = vmatprep.subr.bf16.mxu1 %v19751_v54  ;;  %v19806_v54 = vld [vmem:[#allocation7 + $0x2c0] ss:$84 sps:$4 sm:$0xff]  }
 0x3b7   :  { %12233 = vmatpush1.bf16.msra.mxu0 %v19746_v47  ;;  %v19808_v47 = vld [vmem:[#allocation7 + $0x2c4] ss:$84 sps:$4 sm:$0xff]  }
 0x3b8   :  { %12479 = vmatpush1.bf16.msra.mxu1 %v19749_v55  ;;  %12234 = vmatprep.subr.bf16.mxu0 %v19754_v51  ;;  %v19811_v55 = vld [vmem:[#allocation7 + $0x2cc] ss:$84 sps:$4 sm:$0xff]   ;;  %v19809_v51 = vld [vmem:[#allocation7 + $0x2c8] ss:$84 sps:$4 sm:$0xff]  }
 0x3b9   :  { %12480 = vmatprep.subr.bf16.mxu1 %v19757_v49  ;;  %v19812_v49 = vld [vmem:[#allocation7 + $0x368] ss:$84 sps:$4 sm:$0xff]  }
 0x3bb   :  { %12235 = vmatpush1.bf16.msra.mxu0 %v19752_v57  ;;  %v19814_v57 = vld [vmem:[#allocation7 + $0x36c] ss:$84 sps:$4 sm:$0xff]  }
 0x3bc   :  { %12481 = vmatpush1.bf16.msra.mxu1 %v19755_v58  ;;  %12245 = vmatprep.subr.bf16.mxu0 %v19760_v59  ;;  %v19817_v58 = vld [vmem:[#allocation7 + $0x374] ss:$84 sps:$4 sm:$0xff]   ;;  %v19815_v59 = vld [vmem:[#allocation7 + $0x370] ss:$84 sps:$4 sm:$0xff]  }
 0x3bd   :  { %12491 = vmatprep.subr.bf16.mxu1 %v19763_v33  ;;  %v19818_v33 = vld [vmem:[#allocation7 + $0x410] ss:$84 sps:$4 sm:$0xff]  }
 0x3be   :  { %12237 = vmatmul.mubr.bf16.vlgmr.msra.gmra.mrb[20].mxu0 %v22020_v48 }
 0x3bf   :  { %12483 = vmatmul.mubr.bf16.vlgmr.msra.gmra.mrb[12].mxu1 %v22020_v48  ;;  %12246 = vmatpush1.bf16.msra.mxu0 %v19758_v61  ;;  %v19820_v61 = vld [vmem:[#allocation7 + $0x414] ss:$84 sps:$4 sm:$0xff]  }
 0x3c0   :  { %12492 = vmatpush1.bf16.msra.mxu1 %v19761_v62  ;;  %12247 = vmatprep.subr.bf16.mxu0 %v19766_v11  ;;  %v19823_v62 = vld [vmem:[#allocation7 + $0x41c] ss:$84 sps:$4 sm:$0xff]   ;;  %v19821_v11 = vld [vmem:[#allocation7 + $0x418] ss:$84 sps:$4 sm:$0xff]  }
 0x3c1   :  { %12493 = vmatprep.subr.bf16.mxu1 %v19769_v6  ;;  %12277 = vmatprep.mubr.bf16.mxu0 %v21723_v1  ;;  %v19824_v6 = vld [vmem:[#allocation7 + $0x4b8] ss:$84 sps:$4 sm:$0xff]  }
 0x3c2   :  { %12523 = vmatprep.mubr.bf16.mxu1 %v21723_v1 }
 0x3c3   :  { %12248 = vmatpush1.bf16.msra.mxu0 %v19764_v5  ;;  %v19826_v5 = vld [vmem:[#allocation7 + $0x4bc] ss:$84 sps:$4 sm:$0xff]  }
 0x3c4   :  { %12494 = vmatpush1.bf16.msra.mxu1 %v19767_v7  ;;  %12249 = vmatprep.subr.bf16.mxu0 %v19772_v8  ;;  %v19829_v7 = vld [vmem:[#allocation7 + $0x4c4] ss:$84 sps:$4 sm:$0xff]   ;;  %v19827_v8 = vld [vmem:[#allocation7 + $0x4c0] ss:$84 sps:$4 sm:$0xff]  }
 0x3c5   :  { %12495 = vmatprep.subr.bf16.mxu1 %v19775_v15  ;;  %v19830_v15 = vld [vmem:[#allocation7 + $0x560] ss:$84 sps:$4 sm:$0xff]  }
 0x3c7   :  { %12250 = vmatpush1.bf16.msra.mxu0 %v19770_v13  ;;  %v19832_v13 = vld [vmem:[#allocation7 + $0x564] ss:$84 sps:$4 sm:$0xff]  }
 0x3c8   :  { %12496 = vmatpush1.bf16.msra.mxu1 %v19773_v19  ;;  %12251 = vmatprep.subr.bf16.mxu0 %v19778_v20  ;;  %v19835_v19 = vld [vmem:[#allocation7 + $0x56c] ss:$84 sps:$4 sm:$0xff]   ;;  %v19833_v20 = vld [vmem:[#allocation7 + $0x568] ss:$84 sps:$4 sm:$0xff]  }
 0x3c9   :  { %12497 = vmatprep.subr.bf16.mxu1 %v19781_v23  ;;  %v19836_v23 = vld [vmem:[#allocation7 + $0x608] ss:$84 sps:$4 sm:$0xff]  }
 0x3cb   :  { %12252 = vmatpush1.bf16.msra.mxu0 %v19776_v22  ;;  %v19838_v22 = vld [vmem:[#allocation7 + $0x60c] ss:$84 sps:$4 sm:$0xff]  }
 0x3cc   :  { %12498 = vmatpush1.bf16.msra.mxu1 %v19779_v25  ;;  %12532 = vmatprep.subr.bf16.mxu0 %v19784_v26  ;;  %v19841_v25 = vld [vmem:[#allocation7 + $0x614] ss:$84 sps:$4 sm:$0xff]   ;;  %v19839_v26 = vld [vmem:[#allocation7 + $0x610] ss:$84 sps:$4 sm:$0xff]  }
 0x3cd   :  { %12778 = vmatprep.subr.bf16.mxu1 %v19787_v27  ;;  %v19844_v27 = vld [vmem:[#allocation7 + $0x6b4] ss:$84 sps:$4 sm:$0xff]  }
 0x3ce   :  { %17920 = vmatmul.mubr.msk.bf16.vlgmr.msra.gmra.mrb[20].mxu0 %vm11544_vm3, %v22027_v17 }
 0x3cf   :  { %17921 = vmatmul.mubr.msk.bf16.vlgmr.msra.gmra.mrb[12].mxu1 %vm11544_vm3, %v22027_v17  ;;  %12533 = vmatpush1.bf16.msra.mxu0 %v19782_v28  ;;  %v19842_v28 = vld [vmem:[#allocation7 + $0x6b0] ss:$84 sps:$4 sm:$0xff]  }
 0x3d0   :  { %12564 = vmatprep.mubr.bf16.mxu0 %v21922_v2  ;;  %12779 = vmatpush1.bf16.msra.mxu1 %v19785_v29  ;;  %v19847_v29 = vld [vmem:[#allocation7 + $0x6bc] ss:$84 sps:$4 sm:$0xff]  }
 0x3d1   :  { %12810 = vmatprep.mubr.bf16.mxu1 %v21922_v2  ;;  %12534 = vmatprep.subr.bf16.mxu0 %v19790_v34  ;;  %v19845_v34 = vld [vmem:[#allocation7 + $0x6b8] ss:$84 sps:$4 sm:$0xff]  }
 0x3d2   :  { %12780 = vmatprep.subr.bf16.mxu1 %v19793_v37  ;;  %v19853_v37 = vld [vmem:[#allocation7 + $0x764] ss:$84 sps:$4 sm:$0xff]  }
 0x3d3   :  { %12535 = vmatpush1.bf16.msra.mxu0 %v19788_v35  ;;  %v19850_v35 = vld [vmem:[#allocation7 + $0x75c] ss:$84 sps:$4 sm:$0xff]  }
 0x3d4   :  { %12781 = vmatpush1.bf16.msra.mxu1 %v19791_v32  ;;  %12536 = vmatprep.subr.bf16.mxu0 %v19796_v38  ;;  %v19848_v32 = vld [vmem:[#allocation7 + $0x758] ss:$84 sps:$4 sm:$0xff]   ;;  %v19851_v38 = vld [vmem:[#allocation7 + $0x760] ss:$84 sps:$4 sm:$0xff]  }
 0x3d5   :  { %12782 = vmatprep.subr.bf16.mxu1 %v19799_v53  ;;  %v19856_v53 = vld [vmem:[#allocation7 + $0x804] ss:$84 sps:$4 sm:$0xff]  }
 0x3d7   :  { %12537 = vmatpush1.bf16.msra.mxu0 %v19794_v40  ;;  %v19854_v40 = vld [vmem:[#allocation7 + $0x800] ss:$84 sps:$4 sm:$0xff]  }
 0x3d8   :  { %12783 = vmatpush1.bf16.msra.mxu1 %v19797_v41  ;;  %12538 = vmatprep.subr.bf16.mxu0 %v19802_v42  ;;  %v19859_v41 = vld [vmem:[#allocation7 + $0x80c] ss:$84 sps:$4 sm:$0xff]   ;;  %v19857_v42 = vld [vmem:[#allocation7 + $0x808] ss:$84 sps:$4 sm:$0xff]  }
 0x3d9   :  { %12784 = vmatprep.subr.bf16.mxu1 %v19805_v44  ;;  %v19860_v44 = vld [vmem:[#allocation7 + $0x8a8] ss:$84 sps:$4 sm:$0xff]  }
 0x3db   :  { %12539 = vmatpush1.bf16.msra.mxu0 %v19800_v12  ;;  %v19862_v12 = vld [vmem:[#allocation7 + $0x8ac] ss:$84 sps:$4 sm:$0xff]  }
 0x3dc   :  { %12785 = vmatpush1.bf16.msra.mxu1 %v19803_v45  ;;  %12540 = vmatprep.subr.bf16.mxu0 %v19808_v47  ;;  %v19865_v45 = vld [vmem:[#allocation7 + $0x8b4] ss:$84 sps:$4 sm:$0xff]   ;;  %v19863_v47 = vld [vmem:[#allocation7 + $0x8b0] ss:$84 sps:$4 sm:$0xff]  }
 0x3dd   :  { %12786 = vmatprep.subr.bf16.mxu1 %v19811_v55  ;;  %v19866_v55 = vld [vmem:[#allocation7 + $0x950] ss:$84 sps:$4 sm:$0xff]  }
 0x3df   :  { %12541 = vmatpush1.bf16.msra.mxu0 %v19806_v54  ;;  %v19868_v54 = vld [vmem:[#allocation7 + $0x954] ss:$84 sps:$4 sm:$0xff]  }
 0x3e0   :  { %12787 = vmatpush1.bf16.msra.mxu1 %v19809_v51  ;;  %12542 = vmatprep.subr.bf16.mxu0 %v19814_v57  ;;  %v19871_v51 = vld [vmem:[#allocation7 + $0x95c] ss:$84 sps:$4 sm:$0xff]   ;;  %v19869_v57 = vld [vmem:[#allocation7 + $0x958] ss:$84 sps:$4 sm:$0xff]  }
 0x3e1   :  { %12788 = vmatprep.subr.bf16.mxu1 %v19817_v58  ;;  %v19872_v58 = vld [vmem:[#allocation7 + $0x9f8] ss:$84 sps:$4 sm:$0xff]  }
 0x3e3   :  { %12543 = vmatpush1.bf16.msra.mxu0 %v19812_v49  ;;  %v19874_v49 = vld [vmem:[#allocation7 + $0x9fc] ss:$84 sps:$4 sm:$0xff]  }
 0x3e4   :  { %12789 = vmatpush1.bf16.msra.mxu1 %v19815_v59  ;;  %12544 = vmatprep.subr.bf16.mxu0 %v19820_v61  ;;  %v19877_v59 = vld [vmem:[#allocation7 + $0xa04] ss:$84 sps:$4 sm:$0xff]   ;;  %v19875_v61 = vld [vmem:[#allocation7 + $0xa00] ss:$84 sps:$4 sm:$0xff]  }
 0x3e5   :  { %12790 = vmatprep.subr.bf16.mxu1 %v19823_v62  ;;  %v19878_v62 = vld [vmem:[#allocation7 + $0xaa0] ss:$84 sps:$4 sm:$0xff]  }
 0x3e7   :  { %12545 = vmatpush1.bf16.msra.mxu0 %v19818_v33  ;;  %v19880_v33 = vld [vmem:[#allocation7 + $0xaa4] ss:$84 sps:$4 sm:$0xff]  }
 0x3e8   :  { %12791 = vmatpush1.bf16.msra.mxu1 %v19821_v11  ;;  %12546 = vmatprep.subr.bf16.mxu0 %v19826_v5  ;;  %v19883_v11 = vld [vmem:[#allocation7 + $0xaac] ss:$84 sps:$4 sm:$0xff]   ;;  %v19881_v5 = vld [vmem:[#allocation7 + $0xaa8] ss:$84 sps:$4 sm:$0xff]  }
 0x3e9   :  { %12792 = vmatprep.subr.bf16.mxu1 %v19829_v7  ;;  %v19884_v7 = vld [vmem:[#allocation7 + $0xb48] ss:$84 sps:$4 sm:$0xff]  }
 0x3eb   :  { %12547 = vmatpush1.bf16.msra.mxu0 %v19824_v6  ;;  %v19886_v6 = vld [vmem:[#allocation7 + $0xb4c] ss:$84 sps:$4 sm:$0xff]  }
 0x3ec   :  { %12793 = vmatpush1.bf16.msra.mxu1 %v19827_v8  ;;  %12548 = vmatprep.subr.bf16.mxu0 %v19832_v13  ;;  %v19887_v8 = vld [vmem:[#allocation7 + $0xb50] ss:$84 sps:$4 sm:$0xff]   ;;  %v19889_v13 = vld [vmem:[#allocation7 + $0xb54] ss:$84 sps:$4 sm:$0xff]  }
 0x3ed   :  { %12794 = vmatprep.subr.bf16.mxu1 %v19835_v19  ;;  %v19895_v19 = vld [vmem:[#allocation7 + $0xbfc] ss:$84 sps:$4 sm:$0xff]  }
 0x3ef   :  { %12549 = vmatpush1.bf16.msra.mxu0 %v19830_v15  ;;  %v19892_v15 = vld [vmem:[#allocation7 + $0xbf4] ss:$84 sps:$4 sm:$0xff]  }
 0x3f0   :  { %12795 = vmatpush1.bf16.msra.mxu1 %v19833_v20  ;;  %12550 = vmatprep.subr.bf16.mxu0 %v19838_v22  ;;  %v19890_v20 = vld [vmem:[#allocation7 + $0xbf0] ss:$84 sps:$4 sm:$0xff]   ;;  %v19893_v22 = vld [vmem:[#allocation7 + $0xbf8] ss:$84 sps:$4 sm:$0xff]  }
 0x3f1   :  { %12796 = vmatprep.subr.bf16.mxu1 %v19841_v25  ;;  %v19896_v25 = vld [vmem:[#allocation7 + $0xc98] ss:$84 sps:$4 sm:$0xff]  }
 0x3f3   :  { %12551 = vmatpush1.bf16.msra.mxu0 %v19836_v23  ;;  %v19898_v23 = vld [vmem:[#allocation7 + $0xc9c] ss:$84 sps:$4 sm:$0xff]  }
 0x3f4   :  { %12797 = vmatpush1.bf16.msra.mxu1 %v19839_v26  ;;  %12552 = vmatprep.subr.bf16.mxu0 %v19844_v27  ;;  %v19901_v26 = vld [vmem:[#allocation7 + $0xca4] ss:$84 sps:$4 sm:$0xff]   ;;  %v19899_v27 = vld [vmem:[#allocation7 + $0xca0] ss:$84 sps:$4 sm:$0xff]  }
 0x3f5   :  { %12798 = vmatprep.subr.bf16.mxu1 %v19847_v29  ;;  %v19902_v29 = vld [vmem:[#allocation7 + $0xd40] ss:$84 sps:$4 sm:$0xff]  }
 0x3f7   :  { %12553 = vmatpush1.bf16.msra.mxu0 %v19842_v28  ;;  %v19904_v28 = vld [vmem:[#allocation7 + $0xd44] ss:$84 sps:$4 sm:$0xff]  }
 0x3f8   :  { %12799 = vmatpush1.bf16.msra.mxu1 %v19845_v34  ;;  %12554 = vmatprep.subr.bf16.mxu0 %v19850_v35  ;;  %v19907_v34 = vld [vmem:[#allocation7 + $0xd4c] ss:$84 sps:$4 sm:$0xff]   ;;  %v19905_v35 = vld [vmem:[#allocation7 + $0xd48] ss:$84 sps:$4 sm:$0xff]  }
 0x3f9   :  { %12800 = vmatprep.subr.bf16.mxu1 %v19853_v37  ;;  %v19908_v37 = vld [vmem:[#allocation7 + $0xde8] ss:$84 sps:$4 sm:$0xff]  }
 0x3fb   :  { %12555 = vmatpush1.bf16.msra.mxu0 %v19848_v32  ;;  %v19910_v32 = vld [vmem:[#allocation7 + $0xdec] ss:$84 sps:$4 sm:$0xff]  }
 0x3fc   :  { %12801 = vmatpush1.bf16.msra.mxu1 %v19851_v38  ;;  %12556 = vmatprep.subr.bf16.mxu0 %v19856_v53  ;;  %v19913_v38 = vld [vmem:[#allocation7 + $0xdf4] ss:$84 sps:$4 sm:$0xff]   ;;  %v19911_v53 = vld [vmem:[#allocation7 + $0xdf0] ss:$84 sps:$4 sm:$0xff]  }
 0x3fd   :  { %12802 = vmatprep.subr.bf16.mxu1 %v19859_v41  ;;  %v19919_v41 = vld [vmem:[#allocation7 + $0xe9c] ss:$84 sps:$4 sm:$0xff]  }
 0x3ff   :  { %12557 = vmatpush1.bf16.msra.mxu0 %v19854_v40  ;;  %v19916_v40 = vld [vmem:[#allocation7 + $0xe94] ss:$84 sps:$4 sm:$0xff]  }
 0x400   :  { %12803 = vmatpush1.bf16.msra.mxu1 %v19857_v42  ;;  %12558 = vmatprep.subr.bf16.mxu0 %v19862_v12  ;;  %v19914_v42 = vld [vmem:[#allocation7 + $0xe90] ss:$84 sps:$4 sm:$0xff]   ;;  %v19917_v12 = vld [vmem:[#allocation7 + $0xe98] ss:$84 sps:$4 sm:$0xff]  }
 0x401   :  { %12804 = vmatprep.subr.bf16.mxu1 %v19865_v45  ;;  %v19925_v45 = vld [vmem:[#allocation7 + $0xf44] ss:$84 sps:$4 sm:$0xff]  }
 0x403   :  { %12559 = vmatpush1.bf16.msra.mxu0 %v19860_v44  ;;  %v19922_v44 = vld [vmem:[#allocation7 + $0xf3c] ss:$84 sps:$4 sm:$0xff]  }
 0x404   :  { %12805 = vmatpush1.bf16.msra.mxu1 %v19863_v47  ;;  %12560 = vmatprep.subr.bf16.mxu0 %v19868_v54  ;;  %v19920_v47 = vld [vmem:[#allocation7 + $0xf38] ss:$84 sps:$4 sm:$0xff]   ;;  %v19923_v54 = vld [vmem:[#allocation7 + $0xf40] ss:$84 sps:$4 sm:$0xff]  }
 0x405   :  { %12806 = vmatprep.subr.bf16.mxu1 %v19871_v51  ;;  %v19926_v51 = vld [vmem:[#allocation7 + $0xfe0] ss:$84 sps:$4 sm:$0xff]  }
 0x407   :  { %12561 = vmatpush1.bf16.msra.mxu0 %v19866_v55  ;;  %v19928_v55 = vld [vmem:[#allocation7 + $0xfe4] ss:$84 sps:$4 sm:$0xff]  }
 0x408   :  { %12807 = vmatpush1.bf16.msra.mxu1 %v19869_v57  ;;  %12562 = vmatprep.subr.bf16.mxu0 %v19874_v49  ;;  %v19931_v57 = vld [vmem:[#allocation7 + $0xfec] ss:$84 sps:$4 sm:$0xff]   ;;  %v19929_v49 = vld [vmem:[#allocation7 + $0xfe8] ss:$84 sps:$4 sm:$0xff]  }
 0x409   :  { %12808 = vmatprep.subr.bf16.mxu1 %v19877_v59  ;;  %v19932_v59 = vld [vmem:[#allocation7 + $0x1088] ss:$84 sps:$4 sm:$0xff]  }
 0x40b   :  { %12563 = vmatpush1.bf16.msra.mxu0 %v19872_v58  ;;  %v19934_v58 = vld [vmem:[#allocation7 + $0x108c] ss:$84 sps:$4 sm:$0xff]  }
 0x40c   :  { %12809 = vmatpush1.bf16.msra.mxu1 %v19875_v61  ;;  %12573 = vmatprep.subr.bf16.mxu0 %v19880_v33  ;;  %v19937_v61 = vld [vmem:[#allocation7 + $0x1094] ss:$84 sps:$4 sm:$0xff]   ;;  %v19935_v33 = vld [vmem:[#allocation7 + $0x1090] ss:$84 sps:$4 sm:$0xff]  }
 0x40d   :  { %12819 = vmatprep.subr.bf16.mxu1 %v19883_v11  ;;  %v19938_v11 = vld [vmem:[#allocation7 + $0x1130] ss:$84 sps:$4 sm:$0xff]  }
 0x40e   :  { %12565 = vmatmul.mubr.bf16.vlgmr.msra.gmra.mrb[24].mxu0 %v21927_v4 }
 0x40f   :  { %12811 = vmatmul.mubr.bf16.vlgmr.msra.gmra.mrb[16].mxu1 %v21927_v4  ;;  %12574 = vmatpush1.bf16.msra.mxu0 %v19878_v62  ;;  %v19940_v62 = vld [vmem:[#allocation7 + $0x1134] ss:$84 sps:$4 sm:$0xff]  }
 0x410   :  { %12605 = vmatprep.mubr.bf16.mxu0 %v21937_v24  ;;  %12820 = vmatpush1.bf16.msra.mxu1 %v19881_v5  ;;  %v19943_v5 = vld [vmem:[#allocation7 + $0x113c] ss:$84 sps:$4 sm:$0xff]  }
 0x411   :  { %12851 = vmatprep.mubr.bf16.mxu1 %v21937_v24  ;;  %12575 = vmatprep.subr.bf16.mxu0 %v19886_v6  ;;  %v19941_v6 = vld [vmem:[#allocation7 + $0x1138] ss:$84 sps:$4 sm:$0xff]  }
 0x412   :  { %12821 = vmatprep.subr.bf16.mxu1 %v19889_v13  ;;  %v19949_v13 = vld [vmem:[#allocation7 + $0x11e4] ss:$84 sps:$4 sm:$0xff]  }
 0x413   :  { %12576 = vmatpush1.bf16.msra.mxu0 %v19884_v7  ;;  %v19946_v7 = vld [vmem:[#allocation7 + $0x11dc] ss:$84 sps:$4 sm:$0xff]  }
 0x414   :  { %12822 = vmatpush1.bf16.msra.mxu1 %v19887_v8  ;;  %12577 = vmatprep.subr.bf16.mxu0 %v19892_v15  ;;  %v19944_v8 = vld [vmem:[#allocation7 + $0x11d8] ss:$84 sps:$4 sm:$0xff]   ;;  %v19947_v15 = vld [vmem:[#allocation7 + $0x11e0] ss:$84 sps:$4 sm:$0xff]  }
 0x415   :  { %12823 = vmatprep.subr.bf16.mxu1 %v19895_v19  ;;  %v19952_v19 = vld [vmem:[#allocation7 + $0x1284] ss:$84 sps:$4 sm:$0xff]  }
 0x417   :  { %12578 = vmatpush1.bf16.msra.mxu0 %v19890_v20  ;;  %v19950_v20 = vld [vmem:[#allocation7 + $0x1280] ss:$84 sps:$4 sm:$0xff]  }
 0x418   :  { %12824 = vmatpush1.bf16.msra.mxu1 %v19893_v22  ;;  %12579 = vmatprep.subr.bf16.mxu0 %v19898_v23  ;;  %v19955_v22 = vld [vmem:[#allocation7 + $0x128c] ss:$84 sps:$4 sm:$0xff]   ;;  %v19953_v23 = vld [vmem:[#allocation7 + $0x1288] ss:$84 sps:$4 sm:$0xff]  }
 0x419   :  { %12825 = vmatprep.subr.bf16.mxu1 %v19901_v26  ;;  %v19956_v26 = vld [vmem:[#allocation7 + $0x1328] ss:$84 sps:$4 sm:$0xff]  }
 0x41b   :  { %12580 = vmatpush1.bf16.msra.mxu0 %v19896_v25  ;;  %v19958_v25 = vld [vmem:[#allocation7 + $0x132c] ss:$84 sps:$4 sm:$0xff]  }
 0x41c   :  { %12826 = vmatpush1.bf16.msra.mxu1 %v19899_v27  ;;  %12581 = vmatprep.subr.bf16.mxu0 %v19904_v28  ;;  %v19961_v27 = vld [vmem:[#allocation7 + $0x1334] ss:$84 sps:$4 sm:$0xff]   ;;  %v19959_v28 = vld [vmem:[#allocation7 + $0x1330] ss:$84 sps:$4 sm:$0xff]  }
 0x41d   :  { %12827 = vmatprep.subr.bf16.mxu1 %v19907_v34  ;;  %v19962_v34 = vld [vmem:[#allocation7 + $0x13d0] ss:$84 sps:$4 sm:$0xff]  }
 0x41f   :  { %12582 = vmatpush1.bf16.msra.mxu0 %v19902_v29  ;;  %v19964_v29 = vld [vmem:[#allocation7 + $0x13d4] ss:$84 sps:$4 sm:$0xff]  }
 0x420   :  { %12828 = vmatpush1.bf16.msra.mxu1 %v19905_v35  ;;  %12583 = vmatprep.subr.bf16.mxu0 %v19910_v32  ;;  %v19967_v35 = vld [vmem:[#allocation7 + $0x13dc] ss:$84 sps:$4 sm:$0xff]   ;;  %v19965_v32 = vld [vmem:[#allocation7 + $0x13d8] ss:$84 sps:$4 sm:$0xff]  }
 0x421   :  { %12829 = vmatprep.subr.bf16.mxu1 %v19913_v38  ;;  %v19968_v38 = vld [vmem:[#allocation7 + $0x1478] ss:$84 sps:$4 sm:$0xff]  }
 0x423   :  { %12584 = vmatpush1.bf16.msra.mxu0 %v19908_v37  ;;  %v19970_v37 = vld [vmem:[#allocation7 + $0x147c] ss:$84 sps:$4 sm:$0xff]  }
 0x424   :  { %12830 = vmatpush1.bf16.msra.mxu1 %v19911_v53  ;;  %12585 = vmatprep.subr.bf16.mxu0 %v19916_v40  ;;  %v19973_v53 = vld [vmem:[#allocation7 + $0x1484] ss:$84 sps:$4 sm:$0xff]   ;;  %v19971_v40 = vld [vmem:[#allocation7 + $0x1480] ss:$84 sps:$4 sm:$0xff]  }
 0x425   :  { %12831 = vmatprep.subr.bf16.mxu1 %v19919_v41  ;;  %v19976_v41 = vld [vmem:[#allocation7 + $0x1524] ss:$84 sps:$4 sm:$0xff]  }
 0x427   :  { %12586 = vmatpush1.bf16.msra.mxu0 %v19914_v42  ;;  %v19974_v42 = vld [vmem:[#allocation7 + $0x1520] ss:$84 sps:$4 sm:$0xff]  }
 0x428   :  { %12832 = vmatpush1.bf16.msra.mxu1 %v19917_v12  ;;  %12587 = vmatprep.subr.bf16.mxu0 %v19922_v44  ;;  %v19979_v12 = vld [vmem:[#allocation7 + $0x152c] ss:$84 sps:$4 sm:$0xff]   ;;  %v19977_v44 = vld [vmem:[#allocation7 + $0x1528] ss:$84 sps:$4 sm:$0xff]  }
 0x429   :  { %12833 = vmatprep.subr.bf16.mxu1 %v19925_v45  ;;  %v19982_v45 = vld [vmem:[#allocation7 + $0x15cc] ss:$84 sps:$4 sm:$0xff]  }
 0x42b   :  { %12588 = vmatpush1.bf16.msra.mxu0 %v19920_v47  ;;  %v19980_v47 = vld [vmem:[#allocation7 + $0x15c8] ss:$84 sps:$4 sm:$0xff]  }
 0x42c   :  { %12834 = vmatpush1.bf16.msra.mxu1 %v19923_v54  ;;  %12589 = vmatprep.subr.bf16.mxu0 %v19928_v55  ;;  %v19983_v54 = vld [vmem:[#allocation7 + $0x15d0] ss:$84 sps:$4 sm:$0xff]   ;;  %v19985_v55 = vld [vmem:[#allocation7 + $0x15d4] ss:$84 sps:$4 sm:$0xff]  }
 0x42d   :  { %12835 = vmatprep.subr.bf16.mxu1 %v19931_v57  ;;  %v19991_v57 = vld [vmem:[#allocation7 + $0x167c] ss:$84 sps:$4 sm:$0xff]  }
 0x42f   :  { %12590 = vmatpush1.bf16.msra.mxu0 %v19926_v51  ;;  %v19988_v51 = vld [vmem:[#allocation7 + $0x1674] ss:$84 sps:$4 sm:$0xff]  }
 0x430   :  { %12836 = vmatpush1.bf16.msra.mxu1 %v19929_v49  ;;  %12591 = vmatprep.subr.bf16.mxu0 %v19934_v58  ;;  %v19986_v49 = vld [vmem:[#allocation7 + $0x1670] ss:$84 sps:$4 sm:$0xff]   ;;  %v19989_v58 = vld [vmem:[#allocation7 + $0x1678] ss:$84 sps:$4 sm:$0xff]  }
 0x431   :  { %12837 = vmatprep.subr.bf16.mxu1 %v19937_v61  ;;  %v19992_v61 = vld [vmem:[#allocation7 + $0x1718] ss:$84 sps:$4 sm:$0xff]  }
 0x433   :  { %12592 = vmatpush1.bf16.msra.mxu0 %v19932_v59  ;;  %v19994_v59 = vld [vmem:[#allocation7 + $0x171c] ss:$84 sps:$4 sm:$0xff]  }
 0x434   :  { %12838 = vmatpush1.bf16.msra.mxu1 %v19935_v33  ;;  %12593 = vmatprep.subr.bf16.mxu0 %v19940_v62  ;;  %v19997_v33 = vld [vmem:[#allocation7 + $0x1724] ss:$84 sps:$4 sm:$0xff]   ;;  %v19995_v62 = vld [vmem:[#allocation7 + $0x1720] ss:$84 sps:$4 sm:$0xff]  }
 0x435   :  { %12839 = vmatprep.subr.bf16.mxu1 %v19943_v5  ;;  %v19998_v5 = vld [vmem:[#allocation7 + $0x17c0] ss:$84 sps:$4 sm:$0xff]  }
 0x437   :  { %12594 = vmatpush1.bf16.msra.mxu0 %v19938_v11  ;;  %v20000_v11 = vld [vmem:[#allocation7 + $0x17c4] ss:$84 sps:$4 sm:$0xff]  }
 0x438   :  { %12840 = vmatpush1.bf16.msra.mxu1 %v19941_v6  ;;  %12595 = vmatprep.subr.bf16.mxu0 %v19946_v7  ;;  %v20003_v6 = vld [vmem:[#allocation7 + $0x17cc] ss:$84 sps:$4 sm:$0xff]   ;;  %v20001_v7 = vld [vmem:[#allocation7 + $0x17c8] ss:$84 sps:$4 sm:$0xff]  }
 0x439   :  { %12841 = vmatprep.subr.bf16.mxu1 %v19949_v13  ;;  %v20004_v13 = vld [vmem:[#allocation7 + $0x1868] ss:$84 sps:$4 sm:$0xff]  }
 0x43b   :  { %12596 = vmatpush1.bf16.msra.mxu0 %v19944_v8  ;;  %v20006_v8 = vld [vmem:[#allocation7 + $0x186c] ss:$84 sps:$4 sm:$0xff]  }
 0x43c   :  { %12842 = vmatpush1.bf16.msra.mxu1 %v19947_v15  ;;  %12597 = vmatprep.subr.bf16.mxu0 %v19952_v19  ;;  %v20009_v15 = vld [vmem:[#allocation7 + $0x1874] ss:$84 sps:$4 sm:$0xff]   ;;  %v20007_v19 = vld [vmem:[#allocation7 + $0x1870] ss:$84 sps:$4 sm:$0xff]  }
 0x43d   :  { %12843 = vmatprep.subr.bf16.mxu1 %v19955_v22  ;;  %v20010_v22 = vld [vmem:[#allocation7 + $0x1910] ss:$84 sps:$4 sm:$0xff]  }
 0x43f   :  { %12598 = vmatpush1.bf16.msra.mxu0 %v19950_v20  ;;  %v20012_v20 = vld [vmem:[#allocation7 + $0x1914] ss:$84 sps:$4 sm:$0xff]  }
 0x440   :  { %12844 = vmatpush1.bf16.msra.mxu1 %v19953_v23  ;;  %12599 = vmatprep.subr.bf16.mxu0 %v19958_v25  ;;  %v20015_v23 = vld [vmem:[#allocation7 + $0x191c] ss:$84 sps:$4 sm:$0xff]   ;;  %v20013_v25 = vld [vmem:[#allocation7 + $0x1918] ss:$84 sps:$4 sm:$0xff]  }
 0x441   :  { %12845 = vmatprep.subr.bf16.mxu1 %v19961_v27  ;;  %v20016_v27 = vld [vmem:[#allocation7 + $0x19b8] ss:$84 sps:$4 sm:$0xff]  }
 0x443   :  { %12600 = vmatpush1.bf16.msra.mxu0 %v19956_v26  ;;  %v20018_v26 = vld [vmem:[#allocation7 + $0x19bc] ss:$84 sps:$4 sm:$0xff]  }
 0x444   :  { %12846 = vmatpush1.bf16.msra.mxu1 %v19959_v28  ;;  %12601 = vmatprep.subr.bf16.mxu0 %v19964_v29  ;;  %v20021_v28 = vld [vmem:[#allocation7 + $0x19c4] ss:$84 sps:$4 sm:$0xff]   ;;  %v20019_v29 = vld [vmem:[#allocation7 + $0x19c0] ss:$84 sps:$4 sm:$0xff]  }
 0x445   :  { %12847 = vmatprep.subr.bf16.mxu1 %v19967_v35  ;;  %v20022_v35 = vld [vmem:[#allocation7 + $0x1a60] ss:$84 sps:$4 sm:$0xff]  }
 0x447   :  { %12602 = vmatpush1.bf16.msra.mxu0 %v19962_v34  ;;  %v20024_v34 = vld [vmem:[#allocation7 + $0x1a64] ss:$84 sps:$4 sm:$0xff]  }
 0x448   :  { %12848 = vmatpush1.bf16.msra.mxu1 %v19965_v32  ;;  %12603 = vmatprep.subr.bf16.mxu0 %v19970_v37  ;;  %v20027_v32 = vld [vmem:[#allocation7 + $0x1a6c] ss:$84 sps:$4 sm:$0xff]   ;;  %v20025_v37 = vld [vmem:[#allocation7 + $0x1a68] ss:$84 sps:$4 sm:$0xff]  }
 0x449   :  { %12849 = vmatprep.subr.bf16.mxu1 %v19973_v53  ;;  %v20028_v53 = vld [vmem:[#allocation7 + $0x1b08] ss:$84 sps:$4 sm:$0xff]  }
 0x44b   :  { %12604 = vmatpush1.bf16.msra.mxu0 %v19968_v38  ;;  %v20030_v38 = vld [vmem:[#allocation7 + $0x1b0c] ss:$84 sps:$4 sm:$0xff]  }
 0x44c   :  { %12850 = vmatpush1.bf16.msra.mxu1 %v19971_v40  ;;  %12614 = vmatprep.subr.bf16.mxu0 %v19976_v41  ;;  %v20033_v40 = vld [vmem:[#allocation7 + $0x1b14] ss:$84 sps:$4 sm:$0xff]   ;;  %v20031_v41 = vld [vmem:[#allocation7 + $0x1b10] ss:$84 sps:$4 sm:$0xff]  }
 0x44d   :  { %12860 = vmatprep.subr.bf16.mxu1 %v19979_v12  ;;  %v20034_v12 = vld [vmem:[#allocation7 + $0x1bb0] ss:$84 sps:$4 sm:$0xff]  }
 0x44e   :  { %12606 = vmatmul.mubr.bf16.vlgmr.msra.gmra.mrb[24].mxu0 %v21968_v60 }
 0x44f   :  { %12852 = vmatmul.mubr.bf16.vlgmr.msra.gmra.mrb[16].mxu1 %v21968_v60  ;;  %12615 = vmatpush1.bf16.msra.mxu0 %v19974_v42  ;;  %v20036_v42 = vld [vmem:[#allocation7 + $0x1bb4] ss:$84 sps:$4 sm:$0xff]  }
 0x450   :  { %12646 = vmatprep.mubr.bf16.mxu0 %v21970_v0  ;;  %12861 = vmatpush1.bf16.msra.mxu1 %v19977_v44  ;;  %v20039_v44 = vld [vmem:[#allocation7 + $0x1bbc] ss:$84 sps:$4 sm:$0xff]  }
 0x451   :  { %12892 = vmatprep.mubr.bf16.mxu1 %v21970_v0  ;;  %12616 = vmatprep.subr.bf16.mxu0 %v19982_v45  ;;  %v20037_v45 = vld [vmem:[#allocation7 + $0x1bb8] ss:$84 sps:$4 sm:$0xff]  }
 0x452   :  { %12862 = vmatprep.subr.bf16.mxu1 %v19985_v55  ;;  %v20045_v55 = vld [vmem:[#allocation7 + $0x1c64] ss:$84 sps:$4 sm:$0xff]  }
 0x453   :  { %12617 = vmatpush1.bf16.msra.mxu0 %v19980_v47  ;;  %v20042_v47 = vld [vmem:[#allocation7 + $0x1c5c] ss:$84 sps:$4 sm:$0xff]  }
 0x454   :  { %12863 = vmatpush1.bf16.msra.mxu1 %v19983_v54  ;;  %12618 = vmatprep.subr.bf16.mxu0 %v19988_v51  ;;  %v20040_v54 = vld [vmem:[#allocation7 + $0x1c58] ss:$84 sps:$4 sm:$0xff]   ;;  %v20043_v51 = vld [vmem:[#allocation7 + $0x1c60] ss:$84 sps:$4 sm:$0xff]  }
 0x455   :  { %12864 = vmatprep.subr.bf16.mxu1 %v19991_v57  ;;  %v20048_v57 = vld [vmem:[#allocation7 + $0x1d04] ss:$84 sps:$4 sm:$0xff]  }
 0x457   :  { %12619 = vmatpush1.bf16.msra.mxu0 %v19986_v49  ;;  %v20046_v49 = vld [vmem:[#allocation7 + $0x1d00] ss:$84 sps:$4 sm:$0xff]  }
 0x458   :  { %12865 = vmatpush1.bf16.msra.mxu1 %v19989_v58  ;;  %12620 = vmatprep.subr.bf16.mxu0 %v19994_v59  ;;  %v20051_v58 = vld [vmem:[#allocation7 + $0x1d0c] ss:$84 sps:$4 sm:$0xff]   ;;  %v20049_v59 = vld [vmem:[#allocation7 + $0x1d08] ss:$84 sps:$4 sm:$0xff]  }
 0x459   :  { %12866 = vmatprep.subr.bf16.mxu1 %v19997_v33  ;;  %v20052_v33 = vld [vmem:[#allocation7 + $0x1da8] ss:$84 sps:$4 sm:$0xff]  }
 0x45b   :  { %12621 = vmatpush1.bf16.msra.mxu0 %v19992_v61  ;;  %v20054_v61 = vld [vmem:[#allocation7 + $0x1dac] ss:$84 sps:$4 sm:$0xff]  }
 0x45c   :  { %12867 = vmatpush1.bf16.msra.mxu1 %v19995_v62  ;;  %12622 = vmatprep.subr.bf16.mxu0 %v20000_v11  ;;  %v20057_v62 = vld [vmem:[#allocation7 + $0x1db4] ss:$84 sps:$4 sm:$0xff]   ;;  %v20055_v11 = vld [vmem:[#allocation7 + $0x1db0] ss:$84 sps:$4 sm:$0xff]  }
 0x45d   :  { %12868 = vmatprep.subr.bf16.mxu1 %v20003_v6  ;;  %v20058_v6 = vld [vmem:[#allocation7 + $0x1e50] ss:$84 sps:$4 sm:$0xff]  }
 0x45f   :  { %12623 = vmatpush1.bf16.msra.mxu0 %v19998_v5  ;;  %v20060_v5 = vld [vmem:[#allocation7 + $0x1e54] ss:$84 sps:$4 sm:$0xff]  }
 0x460   :  { %12869 = vmatpush1.bf16.msra.mxu1 %v20001_v7  ;;  %12624 = vmatprep.subr.bf16.mxu0 %v20006_v8  ;;  %v20063_v7 = vld [vmem:[#allocation7 + $0x1e5c] ss:$84 sps:$4 sm:$0xff]   ;;  %v20061_v8 = vld [vmem:[#allocation7 + $0x1e58] ss:$84 sps:$4 sm:$0xff]  }
 0x461   :  { %12870 = vmatprep.subr.bf16.mxu1 %v20009_v15  ;;  %v20064_v15 = vld [vmem:[#allocation7 + $0x1ef8] ss:$84 sps:$4 sm:$0xff]  }
 0x463   :  { %12625 = vmatpush1.bf16.msra.mxu0 %v20004_v13  ;;  %v20066_v13 = vld [vmem:[#allocation7 + $0x1efc] ss:$84 sps:$4 sm:$0xff]  }
 0x464   :  { %12871 = vmatpush1.bf16.msra.mxu1 %v20007_v19  ;;  %12626 = vmatprep.subr.bf16.mxu0 %v20012_v20  ;;  %v20069_v19 = vld [vmem:[#allocation7 + $0x1f04] ss:$84 sps:$4 sm:$0xff]   ;;  %v20067_v20 = vld [vmem:[#allocation7 + $0x1f00] ss:$84 sps:$4 sm:$0xff]  }
 0x465   :  { %12872 = vmatprep.subr.bf16.mxu1 %v20015_v23  ;;  %v20070_v23 = vld [vmem:[#allocation7 + $0x1fa0] ss:$84 sps:$4 sm:$0xff]  }
 0x467   :  { %12627 = vmatpush1.bf16.msra.mxu0 %v20010_v22  ;;  %v20072_v22 = vld [vmem:[#allocation7 + $0x1fa4] ss:$84 sps:$4 sm:$0xff]  }
 0x468   :  { %12873 = vmatpush1.bf16.msra.mxu1 %v20013_v25  ;;  %12628 = vmatprep.subr.bf16.mxu0 %v20018_v26  ;;  %v20075_v25 = vld [vmem:[#allocation7 + $0x1fac] ss:$84 sps:$4 sm:$0xff]   ;;  %v20073_v26 = vld [vmem:[#allocation7 + $0x1fa8] ss:$84 sps:$4 sm:$0xff]  }
 0x469   :  { %12874 = vmatprep.subr.bf16.mxu1 %v20021_v28  ;;  %v20081_v28 = vld [vmem:[#allocation7 + $0x2054] ss:$84 sps:$4 sm:$0xff]  }
 0x46b   :  { %12629 = vmatpush1.bf16.msra.mxu0 %v20016_v27  ;;  %v20078_v27 = vld [vmem:[#allocation7 + $0x204c] ss:$84 sps:$4 sm:$0xff]  }
 0x46c   :  { %12875 = vmatpush1.bf16.msra.mxu1 %v20019_v29  ;;  %12630 = vmatprep.subr.bf16.mxu0 %v20024_v34  ;;  %v20076_v29 = vld [vmem:[#allocation7 + $0x2048] ss:$84 sps:$4 sm:$0xff]   ;;  %v20079_v34 = vld [vmem:[#allocation7 + $0x2050] ss:$84 sps:$4 sm:$0xff]  }
 0x46d   :  { %12876 = vmatprep.subr.bf16.mxu1 %v20027_v32  ;;  %v20082_v32 = vld [vmem:[#allocation7 + $0x20f0] ss:$84 sps:$4 sm:$0xff]  }
 0x46f   :  { %12631 = vmatpush1.bf16.msra.mxu0 %v20022_v35  ;;  %v20084_v35 = vld [vmem:[#allocation7 + $0x20f4] ss:$84 sps:$4 sm:$0xff]  }
 0x470   :  { %12877 = vmatpush1.bf16.msra.mxu1 %v20025_v37  ;;  %12632 = vmatprep.subr.bf16.mxu0 %v20030_v38  ;;  %v20087_v37 = vld [vmem:[#allocation7 + $0x20fc] ss:$84 sps:$4 sm:$0xff]   ;;  %v20085_v38 = vld [vmem:[#allocation7 + $0x20f8] ss:$84 sps:$4 sm:$0xff]  }
 0x471   :  { %12878 = vmatprep.subr.bf16.mxu1 %v20033_v40  ;;  %v20088_v40 = vld [vmem:[#allocation7 + $0x2198] ss:$84 sps:$4 sm:$0xff]  }
 0x473   :  { %12633 = vmatpush1.bf16.msra.mxu0 %v20028_v53  ;;  %v20090_v53 = vld [vmem:[#allocation7 + $0x219c] ss:$84 sps:$4 sm:$0xff]  }
 0x474   :  { %12879 = vmatpush1.bf16.msra.mxu1 %v20031_v41  ;;  %12634 = vmatprep.subr.bf16.mxu0 %v20036_v42  ;;  %v20093_v41 = vld [vmem:[#allocation7 + $0x21a4] ss:$84 sps:$4 sm:$0xff]   ;;  %v20091_v42 = vld [vmem:[#allocation7 + $0x21a0] ss:$84 sps:$4 sm:$0xff]  }
 0x475   :  { %12880 = vmatprep.subr.bf16.mxu1 %v20039_v44  ;;  %v20094_v44 = vld [vmem:[#allocation7 + $0x2240] ss:$84 sps:$4 sm:$0xff]  }
 0x477   :  { %12635 = vmatpush1.bf16.msra.mxu0 %v20034_v12  ;;  %v20096_v12 = vld [vmem:[#allocation7 + $0x2244] ss:$84 sps:$4 sm:$0xff]  }
 0x478   :  { %12881 = vmatpush1.bf16.msra.mxu1 %v20037_v45  ;;  %12636 = vmatprep.subr.bf16.mxu0 %v20042_v47  ;;  %v20099_v45 = vld [vmem:[#allocation7 + $0x224c] ss:$84 sps:$4 sm:$0xff]   ;;  %v20097_v47 = vld [vmem:[#allocation7 + $0x2248] ss:$84 sps:$4 sm:$0xff]  }
 0x479   :  { %12882 = vmatprep.subr.bf16.mxu1 %v20045_v55  ;;  %v20105_v55 = vld [vmem:[#allocation7 + $0x22f4] ss:$84 sps:$4 sm:$0xff]  }
 0x47b   :  { %12637 = vmatpush1.bf16.msra.mxu0 %v20040_v54  ;;  %v20102_v54 = vld [vmem:[#allocation7 + $0x22ec] ss:$84 sps:$4 sm:$0xff]  }
 0x47c   :  { %12883 = vmatpush1.bf16.msra.mxu1 %v20043_v51  ;;  %12638 = vmatprep.subr.bf16.mxu0 %v20048_v57  ;;  %v20100_v51 = vld [vmem:[#allocation7 + $0x22e8] ss:$84 sps:$4 sm:$0xff]   ;;  %v20103_v57 = vld [vmem:[#allocation7 + $0x22f0] ss:$84 sps:$4 sm:$0xff]  }
 0x47d   :  { %12884 = vmatprep.subr.bf16.mxu1 %v20051_v58 }
 0x47f   :  { %12639 = vmatpush1.bf16.msra.mxu0 %v20046_v49  ;;  %v20108_v49 = vld [vmem:[#allocation7 + $0x2394] ss:$84 sps:$4 sm:$0xff]  }
 0x480   :  { %12885 = vmatpush1.bf16.msra.mxu1 %v20049_v59  ;;  %12640 = vmatprep.subr.bf16.mxu0 %v20054_v61  ;;  %v20111_v59 = vld [vmem:[#allocation7 + $0x239c] ss:$84 sps:$4 sm:$0xff]  }
 0x481   :  { %12886 = vmatprep.subr.bf16.mxu1 %v20057_v62  ;;  %v20106_v62 = vld [vmem:[#allocation7 + $0x2390] ss:$84 sps:$4 sm:$0xff]  }
 0x483   :  { %12641 = vmatpush1.bf16.msra.mxu0 %v20052_v33 }
 0x484   :  { %12887 = vmatpush1.bf16.msra.mxu1 %v20055_v11  ;;  %12642 = vmatprep.subr.bf16.mxu0 %v20060_v5 }
 0x485   :  { %12888 = vmatprep.subr.bf16.mxu1 %v20063_v7 }
 0x487   :  { %12643 = vmatpush1.bf16.msra.mxu0 %v20058_v6 }
 0x488   :  { %12889 = vmatpush1.bf16.msra.mxu1 %v20061_v8  ;;  %12644 = vmatprep.subr.bf16.mxu0 %v20066_v13  ;;  %v20109_v8 = vld [vmem:[#allocation7 + $0x2398] ss:$84 sps:$4 sm:$0xff]   ;;  %v20114_v13 = vld [vmem:[#allocation7 + $0x243c] ss:$84 sps:$4 sm:$0xff]  }
 0x489   :  { %12890 = vmatprep.subr.bf16.mxu1 %v20069_v19  ;;  %v20117_v19 = vld [vmem:[#allocation7 + $0x2444] ss:$84 sps:$4 sm:$0xff]  }
 0x48b   :  { %12645 = vmatpush1.bf16.msra.mxu0 %v20064_v15 }
 0x48c   :  { %12891 = vmatpush1.bf16.msra.mxu1 %v20067_v20  ;;  %12655 = vmatprep.subr.bf16.mxu0 %v20072_v22  ;;  %v20112_v20 = vld [vmem:[#allocation7 + $0x2438] ss:$84 sps:$4 sm:$0xff]   ;;  %v20115_v22 = vld [vmem:[#allocation7 + $0x2440] ss:$84 sps:$4 sm:$0xff]  }
 0x48d   :  { %12901 = vmatprep.subr.bf16.mxu1 %v20075_v25  ;;  %v20118_v25 = vld [vmem:[#allocation7 + $0x24e0] ss:$84 sps:$4 sm:$0xff]  }
 0x48e   :  { %12647 = vmatmul.mubr.bf16.vlgmr.msra.gmra.mrb[24].mxu0 %v21990_v36 }
 0x48f   :  { %12893 = vmatmul.mubr.bf16.vlgmr.msra.gmra.mrb[16].mxu1 %v21990_v36  ;;  %12656 = vmatpush1.bf16.msra.mxu0 %v20070_v23  ;;  %v20120_v23 = vld [vmem:[#allocation7 + $0x24e4] ss:$84 sps:$4 sm:$0xff]  }
 0x490   :  { %12687 = vmatprep.mubr.bf16.mxu0 %v21992_v39  ;;  %12902 = vmatpush1.bf16.msra.mxu1 %v20073_v26  ;;  %v20123_v26 = vld [vmem:[#allocation7 + $0x24ec] ss:$84 sps:$4 sm:$0xff]  }
 0x491   :  { %12933 = vmatprep.mubr.bf16.mxu1 %v21992_v39  ;;  %12657 = vmatprep.subr.bf16.mxu0 %v20078_v27  ;;  %v20121_v27 = vld [vmem:[#allocation7 + $0x24e8] ss:$84 sps:$4 sm:$0xff]  }
 0x492   :  { %12903 = vmatprep.subr.bf16.mxu1 %v20081_v28  ;;  %v20126_v28 = vld [vmem:[#allocation7 + $0x258c] ss:$84 sps:$4 sm:$0xff]  }
 0x493   :  { %12658 = vmatpush1.bf16.msra.mxu0 %v20076_v29  ;;  %v20124_v29 = vld [vmem:[#allocation7 + $0x2588] ss:$84 sps:$4 sm:$0xff]  }
 0x494   :  { %12904 = vmatpush1.bf16.msra.mxu1 %v20079_v34  ;;  %12659 = vmatprep.subr.bf16.mxu0 %v20084_v35  ;;  %v20129_v34 = vld [vmem:[#allocation7 + $0x2594] ss:$84 sps:$4 sm:$0xff]   ;;  %v20127_v35 = vld [vmem:[#allocation7 + $0x2590] ss:$84 sps:$4 sm:$0xff]  }
 0x495   :  { %12905 = vmatprep.subr.bf16.mxu1 %v20087_v37  ;;  %v20130_v37 = vld [vmem:[#allocation7 + $0x2630] ss:$84 sps:$4 sm:$0xff]  }
 0x497   :  { %12660 = vmatpush1.bf16.msra.mxu0 %v20082_v32  ;;  %v20132_v32 = vld [vmem:[#allocation7 + $0x2634] ss:$84 sps:$4 sm:$0xff]  }
 0x498   :  { %12906 = vmatpush1.bf16.msra.mxu1 %v20085_v38  ;;  %12661 = vmatprep.subr.bf16.mxu0 %v20090_v53  ;;  %v20135_v38 = vld [vmem:[#allocation7 + $0x263c] ss:$84 sps:$4 sm:$0xff]   ;;  %v20133_v53 = vld [vmem:[#allocation7 + $0x2638] ss:$84 sps:$4 sm:$0xff]  }
 0x499   :  { %12907 = vmatprep.subr.bf16.mxu1 %v20093_v41  ;;  %v20136_v41 = vld [vmem:[#allocation7 + $0x26d8] ss:$84 sps:$4 sm:$0xff]  }
 0x49b   :  { %12662 = vmatpush1.bf16.msra.mxu0 %v20088_v40  ;;  %v20138_v40 = vld [vmem:[#allocation7 + $0x26dc] ss:$84 sps:$4 sm:$0xff]  }
 0x49c   :  { %12908 = vmatpush1.bf16.msra.mxu1 %v20091_v42  ;;  %12663 = vmatprep.subr.bf16.mxu0 %v20096_v12  ;;  %v20141_v42 = vld [vmem:[#allocation7 + $0x26e4] ss:$84 sps:$4 sm:$0xff]   ;;  %v20139_v12 = vld [vmem:[#allocation7 + $0x26e0] ss:$84 sps:$4 sm:$0xff]  }
 0x49d   :  { %12909 = vmatprep.subr.bf16.mxu1 %v20099_v45  ;;  %v20142_v45 = vld [vmem:[#allocation7 + $0x2780] ss:$84 sps:$4 sm:$0xff]  }
 0x49f   :  { %12664 = vmatpush1.bf16.msra.mxu0 %v20094_v44  ;;  %v20144_v44 = vld [vmem:[#allocation7 + $0x2784] ss:$84 sps:$4 sm:$0xff]  }
 0x4a0   :  { %12910 = vmatpush1.bf16.msra.mxu1 %v20097_v47  ;;  %12665 = vmatprep.subr.bf16.mxu0 %v20102_v54  ;;  %v20147_v47 = vld [vmem:[#allocation7 + $0x278c] ss:$84 sps:$4 sm:$0xff]   ;;  %v20145_v54 = vld [vmem:[#allocation7 + $0x2788] ss:$84 sps:$4 sm:$0xff]  }
 0x4a1   :  { %v22081_v58 = vpop.f32.mrb[20].mxu0  ;;  %12911 = vmatprep.subr.bf16.mxu1 %v20105_v55  ;;  %v20150_v55 = vld [vmem:[#allocation7 + $0x282c] ss:$84 sps:$4 sm:$0xff]  }
 0x4a2   :  { %v22083_v61 = vpop.f32.mrb[12].mxu1  ;;  %v22085_v33 = vpop.f32.mrb[21].mxu0 }
 0x4a3   :  { %v22087_v11 = vpop.f32.mrb[13].mxu1  ;;  %v12283_v5 = vpop.f32.mrb[22].mxu0  ;;  %12666 = vmatpush1.bf16.msra.mxu0 %v20100_v51  ;;  %v20148_v51 = vld [vmem:[#allocation7 + $0x2828] ss:$84 sps:$4 sm:$0xff]  }
 0x4a4   :  { %v12529_v6 = vpop.f32.mrb[14].mxu1  ;;  %12912 = vmatpush1.bf16.msra.mxu1 %v20103_v57  ;;  %v12284_v7 = vpop.f32.mrb[23].mxu0  ;;  %12667 = vmatprep.subr.bf16.mxu0 %v20108_v49  ;;  %v20153_v57 = vld [vmem:[#allocation7 + $0x2834] ss:$84 sps:$4 sm:$0xff]   ;;  %v20151_v49 = vld [vmem:[#allocation7 + $0x2830] ss:$84 sps:$4 sm:$0xff]  }
 0x4a5   :  { %v12530_v15 = vpop.f32.mrb[15].mxu1  ;;  %12913 = vmatprep.subr.bf16.mxu1 %v20111_v59  ;;  %v20156_v59 = vld [vmem:[#allocation7 + $0x28d4] ss:$84 sps:$4 sm:$0xff]   ;;  %v20159_v5 = vld [vmem:[#allocation7 + $0x28dc] ss:$84 sps:$4 sm:$0xff]  }
 0x4a6   :  { %v20157_v6 = vld [vmem:[#allocation7 + $0x28d8] ss:$84 sps:$4 sm:$0xff]   ;;  %v20162_v7 = vld [vmem:[#allocation7 + $0x297c] ss:$84 sps:$4 sm:$0xff]   ;;  %v20163_v15 = vld [vmem:[#allocation7 + $0x2980] ss:$84 sps:$4 sm:$0xff]  }
 0x4a7   :  { %12668 = vmatpush1.bf16.msra.mxu0 %v20106_v62  ;;  %v20154_v62 = vld [vmem:[#allocation7 + $0x28d0] ss:$84 sps:$4 sm:$0xff]  }
 0x4a8   :  { %12914 = vmatpush1.bf16.msra.mxu1 %v20109_v8  ;;  %12669 = vmatprep.subr.bf16.mxu0 %v20114_v13  ;;  %v20160_v8 = vld [vmem:[#allocation7 + $0x2978] ss:$84 sps:$4 sm:$0xff]  }
 0x4a9   :  { %12915 = vmatprep.subr.bf16.mxu1 %v20117_v19  ;;  %v20165_v13 = vld [vmem:[#allocation7 + $0x2984] ss:$84 sps:$4 sm:$0xff]  }
 0x4aa   :  { %v20168_v19 = vld [vmem:[#allocation7 + $0x2a24] ss:$84 sps:$4 sm:$0xff]  }
 0x4ab   :  { %12670 = vmatpush1.bf16.msra.mxu0 %v20112_v20  ;;  %v20166_v20 = vld [vmem:[#allocation7 + $0x2a20] ss:$84 sps:$4 sm:$0xff]  }
 0x4ac   :  { %12916 = vmatpush1.bf16.msra.mxu1 %v20115_v22  ;;  %12671 = vmatprep.subr.bf16.mxu0 %v20120_v23  ;;  %v20171_v22 = vld [vmem:[#allocation7 + $0x2a2c] ss:$84 sps:$4 sm:$0xff]   ;;  %v20169_v23 = vld [vmem:[#allocation7 + $0x2a28] ss:$84 sps:$4 sm:$0xff]  }
 0x4ad   :  { %12917 = vmatprep.subr.bf16.mxu1 %v20123_v26  ;;  %v20172_v26 = vld [vmem:[#allocation7 + $0x2ac8] ss:$84 sps:$4 sm:$0xff]  }
 0x4af   :  { %12672 = vmatpush1.bf16.msra.mxu0 %v20118_v25  ;;  %v20174_v25 = vld [vmem:[#allocation7 + $0x2acc] ss:$84 sps:$4 sm:$0xff]  }
 0x4b0   :  { %12918 = vmatpush1.bf16.msra.mxu1 %v20121_v27  ;;  %12673 = vmatprep.subr.bf16.mxu0 %v20126_v28  ;;  %v20177_v27 = vld [vmem:[#allocation7 + $0x2ad4] ss:$84 sps:$4 sm:$0xff]   ;;  %v20175_v28 = vld [vmem:[#allocation7 + $0x2ad0] ss:$84 sps:$4 sm:$0xff]  }
 0x4b1   :  { %12919 = vmatprep.subr.bf16.mxu1 %v20129_v34  ;;  %v20178_v34 = vld [vmem:[#allocation7 + $0x2b70] ss:$84 sps:$4 sm:$0xff]  }
 0x4b3   :  { %12674 = vmatpush1.bf16.msra.mxu0 %v20124_v29  ;;  %v20180_v29 = vld [vmem:[#allocation7 + $0x2b74] ss:$84 sps:$4 sm:$0xff]  }
 0x4b4   :  { %12920 = vmatpush1.bf16.msra.mxu1 %v20127_v35  ;;  %12675 = vmatprep.subr.bf16.mxu0 %v20132_v32  ;;  %v20183_v35 = vld [vmem:[#allocation7 + $0x2b7c] ss:$84 sps:$4 sm:$0xff]   ;;  %v20181_v32 = vld [vmem:[#allocation7 + $0x2b78] ss:$84 sps:$4 sm:$0xff]  }
 0x4b5   :  { %12921 = vmatprep.subr.bf16.mxu1 %v20135_v38  ;;  %v20184_v38 = vld [vmem:[#allocation7 + $0x2c18] ss:$84 sps:$4 sm:$0xff]  }
 0x4b7   :  { %12676 = vmatpush1.bf16.msra.mxu0 %v20130_v37  ;;  %v20186_v37 = vld [vmem:[#allocation7 + $0x2c1c] ss:$84 sps:$4 sm:$0xff]  }
 0x4b8   :  { %12922 = vmatpush1.bf16.msra.mxu1 %v20133_v53  ;;  %12677 = vmatprep.subr.bf16.mxu0 %v20138_v40  ;;  %v20189_v53 = vld [vmem:[#allocation7 + $0x2c24] ss:$84 sps:$4 sm:$0xff]   ;;  %v20187_v40 = vld [vmem:[#allocation7 + $0x2c20] ss:$84 sps:$4 sm:$0xff]  }
 0x4b9   :  { %12923 = vmatprep.subr.bf16.mxu1 %v20141_v42  ;;  %v20190_v42 = vld [vmem:[#allocation7 + $0x2cc0] ss:$84 sps:$4 sm:$0xff]  }
 0x4bb   :  { %12678 = vmatpush1.bf16.msra.mxu0 %v20136_v41  ;;  %v20192_v41 = vld [vmem:[#allocation7 + $0x2cc4] ss:$84 sps:$4 sm:$0xff]  }
 0x4bc   :  { %12924 = vmatpush1.bf16.msra.mxu1 %v20139_v12  ;;  %12679 = vmatprep.subr.bf16.mxu0 %v20144_v44  ;;  %v20195_v12 = vld [vmem:[#allocation7 + $0x2ccc] ss:$84 sps:$4 sm:$0xff]   ;;  %v20193_v44 = vld [vmem:[#allocation7 + $0x2cc8] ss:$84 sps:$4 sm:$0xff]  }
 0x4bd   :  { %12925 = vmatprep.subr.bf16.mxu1 %v20147_v47  ;;  %v20201_v47 = vld [vmem:[#allocation7 + $0x2d74] ss:$84 sps:$4 sm:$0xff]  }
 0x4bf   :  { %12680 = vmatpush1.bf16.msra.mxu0 %v20142_v45  ;;  %v20198_v45 = vld [vmem:[#allocation7 + $0x2d6c] ss:$84 sps:$4 sm:$0xff]  }
 0x4c0   :  { %12926 = vmatpush1.bf16.msra.mxu1 %v20145_v54  ;;  %12681 = vmatprep.subr.bf16.mxu0 %v20150_v55  ;;  %v20196_v54 = vld [vmem:[#allocation7 + $0x2d68] ss:$84 sps:$4 sm:$0xff]   ;;  %v20199_v55 = vld [vmem:[#allocation7 + $0x2d70] ss:$84 sps:$4 sm:$0xff]  }
 0x4c1   :  { %12927 = vmatprep.subr.bf16.mxu1 %v20153_v57  ;;  %v20207_v57 = vld [vmem:[#allocation7 + $0x2e1c] ss:$84 sps:$4 sm:$0xff]  }
 0x4c3   :  { %12682 = vmatpush1.bf16.msra.mxu0 %v20148_v51  ;;  %v20204_v51 = vld [vmem:[#allocation7 + $0x2e14] ss:$84 sps:$4 sm:$0xff]  }
 0x4c4   :  { %12928 = vmatpush1.bf16.msra.mxu1 %v20151_v49  ;;  %12683 = vmatprep.subr.bf16.mxu0 %v20156_v59  ;;  %v20202_v49 = vld [vmem:[#allocation7 + $0x2e10] ss:$84 sps:$4 sm:$0xff]   ;;  %v20205_v59 = vld [vmem:[#allocation7 + $0x2e18] ss:$84 sps:$4 sm:$0xff]  }
 0x4c5   :  { %12929 = vmatprep.subr.bf16.mxu1 %v20159_v5  ;;  %v20213_v5 = vld [vmem:[#allocation7 + $0x2ec4] ss:$84 sps:$4 sm:$0xff]  }
 0x4c7   :  { %12684 = vmatpush1.bf16.msra.mxu0 %v20154_v62  ;;  %v20210_v62 = vld [vmem:[#allocation7 + $0x2ebc] ss:$84 sps:$4 sm:$0xff]  }
 0x4c8   :  { %12930 = vmatpush1.bf16.msra.mxu1 %v20157_v6  ;;  %12685 = vmatprep.subr.bf16.mxu0 %v20162_v7  ;;  %v20208_v6 = vld [vmem:[#allocation7 + $0x2eb8] ss:$84 sps:$4 sm:$0xff]   ;;  %v20211_v7 = vld [vmem:[#allocation7 + $0x2ec0] ss:$84 sps:$4 sm:$0xff]  }
 0x4c9   :  { %12931 = vmatprep.subr.bf16.mxu1 %v20165_v13  ;;  %v20219_v13 = vld [vmem:[#allocation7 + $0x2f6c] ss:$84 sps:$4 sm:$0xff]  }
 0x4cb   :  { %12686 = vmatpush1.bf16.msra.mxu0 %v20160_v8  ;;  %v20216_v8 = vld [vmem:[#allocation7 + $0x2f64] ss:$84 sps:$4 sm:$0xff]  }
 0x4cc   :  { %12932 = vmatpush1.bf16.msra.mxu1 %v20163_v15  ;;  %12696 = vmatprep.subr.bf16.mxu0 %v20168_v19  ;;  %v20214_v15 = vld [vmem:[#allocation7 + $0x2f60] ss:$84 sps:$4 sm:$0xff]   ;;  %v20217_v19 = vld [vmem:[#allocation7 + $0x2f68] ss:$84 sps:$4 sm:$0xff]  }
 0x4cd   :  { %12942 = vmatprep.subr.bf16.mxu1 %v20171_v22  ;;  %v20225_v22 = vld [vmem:[#allocation7 + $0x3014] ss:$84 sps:$4 sm:$0xff]  }
 0x4ce   :  { %12688 = vmatmul.mubr.bf16.vlgmr.msra.gmra.mrb[24].mxu0 %v22009_v46 }
 0x4cf   :  { %12934 = vmatmul.mubr.bf16.vlgmr.msra.gmra.mrb[16].mxu1 %v22009_v46  ;;  %12697 = vmatpush1.bf16.msra.mxu0 %v20166_v20  ;;  %v20222_v20 = vld [vmem:[#allocation7 + $0x300c] ss:$84 sps:$4 sm:$0xff]  }
 0x4d0   :  { %12728 = vmatprep.mubr.bf16.mxu0 %v22011_v56  ;;  %12943 = vmatpush1.bf16.msra.mxu1 %v20169_v23  ;;  %v20220_v23 = vld [vmem:[#allocation7 + $0x3008] ss:$84 sps:$4 sm:$0xff]  }
 0x4d1   :  { %12974 = vmatprep.mubr.bf16.mxu1 %v22011_v56  ;;  %12698 = vmatprep.subr.bf16.mxu0 %v20174_v25  ;;  %v20223_v25 = vld [vmem:[#allocation7 + $0x3010] ss:$84 sps:$4 sm:$0xff]  }
 0x4d2   :  { %12944 = vmatprep.subr.bf16.mxu1 %v20177_v27  ;;  %v20231_v27 = vld [vmem:[#allocation7 + $0x30bc] ss:$84 sps:$4 sm:$0xff]  }
 0x4d3   :  { %12699 = vmatpush1.bf16.msra.mxu0 %v20172_v26  ;;  %v20228_v26 = vld [vmem:[#allocation7 + $0x30b4] ss:$84 sps:$4 sm:$0xff]  }
 0x4d4   :  { %12945 = vmatpush1.bf16.msra.mxu1 %v20175_v28  ;;  %12700 = vmatprep.subr.bf16.mxu0 %v20180_v29  ;;  %v20226_v28 = vld [vmem:[#allocation7 + $0x30b0] ss:$84 sps:$4 sm:$0xff]   ;;  %v20229_v29 = vld [vmem:[#allocation7 + $0x30b8] ss:$84 sps:$4 sm:$0xff]  }
 0x4d5   :  { %12946 = vmatprep.subr.bf16.mxu1 %v20183_v35  ;;  %v20237_v35 = vld [vmem:[#allocation7 + $0x3164] ss:$84 sps:$4 sm:$0xff]  }
 0x4d7   :  { %12701 = vmatpush1.bf16.msra.mxu0 %v20178_v34  ;;  %v20234_v34 = vld [vmem:[#allocation7 + $0x315c] ss:$84 sps:$4 sm:$0xff]  }
 0x4d8   :  { %12947 = vmatpush1.bf16.msra.mxu1 %v20181_v32  ;;  %12702 = vmatprep.subr.bf16.mxu0 %v20186_v37  ;;  %v20232_v32 = vld [vmem:[#allocation7 + $0x3158] ss:$84 sps:$4 sm:$0xff]   ;;  %v20235_v37 = vld [vmem:[#allocation7 + $0x3160] ss:$84 sps:$4 sm:$0xff]  }
 0x4d9   :  { %12948 = vmatprep.subr.bf16.mxu1 %v20189_v53  ;;  %v20243_v53 = vld [vmem:[#allocation7 + $0x320c] ss:$84 sps:$4 sm:$0xff]  }
 0x4db   :  { %12703 = vmatpush1.bf16.msra.mxu0 %v20184_v38  ;;  %v20240_v38 = vld [vmem:[#allocation7 + $0x3204] ss:$84 sps:$4 sm:$0xff]  }
 0x4dc   :  { %12949 = vmatpush1.bf16.msra.mxu1 %v20187_v40  ;;  %12704 = vmatprep.subr.bf16.mxu0 %v20192_v41  ;;  %v20238_v40 = vld [vmem:[#allocation7 + $0x3200] ss:$84 sps:$4 sm:$0xff]   ;;  %v20241_v41 = vld [vmem:[#allocation7 + $0x3208] ss:$84 sps:$4 sm:$0xff]  }
 0x4dd   :  { %12950 = vmatprep.subr.bf16.mxu1 %v20195_v12  ;;  %v20249_v12 = vld [vmem:[#allocation7 + $0x32b4] ss:$84 sps:$4 sm:$0xff]  }
 0x4df   :  { %12705 = vmatpush1.bf16.msra.mxu0 %v20190_v42  ;;  %v20246_v42 = vld [vmem:[#allocation7 + $0x32ac] ss:$84 sps:$4 sm:$0xff]  }
 0x4e0   :  { %12951 = vmatpush1.bf16.msra.mxu1 %v20193_v44  ;;  %12706 = vmatprep.subr.bf16.mxu0 %v20198_v45  ;;  %v20244_v44 = vld [vmem:[#allocation7 + $0x32a8] ss:$84 sps:$4 sm:$0xff]   ;;  %v20247_v45 = vld [vmem:[#allocation7 + $0x32b0] ss:$84 sps:$4 sm:$0xff]  }
 0x4e1   :  { %12952 = vmatprep.subr.bf16.mxu1 %v20201_v47  ;;  %v20252_v47 = vld [vmem:[#allocation7 + $0x3354] ss:$84 sps:$4 sm:$0xff]  }
 0x4e3   :  { %12707 = vmatpush1.bf16.msra.mxu0 %v20196_v54  ;;  %v20255_v54 = vld [vmem:[#allocation7 + $0x335c] ss:$84 sps:$4 sm:$0xff]  }
 0x4e4   :  { %12953 = vmatpush1.bf16.msra.mxu1 %v20199_v55  ;;  %12708 = vmatprep.subr.bf16.mxu0 %v20204_v51  ;;  %v20250_v55 = vld [vmem:[#allocation7 + $0x3350] ss:$84 sps:$4 sm:$0xff]   ;;  %v20253_v51 = vld [vmem:[#allocation7 + $0x3358] ss:$84 sps:$4 sm:$0xff]  }
 0x4e5   :  { %12954 = vmatprep.subr.bf16.mxu1 %v20207_v57  ;;  %v20258_v57 = vld [vmem:[#allocation7 + $0x33fc] ss:$84 sps:$4 sm:$0xff]  }
 0x4e7   :  { %12709 = vmatpush1.bf16.msra.mxu0 %v20202_v49  ;;  %v20261_v49 = vld [vmem:[#allocation7 + $0x3404] ss:$84 sps:$4 sm:$0xff]  }
 0x4e8   :  { %12955 = vmatpush1.bf16.msra.mxu1 %v20205_v59  ;;  %12710 = vmatprep.subr.bf16.mxu0 %v20210_v62  ;;  %v20256_v59 = vld [vmem:[#allocation7 + $0x33f8] ss:$84 sps:$4 sm:$0xff]   ;;  %v20259_v62 = vld [vmem:[#allocation7 + $0x3400] ss:$84 sps:$4 sm:$0xff]  }
 0x4e9   :  { %12956 = vmatprep.subr.bf16.mxu1 %v20213_v5  ;;  %v20264_v5 = vld [vmem:[#allocation7 + $0x34a4] ss:$84 sps:$4 sm:$0xff]  }
 0x4eb   :  { %12711 = vmatpush1.bf16.msra.mxu0 %v20208_v6  ;;  %v20267_v6 = vld [vmem:[#allocation7 + $0x34ac] ss:$84 sps:$4 sm:$0xff]  }
 0x4ec   :  { %12957 = vmatpush1.bf16.msra.mxu1 %v20211_v7  ;;  %12712 = vmatprep.subr.bf16.mxu0 %v20216_v8  ;;  %v20262_v7 = vld [vmem:[#allocation7 + $0x34a0] ss:$84 sps:$4 sm:$0xff]   ;;  %v20265_v8 = vld [vmem:[#allocation7 + $0x34a8] ss:$84 sps:$4 sm:$0xff]  }
 0x4ed   :  { %12958 = vmatprep.subr.bf16.mxu1 %v20219_v13  ;;  %v20270_v13 = vld [vmem:[#allocation7 + $0x354c] ss:$84 sps:$4 sm:$0xff]  }
 0x4ef   :  { %12713 = vmatpush1.bf16.msra.mxu0 %v20214_v15  ;;  %v20273_v15 = vld [vmem:[#allocation7 + $0x3554] ss:$84 sps:$4 sm:$0xff]  }
 0x4f0   :  { %12959 = vmatpush1.bf16.msra.mxu1 %v20217_v19  ;;  %12714 = vmatprep.subr.bf16.mxu0 %v20222_v20  ;;  %v20268_v19 = vld [vmem:[#allocation7 + $0x3548] ss:$84 sps:$4 sm:$0xff]   ;;  %v20271_v20 = vld [vmem:[#allocation7 + $0x3550] ss:$84 sps:$4 sm:$0xff]  }
 0x4f1   :  { %12960 = vmatprep.subr.bf16.mxu1 %v20225_v22  ;;  %v20276_v22 = vld [vmem:[#allocation7 + $0x35f4] ss:$84 sps:$4 sm:$0xff]  }
 0x4f3   :  { %12715 = vmatpush1.bf16.msra.mxu0 %v20220_v23  ;;  %v20279_v23 = vld [vmem:[#allocation7 + $0x35fc] ss:$84 sps:$4 sm:$0xff]  }
 0x4f4   :  { %12961 = vmatpush1.bf16.msra.mxu1 %v20223_v25  ;;  %12716 = vmatprep.subr.bf16.mxu0 %v20228_v26  ;;  %v20274_v25 = vld [vmem:[#allocation7 + $0x35f0] ss:$84 sps:$4 sm:$0xff]   ;;  %v20277_v26 = vld [vmem:[#allocation7 + $0x35f8] ss:$84 sps:$4 sm:$0xff]  }
 0x4f5   :  { %12962 = vmatprep.subr.bf16.mxu1 %v20231_v27  ;;  %v20282_v27 = vld [vmem:[#allocation7 + $0x369c] ss:$84 sps:$4 sm:$0xff]  }
 0x4f7   :  { %12717 = vmatpush1.bf16.msra.mxu0 %v20226_v28  ;;  %v20285_v28 = vld [vmem:[#allocation7 + $0x36a4] ss:$84 sps:$4 sm:$0xff]  }
 0x4f8   :  { %12963 = vmatpush1.bf16.msra.mxu1 %v20229_v29  ;;  %12718 = vmatprep.subr.bf16.mxu0 %v20234_v34  ;;  %v20280_v29 = vld [vmem:[#allocation7 + $0x3698] ss:$84 sps:$4 sm:$0xff]   ;;  %v20283_v34 = vld [vmem:[#allocation7 + $0x36a0] ss:$84 sps:$4 sm:$0xff]  }
 0x4f9   :  { %12964 = vmatprep.subr.bf16.mxu1 %v20237_v35  ;;  %v20288_v35 = vld [vmem:[#allocation7 + $0x34] ss:$84 sps:$4 sm:$0xff]  }
 0x4fb   :  { %12719 = vmatpush1.bf16.msra.mxu0 %v20232_v32  ;;  %v20291_v32 = vld [vmem:[#allocation7 + $0x3c] ss:$84 sps:$4 sm:$0xff]  }
 0x4fc   :  { %12965 = vmatpush1.bf16.msra.mxu1 %v20235_v37  ;;  %12720 = vmatprep.subr.bf16.mxu0 %v20240_v38  ;;  %v20286_v37 = vld [vmem:[#allocation7 + $0x30] ss:$84 sps:$4 sm:$0xff]   ;;  %v20289_v38 = vld [vmem:[#allocation7 + $0x38] ss:$84 sps:$4 sm:$0xff]  }
 0x4fd   :  { %12966 = vmatprep.subr.bf16.mxu1 %v20243_v53  ;;  %v20294_v53 = vld [vmem:[#allocation7 + $0xdc] ss:$84 sps:$4 sm:$0xff]  }
 0x4ff   :  { %12721 = vmatpush1.bf16.msra.mxu0 %v20238_v40  ;;  %v20297_v40 = vld [vmem:[#allocation7 + $0xe4] ss:$84 sps:$4 sm:$0xff]  }
 0x500   :  { %12967 = vmatpush1.bf16.msra.mxu1 %v20241_v41  ;;  %12722 = vmatprep.subr.bf16.mxu0 %v20246_v42  ;;  %v20292_v41 = vld [vmem:[#allocation7 + $0xd8] ss:$84 sps:$4 sm:$0xff]   ;;  %v20295_v42 = vld [vmem:[#allocation7 + $0xe0] ss:$84 sps:$4 sm:$0xff]  }
 0x501   :  { %12968 = vmatprep.subr.bf16.mxu1 %v20249_v12  ;;  %v20300_v12 = vld [vmem:[#allocation7 + $0x184] ss:$84 sps:$4 sm:$0xff]  }
 0x503   :  { %12723 = vmatpush1.bf16.msra.mxu0 %v20244_v44  ;;  %v20303_v44 = vld [vmem:[#allocation7 + $0x18c] ss:$84 sps:$4 sm:$0xff]  }
 0x504   :  { %12969 = vmatpush1.bf16.msra.mxu1 %v20247_v45  ;;  %12724 = vmatprep.subr.bf16.mxu0 %v20252_v47  ;;  %v20298_v45 = vld [vmem:[#allocation7 + $0x180] ss:$84 sps:$4 sm:$0xff]   ;;  %v20301_v47 = vld [vmem:[#allocation7 + $0x188] ss:$84 sps:$4 sm:$0xff]  }
 0x505   :  { %12970 = vmatprep.subr.bf16.mxu1 %v20255_v54  ;;  %v20306_v54 = vld [vmem:[#allocation7 + $0x22c] ss:$84 sps:$4 sm:$0xff]  }
 0x507   :  { %12725 = vmatpush1.bf16.msra.mxu0 %v20250_v55  ;;  %v20309_v55 = vld [vmem:[#allocation7 + $0x234] ss:$84 sps:$4 sm:$0xff]  }
 0x508   :  { %12971 = vmatpush1.bf16.msra.mxu1 %v20253_v51  ;;  %12726 = vmatprep.subr.bf16.mxu0 %v20258_v57  ;;  %v20304_v51 = vld [vmem:[#allocation7 + $0x228] ss:$84 sps:$4 sm:$0xff]   ;;  %v20307_v57 = vld [vmem:[#allocation7 + $0x230] ss:$84 sps:$4 sm:$0xff]  }
 0x509   :  { %12972 = vmatprep.subr.bf16.mxu1 %v20261_v49  ;;  %v20312_v49 = vld [vmem:[#allocation7 + $0x2d4] ss:$84 sps:$4 sm:$0xff]  }
 0x50b   :  { %12727 = vmatpush1.bf16.msra.mxu0 %v20256_v59  ;;  %v20315_v59 = vld [vmem:[#allocation7 + $0x2dc] ss:$84 sps:$4 sm:$0xff]  }
 0x50c   :  { %12973 = vmatpush1.bf16.msra.mxu1 %v20259_v62  ;;  %12737 = vmatprep.subr.bf16.mxu0 %v20264_v5  ;;  %v20310_v62 = vld [vmem:[#allocation7 + $0x2d0] ss:$84 sps:$4 sm:$0xff]   ;;  %v20313_v5 = vld [vmem:[#allocation7 + $0x2d8] ss:$84 sps:$4 sm:$0xff]  }
 0x50d   :  { %12983 = vmatprep.subr.bf16.mxu1 %v20267_v6  ;;  %v20318_v6 = vld [vmem:[#allocation7 + $0x37c] ss:$84 sps:$4 sm:$0xff]  }
 0x50e   :  { %12729 = vmatmul.mubr.bf16.vlgmr.msra.gmra.mrb[24].mxu0 %v22020_v48 }
 0x50f   :  { %12975 = vmatmul.mubr.bf16.vlgmr.msra.gmra.mrb[16].mxu1 %v22020_v48  ;;  %12738 = vmatpush1.bf16.msra.mxu0 %v20262_v7  ;;  %v20321_v7 = vld [vmem:[#allocation7 + $0x384] ss:$84 sps:$4 sm:$0xff]  }
 0x510   :  { %12984 = vmatpush1.bf16.msra.mxu1 %v20265_v8  ;;  %12739 = vmatprep.subr.bf16.mxu0 %v20270_v13  ;;  %v20316_v8 = vld [vmem:[#allocation7 + $0x378] ss:$84 sps:$4 sm:$0xff]   ;;  %v20319_v13 = vld [vmem:[#allocation7 + $0x380] ss:$84 sps:$4 sm:$0xff]  }
 0x511   :  { %12985 = vmatprep.subr.bf16.mxu1 %v20273_v15  ;;  %12769 = vmatprep.mubr.bf16.mxu0 %v21723_v1  ;;  %v20324_v15 = vld [vmem:[#allocation7 + $0x424] ss:$84 sps:$4 sm:$0xff]  }
 0x512   :  { %13015 = vmatprep.mubr.bf16.mxu1 %v21723_v1 }
 0x513   :  { %12740 = vmatpush1.bf16.msra.mxu0 %v20268_v19  ;;  %v20327_v19 = vld [vmem:[#allocation7 + $0x42c] ss:$84 sps:$4 sm:$0xff]  }
 0x514   :  { %12986 = vmatpush1.bf16.msra.mxu1 %v20271_v20  ;;  %12741 = vmatprep.subr.bf16.mxu0 %v20276_v22  ;;  %v20322_v20 = vld [vmem:[#allocation7 + $0x420] ss:$84 sps:$4 sm:$0xff]   ;;  %v20325_v22 = vld [vmem:[#allocation7 + $0x428] ss:$84 sps:$4 sm:$0xff]  }
 0x515   :  { %12987 = vmatprep.subr.bf16.mxu1 %v20279_v23  ;;  %v20330_v23 = vld [vmem:[#allocation7 + $0x4cc] ss:$84 sps:$4 sm:$0xff]  }
 0x517   :  { %12742 = vmatpush1.bf16.msra.mxu0 %v20274_v25  ;;  %v20333_v25 = vld [vmem:[#allocation7 + $0x4d4] ss:$84 sps:$4 sm:$0xff]  }
 0x518   :  { %12988 = vmatpush1.bf16.msra.mxu1 %v20277_v26  ;;  %12743 = vmatprep.subr.bf16.mxu0 %v20282_v27  ;;  %v20328_v26 = vld [vmem:[#allocation7 + $0x4c8] ss:$84 sps:$4 sm:$0xff]   ;;  %v20331_v27 = vld [vmem:[#allocation7 + $0x4d0] ss:$84 sps:$4 sm:$0xff]  }
 0x519   :  { %12989 = vmatprep.subr.bf16.mxu1 %v20285_v28  ;;  %v20336_v28 = vld [vmem:[#allocation7 + $0x574] ss:$84 sps:$4 sm:$0xff]  }
 0x51b   :  { %12744 = vmatpush1.bf16.msra.mxu0 %v20280_v29  ;;  %v20339_v29 = vld [vmem:[#allocation7 + $0x57c] ss:$84 sps:$4 sm:$0xff]  }
 0x51c   :  { %12990 = vmatpush1.bf16.msra.mxu1 %v20283_v34  ;;  %13024 = vmatprep.subr.bf16.mxu0 %v20288_v35  ;;  %v20334_v34 = vld [vmem:[#allocation7 + $0x570] ss:$84 sps:$4 sm:$0xff]   ;;  %v20337_v35 = vld [vmem:[#allocation7 + $0x578] ss:$84 sps:$4 sm:$0xff]  }
 0x51d   :  { %13270 = vmatprep.subr.bf16.mxu1 %v20291_v32  ;;  %v20342_v32 = vld [vmem:[#allocation7 + $0x61c] ss:$84 sps:$4 sm:$0xff]  }
 0x51e   :  { %17922 = vmatmul.mubr.msk.bf16.vlgmr.msra.gmra.mrb[24].mxu0 %vm11544_vm3, %v22027_v17 }
 0x51f   :  { %17923 = vmatmul.mubr.msk.bf16.vlgmr.msra.gmra.mrb[16].mxu1 %vm11544_vm3, %v22027_v17  ;;  %13025 = vmatpush1.bf16.msra.mxu0 %v20286_v37  ;;  %v20345_v37 = vld [vmem:[#allocation7 + $0x624] ss:$84 sps:$4 sm:$0xff]  }
 0x520   :  { %13056 = vmatprep.mubr.bf16.mxu0 %v21922_v2  ;;  %13271 = vmatpush1.bf16.msra.mxu1 %v20289_v38  ;;  %v20340_v38 = vld [vmem:[#allocation7 + $0x618] ss:$84 sps:$4 sm:$0xff]  }
 0x521   :  { %13302 = vmatprep.mubr.bf16.mxu1 %v21922_v2  ;;  %13026 = vmatprep.subr.bf16.mxu0 %v20294_v53  ;;  %v20343_v53 = vld [vmem:[#allocation7 + $0x620] ss:$84 sps:$4 sm:$0xff]  }
 0x522   :  { %13272 = vmatprep.subr.bf16.mxu1 %v20297_v40  ;;  %v20348_v40 = vld [vmem:[#allocation7 + $0x6c4] ss:$84 sps:$4 sm:$0xff]  }
 0x523   :  { %13027 = vmatpush1.bf16.msra.mxu0 %v20292_v41  ;;  %v20351_v41 = vld [vmem:[#allocation7 + $0x6cc] ss:$84 sps:$4 sm:$0xff]  }
 0x524   :  { %13273 = vmatpush1.bf16.msra.mxu1 %v20295_v42  ;;  %13028 = vmatprep.subr.bf16.mxu0 %v20300_v12  ;;  %v20346_v42 = vld [vmem:[#allocation7 + $0x6c0] ss:$84 sps:$4 sm:$0xff]   ;;  %v20349_v12 = vld [vmem:[#allocation7 + $0x6c8] ss:$84 sps:$4 sm:$0xff]  }
 0x525   :  { %13274 = vmatprep.subr.bf16.mxu1 %v20303_v44  ;;  %v20354_v44 = vld [vmem:[#allocation7 + $0x76c] ss:$84 sps:$4 sm:$0xff]  }
 0x527   :  { %13029 = vmatpush1.bf16.msra.mxu0 %v20298_v45  ;;  %v20357_v45 = vld [vmem:[#allocation7 + $0x774] ss:$84 sps:$4 sm:$0xff]  }
 0x528   :  { %13275 = vmatpush1.bf16.msra.mxu1 %v20301_v47  ;;  %13030 = vmatprep.subr.bf16.mxu0 %v20306_v54  ;;  %v20352_v47 = vld [vmem:[#allocation7 + $0x768] ss:$84 sps:$4 sm:$0xff]   ;;  %v20355_v54 = vld [vmem:[#allocation7 + $0x770] ss:$84 sps:$4 sm:$0xff]  }
 0x529   :  { %13276 = vmatprep.subr.bf16.mxu1 %v20309_v55  ;;  %v20360_v55 = vld [vmem:[#allocation7 + $0x814] ss:$84 sps:$4 sm:$0xff]  }
 0x52b   :  { %13031 = vmatpush1.bf16.msra.mxu0 %v20304_v51  ;;  %v20363_v51 = vld [vmem:[#allocation7 + $0x81c] ss:$84 sps:$4 sm:$0xff]  }
 0x52c   :  { %13277 = vmatpush1.bf16.msra.mxu1 %v20307_v57  ;;  %13032 = vmatprep.subr.bf16.mxu0 %v20312_v49  ;;  %v20358_v57 = vld [vmem:[#allocation7 + $0x810] ss:$84 sps:$4 sm:$0xff]   ;;  %v20361_v49 = vld [vmem:[#allocation7 + $0x818] ss:$84 sps:$4 sm:$0xff]  }
 0x52d   :  { %13278 = vmatprep.subr.bf16.mxu1 %v20315_v59  ;;  %v20366_v59 = vld [vmem:[#allocation7 + $0x8bc] ss:$84 sps:$4 sm:$0xff]  }
 0x52f   :  { %13033 = vmatpush1.bf16.msra.mxu0 %v20310_v62  ;;  %v20369_v62 = vld [vmem:[#allocation7 + $0x8c4] ss:$84 sps:$4 sm:$0xff]  }
 0x530   :  { %13279 = vmatpush1.bf16.msra.mxu1 %v20313_v5  ;;  %13034 = vmatprep.subr.bf16.mxu0 %v20318_v6  ;;  %v20364_v5 = vld [vmem:[#allocation7 + $0x8b8] ss:$84 sps:$4 sm:$0xff]   ;;  %v20367_v6 = vld [vmem:[#allocation7 + $0x8c0] ss:$84 sps:$4 sm:$0xff]  }
 0x531   :  { %13280 = vmatprep.subr.bf16.mxu1 %v20321_v7  ;;  %v20372_v7 = vld [vmem:[#allocation7 + $0x964] ss:$84 sps:$4 sm:$0xff]  }
 0x533   :  { %13035 = vmatpush1.bf16.msra.mxu0 %v20316_v8  ;;  %v20375_v8 = vld [vmem:[#allocation7 + $0x96c] ss:$84 sps:$4 sm:$0xff]  }
 0x534   :  { %13281 = vmatpush1.bf16.msra.mxu1 %v20319_v13  ;;  %13036 = vmatprep.subr.bf16.mxu0 %v20324_v15  ;;  %v20370_v13 = vld [vmem:[#allocation7 + $0x960] ss:$84 sps:$4 sm:$0xff]   ;;  %v20373_v15 = vld [vmem:[#allocation7 + $0x968] ss:$84 sps:$4 sm:$0xff]  }
 0x535   :  { %13282 = vmatprep.subr.bf16.mxu1 %v20327_v19  ;;  %v20378_v19 = vld [vmem:[#allocation7 + $0xa0c] ss:$84 sps:$4 sm:$0xff]  }
 0x537   :  { %13037 = vmatpush1.bf16.msra.mxu0 %v20322_v20  ;;  %v20381_v20 = vld [vmem:[#allocation7 + $0xa14] ss:$84 sps:$4 sm:$0xff]  }
 0x538   :  { %13283 = vmatpush1.bf16.msra.mxu1 %v20325_v22  ;;  %13038 = vmatprep.subr.bf16.mxu0 %v20330_v23  ;;  %v20376_v22 = vld [vmem:[#allocation7 + $0xa08] ss:$84 sps:$4 sm:$0xff]   ;;  %v20379_v23 = vld [vmem:[#allocation7 + $0xa10] ss:$84 sps:$4 sm:$0xff]  }
 0x539   :  { %13284 = vmatprep.subr.bf16.mxu1 %v20333_v25  ;;  %v20384_v25 = vld [vmem:[#allocation7 + $0xab4] ss:$84 sps:$4 sm:$0xff]  }
 0x53b   :  { %13039 = vmatpush1.bf16.msra.mxu0 %v20328_v26  ;;  %v20387_v26 = vld [vmem:[#allocation7 + $0xabc] ss:$84 sps:$4 sm:$0xff]  }
 0x53c   :  { %13285 = vmatpush1.bf16.msra.mxu1 %v20331_v27  ;;  %13040 = vmatprep.subr.bf16.mxu0 %v20336_v28  ;;  %v20382_v27 = vld [vmem:[#allocation7 + $0xab0] ss:$84 sps:$4 sm:$0xff]   ;;  %v20385_v28 = vld [vmem:[#allocation7 + $0xab8] ss:$84 sps:$4 sm:$0xff]  }
 0x53d   :  { %13286 = vmatprep.subr.bf16.mxu1 %v20339_v29  ;;  %v20390_v29 = vld [vmem:[#allocation7 + $0xb5c] ss:$84 sps:$4 sm:$0xff]  }
 0x53f   :  { %13041 = vmatpush1.bf16.msra.mxu0 %v20334_v34  ;;  %v20393_v34 = vld [vmem:[#allocation7 + $0xb64] ss:$84 sps:$4 sm:$0xff]  }
 0x540   :  { %13287 = vmatpush1.bf16.msra.mxu1 %v20337_v35  ;;  %13042 = vmatprep.subr.bf16.mxu0 %v20342_v32  ;;  %v20388_v35 = vld [vmem:[#allocation7 + $0xb58] ss:$84 sps:$4 sm:$0xff]   ;;  %v20391_v32 = vld [vmem:[#allocation7 + $0xb60] ss:$84 sps:$4 sm:$0xff]  }
 0x541   :  { %13288 = vmatprep.subr.bf16.mxu1 %v20345_v37  ;;  %v20396_v37 = vld [vmem:[#allocation7 + $0xc04] ss:$84 sps:$4 sm:$0xff]  }
 0x543   :  { %13043 = vmatpush1.bf16.msra.mxu0 %v20340_v38  ;;  %v20399_v38 = vld [vmem:[#allocation7 + $0xc0c] ss:$84 sps:$4 sm:$0xff]  }
 0x544   :  { %13289 = vmatpush1.bf16.msra.mxu1 %v20343_v53  ;;  %13044 = vmatprep.subr.bf16.mxu0 %v20348_v40  ;;  %v20394_v53 = vld [vmem:[#allocation7 + $0xc00] ss:$84 sps:$4 sm:$0xff]   ;;  %v20397_v40 = vld [vmem:[#allocation7 + $0xc08] ss:$84 sps:$4 sm:$0xff]  }
 0x545   :  { %13290 = vmatprep.subr.bf16.mxu1 %v20351_v41  ;;  %v20402_v41 = vld [vmem:[#allocation7 + $0xcac] ss:$84 sps:$4 sm:$0xff]  }
 0x547   :  { %13045 = vmatpush1.bf16.msra.mxu0 %v20346_v42  ;;  %v20405_v42 = vld [vmem:[#allocation7 + $0xcb4] ss:$84 sps:$4 sm:$0xff]  }
 0x548   :  { %13291 = vmatpush1.bf16.msra.mxu1 %v20349_v12  ;;  %13046 = vmatprep.subr.bf16.mxu0 %v20354_v44  ;;  %v20400_v12 = vld [vmem:[#allocation7 + $0xca8] ss:$84 sps:$4 sm:$0xff]   ;;  %v20403_v44 = vld [vmem:[#allocation7 + $0xcb0] ss:$84 sps:$4 sm:$0xff]  }
 0x549   :  { %13292 = vmatprep.subr.bf16.mxu1 %v20357_v45  ;;  %v20408_v45 = vld [vmem:[#allocation7 + $0xd54] ss:$84 sps:$4 sm:$0xff]  }
 0x54b   :  { %13047 = vmatpush1.bf16.msra.mxu0 %v20352_v47  ;;  %v20411_v47 = vld [vmem:[#allocation7 + $0xd5c] ss:$84 sps:$4 sm:$0xff]  }
 0x54c   :  { %13293 = vmatpush1.bf16.msra.mxu1 %v20355_v54  ;;  %13048 = vmatprep.subr.bf16.mxu0 %v20360_v55  ;;  %v20406_v54 = vld [vmem:[#allocation7 + $0xd50] ss:$84 sps:$4 sm:$0xff]   ;;  %v20409_v55 = vld [vmem:[#allocation7 + $0xd58] ss:$84 sps:$4 sm:$0xff]  }
 0x54d   :  { %13294 = vmatprep.subr.bf16.mxu1 %v20363_v51  ;;  %v20414_v51 = vld [vmem:[#allocation7 + $0xdfc] ss:$84 sps:$4 sm:$0xff]  }
 0x54f   :  { %13049 = vmatpush1.bf16.msra.mxu0 %v20358_v57  ;;  %v20417_v57 = vld [vmem:[#allocation7 + $0xe04] ss:$84 sps:$4 sm:$0xff]  }
 0x550   :  { %13295 = vmatpush1.bf16.msra.mxu1 %v20361_v49  ;;  %13050 = vmatprep.subr.bf16.mxu0 %v20366_v59  ;;  %v20412_v49 = vld [vmem:[#allocation7 + $0xdf8] ss:$84 sps:$4 sm:$0xff]   ;;  %v20415_v59 = vld [vmem:[#allocation7 + $0xe00] ss:$84 sps:$4 sm:$0xff]  }
 0x551   :  { %13296 = vmatprep.subr.bf16.mxu1 %v20369_v62  ;;  %v20420_v62 = vld [vmem:[#allocation7 + $0xea4] ss:$84 sps:$4 sm:$0xff]  }
 0x553   :  { %13051 = vmatpush1.bf16.msra.mxu0 %v20364_v5  ;;  %v20423_v5 = vld [vmem:[#allocation7 + $0xeac] ss:$84 sps:$4 sm:$0xff]  }
 0x554   :  { %13297 = vmatpush1.bf16.msra.mxu1 %v20367_v6  ;;  %13052 = vmatprep.subr.bf16.mxu0 %v20372_v7  ;;  %v20418_v6 = vld [vmem:[#allocation7 + $0xea0] ss:$84 sps:$4 sm:$0xff]   ;;  %v20421_v7 = vld [vmem:[#allocation7 + $0xea8] ss:$84 sps:$4 sm:$0xff]  }
 0x555   :  { %13298 = vmatprep.subr.bf16.mxu1 %v20375_v8  ;;  %v20426_v8 = vld [vmem:[#allocation7 + $0xf4c] ss:$84 sps:$4 sm:$0xff]  }
 0x557   :  { %13053 = vmatpush1.bf16.msra.mxu0 %v20370_v13  ;;  %v20429_v13 = vld [vmem:[#allocation7 + $0xf54] ss:$84 sps:$4 sm:$0xff]  }
 0x558   :  { %13299 = vmatpush1.bf16.msra.mxu1 %v20373_v15  ;;  %13054 = vmatprep.subr.bf16.mxu0 %v20378_v19  ;;  %v20424_v15 = vld [vmem:[#allocation7 + $0xf48] ss:$84 sps:$4 sm:$0xff]   ;;  %v20427_v19 = vld [vmem:[#allocation7 + $0xf50] ss:$84 sps:$4 sm:$0xff]  }
 0x559   :  { %13300 = vmatprep.subr.bf16.mxu1 %v20381_v20  ;;  %v20432_v20 = vld [vmem:[#allocation7 + $0xff4] ss:$84 sps:$4 sm:$0xff]  }
 0x55b   :  { %13055 = vmatpush1.bf16.msra.mxu0 %v20376_v22  ;;  %v20435_v22 = vld [vmem:[#allocation7 + $0xffc] ss:$84 sps:$4 sm:$0xff]  }
 0x55c   :  { %13301 = vmatpush1.bf16.msra.mxu1 %v20379_v23  ;;  %13065 = vmatprep.subr.bf16.mxu0 %v20384_v25  ;;  %v20430_v23 = vld [vmem:[#allocation7 + $0xff0] ss:$84 sps:$4 sm:$0xff]   ;;  %v20433_v25 = vld [vmem:[#allocation7 + $0xff8] ss:$84 sps:$4 sm:$0xff]  }
 0x55d   :  { %13311 = vmatprep.subr.bf16.mxu1 %v20387_v26  ;;  %v20438_v26 = vld [vmem:[#allocation7 + $0x109c] ss:$84 sps:$4 sm:$0xff]  }
 0x55e   :  { %13057 = vmatmul.mubr.bf16.vlgmr.msra.gmra.mrb[28].mxu0 %v21927_v4 }
 0x55f   :  { %13303 = vmatmul.mubr.bf16.vlgmr.msra.gmra.mrb[20].mxu1 %v21927_v4  ;;  %13066 = vmatpush1.bf16.msra.mxu0 %v20382_v27  ;;  %v20441_v27 = vld [vmem:[#allocation7 + $0x10a4] ss:$84 sps:$4 sm:$0xff]  }
 0x560   :  { %13097 = vmatprep.mubr.bf16.mxu0 %v21937_v24  ;;  %13312 = vmatpush1.bf16.msra.mxu1 %v20385_v28  ;;  %v20436_v28 = vld [vmem:[#allocation7 + $0x1098] ss:$84 sps:$4 sm:$0xff]  }
 0x561   :  { %13343 = vmatprep.mubr.bf16.mxu1 %v21937_v24  ;;  %13067 = vmatprep.subr.bf16.mxu0 %v20390_v29  ;;  %v20439_v29 = vld [vmem:[#allocation7 + $0x10a0] ss:$84 sps:$4 sm:$0xff]  }
 0x562   :  { %13313 = vmatprep.subr.bf16.mxu1 %v20393_v34  ;;  %v20444_v34 = vld [vmem:[#allocation7 + $0x1144] ss:$84 sps:$4 sm:$0xff]  }
 0x563   :  { %13068 = vmatpush1.bf16.msra.mxu0 %v20388_v35  ;;  %v20447_v35 = vld [vmem:[#allocation7 + $0x114c] ss:$84 sps:$4 sm:$0xff]  }
 0x564   :  { %13314 = vmatpush1.bf16.msra.mxu1 %v20391_v32  ;;  %13069 = vmatprep.subr.bf16.mxu0 %v20396_v37  ;;  %v20442_v32 = vld [vmem:[#allocation7 + $0x1140] ss:$84 sps:$4 sm:$0xff]   ;;  %v20445_v37 = vld [vmem:[#allocation7 + $0x1148] ss:$84 sps:$4 sm:$0xff]  }
 0x565   :  { %13315 = vmatprep.subr.bf16.mxu1 %v20399_v38  ;;  %v20450_v38 = vld [vmem:[#allocation7 + $0x11ec] ss:$84 sps:$4 sm:$0xff]  }
 0x567   :  { %13070 = vmatpush1.bf16.msra.mxu0 %v20394_v53  ;;  %v20453_v53 = vld [vmem:[#allocation7 + $0x11f4] ss:$84 sps:$4 sm:$0xff]  }
 0x568   :  { %13316 = vmatpush1.bf16.msra.mxu1 %v20397_v40  ;;  %13071 = vmatprep.subr.bf16.mxu0 %v20402_v41  ;;  %v20448_v40 = vld [vmem:[#allocation7 + $0x11e8] ss:$84 sps:$4 sm:$0xff]   ;;  %v20451_v41 = vld [vmem:[#allocation7 + $0x11f0] ss:$84 sps:$4 sm:$0xff]  }
 0x569   :  { %13317 = vmatprep.subr.bf16.mxu1 %v20405_v42  ;;  %v20456_v42 = vld [vmem:[#allocation7 + $0x1294] ss:$84 sps:$4 sm:$0xff]  }
 0x56b   :  { %13072 = vmatpush1.bf16.msra.mxu0 %v20400_v12  ;;  %v20459_v12 = vld [vmem:[#allocation7 + $0x129c] ss:$84 sps:$4 sm:$0xff]  }
 0x56c   :  { %13318 = vmatpush1.bf16.msra.mxu1 %v20403_v44  ;;  %13073 = vmatprep.subr.bf16.mxu0 %v20408_v45  ;;  %v20454_v44 = vld [vmem:[#allocation7 + $0x1290] ss:$84 sps:$4 sm:$0xff]   ;;  %v20457_v45 = vld [vmem:[#allocation7 + $0x1298] ss:$84 sps:$4 sm:$0xff]  }
 0x56d   :  { %13319 = vmatprep.subr.bf16.mxu1 %v20411_v47  ;;  %v20462_v47 = vld [vmem:[#allocation7 + $0x133c] ss:$84 sps:$4 sm:$0xff]  }
 0x56f   :  { %13074 = vmatpush1.bf16.msra.mxu0 %v20406_v54  ;;  %v20465_v54 = vld [vmem:[#allocation7 + $0x1344] ss:$84 sps:$4 sm:$0xff]  }
 0x570   :  { %13320 = vmatpush1.bf16.msra.mxu1 %v20409_v55  ;;  %13075 = vmatprep.subr.bf16.mxu0 %v20414_v51  ;;  %v20460_v55 = vld [vmem:[#allocation7 + $0x1338] ss:$84 sps:$4 sm:$0xff]   ;;  %v20463_v51 = vld [vmem:[#allocation7 + $0x1340] ss:$84 sps:$4 sm:$0xff]  }
 0x571   :  { %13321 = vmatprep.subr.bf16.mxu1 %v20417_v57  ;;  %v20468_v57 = vld [vmem:[#allocation7 + $0x13e4] ss:$84 sps:$4 sm:$0xff]  }
 0x573   :  { %13076 = vmatpush1.bf16.msra.mxu0 %v20412_v49  ;;  %v20471_v49 = vld [vmem:[#allocation7 + $0x13ec] ss:$84 sps:$4 sm:$0xff]  }
 0x574   :  { %13322 = vmatpush1.bf16.msra.mxu1 %v20415_v59  ;;  %13077 = vmatprep.subr.bf16.mxu0 %v20420_v62  ;;  %v20466_v59 = vld [vmem:[#allocation7 + $0x13e0] ss:$84 sps:$4 sm:$0xff]   ;;  %v20469_v62 = vld [vmem:[#allocation7 + $0x13e8] ss:$84 sps:$4 sm:$0xff]  }
 0x575   :  { %13323 = vmatprep.subr.bf16.mxu1 %v20423_v5  ;;  %v20474_v5 = vld [vmem:[#allocation7 + $0x148c] ss:$84 sps:$4 sm:$0xff]  }
 0x577   :  { %13078 = vmatpush1.bf16.msra.mxu0 %v20418_v6  ;;  %v20477_v6 = vld [vmem:[#allocation7 + $0x1494] ss:$84 sps:$4 sm:$0xff]  }
 0x578   :  { %13324 = vmatpush1.bf16.msra.mxu1 %v20421_v7  ;;  %13079 = vmatprep.subr.bf16.mxu0 %v20426_v8  ;;  %v20472_v7 = vld [vmem:[#allocation7 + $0x1488] ss:$84 sps:$4 sm:$0xff]   ;;  %v20475_v8 = vld [vmem:[#allocation7 + $0x1490] ss:$84 sps:$4 sm:$0xff]  }
 0x579   :  { %13325 = vmatprep.subr.bf16.mxu1 %v20429_v13  ;;  %v20480_v13 = vld [vmem:[#allocation7 + $0x1534] ss:$84 sps:$4 sm:$0xff]  }
 0x57b   :  { %13080 = vmatpush1.bf16.msra.mxu0 %v20424_v15  ;;  %v20483_v15 = vld [vmem:[#allocation7 + $0x153c] ss:$84 sps:$4 sm:$0xff]  }
 0x57c   :  { %13326 = vmatpush1.bf16.msra.mxu1 %v20427_v19  ;;  %13081 = vmatprep.subr.bf16.mxu0 %v20432_v20  ;;  %v20478_v19 = vld [vmem:[#allocation7 + $0x1530] ss:$84 sps:$4 sm:$0xff]   ;;  %v20481_v20 = vld [vmem:[#allocation7 + $0x1538] ss:$84 sps:$4 sm:$0xff]  }
 0x57d   :  { %13327 = vmatprep.subr.bf16.mxu1 %v20435_v22  ;;  %v20486_v22 = vld [vmem:[#allocation7 + $0x15dc] ss:$84 sps:$4 sm:$0xff]  }
 0x57f   :  { %13082 = vmatpush1.bf16.msra.mxu0 %v20430_v23  ;;  %v20489_v23 = vld [vmem:[#allocation7 + $0x15e4] ss:$84 sps:$4 sm:$0xff]  }
 0x580   :  { %13328 = vmatpush1.bf16.msra.mxu1 %v20433_v25  ;;  %13083 = vmatprep.subr.bf16.mxu0 %v20438_v26  ;;  %v20484_v25 = vld [vmem:[#allocation7 + $0x15d8] ss:$84 sps:$4 sm:$0xff]   ;;  %v20487_v26 = vld [vmem:[#allocation7 + $0x15e0] ss:$84 sps:$4 sm:$0xff]  }
 0x581   :  { %13329 = vmatprep.subr.bf16.mxu1 %v20441_v27  ;;  %v20492_v27 = vld [vmem:[#allocation7 + $0x1684] ss:$84 sps:$4 sm:$0xff]  }
 0x583   :  { %13084 = vmatpush1.bf16.msra.mxu0 %v20436_v28  ;;  %v20495_v28 = vld [vmem:[#allocation7 + $0x168c] ss:$84 sps:$4 sm:$0xff]  }
 0x584   :  { %13330 = vmatpush1.bf16.msra.mxu1 %v20439_v29  ;;  %13085 = vmatprep.subr.bf16.mxu0 %v20444_v34  ;;  %v20490_v29 = vld [vmem:[#allocation7 + $0x1680] ss:$84 sps:$4 sm:$0xff]   ;;  %v20493_v34 = vld [vmem:[#allocation7 + $0x1688] ss:$84 sps:$4 sm:$0xff]  }
 0x585   :  { %13331 = vmatprep.subr.bf16.mxu1 %v20447_v35  ;;  %v20498_v35 = vld [vmem:[#allocation7 + $0x172c] ss:$84 sps:$4 sm:$0xff]  }
 0x587   :  { %13086 = vmatpush1.bf16.msra.mxu0 %v20442_v32  ;;  %v20501_v32 = vld [vmem:[#allocation7 + $0x1734] ss:$84 sps:$4 sm:$0xff]  }
 0x588   :  { %13332 = vmatpush1.bf16.msra.mxu1 %v20445_v37  ;;  %13087 = vmatprep.subr.bf16.mxu0 %v20450_v38  ;;  %v20496_v37 = vld [vmem:[#allocation7 + $0x1728] ss:$84 sps:$4 sm:$0xff]   ;;  %v20499_v38 = vld [vmem:[#allocation7 + $0x1730] ss:$84 sps:$4 sm:$0xff]  }
 0x589   :  { %13333 = vmatprep.subr.bf16.mxu1 %v20453_v53  ;;  %v20504_v53 = vld [vmem:[#allocation7 + $0x17d4] ss:$84 sps:$4 sm:$0xff]  }
 0x58b   :  { %13088 = vmatpush1.bf16.msra.mxu0 %v20448_v40  ;;  %v20507_v40 = vld [vmem:[#allocation7 + $0x17dc] ss:$84 sps:$4 sm:$0xff]  }
 0x58c   :  { %13334 = vmatpush1.bf16.msra.mxu1 %v20451_v41  ;;  %13089 = vmatprep.subr.bf16.mxu0 %v20456_v42  ;;  %v20502_v41 = vld [vmem:[#allocation7 + $0x17d0] ss:$84 sps:$4 sm:$0xff]   ;;  %v20505_v42 = vld [vmem:[#allocation7 + $0x17d8] ss:$84 sps:$4 sm:$0xff]  }
 0x58d   :  { %13335 = vmatprep.subr.bf16.mxu1 %v20459_v12  ;;  %v20510_v12 = vld [vmem:[#allocation7 + $0x187c] ss:$84 sps:$4 sm:$0xff]  }
 0x58f   :  { %13090 = vmatpush1.bf16.msra.mxu0 %v20454_v44  ;;  %v20513_v44 = vld [vmem:[#allocation7 + $0x1884] ss:$84 sps:$4 sm:$0xff]  }
 0x590   :  { %13336 = vmatpush1.bf16.msra.mxu1 %v20457_v45  ;;  %13091 = vmatprep.subr.bf16.mxu0 %v20462_v47  ;;  %v20508_v45 = vld [vmem:[#allocation7 + $0x1878] ss:$84 sps:$4 sm:$0xff]   ;;  %v20511_v47 = vld [vmem:[#allocation7 + $0x1880] ss:$84 sps:$4 sm:$0xff]  }
 0x591   :  { %13337 = vmatprep.subr.bf16.mxu1 %v20465_v54  ;;  %v20516_v54 = vld [vmem:[#allocation7 + $0x1924] ss:$84 sps:$4 sm:$0xff]  }
 0x593   :  { %13092 = vmatpush1.bf16.msra.mxu0 %v20460_v55  ;;  %v20519_v55 = vld [vmem:[#allocation7 + $0x192c] ss:$84 sps:$4 sm:$0xff]  }
 0x594   :  { %13338 = vmatpush1.bf16.msra.mxu1 %v20463_v51  ;;  %13093 = vmatprep.subr.bf16.mxu0 %v20468_v57  ;;  %v20514_v51 = vld [vmem:[#allocation7 + $0x1920] ss:$84 sps:$4 sm:$0xff]   ;;  %v20517_v57 = vld [vmem:[#allocation7 + $0x1928] ss:$84 sps:$4 sm:$0xff]  }
 0x595   :  { %13339 = vmatprep.subr.bf16.mxu1 %v20471_v49  ;;  %v20522_v49 = vld [vmem:[#allocation7 + $0x19cc] ss:$84 sps:$4 sm:$0xff]  }
 0x597   :  { %13094 = vmatpush1.bf16.msra.mxu0 %v20466_v59  ;;  %v20525_v59 = vld [vmem:[#allocation7 + $0x19d4] ss:$84 sps:$4 sm:$0xff]  }
 0x598   :  { %13340 = vmatpush1.bf16.msra.mxu1 %v20469_v62  ;;  %13095 = vmatprep.subr.bf16.mxu0 %v20474_v5  ;;  %v20520_v62 = vld [vmem:[#allocation7 + $0x19c8] ss:$84 sps:$4 sm:$0xff]   ;;  %v20523_v5 = vld [vmem:[#allocation7 + $0x19d0] ss:$84 sps:$4 sm:$0xff]  }
 0x599   :  { %13341 = vmatprep.subr.bf16.mxu1 %v20477_v6  ;;  %v20528_v6 = vld [vmem:[#allocation7 + $0x1a74] ss:$84 sps:$4 sm:$0xff]  }
 0x59b   :  { %13096 = vmatpush1.bf16.msra.mxu0 %v20472_v7  ;;  %v20531_v7 = vld [vmem:[#allocation7 + $0x1a7c] ss:$84 sps:$4 sm:$0xff]  }
 0x59c   :  { %13342 = vmatpush1.bf16.msra.mxu1 %v20475_v8  ;;  %13106 = vmatprep.subr.bf16.mxu0 %v20480_v13  ;;  %v20526_v8 = vld [vmem:[#allocation7 + $0x1a70] ss:$84 sps:$4 sm:$0xff]   ;;  %v20529_v13 = vld [vmem:[#allocation7 + $0x1a78] ss:$84 sps:$4 sm:$0xff]  }
 0x59d   :  { %13352 = vmatprep.subr.bf16.mxu1 %v20483_v15  ;;  %v20534_v15 = vld [vmem:[#allocation7 + $0x1b1c] ss:$84 sps:$4 sm:$0xff]  }
 0x59e   :  { %13098 = vmatmul.mubr.bf16.vlgmr.msra.gmra.mrb[28].mxu0 %v21968_v60 }
 0x59f   :  { %13344 = vmatmul.mubr.bf16.vlgmr.msra.gmra.mrb[20].mxu1 %v21968_v60  ;;  %13107 = vmatpush1.bf16.msra.mxu0 %v20478_v19  ;;  %v20537_v19 = vld [vmem:[#allocation7 + $0x1b24] ss:$84 sps:$4 sm:$0xff]  }
 0x5a0   :  { %13138 = vmatprep.mubr.bf16.mxu0 %v21970_v0  ;;  %13353 = vmatpush1.bf16.msra.mxu1 %v20481_v20  ;;  %v20532_v20 = vld [vmem:[#allocation7 + $0x1b18] ss:$84 sps:$4 sm:$0xff]  }
 0x5a1   :  { %13384 = vmatprep.mubr.bf16.mxu1 %v21970_v0  ;;  %13108 = vmatprep.subr.bf16.mxu0 %v20486_v22  ;;  %v20535_v22 = vld [vmem:[#allocation7 + $0x1b20] ss:$84 sps:$4 sm:$0xff]  }
 0x5a2   :  { %13354 = vmatprep.subr.bf16.mxu1 %v20489_v23  ;;  %v20540_v23 = vld [vmem:[#allocation7 + $0x1bc4] ss:$84 sps:$4 sm:$0xff]  }
 0x5a3   :  { %13109 = vmatpush1.bf16.msra.mxu0 %v20484_v25  ;;  %v20543_v25 = vld [vmem:[#allocation7 + $0x1bcc] ss:$84 sps:$4 sm:$0xff]  }
 0x5a4   :  { %13355 = vmatpush1.bf16.msra.mxu1 %v20487_v26  ;;  %13110 = vmatprep.subr.bf16.mxu0 %v20492_v27  ;;  %v20538_v26 = vld [vmem:[#allocation7 + $0x1bc0] ss:$84 sps:$4 sm:$0xff]   ;;  %v20541_v27 = vld [vmem:[#allocation7 + $0x1bc8] ss:$84 sps:$4 sm:$0xff]  }
 0x5a5   :  { %13356 = vmatprep.subr.bf16.mxu1 %v20495_v28  ;;  %v20546_v28 = vld [vmem:[#allocation7 + $0x1c6c] ss:$84 sps:$4 sm:$0xff]  }
 0x5a7   :  { %13111 = vmatpush1.bf16.msra.mxu0 %v20490_v29  ;;  %v20549_v29 = vld [vmem:[#allocation7 + $0x1c74] ss:$84 sps:$4 sm:$0xff]  }
 0x5a8   :  { %13357 = vmatpush1.bf16.msra.mxu1 %v20493_v34  ;;  %13112 = vmatprep.subr.bf16.mxu0 %v20498_v35  ;;  %v20544_v34 = vld [vmem:[#allocation7 + $0x1c68] ss:$84 sps:$4 sm:$0xff]   ;;  %v20547_v35 = vld [vmem:[#allocation7 + $0x1c70] ss:$84 sps:$4 sm:$0xff]  }
 0x5a9   :  { %13358 = vmatprep.subr.bf16.mxu1 %v20501_v32  ;;  %v20552_v32 = vld [vmem:[#allocation7 + $0x1d14] ss:$84 sps:$4 sm:$0xff]  }
 0x5ab   :  { %13113 = vmatpush1.bf16.msra.mxu0 %v20496_v37  ;;  %v20555_v37 = vld [vmem:[#allocation7 + $0x1d1c] ss:$84 sps:$4 sm:$0xff]  }
 0x5ac   :  { %13359 = vmatpush1.bf16.msra.mxu1 %v20499_v38  ;;  %13114 = vmatprep.subr.bf16.mxu0 %v20504_v53  ;;  %v20550_v38 = vld [vmem:[#allocation7 + $0x1d10] ss:$84 sps:$4 sm:$0xff]   ;;  %v20553_v53 = vld [vmem:[#allocation7 + $0x1d18] ss:$84 sps:$4 sm:$0xff]  }
 0x5ad   :  { %13360 = vmatprep.subr.bf16.mxu1 %v20507_v40  ;;  %v20558_v40 = vld [vmem:[#allocation7 + $0x1dbc] ss:$84 sps:$4 sm:$0xff]  }
 0x5af   :  { %13115 = vmatpush1.bf16.msra.mxu0 %v20502_v41  ;;  %v20561_v41 = vld [vmem:[#allocation7 + $0x1dc4] ss:$84 sps:$4 sm:$0xff]  }
 0x5b0   :  { %13361 = vmatpush1.bf16.msra.mxu1 %v20505_v42  ;;  %13116 = vmatprep.subr.bf16.mxu0 %v20510_v12  ;;  %v20556_v42 = vld [vmem:[#allocation7 + $0x1db8] ss:$84 sps:$4 sm:$0xff]   ;;  %v20559_v12 = vld [vmem:[#allocation7 + $0x1dc0] ss:$84 sps:$4 sm:$0xff]  }
 0x5b1   :  { %13362 = vmatprep.subr.bf16.mxu1 %v20513_v44  ;;  %v20564_v44 = vld [vmem:[#allocation7 + $0x1e64] ss:$84 sps:$4 sm:$0xff]  }
 0x5b3   :  { %13117 = vmatpush1.bf16.msra.mxu0 %v20508_v45  ;;  %v20567_v45 = vld [vmem:[#allocation7 + $0x1e6c] ss:$84 sps:$4 sm:$0xff]  }
 0x5b4   :  { %13363 = vmatpush1.bf16.msra.mxu1 %v20511_v47  ;;  %13118 = vmatprep.subr.bf16.mxu0 %v20516_v54  ;;  %v20562_v47 = vld [vmem:[#allocation7 + $0x1e60] ss:$84 sps:$4 sm:$0xff]   ;;  %v20565_v54 = vld [vmem:[#allocation7 + $0x1e68] ss:$84 sps:$4 sm:$0xff]  }
 0x5b5   :  { %13364 = vmatprep.subr.bf16.mxu1 %v20519_v55  ;;  %v20570_v55 = vld [vmem:[#allocation7 + $0x1f0c] ss:$84 sps:$4 sm:$0xff]  }
 0x5b7   :  { %13119 = vmatpush1.bf16.msra.mxu0 %v20514_v51  ;;  %v20573_v51 = vld [vmem:[#allocation7 + $0x1f14] ss:$84 sps:$4 sm:$0xff]  }
 0x5b8   :  { %13365 = vmatpush1.bf16.msra.mxu1 %v20517_v57  ;;  %13120 = vmatprep.subr.bf16.mxu0 %v20522_v49  ;;  %v20568_v57 = vld [vmem:[#allocation7 + $0x1f08] ss:$84 sps:$4 sm:$0xff]   ;;  %v20571_v49 = vld [vmem:[#allocation7 + $0x1f10] ss:$84 sps:$4 sm:$0xff]  }
 0x5b9   :  { %13366 = vmatprep.subr.bf16.mxu1 %v20525_v59  ;;  %v20576_v59 = vld [vmem:[#allocation7 + $0x1fb4] ss:$84 sps:$4 sm:$0xff]  }
 0x5bb   :  { %13121 = vmatpush1.bf16.msra.mxu0 %v20520_v62  ;;  %v20579_v62 = vld [vmem:[#allocation7 + $0x1fbc] ss:$84 sps:$4 sm:$0xff]  }
 0x5bc   :  { %13367 = vmatpush1.bf16.msra.mxu1 %v20523_v5  ;;  %13122 = vmatprep.subr.bf16.mxu0 %v20528_v6  ;;  %v20574_v5 = vld [vmem:[#allocation7 + $0x1fb0] ss:$84 sps:$4 sm:$0xff]   ;;  %v20577_v6 = vld [vmem:[#allocation7 + $0x1fb8] ss:$84 sps:$4 sm:$0xff]  }
 0x5bd   :  { %13368 = vmatprep.subr.bf16.mxu1 %v20531_v7  ;;  %v20582_v7 = vld [vmem:[#allocation7 + $0x205c] ss:$84 sps:$4 sm:$0xff]  }
 0x5bf   :  { %13123 = vmatpush1.bf16.msra.mxu0 %v20526_v8  ;;  %v20585_v8 = vld [vmem:[#allocation7 + $0x2064] ss:$84 sps:$4 sm:$0xff]  }
 0x5c0   :  { %13369 = vmatpush1.bf16.msra.mxu1 %v20529_v13  ;;  %13124 = vmatprep.subr.bf16.mxu0 %v20534_v15  ;;  %v20580_v13 = vld [vmem:[#allocation7 + $0x2058] ss:$84 sps:$4 sm:$0xff]   ;;  %v20583_v15 = vld [vmem:[#allocation7 + $0x2060] ss:$84 sps:$4 sm:$0xff]  }
 0x5c1   :  { %13370 = vmatprep.subr.bf16.mxu1 %v20537_v19  ;;  %v20588_v19 = vld [vmem:[#allocation7 + $0x2104] ss:$84 sps:$4 sm:$0xff]  }
 0x5c3   :  { %13125 = vmatpush1.bf16.msra.mxu0 %v20532_v20  ;;  %v20591_v20 = vld [vmem:[#allocation7 + $0x210c] ss:$84 sps:$4 sm:$0xff]  }
 0x5c4   :  { %13371 = vmatpush1.bf16.msra.mxu1 %v20535_v22  ;;  %13126 = vmatprep.subr.bf16.mxu0 %v20540_v23  ;;  %v20586_v22 = vld [vmem:[#allocation7 + $0x2100] ss:$84 sps:$4 sm:$0xff]   ;;  %v20589_v23 = vld [vmem:[#allocation7 + $0x2108] ss:$84 sps:$4 sm:$0xff]  }
 0x5c5   :  { %13372 = vmatprep.subr.bf16.mxu1 %v20543_v25  ;;  %v20594_v25 = vld [vmem:[#allocation7 + $0x21ac] ss:$84 sps:$4 sm:$0xff]  }
 0x5c7   :  { %13127 = vmatpush1.bf16.msra.mxu0 %v20538_v26  ;;  %v20597_v26 = vld [vmem:[#allocation7 + $0x21b4] ss:$84 sps:$4 sm:$0xff]  }
 0x5c8   :  { %13373 = vmatpush1.bf16.msra.mxu1 %v20541_v27  ;;  %13128 = vmatprep.subr.bf16.mxu0 %v20546_v28  ;;  %v20592_v27 = vld [vmem:[#allocation7 + $0x21a8] ss:$84 sps:$4 sm:$0xff]   ;;  %v20595_v28 = vld [vmem:[#allocation7 + $0x21b0] ss:$84 sps:$4 sm:$0xff]  }
 0x5c9   :  { %13374 = vmatprep.subr.bf16.mxu1 %v20549_v29  ;;  %v20600_v29 = vld [vmem:[#allocation7 + $0x2254] ss:$84 sps:$4 sm:$0xff]  }
 0x5cb   :  { %13129 = vmatpush1.bf16.msra.mxu0 %v20544_v34  ;;  %v20603_v34 = vld [vmem:[#allocation7 + $0x225c] ss:$84 sps:$4 sm:$0xff]  }
 0x5cc   :  { %13375 = vmatpush1.bf16.msra.mxu1 %v20547_v35  ;;  %13130 = vmatprep.subr.bf16.mxu0 %v20552_v32  ;;  %v20598_v35 = vld [vmem:[#allocation7 + $0x2250] ss:$84 sps:$4 sm:$0xff]   ;;  %v20601_v32 = vld [vmem:[#allocation7 + $0x2258] ss:$84 sps:$4 sm:$0xff]  }
 0x5cd   :  { %13376 = vmatprep.subr.bf16.mxu1 %v20555_v37  ;;  %v20606_v37 = vld [vmem:[#allocation7 + $0x22fc] ss:$84 sps:$4 sm:$0xff]  }
 0x5cf   :  { %13131 = vmatpush1.bf16.msra.mxu0 %v20550_v38  ;;  %v20609_v38 = vld [vmem:[#allocation7 + $0x2304] ss:$84 sps:$4 sm:$0xff]  }
 0x5d0   :  { %13377 = vmatpush1.bf16.msra.mxu1 %v20553_v53  ;;  %13132 = vmatprep.subr.bf16.mxu0 %v20558_v40  ;;  %v20604_v53 = vld [vmem:[#allocation7 + $0x22f8] ss:$84 sps:$4 sm:$0xff]   ;;  %v20607_v40 = vld [vmem:[#allocation7 + $0x2300] ss:$84 sps:$4 sm:$0xff]  }
 0x5d1   :  { %13378 = vmatprep.subr.bf16.mxu1 %v20561_v41  ;;  %v20612_v41 = vld [vmem:[#allocation7 + $0x23a4] ss:$84 sps:$4 sm:$0xff]  }
 0x5d3   :  { %13133 = vmatpush1.bf16.msra.mxu0 %v20556_v42 }
 0x5d4   :  { %13379 = vmatpush1.bf16.msra.mxu1 %v20559_v12  ;;  %13134 = vmatprep.subr.bf16.mxu0 %v20564_v44  ;;  %v20615_v12 = vld [vmem:[#allocation7 + $0x23ac] ss:$84 sps:$4 sm:$0xff]  }
 0x5d5   :  { %13380 = vmatprep.subr.bf16.mxu1 %v20567_v45 }
 0x5d7   :  { %13135 = vmatpush1.bf16.msra.mxu0 %v20562_v47 }
 0x5d8   :  { %13381 = vmatpush1.bf16.msra.mxu1 %v20565_v54  ;;  %13136 = vmatprep.subr.bf16.mxu0 %v20570_v55  ;;  %v20610_v55 = vld [vmem:[#allocation7 + $0x23a0] ss:$84 sps:$4 sm:$0xff]  }
 0x5d9   :  { %13382 = vmatprep.subr.bf16.mxu1 %v20573_v51 }
 0x5db   :  { %13137 = vmatpush1.bf16.msra.mxu0 %v20568_v57 }
 0x5dc   :  { %13383 = vmatpush1.bf16.msra.mxu1 %v20571_v49  ;;  %13147 = vmatprep.subr.bf16.mxu0 %v20576_v59  ;;  %v20613_v49 = vld [vmem:[#allocation7 + $0x23a8] ss:$84 sps:$4 sm:$0xff]   ;;  %v20618_v59 = vld [vmem:[#allocation7 + $0x244c] ss:$84 sps:$4 sm:$0xff]  }
 0x5dd   :  { %13393 = vmatprep.subr.bf16.mxu1 %v20579_v62 }
 0x5de   :  { %13139 = vmatmul.mubr.bf16.vlgmr.msra.gmra.mrb[28].mxu0 %v21990_v36 }
 0x5df   :  { %13385 = vmatmul.mubr.bf16.vlgmr.msra.gmra.mrb[20].mxu1 %v21990_v36  ;;  %13148 = vmatpush1.bf16.msra.mxu0 %v20574_v5  ;;  %v20621_v5 = vld [vmem:[#allocation7 + $0x2454] ss:$84 sps:$4 sm:$0xff]  }
 0x5e0   :  { %13179 = vmatprep.mubr.bf16.mxu0 %v21992_v39  ;;  %13394 = vmatpush1.bf16.msra.mxu1 %v20577_v6  ;;  %v20616_v6 = vld [vmem:[#allocation7 + $0x2448] ss:$84 sps:$4 sm:$0xff]  }
 0x5e1   :  { %13425 = vmatprep.mubr.bf16.mxu1 %v21992_v39  ;;  %13149 = vmatprep.subr.bf16.mxu0 %v20582_v7  ;;  %v20619_v7 = vld [vmem:[#allocation7 + $0x2450] ss:$84 sps:$4 sm:$0xff]  }
 0x5e2   :  { %13395 = vmatprep.subr.bf16.mxu1 %v20585_v8  ;;  %v20624_v8 = vld [vmem:[#allocation7 + $0x24f4] ss:$84 sps:$4 sm:$0xff]  }
 0x5e3   :  { %13150 = vmatpush1.bf16.msra.mxu0 %v20580_v13  ;;  %v20627_v13 = vld [vmem:[#allocation7 + $0x24fc] ss:$84 sps:$4 sm:$0xff]  }
 0x5e4   :  { %13396 = vmatpush1.bf16.msra.mxu1 %v20583_v15  ;;  %13151 = vmatprep.subr.bf16.mxu0 %v20588_v19  ;;  %v20622_v15 = vld [vmem:[#allocation7 + $0x24f0] ss:$84 sps:$4 sm:$0xff]   ;;  %v20625_v19 = vld [vmem:[#allocation7 + $0x24f8] ss:$84 sps:$4 sm:$0xff]  }
 0x5e5   :  { %13397 = vmatprep.subr.bf16.mxu1 %v20591_v20  ;;  %v20630_v20 = vld [vmem:[#allocation7 + $0x259c] ss:$84 sps:$4 sm:$0xff]  }
 0x5e7   :  { %13152 = vmatpush1.bf16.msra.mxu0 %v20586_v22  ;;  %v20633_v22 = vld [vmem:[#allocation7 + $0x25a4] ss:$84 sps:$4 sm:$0xff]  }
 0x5e8   :  { %13398 = vmatpush1.bf16.msra.mxu1 %v20589_v23  ;;  %13153 = vmatprep.subr.bf16.mxu0 %v20594_v25  ;;  %v20628_v23 = vld [vmem:[#allocation7 + $0x2598] ss:$84 sps:$4 sm:$0xff]   ;;  %v20631_v25 = vld [vmem:[#allocation7 + $0x25a0] ss:$84 sps:$4 sm:$0xff]  }
 0x5e9   :  { %13399 = vmatprep.subr.bf16.mxu1 %v20597_v26  ;;  %v20636_v26 = vld [vmem:[#allocation7 + $0x2644] ss:$84 sps:$4 sm:$0xff]  }
 0x5eb   :  { %13154 = vmatpush1.bf16.msra.mxu0 %v20592_v27  ;;  %v20639_v27 = vld [vmem:[#allocation7 + $0x264c] ss:$84 sps:$4 sm:$0xff]  }
 0x5ec   :  { %13400 = vmatpush1.bf16.msra.mxu1 %v20595_v28  ;;  %13155 = vmatprep.subr.bf16.mxu0 %v20600_v29  ;;  %v20634_v28 = vld [vmem:[#allocation7 + $0x2640] ss:$84 sps:$4 sm:$0xff]   ;;  %v20637_v29 = vld [vmem:[#allocation7 + $0x2648] ss:$84 sps:$4 sm:$0xff]  }
 0x5ed   :  { %13401 = vmatprep.subr.bf16.mxu1 %v20603_v34  ;;  %v20642_v34 = vld [vmem:[#allocation7 + $0x26ec] ss:$84 sps:$4 sm:$0xff]  }
 0x5ef   :  { %13156 = vmatpush1.bf16.msra.mxu0 %v20598_v35  ;;  %v20645_v35 = vld [vmem:[#allocation7 + $0x26f4] ss:$84 sps:$4 sm:$0xff]  }
 0x5f0   :  { %13402 = vmatpush1.bf16.msra.mxu1 %v20601_v32  ;;  %13157 = vmatprep.subr.bf16.mxu0 %v20606_v37  ;;  %v20640_v32 = vld [vmem:[#allocation7 + $0x26e8] ss:$84 sps:$4 sm:$0xff]   ;;  %v20643_v37 = vld [vmem:[#allocation7 + $0x26f0] ss:$84 sps:$4 sm:$0xff]  }
 0x5f1   :  { %v22115_v42 = vpop.f32.mrb[24].mxu0  ;;  %13403 = vmatprep.subr.bf16.mxu1 %v20609_v38  ;;  %v20648_v38 = vld [vmem:[#allocation7 + $0x2794] ss:$84 sps:$4 sm:$0xff]  }
 0x5f2   :  { %v22117_v44 = vpop.f32.mrb[16].mxu1  ;;  %v22119_v45 = vpop.f32.mrb[25].mxu0 }
 0x5f3   :  { %v22121_v47 = vpop.f32.mrb[17].mxu1  ;;  %v12775_v54 = vpop.f32.mrb[26].mxu0  ;;  %13158 = vmatpush1.bf16.msra.mxu0 %v20604_v53  ;;  %v20651_v53 = vld [vmem:[#allocation7 + $0x279c] ss:$84 sps:$4 sm:$0xff]  }
 0x5f4   :  { %v13021_v51 = vpop.f32.mrb[18].mxu1  ;;  %13404 = vmatpush1.bf16.msra.mxu1 %v20607_v40  ;;  %v12776_v57 = vpop.f32.mrb[27].mxu0  ;;  %13159 = vmatprep.subr.bf16.mxu0 %v20612_v41  ;;  %v20646_v40 = vld [vmem:[#allocation7 + $0x2790] ss:$84 sps:$4 sm:$0xff]   ;;  %v20649_v41 = vld [vmem:[#allocation7 + $0x2798] ss:$84 sps:$4 sm:$0xff]  }
 0x5f5   :  { %v13022_v62 = vpop.f32.mrb[19].mxu1  ;;  %13405 = vmatprep.subr.bf16.mxu1 %v20615_v12  ;;  %v20654_v12 = vld [vmem:[#allocation7 + $0x283c] ss:$84 sps:$4 sm:$0xff]   ;;  %v20657_v54 = vld [vmem:[#allocation7 + $0x2844] ss:$84 sps:$4 sm:$0xff]  }
 0x5f6   :  { %v20655_v51 = vld [vmem:[#allocation7 + $0x2840] ss:$84 sps:$4 sm:$0xff]   ;;  %v20660_v57 = vld [vmem:[#allocation7 + $0x28e4] ss:$84 sps:$4 sm:$0xff]   ;;  %v20661_v62 = vld [vmem:[#allocation7 + $0x28e8] ss:$84 sps:$4 sm:$0xff]  }
 0x5f7   :  { %13160 = vmatpush1.bf16.msra.mxu0 %v20610_v55  ;;  %v20652_v55 = vld [vmem:[#allocation7 + $0x2838] ss:$84 sps:$4 sm:$0xff]  }
 0x5f8   :  { %13406 = vmatpush1.bf16.msra.mxu1 %v20613_v49  ;;  %13161 = vmatprep.subr.bf16.mxu0 %v20618_v59  ;;  %v20663_v49 = vld [vmem:[#allocation7 + $0x28ec] ss:$84 sps:$4 sm:$0xff]  }
 0x5f9   :  { %13407 = vmatprep.subr.bf16.mxu1 %v20621_v5  ;;  %v20658_v59 = vld [vmem:[#allocation7 + $0x28e0] ss:$84 sps:$4 sm:$0xff]  }
 0x5fa   :  { %v20666_v5 = vld [vmem:[#allocation7 + $0x298c] ss:$84 sps:$4 sm:$0xff]  }
 0x5fb   :  { %13162 = vmatpush1.bf16.msra.mxu0 %v20616_v6  ;;  %v20669_v6 = vld [vmem:[#allocation7 + $0x2994] ss:$84 sps:$4 sm:$0xff]  }
 0x5fc   :  { %13408 = vmatpush1.bf16.msra.mxu1 %v20619_v7  ;;  %13163 = vmatprep.subr.bf16.mxu0 %v20624_v8  ;;  %v20664_v7 = vld [vmem:[#allocation7 + $0x2988] ss:$84 sps:$4 sm:$0xff]   ;;  %v20667_v8 = vld [vmem:[#allocation7 + $0x2990] ss:$84 sps:$4 sm:$0xff]  }
 0x5fd   :  { %13409 = vmatprep.subr.bf16.mxu1 %v20627_v13  ;;  %v20672_v13 = vld [vmem:[#allocation7 + $0x2a34] ss:$84 sps:$4 sm:$0xff]  }
 0x5ff   :  { %13164 = vmatpush1.bf16.msra.mxu0 %v20622_v15  ;;  %v20675_v15 = vld [vmem:[#allocation7 + $0x2a3c] ss:$84 sps:$4 sm:$0xff]  }
 0x600   :  { %13410 = vmatpush1.bf16.msra.mxu1 %v20625_v19  ;;  %13165 = vmatprep.subr.bf16.mxu0 %v20630_v20  ;;  %v20670_v19 = vld [vmem:[#allocation7 + $0x2a30] ss:$84 sps:$4 sm:$0xff]   ;;  %v20673_v20 = vld [vmem:[#allocation7 + $0x2a38] ss:$84 sps:$4 sm:$0xff]  }
 0x601   :  { %13411 = vmatprep.subr.bf16.mxu1 %v20633_v22  ;;  %v20678_v22 = vld [vmem:[#allocation7 + $0x2adc] ss:$84 sps:$4 sm:$0xff]  }
 0x603   :  { %13166 = vmatpush1.bf16.msra.mxu0 %v20628_v23  ;;  %v20681_v23 = vld [vmem:[#allocation7 + $0x2ae4] ss:$84 sps:$4 sm:$0xff]  }
 0x604   :  { %13412 = vmatpush1.bf16.msra.mxu1 %v20631_v25  ;;  %13167 = vmatprep.subr.bf16.mxu0 %v20636_v26  ;;  %v20676_v25 = vld [vmem:[#allocation7 + $0x2ad8] ss:$84 sps:$4 sm:$0xff]   ;;  %v20679_v26 = vld [vmem:[#allocation7 + $0x2ae0] ss:$84 sps:$4 sm:$0xff]  }
 0x605   :  { %13413 = vmatprep.subr.bf16.mxu1 %v20639_v27  ;;  %v20684_v27 = vld [vmem:[#allocation7 + $0x2b84] ss:$84 sps:$4 sm:$0xff]  }
 0x607   :  { %13168 = vmatpush1.bf16.msra.mxu0 %v20634_v28  ;;  %v20687_v28 = vld [vmem:[#allocation7 + $0x2b8c] ss:$84 sps:$4 sm:$0xff]  }
 0x608   :  { %13414 = vmatpush1.bf16.msra.mxu1 %v20637_v29  ;;  %13169 = vmatprep.subr.bf16.mxu0 %v20642_v34  ;;  %v20682_v29 = vld [vmem:[#allocation7 + $0x2b80] ss:$84 sps:$4 sm:$0xff]   ;;  %v20685_v34 = vld [vmem:[#allocation7 + $0x2b88] ss:$84 sps:$4 sm:$0xff]  }
 0x609   :  { %13415 = vmatprep.subr.bf16.mxu1 %v20645_v35  ;;  %v20690_v35 = vld [vmem:[#allocation7 + $0x2c2c] ss:$84 sps:$4 sm:$0xff]  }
 0x60b   :  { %13170 = vmatpush1.bf16.msra.mxu0 %v20640_v32  ;;  %v20693_v32 = vld [vmem:[#allocation7 + $0x2c34] ss:$84 sps:$4 sm:$0xff]  }
 0x60c   :  { %13416 = vmatpush1.bf16.msra.mxu1 %v20643_v37  ;;  %13171 = vmatprep.subr.bf16.mxu0 %v20648_v38  ;;  %v20688_v37 = vld [vmem:[#allocation7 + $0x2c28] ss:$84 sps:$4 sm:$0xff]   ;;  %v20691_v38 = vld [vmem:[#allocation7 + $0x2c30] ss:$84 sps:$4 sm:$0xff]  }
 0x60d   :  { %13417 = vmatprep.subr.bf16.mxu1 %v20651_v53  ;;  %v20696_v53 = vld [vmem:[#allocation7 + $0x2cd4] ss:$84 sps:$4 sm:$0xff]  }
 0x60f   :  { %13172 = vmatpush1.bf16.msra.mxu0 %v20646_v40  ;;  %v20699_v40 = vld [vmem:[#allocation7 + $0x2cdc] ss:$84 sps:$4 sm:$0xff]  }
 0x610   :  { %13418 = vmatpush1.bf16.msra.mxu1 %v20649_v41  ;;  %13173 = vmatprep.subr.bf16.mxu0 %v20654_v12  ;;  %v20694_v41 = vld [vmem:[#allocation7 + $0x2cd0] ss:$84 sps:$4 sm:$0xff]   ;;  %v20697_v12 = vld [vmem:[#allocation7 + $0x2cd8] ss:$84 sps:$4 sm:$0xff]  }
 0x611   :  { %13419 = vmatprep.subr.bf16.mxu1 %v20657_v54  ;;  %v20702_v54 = vld [vmem:[#allocation7 + $0x2d7c] ss:$84 sps:$4 sm:$0xff]  }
 0x613   :  { %13174 = vmatpush1.bf16.msra.mxu0 %v20652_v55  ;;  %v20705_v55 = vld [vmem:[#allocation7 + $0x2d84] ss:$84 sps:$4 sm:$0xff]  }
 0x614   :  { %13420 = vmatpush1.bf16.msra.mxu1 %v20655_v51  ;;  %13175 = vmatprep.subr.bf16.mxu0 %v20660_v57  ;;  %v20700_v51 = vld [vmem:[#allocation7 + $0x2d78] ss:$84 sps:$4 sm:$0xff]   ;;  %v20703_v57 = vld [vmem:[#allocation7 + $0x2d80] ss:$84 sps:$4 sm:$0xff]  }
 0x615   :  { %13421 = vmatprep.subr.bf16.mxu1 %v20663_v49  ;;  %v20708_v49 = vld [vmem:[#allocation7 + $0x2e24] ss:$84 sps:$4 sm:$0xff]  }
 0x617   :  { %13176 = vmatpush1.bf16.msra.mxu0 %v20658_v59  ;;  %v20711_v59 = vld [vmem:[#allocation7 + $0x2e2c] ss:$84 sps:$4 sm:$0xff]  }
 0x618   :  { %13422 = vmatpush1.bf16.msra.mxu1 %v20661_v62  ;;  %13177 = vmatprep.subr.bf16.mxu0 %v20666_v5  ;;  %v20706_v62 = vld [vmem:[#allocation7 + $0x2e20] ss:$84 sps:$4 sm:$0xff]   ;;  %v20709_v5 = vld [vmem:[#allocation7 + $0x2e28] ss:$84 sps:$4 sm:$0xff]  }
 0x619   :  { %13423 = vmatprep.subr.bf16.mxu1 %v20669_v6  ;;  %v20714_v6 = vld [vmem:[#allocation7 + $0x2ecc] ss:$84 sps:$4 sm:$0xff]  }
 0x61b   :  { %13178 = vmatpush1.bf16.msra.mxu0 %v20664_v7  ;;  %v20717_v7 = vld [vmem:[#allocation7 + $0x2ed4] ss:$84 sps:$4 sm:$0xff]  }
 0x61c   :  { %13424 = vmatpush1.bf16.msra.mxu1 %v20667_v8  ;;  %13188 = vmatprep.subr.bf16.mxu0 %v20672_v13  ;;  %v20712_v8 = vld [vmem:[#allocation7 + $0x2ec8] ss:$84 sps:$4 sm:$0xff]   ;;  %v20715_v13 = vld [vmem:[#allocation7 + $0x2ed0] ss:$84 sps:$4 sm:$0xff]  }
 0x61d   :  { %13434 = vmatprep.subr.bf16.mxu1 %v20675_v15  ;;  %v20720_v15 = vld [vmem:[#allocation7 + $0x2f74] ss:$84 sps:$4 sm:$0xff]  }
 0x61e   :  { %13180 = vmatmul.mubr.bf16.vlgmr.msra.gmra.mrb[28].mxu0 %v22009_v46 }
 0x61f   :  { %13426 = vmatmul.mubr.bf16.vlgmr.msra.gmra.mrb[20].mxu1 %v22009_v46  ;;  %13189 = vmatpush1.bf16.msra.mxu0 %v20670_v19  ;;  %v20723_v19 = vld [vmem:[#allocation7 + $0x2f7c] ss:$84 sps:$4 sm:$0xff]  }
 0x620   :  { %13220 = vmatprep.mubr.bf16.mxu0 %v22011_v56  ;;  %13435 = vmatpush1.bf16.msra.mxu1 %v20673_v20  ;;  %v20718_v20 = vld [vmem:[#allocation7 + $0x2f70] ss:$84 sps:$4 sm:$0xff]  }
 0x621   :  { %13466 = vmatprep.mubr.bf16.mxu1 %v22011_v56  ;;  %13190 = vmatprep.subr.bf16.mxu0 %v20678_v22  ;;  %v20721_v22 = vld [vmem:[#allocation7 + $0x2f78] ss:$84 sps:$4 sm:$0xff]  }
 0x622   :  { %13436 = vmatprep.subr.bf16.mxu1 %v20681_v23  ;;  %v20726_v23 = vld [vmem:[#allocation7 + $0x301c] ss:$84 sps:$4 sm:$0xff]  }
 0x623   :  { %13191 = vmatpush1.bf16.msra.mxu0 %v20676_v25  ;;  %v20729_v25 = vld [vmem:[#allocation7 + $0x3024] ss:$84 sps:$4 sm:$0xff]  }
 0x624   :  { %13437 = vmatpush1.bf16.msra.mxu1 %v20679_v26  ;;  %13192 = vmatprep.subr.bf16.mxu0 %v20684_v27  ;;  %v20724_v26 = vld [vmem:[#allocation7 + $0x3018] ss:$84 sps:$4 sm:$0xff]   ;;  %v20727_v27 = vld [vmem:[#allocation7 + $0x3020] ss:$84 sps:$4 sm:$0xff]  }
 0x625   :  { %13438 = vmatprep.subr.bf16.mxu1 %v20687_v28  ;;  %v20732_v28 = vld [vmem:[#allocation7 + $0x30c4] ss:$84 sps:$4 sm:$0xff]  }
 0x627   :  { %13193 = vmatpush1.bf16.msra.mxu0 %v20682_v29  ;;  %v20735_v29 = vld [vmem:[#allocation7 + $0x30cc] ss:$84 sps:$4 sm:$0xff]  }
 0x628   :  { %13439 = vmatpush1.bf16.msra.mxu1 %v20685_v34  ;;  %13194 = vmatprep.subr.bf16.mxu0 %v20690_v35  ;;  %v20730_v34 = vld [vmem:[#allocation7 + $0x30c0] ss:$84 sps:$4 sm:$0xff]   ;;  %v20733_v35 = vld [vmem:[#allocation7 + $0x30c8] ss:$84 sps:$4 sm:$0xff]  }
 0x629   :  { %13440 = vmatprep.subr.bf16.mxu1 %v20693_v32  ;;  %v20738_v32 = vld [vmem:[#allocation7 + $0x316c] ss:$84 sps:$4 sm:$0xff]  }
 0x62b   :  { %13195 = vmatpush1.bf16.msra.mxu0 %v20688_v37  ;;  %v20741_v37 = vld [vmem:[#allocation7 + $0x3174] ss:$84 sps:$4 sm:$0xff]  }
 0x62c   :  { %13441 = vmatpush1.bf16.msra.mxu1 %v20691_v38  ;;  %13196 = vmatprep.subr.bf16.mxu0 %v20696_v53  ;;  %v20736_v38 = vld [vmem:[#allocation7 + $0x3168] ss:$84 sps:$4 sm:$0xff]   ;;  %v20739_v53 = vld [vmem:[#allocation7 + $0x3170] ss:$84 sps:$4 sm:$0xff]  }
 0x62d   :  { %13442 = vmatprep.subr.bf16.mxu1 %v20699_v40  ;;  %v20744_v40 = vld [vmem:[#allocation7 + $0x3214] ss:$84 sps:$4 sm:$0xff]  }
 0x62f   :  { %13197 = vmatpush1.bf16.msra.mxu0 %v20694_v41  ;;  %v20747_v41 = vld [vmem:[#allocation7 + $0x321c] ss:$84 sps:$4 sm:$0xff]  }
 0x630   :  { %13443 = vmatpush1.bf16.msra.mxu1 %v20697_v12  ;;  %13198 = vmatprep.subr.bf16.mxu0 %v20702_v54  ;;  %v20742_v12 = vld [vmem:[#allocation7 + $0x3210] ss:$84 sps:$4 sm:$0xff]   ;;  %v20745_v54 = vld [vmem:[#allocation7 + $0x3218] ss:$84 sps:$4 sm:$0xff]  }
 0x631   :  { %13444 = vmatprep.subr.bf16.mxu1 %v20705_v55  ;;  %v20750_v55 = vld [vmem:[#allocation7 + $0x32bc] ss:$84 sps:$4 sm:$0xff]  }
 0x633   :  { %13199 = vmatpush1.bf16.msra.mxu0 %v20700_v51  ;;  %v20753_v51 = vld [vmem:[#allocation7 + $0x32c4] ss:$84 sps:$4 sm:$0xff]  }
 0x634   :  { %13445 = vmatpush1.bf16.msra.mxu1 %v20703_v57  ;;  %13200 = vmatprep.subr.bf16.mxu0 %v20708_v49  ;;  %v20748_v57 = vld [vmem:[#allocation7 + $0x32b8] ss:$84 sps:$4 sm:$0xff]   ;;  %v20751_v49 = vld [vmem:[#allocation7 + $0x32c0] ss:$84 sps:$4 sm:$0xff]  }
 0x635   :  { %13446 = vmatprep.subr.bf16.mxu1 %v20711_v59  ;;  %v20756_v59 = vld [vmem:[#allocation7 + $0x3364] ss:$84 sps:$4 sm:$0xff]  }
 0x637   :  { %13201 = vmatpush1.bf16.msra.mxu0 %v20706_v62  ;;  %v20759_v62 = vld [vmem:[#allocation7 + $0x336c] ss:$84 sps:$4 sm:$0xff]  }
 0x638   :  { %13447 = vmatpush1.bf16.msra.mxu1 %v20709_v5  ;;  %13202 = vmatprep.subr.bf16.mxu0 %v20714_v6  ;;  %v20754_v5 = vld [vmem:[#allocation7 + $0x3360] ss:$84 sps:$4 sm:$0xff]   ;;  %v20757_v6 = vld [vmem:[#allocation7 + $0x3368] ss:$84 sps:$4 sm:$0xff]  }
 0x639   :  { %13448 = vmatprep.subr.bf16.mxu1 %v20717_v7  ;;  %v20762_v7 = vld [vmem:[#allocation7 + $0x340c] ss:$84 sps:$4 sm:$0xff]  }
 0x63b   :  { %13203 = vmatpush1.bf16.msra.mxu0 %v20712_v8  ;;  %v20765_v8 = vld [vmem:[#allocation7 + $0x3414] ss:$84 sps:$4 sm:$0xff]  }
 0x63c   :  { %13449 = vmatpush1.bf16.msra.mxu1 %v20715_v13  ;;  %13204 = vmatprep.subr.bf16.mxu0 %v20720_v15  ;;  %v20760_v13 = vld [vmem:[#allocation7 + $0x3408] ss:$84 sps:$4 sm:$0xff]   ;;  %v20763_v15 = vld [vmem:[#allocation7 + $0x3410] ss:$84 sps:$4 sm:$0xff]  }
 0x63d   :  { %13450 = vmatprep.subr.bf16.mxu1 %v20723_v19  ;;  %v20768_v19 = vld [vmem:[#allocation7 + $0x34b4] ss:$84 sps:$4 sm:$0xff]  }
 0x63f   :  { %13205 = vmatpush1.bf16.msra.mxu0 %v20718_v20  ;;  %v20771_v20 = vld [vmem:[#allocation7 + $0x34bc] ss:$84 sps:$4 sm:$0xff]  }
 0x640   :  { %13451 = vmatpush1.bf16.msra.mxu1 %v20721_v22  ;;  %13206 = vmatprep.subr.bf16.mxu0 %v20726_v23  ;;  %v20766_v22 = vld [vmem:[#allocation7 + $0x34b0] ss:$84 sps:$4 sm:$0xff]   ;;  %v20769_v23 = vld [vmem:[#allocation7 + $0x34b8] ss:$84 sps:$4 sm:$0xff]  }
 0x641   :  { %13452 = vmatprep.subr.bf16.mxu1 %v20729_v25  ;;  %v20774_v25 = vld [vmem:[#allocation7 + $0x355c] ss:$84 sps:$4 sm:$0xff]  }
 0x643   :  { %13207 = vmatpush1.bf16.msra.mxu0 %v20724_v26  ;;  %v20777_v26 = vld [vmem:[#allocation7 + $0x3564] ss:$84 sps:$4 sm:$0xff]  }
 0x644   :  { %13453 = vmatpush1.bf16.msra.mxu1 %v20727_v27  ;;  %13208 = vmatprep.subr.bf16.mxu0 %v20732_v28  ;;  %v20772_v27 = vld [vmem:[#allocation7 + $0x3558] ss:$84 sps:$4 sm:$0xff]   ;;  %v20775_v28 = vld [vmem:[#allocation7 + $0x3560] ss:$84 sps:$4 sm:$0xff]  }
 0x645   :  { %13454 = vmatprep.subr.bf16.mxu1 %v20735_v29  ;;  %v20780_v29 = vld [vmem:[#allocation7 + $0x3604] ss:$84 sps:$4 sm:$0xff]  }
 0x647   :  { %13209 = vmatpush1.bf16.msra.mxu0 %v20730_v34  ;;  %v20783_v34 = vld [vmem:[#allocation7 + $0x360c] ss:$84 sps:$4 sm:$0xff]  }
 0x648   :  { %13455 = vmatpush1.bf16.msra.mxu1 %v20733_v35  ;;  %13210 = vmatprep.subr.bf16.mxu0 %v20738_v32  ;;  %v20778_v35 = vld [vmem:[#allocation7 + $0x3600] ss:$84 sps:$4 sm:$0xff]   ;;  %v20781_v32 = vld [vmem:[#allocation7 + $0x3608] ss:$84 sps:$4 sm:$0xff]  }
 0x649   :  { %13456 = vmatprep.subr.bf16.mxu1 %v20741_v37  ;;  %v20786_v37 = vld [vmem:[#allocation7 + $0x36ac] ss:$84 sps:$4 sm:$0xff]  }
 0x64b   :  { %13211 = vmatpush1.bf16.msra.mxu0 %v20736_v38  ;;  %v20789_v38 = vld [vmem:[#allocation7 + $0x36b4] ss:$84 sps:$4 sm:$0xff]  }
 0x64c   :  { %13457 = vmatpush1.bf16.msra.mxu1 %v20739_v53  ;;  %13212 = vmatprep.subr.bf16.mxu0 %v20744_v40  ;;  %v20784_v53 = vld [vmem:[#allocation7 + $0x36a8] ss:$84 sps:$4 sm:$0xff]   ;;  %v20787_v40 = vld [vmem:[#allocation7 + $0x36b0] ss:$84 sps:$4 sm:$0xff]  }
 0x64d   :  { %13458 = vmatprep.subr.bf16.mxu1 %v20747_v41  ;;  %v20792_v41 = vld [vmem:[#allocation7 + $0x44] ss:$84 sps:$4 sm:$0xff]  }
 0x64f   :  { %13213 = vmatpush1.bf16.msra.mxu0 %v20742_v12  ;;  %v20795_v12 = vld [vmem:[#allocation7 + $0x4c] ss:$84 sps:$4 sm:$0xff]  }
 0x650   :  { %13459 = vmatpush1.bf16.msra.mxu1 %v20745_v54  ;;  %13214 = vmatprep.subr.bf16.mxu0 %v20750_v55  ;;  %v20790_v54 = vld [vmem:[#allocation7 + $0x40] ss:$84 sps:$4 sm:$0xff]   ;;  %v20793_v55 = vld [vmem:[#allocation7 + $0x48] ss:$84 sps:$4 sm:$0xff]  }
 0x651   :  { %13460 = vmatprep.subr.bf16.mxu1 %v20753_v51  ;;  %v20798_v51 = vld [vmem:[#allocation7 + $0xec] ss:$84 sps:$4 sm:$0xff]  }
 0x653   :  { %13215 = vmatpush1.bf16.msra.mxu0 %v20748_v57  ;;  %v20801_v57 = vld [vmem:[#allocation7 + $0xf4] ss:$84 sps:$4 sm:$0xff]  }
 0x654   :  { %13461 = vmatpush1.bf16.msra.mxu1 %v20751_v49  ;;  %13216 = vmatprep.subr.bf16.mxu0 %v20756_v59  ;;  %v20796_v49 = vld [vmem:[#allocation7 + $0xe8] ss:$84 sps:$4 sm:$0xff]   ;;  %v20799_v59 = vld [vmem:[#allocation7 + $0xf0] ss:$84 sps:$4 sm:$0xff]  }
 0x655   :  { %13462 = vmatprep.subr.bf16.mxu1 %v20759_v62  ;;  %v20804_v62 = vld [vmem:[#allocation7 + $0x194] ss:$84 sps:$4 sm:$0xff]  }
 0x657   :  { %13217 = vmatpush1.bf16.msra.mxu0 %v20754_v5  ;;  %v20807_v5 = vld [vmem:[#allocation7 + $0x19c] ss:$84 sps:$4 sm:$0xff]  }
 0x658   :  { %13463 = vmatpush1.bf16.msra.mxu1 %v20757_v6  ;;  %13218 = vmatprep.subr.bf16.mxu0 %v20762_v7  ;;  %v20802_v6 = vld [vmem:[#allocation7 + $0x190] ss:$84 sps:$4 sm:$0xff]   ;;  %v20805_v7 = vld [vmem:[#allocation7 + $0x198] ss:$84 sps:$4 sm:$0xff]  }
 0x659   :  { %13464 = vmatprep.subr.bf16.mxu1 %v20765_v8  ;;  %v20810_v8 = vld [vmem:[#allocation7 + $0x23c] ss:$84 sps:$4 sm:$0xff]  }
 0x65b   :  { %13219 = vmatpush1.bf16.msra.mxu0 %v20760_v13  ;;  %v20813_v13 = vld [vmem:[#allocation7 + $0x244] ss:$84 sps:$4 sm:$0xff]  }
 0x65c   :  { %13465 = vmatpush1.bf16.msra.mxu1 %v20763_v15  ;;  %13229 = vmatprep.subr.bf16.mxu0 %v20768_v19  ;;  %v20808_v15 = vld [vmem:[#allocation7 + $0x238] ss:$84 sps:$4 sm:$0xff]   ;;  %v20811_v19 = vld [vmem:[#allocation7 + $0x240] ss:$84 sps:$4 sm:$0xff]  }
 0x65d   :  { %13475 = vmatprep.subr.bf16.mxu1 %v20771_v20  ;;  %v20816_v20 = vld [vmem:[#allocation7 + $0x2e4] ss:$84 sps:$4 sm:$0xff]  }
 0x65e   :  { %13221 = vmatmul.mubr.bf16.vlgmr.msra.gmra.mrb[28].mxu0 %v22020_v48 }
 0x65f   :  { %13467 = vmatmul.mubr.bf16.vlgmr.msra.gmra.mrb[20].mxu1 %v22020_v48  ;;  %13230 = vmatpush1.bf16.msra.mxu0 %v20766_v22  ;;  %v20819_v22 = vld [vmem:[#allocation7 + $0x2ec] ss:$84 sps:$4 sm:$0xff]  }
 0x660   :  { %13476 = vmatpush1.bf16.msra.mxu1 %v20769_v23  ;;  %13231 = vmatprep.subr.bf16.mxu0 %v20774_v25  ;;  %v20814_v23 = vld [vmem:[#allocation7 + $0x2e0] ss:$84 sps:$4 sm:$0xff]   ;;  %v20817_v25 = vld [vmem:[#allocation7 + $0x2e8] ss:$84 sps:$4 sm:$0xff]  }
 0x661   :  { %13477 = vmatprep.subr.bf16.mxu1 %v20777_v26  ;;  %13261 = vmatprep.mubr.bf16.mxu0 %v21723_v1  ;;  %v20822_v26 = vld [vmem:[#allocation7 + $0x38c] ss:$84 sps:$4 sm:$0xff]  }
 0x662   :  { %13507 = vmatprep.mubr.bf16.mxu1 %v21723_v1 }
 0x663   :  { %13232 = vmatpush1.bf16.msra.mxu0 %v20772_v27  ;;  %v20825_v27 = vld [vmem:[#allocation7 + $0x394] ss:$84 sps:$4 sm:$0xff]  }
 0x664   :  { %13478 = vmatpush1.bf16.msra.mxu1 %v20775_v28  ;;  %13233 = vmatprep.subr.bf16.mxu0 %v20780_v29  ;;  %v20820_v28 = vld [vmem:[#allocation7 + $0x388] ss:$84 sps:$4 sm:$0xff]   ;;  %v20823_v29 = vld [vmem:[#allocation7 + $0x390] ss:$84 sps:$4 sm:$0xff]  }
 0x665   :  { %13479 = vmatprep.subr.bf16.mxu1 %v20783_v34  ;;  %v20828_v34 = vld [vmem:[#allocation7 + $0x434] ss:$84 sps:$4 sm:$0xff]  }
 0x667   :  { %13234 = vmatpush1.bf16.msra.mxu0 %v20778_v35  ;;  %v20831_v35 = vld [vmem:[#allocation7 + $0x43c] ss:$84 sps:$4 sm:$0xff]  }
 0x668   :  { %13480 = vmatpush1.bf16.msra.mxu1 %v20781_v32  ;;  %13235 = vmatprep.subr.bf16.mxu0 %v20786_v37  ;;  %v20826_v32 = vld [vmem:[#allocation7 + $0x430] ss:$84 sps:$4 sm:$0xff]   ;;  %v20829_v37 = vld [vmem:[#allocation7 + $0x438] ss:$84 sps:$4 sm:$0xff]  }
 0x669   :  { %13481 = vmatprep.subr.bf16.mxu1 %v20789_v38  ;;  %v20834_v38 = vld [vmem:[#allocation7 + $0x4dc] ss:$84 sps:$4 sm:$0xff]  }
 0x66b   :  { %13236 = vmatpush1.bf16.msra.mxu0 %v20784_v53  ;;  %v20837_v53 = vld [vmem:[#allocation7 + $0x4e4] ss:$84 sps:$4 sm:$0xff]  }
 0x66c   :  { %13482 = vmatpush1.bf16.msra.mxu1 %v20787_v40  ;;  %13516 = vmatprep.subr.bf16.mxu0 %v20792_v41  ;;  %v20832_v40 = vld [vmem:[#allocation7 + $0x4d8] ss:$84 sps:$4 sm:$0xff]   ;;  %v20835_v41 = vld [vmem:[#allocation7 + $0x4e0] ss:$84 sps:$4 sm:$0xff]  }
 0x66d   :  { %13762 = vmatprep.subr.bf16.mxu1 %v20795_v12  ;;  %v20840_v12 = vld [vmem:[#allocation7 + $0x584] ss:$84 sps:$4 sm:$0xff]  }
 0x66e   :  { %17924 = vmatmul.mubr.msk.bf16.vlgmr.msra.gmra.mrb[28].mxu0 %vm11544_vm3, %v22027_v17 }
 0x66f   :  { %17925 = vmatmul.mubr.msk.bf16.vlgmr.msra.gmra.mrb[20].mxu1 %vm11544_vm3, %v22027_v17  ;;  %13517 = vmatpush1.bf16.msra.mxu0 %v20790_v54  ;;  %v20843_v54 = vld [vmem:[#allocation7 + $0x58c] ss:$84 sps:$4 sm:$0xff]  }
 0x670   :  { %13548 = vmatprep.mubr.bf16.mxu0 %v21922_v2  ;;  %13763 = vmatpush1.bf16.msra.mxu1 %v20793_v55  ;;  %v20838_v55 = vld [vmem:[#allocation7 + $0x580] ss:$84 sps:$4 sm:$0xff]  }
 0x671   :  { %13794 = vmatprep.mubr.bf16.mxu1 %v21922_v2  ;;  %13518 = vmatprep.subr.bf16.mxu0 %v20798_v51  ;;  %v20841_v51 = vld [vmem:[#allocation7 + $0x588] ss:$84 sps:$4 sm:$0xff]  }
 0x672   :  { %13764 = vmatprep.subr.bf16.mxu1 %v20801_v57  ;;  %v20846_v57 = vld [vmem:[#allocation7 + $0x62c] ss:$84 sps:$4 sm:$0xff]  }
 0x673   :  { %13519 = vmatpush1.bf16.msra.mxu0 %v20796_v49  ;;  %v20849_v49 = vld [vmem:[#allocation7 + $0x634] ss:$84 sps:$4 sm:$0xff]  }
 0x674   :  { %13765 = vmatpush1.bf16.msra.mxu1 %v20799_v59  ;;  %13520 = vmatprep.subr.bf16.mxu0 %v20804_v62  ;;  %v20844_v59 = vld [vmem:[#allocation7 + $0x628] ss:$84 sps:$4 sm:$0xff]   ;;  %v20847_v62 = vld [vmem:[#allocation7 + $0x630] ss:$84 sps:$4 sm:$0xff]  }
 0x675   :  { %13766 = vmatprep.subr.bf16.mxu1 %v20807_v5  ;;  %v20852_v5 = vld [vmem:[#allocation7 + $0x6d4] ss:$84 sps:$4 sm:$0xff]  }
 0x677   :  { %13521 = vmatpush1.bf16.msra.mxu0 %v20802_v6  ;;  %v20855_v6 = vld [vmem:[#allocation7 + $0x6dc] ss:$84 sps:$4 sm:$0xff]  }
 0x678   :  { %13767 = vmatpush1.bf16.msra.mxu1 %v20805_v7  ;;  %13522 = vmatprep.subr.bf16.mxu0 %v20810_v8  ;;  %v20850_v7 = vld [vmem:[#allocation7 + $0x6d0] ss:$84 sps:$4 sm:$0xff]   ;;  %v20853_v8 = vld [vmem:[#allocation7 + $0x6d8] ss:$84 sps:$4 sm:$0xff]  }
 0x679   :  { %13768 = vmatprep.subr.bf16.mxu1 %v20813_v13  ;;  %v20858_v13 = vld [vmem:[#allocation7 + $0x77c] ss:$84 sps:$4 sm:$0xff]  }
 0x67b   :  { %13523 = vmatpush1.bf16.msra.mxu0 %v20808_v15  ;;  %v20861_v15 = vld [vmem:[#allocation7 + $0x784] ss:$84 sps:$4 sm:$0xff]  }
 0x67c   :  { %13769 = vmatpush1.bf16.msra.mxu1 %v20811_v19  ;;  %13524 = vmatprep.subr.bf16.mxu0 %v20816_v20  ;;  %v20856_v19 = vld [vmem:[#allocation7 + $0x778] ss:$84 sps:$4 sm:$0xff]   ;;  %v20859_v20 = vld [vmem:[#allocation7 + $0x780] ss:$84 sps:$4 sm:$0xff]  }
 0x67d   :  { %13770 = vmatprep.subr.bf16.mxu1 %v20819_v22  ;;  %v20864_v22 = vld [vmem:[#allocation7 + $0x824] ss:$84 sps:$4 sm:$0xff]  }
 0x67f   :  { %13525 = vmatpush1.bf16.msra.mxu0 %v20814_v23  ;;  %v20867_v23 = vld [vmem:[#allocation7 + $0x82c] ss:$84 sps:$4 sm:$0xff]  }
 0x680   :  { %13771 = vmatpush1.bf16.msra.mxu1 %v20817_v25  ;;  %13526 = vmatprep.subr.bf16.mxu0 %v20822_v26  ;;  %v20862_v25 = vld [vmem:[#allocation7 + $0x820] ss:$84 sps:$4 sm:$0xff]   ;;  %v20865_v26 = vld [vmem:[#allocation7 + $0x828] ss:$84 sps:$4 sm:$0xff]  }
 0x681   :  { %13772 = vmatprep.subr.bf16.mxu1 %v20825_v27  ;;  %v20870_v27 = vld [vmem:[#allocation7 + $0x8cc] ss:$84 sps:$4 sm:$0xff]  }
 0x683   :  { %13527 = vmatpush1.bf16.msra.mxu0 %v20820_v28  ;;  %v20873_v28 = vld [vmem:[#allocation7 + $0x8d4] ss:$84 sps:$4 sm:$0xff]  }
 0x684   :  { %13773 = vmatpush1.bf16.msra.mxu1 %v20823_v29  ;;  %13528 = vmatprep.subr.bf16.mxu0 %v20828_v34  ;;  %v20868_v29 = vld [vmem:[#allocation7 + $0x8c8] ss:$84 sps:$4 sm:$0xff]   ;;  %v20871_v34 = vld [vmem:[#allocation7 + $0x8d0] ss:$84 sps:$4 sm:$0xff]  }
 0x685   :  { %13774 = vmatprep.subr.bf16.mxu1 %v20831_v35  ;;  %v20876_v35 = vld [vmem:[#allocation7 + $0x974] ss:$84 sps:$4 sm:$0xff]  }
 0x687   :  { %13529 = vmatpush1.bf16.msra.mxu0 %v20826_v32  ;;  %v20879_v32 = vld [vmem:[#allocation7 + $0x97c] ss:$84 sps:$4 sm:$0xff]  }
 0x688   :  { %13775 = vmatpush1.bf16.msra.mxu1 %v20829_v37  ;;  %13530 = vmatprep.subr.bf16.mxu0 %v20834_v38  ;;  %v20874_v37 = vld [vmem:[#allocation7 + $0x970] ss:$84 sps:$4 sm:$0xff]   ;;  %v20877_v38 = vld [vmem:[#allocation7 + $0x978] ss:$84 sps:$4 sm:$0xff]  }
 0x689   :  { %13776 = vmatprep.subr.bf16.mxu1 %v20837_v53  ;;  %v20882_v53 = vld [vmem:[#allocation7 + $0xa1c] ss:$84 sps:$4 sm:$0xff]  }
 0x68b   :  { %13531 = vmatpush1.bf16.msra.mxu0 %v20832_v40  ;;  %v20885_v40 = vld [vmem:[#allocation7 + $0xa24] ss:$84 sps:$4 sm:$0xff]  }
 0x68c   :  { %13777 = vmatpush1.bf16.msra.mxu1 %v20835_v41  ;;  %13532 = vmatprep.subr.bf16.mxu0 %v20840_v12  ;;  %v20880_v41 = vld [vmem:[#allocation7 + $0xa18] ss:$84 sps:$4 sm:$0xff]   ;;  %v20883_v12 = vld [vmem:[#allocation7 + $0xa20] ss:$84 sps:$4 sm:$0xff]  }
 0x68d   :  { %13778 = vmatprep.subr.bf16.mxu1 %v20843_v54  ;;  %v20888_v54 = vld [vmem:[#allocation7 + $0xac4] ss:$84 sps:$4 sm:$0xff]  }
 0x68f   :  { %13533 = vmatpush1.bf16.msra.mxu0 %v20838_v55  ;;  %v20891_v55 = vld [vmem:[#allocation7 + $0xacc] ss:$84 sps:$4 sm:$0xff]  }
 0x690   :  { %13779 = vmatpush1.bf16.msra.mxu1 %v20841_v51  ;;  %13534 = vmatprep.subr.bf16.mxu0 %v20846_v57  ;;  %v20886_v51 = vld [vmem:[#allocation7 + $0xac0] ss:$84 sps:$4 sm:$0xff]   ;;  %v20889_v57 = vld [vmem:[#allocation7 + $0xac8] ss:$84 sps:$4 sm:$0xff]  }
 0x691   :  { %13780 = vmatprep.subr.bf16.mxu1 %v20849_v49  ;;  %v20894_v49 = vld [vmem:[#allocation7 + $0xb6c] ss:$84 sps:$4 sm:$0xff]  }
 0x693   :  { %13535 = vmatpush1.bf16.msra.mxu0 %v20844_v59  ;;  %v20897_v59 = vld [vmem:[#allocation7 + $0xb74] ss:$84 sps:$4 sm:$0xff]  }
 0x694   :  { %13781 = vmatpush1.bf16.msra.mxu1 %v20847_v62  ;;  %13536 = vmatprep.subr.bf16.mxu0 %v20852_v5  ;;  %v20892_v62 = vld [vmem:[#allocation7 + $0xb68] ss:$84 sps:$4 sm:$0xff]   ;;  %v20895_v5 = vld [vmem:[#allocation7 + $0xb70] ss:$84 sps:$4 sm:$0xff]  }
 0x695   :  { %13782 = vmatprep.subr.bf16.mxu1 %v20855_v6  ;;  %v20900_v6 = vld [vmem:[#allocation7 + $0xc14] ss:$84 sps:$4 sm:$0xff]  }
 0x697   :  { %13537 = vmatpush1.bf16.msra.mxu0 %v20850_v7  ;;  %v20903_v7 = vld [vmem:[#allocation7 + $0xc1c] ss:$84 sps:$4 sm:$0xff]  }
 0x698   :  { %13783 = vmatpush1.bf16.msra.mxu1 %v20853_v8  ;;  %13538 = vmatprep.subr.bf16.mxu0 %v20858_v13  ;;  %v20898_v8 = vld [vmem:[#allocation7 + $0xc10] ss:$84 sps:$4 sm:$0xff]   ;;  %v20901_v13 = vld [vmem:[#allocation7 + $0xc18] ss:$84 sps:$4 sm:$0xff]  }
 0x699   :  { %13784 = vmatprep.subr.bf16.mxu1 %v20861_v15  ;;  %v20906_v15 = vld [vmem:[#allocation7 + $0xcbc] ss:$84 sps:$4 sm:$0xff]  }
 0x69b   :  { %13539 = vmatpush1.bf16.msra.mxu0 %v20856_v19  ;;  %v20909_v19 = vld [vmem:[#allocation7 + $0xcc4] ss:$84 sps:$4 sm:$0xff]  }
 0x69c   :  { %13785 = vmatpush1.bf16.msra.mxu1 %v20859_v20  ;;  %13540 = vmatprep.subr.bf16.mxu0 %v20864_v22  ;;  %v20904_v20 = vld [vmem:[#allocation7 + $0xcb8] ss:$84 sps:$4 sm:$0xff]   ;;  %v20907_v22 = vld [vmem:[#allocation7 + $0xcc0] ss:$84 sps:$4 sm:$0xff]  }
 0x69d   :  { %13786 = vmatprep.subr.bf16.mxu1 %v20867_v23  ;;  %v20912_v23 = vld [vmem:[#allocation7 + $0xd64] ss:$84 sps:$4 sm:$0xff]  }
 0x69f   :  { %13541 = vmatpush1.bf16.msra.mxu0 %v20862_v25  ;;  %v20915_v25 = vld [vmem:[#allocation7 + $0xd6c] ss:$84 sps:$4 sm:$0xff]  }
 0x6a0   :  { %13787 = vmatpush1.bf16.msra.mxu1 %v20865_v26  ;;  %13542 = vmatprep.subr.bf16.mxu0 %v20870_v27  ;;  %v20910_v26 = vld [vmem:[#allocation7 + $0xd60] ss:$84 sps:$4 sm:$0xff]   ;;  %v20913_v27 = vld [vmem:[#allocation7 + $0xd68] ss:$84 sps:$4 sm:$0xff]  }
 0x6a1   :  { %13788 = vmatprep.subr.bf16.mxu1 %v20873_v28  ;;  %v20918_v28 = vld [vmem:[#allocation7 + $0xe0c] ss:$84 sps:$4 sm:$0xff]  }
 0x6a3   :  { %13543 = vmatpush1.bf16.msra.mxu0 %v20868_v29  ;;  %v20921_v29 = vld [vmem:[#allocation7 + $0xe14] ss:$84 sps:$4 sm:$0xff]  }
 0x6a4   :  { %13789 = vmatpush1.bf16.msra.mxu1 %v20871_v34  ;;  %13544 = vmatprep.subr.bf16.mxu0 %v20876_v35  ;;  %v20916_v34 = vld [vmem:[#allocation7 + $0xe08] ss:$84 sps:$4 sm:$0xff]   ;;  %v20919_v35 = vld [vmem:[#allocation7 + $0xe10] ss:$84 sps:$4 sm:$0xff]  }
 0x6a5   :  { %13790 = vmatprep.subr.bf16.mxu1 %v20879_v32  ;;  %v20924_v32 = vld [vmem:[#allocation7 + $0xeb4] ss:$84 sps:$4 sm:$0xff]  }
 0x6a7   :  { %13545 = vmatpush1.bf16.msra.mxu0 %v20874_v37  ;;  %v20927_v37 = vld [vmem:[#allocation7 + $0xebc] ss:$84 sps:$4 sm:$0xff]  }
 0x6a8   :  { %13791 = vmatpush1.bf16.msra.mxu1 %v20877_v38  ;;  %13546 = vmatprep.subr.bf16.mxu0 %v20882_v53  ;;  %v20922_v38 = vld [vmem:[#allocation7 + $0xeb0] ss:$84 sps:$4 sm:$0xff]   ;;  %v20925_v53 = vld [vmem:[#allocation7 + $0xeb8] ss:$84 sps:$4 sm:$0xff]  }
 0x6a9   :  { %13792 = vmatprep.subr.bf16.mxu1 %v20885_v40  ;;  %v20930_v40 = vld [vmem:[#allocation7 + $0xf5c] ss:$84 sps:$4 sm:$0xff]  }
 0x6ab   :  { %13547 = vmatpush1.bf16.msra.mxu0 %v20880_v41  ;;  %v20933_v41 = vld [vmem:[#allocation7 + $0xf64] ss:$84 sps:$4 sm:$0xff]  }
 0x6ac   :  { %13793 = vmatpush1.bf16.msra.mxu1 %v20883_v12  ;;  %13557 = vmatprep.subr.bf16.mxu0 %v20888_v54  ;;  %v20928_v12 = vld [vmem:[#allocation7 + $0xf58] ss:$84 sps:$4 sm:$0xff]   ;;  %v20931_v54 = vld [vmem:[#allocation7 + $0xf60] ss:$84 sps:$4 sm:$0xff]  }
 0x6ad   :  { %13803 = vmatprep.subr.bf16.mxu1 %v20891_v55  ;;  %v20936_v55 = vld [vmem:[#allocation7 + $0x1004] ss:$84 sps:$4 sm:$0xff]  }
 0x6ae   :  { %13549 = vmatmul.mubr.bf16.vlgmr.msra.gmra.mrb[32].mxu0 %v21927_v4 }
 0x6af   :  { %13795 = vmatmul.mubr.bf16.vlgmr.msra.gmra.mrb[24].mxu1 %v21927_v4  ;;  %13558 = vmatpush1.bf16.msra.mxu0 %v20886_v51  ;;  %v20939_v51 = vld [vmem:[#allocation7 + $0x100c] ss:$84 sps:$4 sm:$0xff]  }
 0x6b0   :  { %13589 = vmatprep.mubr.bf16.mxu0 %v21937_v24  ;;  %13804 = vmatpush1.bf16.msra.mxu1 %v20889_v57  ;;  %v20934_v57 = vld [vmem:[#allocation7 + $0x1000] ss:$84 sps:$4 sm:$0xff]  }
 0x6b1   :  { %13835 = vmatprep.mubr.bf16.mxu1 %v21937_v24  ;;  %13559 = vmatprep.subr.bf16.mxu0 %v20894_v49  ;;  %v20937_v49 = vld [vmem:[#allocation7 + $0x1008] ss:$84 sps:$4 sm:$0xff]  }
 0x6b2   :  { %13805 = vmatprep.subr.bf16.mxu1 %v20897_v59  ;;  %v20942_v59 = vld [vmem:[#allocation7 + $0x10ac] ss:$84 sps:$4 sm:$0xff]  }
 0x6b3   :  { %13560 = vmatpush1.bf16.msra.mxu0 %v20892_v62  ;;  %v20945_v62 = vld [vmem:[#allocation7 + $0x10b4] ss:$84 sps:$4 sm:$0xff]  }
 0x6b4   :  { %13806 = vmatpush1.bf16.msra.mxu1 %v20895_v5  ;;  %13561 = vmatprep.subr.bf16.mxu0 %v20900_v6  ;;  %v20940_v5 = vld [vmem:[#allocation7 + $0x10a8] ss:$84 sps:$4 sm:$0xff]   ;;  %v20943_v6 = vld [vmem:[#allocation7 + $0x10b0] ss:$84 sps:$4 sm:$0xff]  }
 0x6b5   :  { %13807 = vmatprep.subr.bf16.mxu1 %v20903_v7  ;;  %v20948_v7 = vld [vmem:[#allocation7 + $0x1154] ss:$84 sps:$4 sm:$0xff]  }
 0x6b7   :  { %13562 = vmatpush1.bf16.msra.mxu0 %v20898_v8  ;;  %v20951_v8 = vld [vmem:[#allocation7 + $0x115c] ss:$84 sps:$4 sm:$0xff]  }
 0x6b8   :  { %13808 = vmatpush1.bf16.msra.mxu1 %v20901_v13  ;;  %13563 = vmatprep.subr.bf16.mxu0 %v20906_v15  ;;  %v20946_v13 = vld [vmem:[#allocation7 + $0x1150] ss:$84 sps:$4 sm:$0xff]   ;;  %v20949_v15 = vld [vmem:[#allocation7 + $0x1158] ss:$84 sps:$4 sm:$0xff]  }
 0x6b9   :  { %13809 = vmatprep.subr.bf16.mxu1 %v20909_v19  ;;  %v20954_v19 = vld [vmem:[#allocation7 + $0x11fc] ss:$84 sps:$4 sm:$0xff]  }
 0x6bb   :  { %13564 = vmatpush1.bf16.msra.mxu0 %v20904_v20  ;;  %v20957_v20 = vld [vmem:[#allocation7 + $0x1204] ss:$84 sps:$4 sm:$0xff]  }
 0x6bc   :  { %13810 = vmatpush1.bf16.msra.mxu1 %v20907_v22  ;;  %13565 = vmatprep.subr.bf16.mxu0 %v20912_v23  ;;  %v20952_v22 = vld [vmem:[#allocation7 + $0x11f8] ss:$84 sps:$4 sm:$0xff]   ;;  %v20955_v23 = vld [vmem:[#allocation7 + $0x1200] ss:$84 sps:$4 sm:$0xff]  }
 0x6bd   :  { %13811 = vmatprep.subr.bf16.mxu1 %v20915_v25  ;;  %v20960_v25 = vld [vmem:[#allocation7 + $0x12a4] ss:$84 sps:$4 sm:$0xff]  }
 0x6bf   :  { %13566 = vmatpush1.bf16.msra.mxu0 %v20910_v26  ;;  %v20963_v26 = vld [vmem:[#allocation7 + $0x12ac] ss:$84 sps:$4 sm:$0xff]  }
 0x6c0   :  { %13812 = vmatpush1.bf16.msra.mxu1 %v20913_v27  ;;  %13567 = vmatprep.subr.bf16.mxu0 %v20918_v28  ;;  %v20958_v27 = vld [vmem:[#allocation7 + $0x12a0] ss:$84 sps:$4 sm:$0xff]   ;;  %v20961_v28 = vld [vmem:[#allocation7 + $0x12a8] ss:$84 sps:$4 sm:$0xff]  }
 0x6c1   :  { %13813 = vmatprep.subr.bf16.mxu1 %v20921_v29  ;;  %v20966_v29 = vld [vmem:[#allocation7 + $0x134c] ss:$84 sps:$4 sm:$0xff]  }
 0x6c3   :  { %13568 = vmatpush1.bf16.msra.mxu0 %v20916_v34  ;;  %v20969_v34 = vld [vmem:[#allocation7 + $0x1354] ss:$84 sps:$4 sm:$0xff]  }
 0x6c4   :  { %13814 = vmatpush1.bf16.msra.mxu1 %v20919_v35  ;;  %13569 = vmatprep.subr.bf16.mxu0 %v20924_v32  ;;  %v20964_v35 = vld [vmem:[#allocation7 + $0x1348] ss:$84 sps:$4 sm:$0xff]   ;;  %v20967_v32 = vld [vmem:[#allocation7 + $0x1350] ss:$84 sps:$4 sm:$0xff]  }
 0x6c5   :  { %13815 = vmatprep.subr.bf16.mxu1 %v20927_v37  ;;  %v20972_v37 = vld [vmem:[#allocation7 + $0x13f4] ss:$84 sps:$4 sm:$0xff]  }
 0x6c7   :  { %13570 = vmatpush1.bf16.msra.mxu0 %v20922_v38  ;;  %v20975_v38 = vld [vmem:[#allocation7 + $0x13fc] ss:$84 sps:$4 sm:$0xff]  }
 0x6c8   :  { %13816 = vmatpush1.bf16.msra.mxu1 %v20925_v53  ;;  %13571 = vmatprep.subr.bf16.mxu0 %v20930_v40  ;;  %v20970_v53 = vld [vmem:[#allocation7 + $0x13f0] ss:$84 sps:$4 sm:$0xff]   ;;  %v20973_v40 = vld [vmem:[#allocation7 + $0x13f8] ss:$84 sps:$4 sm:$0xff]  }
 0x6c9   :  { %13817 = vmatprep.subr.bf16.mxu1 %v20933_v41  ;;  %v20978_v41 = vld [vmem:[#allocation7 + $0x149c] ss:$84 sps:$4 sm:$0xff]  }
 0x6cb   :  { %13572 = vmatpush1.bf16.msra.mxu0 %v20928_v12  ;;  %v20981_v12 = vld [vmem:[#allocation7 + $0x14a4] ss:$84 sps:$4 sm:$0xff]  }
 0x6cc   :  { %13818 = vmatpush1.bf16.msra.mxu1 %v20931_v54  ;;  %13573 = vmatprep.subr.bf16.mxu0 %v20936_v55  ;;  %v20976_v54 = vld [vmem:[#allocation7 + $0x1498] ss:$84 sps:$4 sm:$0xff]   ;;  %v20979_v55 = vld [vmem:[#allocation7 + $0x14a0] ss:$84 sps:$4 sm:$0xff]  }
 0x6cd   :  { %13819 = vmatprep.subr.bf16.mxu1 %v20939_v51  ;;  %v20984_v51 = vld [vmem:[#allocation7 + $0x1544] ss:$84 sps:$4 sm:$0xff]  }
 0x6cf   :  { %13574 = vmatpush1.bf16.msra.mxu0 %v20934_v57  ;;  %v20987_v57 = vld [vmem:[#allocation7 + $0x154c] ss:$84 sps:$4 sm:$0xff]  }
 0x6d0   :  { %13820 = vmatpush1.bf16.msra.mxu1 %v20937_v49  ;;  %13575 = vmatprep.subr.bf16.mxu0 %v20942_v59  ;;  %v20982_v49 = vld [vmem:[#allocation7 + $0x1540] ss:$84 sps:$4 sm:$0xff]   ;;  %v20985_v59 = vld [vmem:[#allocation7 + $0x1548] ss:$84 sps:$4 sm:$0xff]  }
 0x6d1   :  { %13821 = vmatprep.subr.bf16.mxu1 %v20945_v62  ;;  %v20990_v62 = vld [vmem:[#allocation7 + $0x15ec] ss:$84 sps:$4 sm:$0xff]  }
 0x6d3   :  { %13576 = vmatpush1.bf16.msra.mxu0 %v20940_v5  ;;  %v20993_v5 = vld [vmem:[#allocation7 + $0x15f4] ss:$84 sps:$4 sm:$0xff]  }
 0x6d4   :  { %13822 = vmatpush1.bf16.msra.mxu1 %v20943_v6  ;;  %13577 = vmatprep.subr.bf16.mxu0 %v20948_v7  ;;  %v20988_v6 = vld [vmem:[#allocation7 + $0x15e8] ss:$84 sps:$4 sm:$0xff]   ;;  %v20991_v7 = vld [vmem:[#allocation7 + $0x15f0] ss:$84 sps:$4 sm:$0xff]  }
 0x6d5   :  { %13823 = vmatprep.subr.bf16.mxu1 %v20951_v8  ;;  %v20996_v8 = vld [vmem:[#allocation7 + $0x1694] ss:$84 sps:$4 sm:$0xff]  }
 0x6d7   :  { %13578 = vmatpush1.bf16.msra.mxu0 %v20946_v13  ;;  %v20999_v13 = vld [vmem:[#allocation7 + $0x169c] ss:$84 sps:$4 sm:$0xff]  }
 0x6d8   :  { %13824 = vmatpush1.bf16.msra.mxu1 %v20949_v15  ;;  %13579 = vmatprep.subr.bf16.mxu0 %v20954_v19  ;;  %v20994_v15 = vld [vmem:[#allocation7 + $0x1690] ss:$84 sps:$4 sm:$0xff]   ;;  %v20997_v19 = vld [vmem:[#allocation7 + $0x1698] ss:$84 sps:$4 sm:$0xff]  }
 0x6d9   :  { %13825 = vmatprep.subr.bf16.mxu1 %v20957_v20  ;;  %v21002_v20 = vld [vmem:[#allocation7 + $0x173c] ss:$84 sps:$4 sm:$0xff]  }
 0x6db   :  { %13580 = vmatpush1.bf16.msra.mxu0 %v20952_v22  ;;  %v21005_v22 = vld [vmem:[#allocation7 + $0x1744] ss:$84 sps:$4 sm:$0xff]  }
 0x6dc   :  { %13826 = vmatpush1.bf16.msra.mxu1 %v20955_v23  ;;  %13581 = vmatprep.subr.bf16.mxu0 %v20960_v25  ;;  %v21000_v23 = vld [vmem:[#allocation7 + $0x1738] ss:$84 sps:$4 sm:$0xff]   ;;  %v21003_v25 = vld [vmem:[#allocation7 + $0x1740] ss:$84 sps:$4 sm:$0xff]  }
 0x6dd   :  { %13827 = vmatprep.subr.bf16.mxu1 %v20963_v26  ;;  %v21008_v26 = vld [vmem:[#allocation7 + $0x17e4] ss:$84 sps:$4 sm:$0xff]  }
 0x6df   :  { %13582 = vmatpush1.bf16.msra.mxu0 %v20958_v27  ;;  %v21011_v27 = vld [vmem:[#allocation7 + $0x17ec] ss:$84 sps:$4 sm:$0xff]  }
 0x6e0   :  { %13828 = vmatpush1.bf16.msra.mxu1 %v20961_v28  ;;  %13583 = vmatprep.subr.bf16.mxu0 %v20966_v29  ;;  %v21006_v28 = vld [vmem:[#allocation7 + $0x17e0] ss:$84 sps:$4 sm:$0xff]   ;;  %v21009_v29 = vld [vmem:[#allocation7 + $0x17e8] ss:$84 sps:$4 sm:$0xff]  }
 0x6e1   :  { %13829 = vmatprep.subr.bf16.mxu1 %v20969_v34  ;;  %v21014_v34 = vld [vmem:[#allocation7 + $0x188c] ss:$84 sps:$4 sm:$0xff]  }
 0x6e3   :  { %13584 = vmatpush1.bf16.msra.mxu0 %v20964_v35  ;;  %v21017_v35 = vld [vmem:[#allocation7 + $0x1894] ss:$84 sps:$4 sm:$0xff]  }
 0x6e4   :  { %13830 = vmatpush1.bf16.msra.mxu1 %v20967_v32  ;;  %13585 = vmatprep.subr.bf16.mxu0 %v20972_v37  ;;  %v21012_v32 = vld [vmem:[#allocation7 + $0x1888] ss:$84 sps:$4 sm:$0xff]   ;;  %v21015_v37 = vld [vmem:[#allocation7 + $0x1890] ss:$84 sps:$4 sm:$0xff]  }
 0x6e5   :  { %13831 = vmatprep.subr.bf16.mxu1 %v20975_v38  ;;  %v21020_v38 = vld [vmem:[#allocation7 + $0x1934] ss:$84 sps:$4 sm:$0xff]  }
 0x6e7   :  { %13586 = vmatpush1.bf16.msra.mxu0 %v20970_v53  ;;  %v21023_v53 = vld [vmem:[#allocation7 + $0x193c] ss:$84 sps:$4 sm:$0xff]  }
 0x6e8   :  { %13832 = vmatpush1.bf16.msra.mxu1 %v20973_v40  ;;  %13587 = vmatprep.subr.bf16.mxu0 %v20978_v41  ;;  %v21018_v40 = vld [vmem:[#allocation7 + $0x1930] ss:$84 sps:$4 sm:$0xff]   ;;  %v21021_v41 = vld [vmem:[#allocation7 + $0x1938] ss:$84 sps:$4 sm:$0xff]  }
 0x6e9   :  { %13833 = vmatprep.subr.bf16.mxu1 %v20981_v12  ;;  %v21026_v12 = vld [vmem:[#allocation7 + $0x19dc] ss:$84 sps:$4 sm:$0xff]  }
 0x6eb   :  { %13588 = vmatpush1.bf16.msra.mxu0 %v20976_v54  ;;  %v21029_v54 = vld [vmem:[#allocation7 + $0x19e4] ss:$84 sps:$4 sm:$0xff]  }
 0x6ec   :  { %13834 = vmatpush1.bf16.msra.mxu1 %v20979_v55  ;;  %13598 = vmatprep.subr.bf16.mxu0 %v20984_v51  ;;  %v21024_v55 = vld [vmem:[#allocation7 + $0x19d8] ss:$84 sps:$4 sm:$0xff]   ;;  %v21027_v51 = vld [vmem:[#allocation7 + $0x19e0] ss:$84 sps:$4 sm:$0xff]  }
 0x6ed   :  { %13844 = vmatprep.subr.bf16.mxu1 %v20987_v57  ;;  %v21032_v57 = vld [vmem:[#allocation7 + $0x1a84] ss:$84 sps:$4 sm:$0xff]  }
 0x6ee   :  { %13590 = vmatmul.mubr.bf16.vlgmr.msra.gmra.mrb[32].mxu0 %v21968_v60 }
 0x6ef   :  { %13836 = vmatmul.mubr.bf16.vlgmr.msra.gmra.mrb[24].mxu1 %v21968_v60  ;;  %13599 = vmatpush1.bf16.msra.mxu0 %v20982_v49  ;;  %v21035_v49 = vld [vmem:[#allocation7 + $0x1a8c] ss:$84 sps:$4 sm:$0xff]  }
 0x6f0   :  { %13630 = vmatprep.mubr.bf16.mxu0 %v21970_v0  ;;  %13845 = vmatpush1.bf16.msra.mxu1 %v20985_v59  ;;  %v21030_v59 = vld [vmem:[#allocation7 + $0x1a80] ss:$84 sps:$4 sm:$0xff]  }
 0x6f1   :  { %13876 = vmatprep.mubr.bf16.mxu1 %v21970_v0  ;;  %13600 = vmatprep.subr.bf16.mxu0 %v20990_v62  ;;  %v21033_v62 = vld [vmem:[#allocation7 + $0x1a88] ss:$84 sps:$4 sm:$0xff]  }
 0x6f2   :  { %13846 = vmatprep.subr.bf16.mxu1 %v20993_v5  ;;  %v21038_v5 = vld [vmem:[#allocation7 + $0x1b2c] ss:$84 sps:$4 sm:$0xff]  }
 0x6f3   :  { %13601 = vmatpush1.bf16.msra.mxu0 %v20988_v6  ;;  %v21041_v6 = vld [vmem:[#allocation7 + $0x1b34] ss:$84 sps:$4 sm:$0xff]  }
 0x6f4   :  { %13847 = vmatpush1.bf16.msra.mxu1 %v20991_v7  ;;  %13602 = vmatprep.subr.bf16.mxu0 %v20996_v8  ;;  %v21036_v7 = vld [vmem:[#allocation7 + $0x1b28] ss:$84 sps:$4 sm:$0xff]   ;;  %v21039_v8 = vld [vmem:[#allocation7 + $0x1b30] ss:$84 sps:$4 sm:$0xff]  }
 0x6f5   :  { %13848 = vmatprep.subr.bf16.mxu1 %v20999_v13  ;;  %v21044_v13 = vld [vmem:[#allocation7 + $0x1bd4] ss:$84 sps:$4 sm:$0xff]  }
 0x6f7   :  { %13603 = vmatpush1.bf16.msra.mxu0 %v20994_v15  ;;  %v21047_v15 = vld [vmem:[#allocation7 + $0x1bdc] ss:$84 sps:$4 sm:$0xff]  }
 0x6f8   :  { %13849 = vmatpush1.bf16.msra.mxu1 %v20997_v19  ;;  %13604 = vmatprep.subr.bf16.mxu0 %v21002_v20  ;;  %v21042_v19 = vld [vmem:[#allocation7 + $0x1bd0] ss:$84 sps:$4 sm:$0xff]   ;;  %v21045_v20 = vld [vmem:[#allocation7 + $0x1bd8] ss:$84 sps:$4 sm:$0xff]  }
 0x6f9   :  { %13850 = vmatprep.subr.bf16.mxu1 %v21005_v22  ;;  %v21050_v22 = vld [vmem:[#allocation7 + $0x1c7c] ss:$84 sps:$4 sm:$0xff]  }
 0x6fb   :  { %13605 = vmatpush1.bf16.msra.mxu0 %v21000_v23  ;;  %v21053_v23 = vld [vmem:[#allocation7 + $0x1c84] ss:$84 sps:$4 sm:$0xff]  }
 0x6fc   :  { %13851 = vmatpush1.bf16.msra.mxu1 %v21003_v25  ;;  %13606 = vmatprep.subr.bf16.mxu0 %v21008_v26  ;;  %v21048_v25 = vld [vmem:[#allocation7 + $0x1c78] ss:$84 sps:$4 sm:$0xff]   ;;  %v21051_v26 = vld [vmem:[#allocation7 + $0x1c80] ss:$84 sps:$4 sm:$0xff]  }
 0x6fd   :  { %13852 = vmatprep.subr.bf16.mxu1 %v21011_v27  ;;  %v21056_v27 = vld [vmem:[#allocation7 + $0x1d24] ss:$84 sps:$4 sm:$0xff]  }
 0x6ff   :  { %13607 = vmatpush1.bf16.msra.mxu0 %v21006_v28  ;;  %v21059_v28 = vld [vmem:[#allocation7 + $0x1d2c] ss:$84 sps:$4 sm:$0xff]  }
 0x700   :  { %13853 = vmatpush1.bf16.msra.mxu1 %v21009_v29  ;;  %13608 = vmatprep.subr.bf16.mxu0 %v21014_v34  ;;  %v21054_v29 = vld [vmem:[#allocation7 + $0x1d20] ss:$84 sps:$4 sm:$0xff]   ;;  %v21057_v34 = vld [vmem:[#allocation7 + $0x1d28] ss:$84 sps:$4 sm:$0xff]  }
 0x701   :  { %13854 = vmatprep.subr.bf16.mxu1 %v21017_v35  ;;  %v21062_v35 = vld [vmem:[#allocation7 + $0x1dcc] ss:$84 sps:$4 sm:$0xff]  }
 0x703   :  { %13609 = vmatpush1.bf16.msra.mxu0 %v21012_v32  ;;  %v21065_v32 = vld [vmem:[#allocation7 + $0x1dd4] ss:$84 sps:$4 sm:$0xff]  }
 0x704   :  { %13855 = vmatpush1.bf16.msra.mxu1 %v21015_v37  ;;  %13610 = vmatprep.subr.bf16.mxu0 %v21020_v38  ;;  %v21060_v37 = vld [vmem:[#allocation7 + $0x1dc8] ss:$84 sps:$4 sm:$0xff]   ;;  %v21063_v38 = vld [vmem:[#allocation7 + $0x1dd0] ss:$84 sps:$4 sm:$0xff]  }
 0x705   :  { %13856 = vmatprep.subr.bf16.mxu1 %v21023_v53  ;;  %v21068_v53 = vld [vmem:[#allocation7 + $0x1e74] ss:$84 sps:$4 sm:$0xff]  }
 0x707   :  { %13611 = vmatpush1.bf16.msra.mxu0 %v21018_v40  ;;  %v21071_v40 = vld [vmem:[#allocation7 + $0x1e7c] ss:$84 sps:$4 sm:$0xff]  }
 0x708   :  { %13857 = vmatpush1.bf16.msra.mxu1 %v21021_v41  ;;  %13612 = vmatprep.subr.bf16.mxu0 %v21026_v12  ;;  %v21066_v41 = vld [vmem:[#allocation7 + $0x1e70] ss:$84 sps:$4 sm:$0xff]   ;;  %v21069_v12 = vld [vmem:[#allocation7 + $0x1e78] ss:$84 sps:$4 sm:$0xff]  }
 0x709   :  { %13858 = vmatprep.subr.bf16.mxu1 %v21029_v54  ;;  %v21074_v54 = vld [vmem:[#allocation7 + $0x1f1c] ss:$84 sps:$4 sm:$0xff]  }
 0x70b   :  { %13613 = vmatpush1.bf16.msra.mxu0 %v21024_v55  ;;  %v21077_v55 = vld [vmem:[#allocation7 + $0x1f24] ss:$84 sps:$4 sm:$0xff]  }
 0x70c   :  { %13859 = vmatpush1.bf16.msra.mxu1 %v21027_v51  ;;  %13614 = vmatprep.subr.bf16.mxu0 %v21032_v57  ;;  %v21072_v51 = vld [vmem:[#allocation7 + $0x1f18] ss:$84 sps:$4 sm:$0xff]   ;;  %v21075_v57 = vld [vmem:[#allocation7 + $0x1f20] ss:$84 sps:$4 sm:$0xff]  }
 0x70d   :  { %13860 = vmatprep.subr.bf16.mxu1 %v21035_v49  ;;  %v21080_v49 = vld [vmem:[#allocation7 + $0x1fc4] ss:$84 sps:$4 sm:$0xff]  }
 0x70f   :  { %13615 = vmatpush1.bf16.msra.mxu0 %v21030_v59  ;;  %v21083_v59 = vld [vmem:[#allocation7 + $0x1fcc] ss:$84 sps:$4 sm:$0xff]  }
 0x710   :  { %13861 = vmatpush1.bf16.msra.mxu1 %v21033_v62  ;;  %13616 = vmatprep.subr.bf16.mxu0 %v21038_v5  ;;  %v21078_v62 = vld [vmem:[#allocation7 + $0x1fc0] ss:$84 sps:$4 sm:$0xff]   ;;  %v21081_v5 = vld [vmem:[#allocation7 + $0x1fc8] ss:$84 sps:$4 sm:$0xff]  }
 0x711   :  { %13862 = vmatprep.subr.bf16.mxu1 %v21041_v6  ;;  %v21086_v6 = vld [vmem:[#allocation7 + $0x206c] ss:$84 sps:$4 sm:$0xff]  }
 0x713   :  { %13617 = vmatpush1.bf16.msra.mxu0 %v21036_v7  ;;  %v21089_v7 = vld [vmem:[#allocation7 + $0x2074] ss:$84 sps:$4 sm:$0xff]  }
 0x714   :  { %13863 = vmatpush1.bf16.msra.mxu1 %v21039_v8  ;;  %13618 = vmatprep.subr.bf16.mxu0 %v21044_v13  ;;  %v21084_v8 = vld [vmem:[#allocation7 + $0x2068] ss:$84 sps:$4 sm:$0xff]   ;;  %v21087_v13 = vld [vmem:[#allocation7 + $0x2070] ss:$84 sps:$4 sm:$0xff]  }
 0x715   :  { %13864 = vmatprep.subr.bf16.mxu1 %v21047_v15  ;;  %v21092_v15 = vld [vmem:[#allocation7 + $0x2114] ss:$84 sps:$4 sm:$0xff]  }
 0x717   :  { %13619 = vmatpush1.bf16.msra.mxu0 %v21042_v19  ;;  %v21095_v19 = vld [vmem:[#allocation7 + $0x211c] ss:$84 sps:$4 sm:$0xff]  }
 0x718   :  { %13865 = vmatpush1.bf16.msra.mxu1 %v21045_v20  ;;  %13620 = vmatprep.subr.bf16.mxu0 %v21050_v22  ;;  %v21090_v20 = vld [vmem:[#allocation7 + $0x2110] ss:$84 sps:$4 sm:$0xff]   ;;  %v21093_v22 = vld [vmem:[#allocation7 + $0x2118] ss:$84 sps:$4 sm:$0xff]  }
 0x719   :  { %13866 = vmatprep.subr.bf16.mxu1 %v21053_v23  ;;  %v21098_v23 = vld [vmem:[#allocation7 + $0x21bc] ss:$84 sps:$4 sm:$0xff]  }
 0x71b   :  { %13621 = vmatpush1.bf16.msra.mxu0 %v21048_v25  ;;  %v21101_v25 = vld [vmem:[#allocation7 + $0x21c4] ss:$84 sps:$4 sm:$0xff]  }
 0x71c   :  { %13867 = vmatpush1.bf16.msra.mxu1 %v21051_v26  ;;  %13622 = vmatprep.subr.bf16.mxu0 %v21056_v27  ;;  %v21096_v26 = vld [vmem:[#allocation7 + $0x21b8] ss:$84 sps:$4 sm:$0xff]   ;;  %v21099_v27 = vld [vmem:[#allocation7 + $0x21c0] ss:$84 sps:$4 sm:$0xff]  }
 0x71d   :  { %13868 = vmatprep.subr.bf16.mxu1 %v21059_v28  ;;  %v21104_v28 = vld [vmem:[#allocation7 + $0x2264] ss:$84 sps:$4 sm:$0xff]  }
 0x71f   :  { %13623 = vmatpush1.bf16.msra.mxu0 %v21054_v29  ;;  %v21107_v29 = vld [vmem:[#allocation7 + $0x226c] ss:$84 sps:$4 sm:$0xff]  }
 0x720   :  { %13869 = vmatpush1.bf16.msra.mxu1 %v21057_v34  ;;  %13624 = vmatprep.subr.bf16.mxu0 %v21062_v35  ;;  %v21102_v34 = vld [vmem:[#allocation7 + $0x2260] ss:$84 sps:$4 sm:$0xff]   ;;  %v21105_v35 = vld [vmem:[#allocation7 + $0x2268] ss:$84 sps:$4 sm:$0xff]  }
 0x721   :  { %13870 = vmatprep.subr.bf16.mxu1 %v21065_v32  ;;  %v21110_v32 = vld [vmem:[#allocation7 + $0x230c] ss:$84 sps:$4 sm:$0xff]  }
 0x723   :  { %13625 = vmatpush1.bf16.msra.mxu0 %v21060_v37  ;;  %v21113_v37 = vld [vmem:[#allocation7 + $0x2314] ss:$84 sps:$4 sm:$0xff]  }
 0x724   :  { %13871 = vmatpush1.bf16.msra.mxu1 %v21063_v38  ;;  %13626 = vmatprep.subr.bf16.mxu0 %v21068_v53  ;;  %v21108_v38 = vld [vmem:[#allocation7 + $0x2308] ss:$84 sps:$4 sm:$0xff]   ;;  %v21111_v53 = vld [vmem:[#allocation7 + $0x2310] ss:$84 sps:$4 sm:$0xff]  }
 0x725   :  { %13872 = vmatprep.subr.bf16.mxu1 %v21071_v40  ;;  %v21116_v40 = vld [vmem:[#allocation7 + $0x23b4] ss:$84 sps:$4 sm:$0xff]  }
 0x727   :  { %13627 = vmatpush1.bf16.msra.mxu0 %v21066_v41 }
 0x728   :  { %13873 = vmatpush1.bf16.msra.mxu1 %v21069_v12  ;;  %13628 = vmatprep.subr.bf16.mxu0 %v21074_v54  ;;  %v21119_v12 = vld [vmem:[#allocation7 + $0x23bc] ss:$84 sps:$4 sm:$0xff]  }
 0x729   :  { %13874 = vmatprep.subr.bf16.mxu1 %v21077_v55 }
 0x72b   :  { %13629 = vmatpush1.bf16.msra.mxu0 %v21072_v51 }
 0x72c   :  { %13875 = vmatpush1.bf16.msra.mxu1 %v21075_v57  ;;  %13639 = vmatprep.subr.bf16.mxu0 %v21080_v49  ;;  %v21114_v49 = vld [vmem:[#allocation7 + $0x23b0] ss:$84 sps:$4 sm:$0xff]  }
 0x72d   :  { %13885 = vmatprep.subr.bf16.mxu1 %v21083_v59 }
 0x72e   :  { %13631 = vmatmul.mubr.bf16.vlgmr.msra.gmra.mrb[32].mxu0 %v21990_v36 }
 0x72f   :  { %13877 = vmatmul.mubr.bf16.vlgmr.msra.gmra.mrb[24].mxu1 %v21990_v36  ;;  %13640 = vmatpush1.bf16.msra.mxu0 %v21078_v62 }
 0x730   :  { %13671 = vmatprep.mubr.bf16.mxu0 %v21992_v39  ;;  %13886 = vmatpush1.bf16.msra.mxu1 %v21081_v5  ;;  %v21117_v5 = vld [vmem:[#allocation7 + $0x23b8] ss:$84 sps:$4 sm:$0xff]  }
 0x731   :  { %13917 = vmatprep.mubr.bf16.mxu1 %v21992_v39  ;;  %13641 = vmatprep.subr.bf16.mxu0 %v21086_v6  ;;  %v21122_v6 = vld [vmem:[#allocation7 + $0x245c] ss:$84 sps:$4 sm:$0xff]  }
 0x732   :  { %13887 = vmatprep.subr.bf16.mxu1 %v21089_v7 }
 0x733   :  { %13642 = vmatpush1.bf16.msra.mxu0 %v21084_v8  ;;  %v21125_v8 = vld [vmem:[#allocation7 + $0x2464] ss:$84 sps:$4 sm:$0xff]  }
 0x734   :  { %13888 = vmatpush1.bf16.msra.mxu1 %v21087_v13  ;;  %13643 = vmatprep.subr.bf16.mxu0 %v21092_v15  ;;  %v21120_v13 = vld [vmem:[#allocation7 + $0x2458] ss:$84 sps:$4 sm:$0xff]   ;;  %v21123_v15 = vld [vmem:[#allocation7 + $0x2460] ss:$84 sps:$4 sm:$0xff]  }
 0x735   :  { %13889 = vmatprep.subr.bf16.mxu1 %v21095_v19  ;;  %v21128_v19 = vld [vmem:[#allocation7 + $0x2504] ss:$84 sps:$4 sm:$0xff]  }
 0x737   :  { %13644 = vmatpush1.bf16.msra.mxu0 %v21090_v20  ;;  %v21131_v20 = vld [vmem:[#allocation7 + $0x250c] ss:$84 sps:$4 sm:$0xff]  }
 0x738   :  { %13890 = vmatpush1.bf16.msra.mxu1 %v21093_v22  ;;  %13645 = vmatprep.subr.bf16.mxu0 %v21098_v23  ;;  %v21126_v22 = vld [vmem:[#allocation7 + $0x2500] ss:$84 sps:$4 sm:$0xff]   ;;  %v21129_v23 = vld [vmem:[#allocation7 + $0x2508] ss:$84 sps:$4 sm:$0xff]  }
 0x739   :  { %13891 = vmatprep.subr.bf16.mxu1 %v21101_v25  ;;  %v21134_v25 = vld [vmem:[#allocation7 + $0x25ac] ss:$84 sps:$4 sm:$0xff]  }
 0x73b   :  { %13646 = vmatpush1.bf16.msra.mxu0 %v21096_v26  ;;  %v21137_v26 = vld [vmem:[#allocation7 + $0x25b4] ss:$84 sps:$4 sm:$0xff]  }
 0x73c   :  { %13892 = vmatpush1.bf16.msra.mxu1 %v21099_v27  ;;  %13647 = vmatprep.subr.bf16.mxu0 %v21104_v28  ;;  %v21132_v27 = vld [vmem:[#allocation7 + $0x25a8] ss:$84 sps:$4 sm:$0xff]   ;;  %v21135_v28 = vld [vmem:[#allocation7 + $0x25b0] ss:$84 sps:$4 sm:$0xff]  }
 0x73d   :  { %13893 = vmatprep.subr.bf16.mxu1 %v21107_v29  ;;  %v21140_v29 = vld [vmem:[#allocation7 + $0x2654] ss:$84 sps:$4 sm:$0xff]  }
 0x73f   :  { %13648 = vmatpush1.bf16.msra.mxu0 %v21102_v34  ;;  %v21143_v34 = vld [vmem:[#allocation7 + $0x265c] ss:$84 sps:$4 sm:$0xff]  }
 0x740   :  { %13894 = vmatpush1.bf16.msra.mxu1 %v21105_v35  ;;  %13649 = vmatprep.subr.bf16.mxu0 %v21110_v32  ;;  %v21138_v35 = vld [vmem:[#allocation7 + $0x2650] ss:$84 sps:$4 sm:$0xff]   ;;  %v21141_v32 = vld [vmem:[#allocation7 + $0x2658] ss:$84 sps:$4 sm:$0xff]  }
 0x741   :  { %v22149_v41 = vpop.f32.mrb[28].mxu0  ;;  %13895 = vmatprep.subr.bf16.mxu1 %v21113_v37  ;;  %v21146_v37 = vld [vmem:[#allocation7 + $0x26fc] ss:$84 sps:$4 sm:$0xff]  }
 0x742   :  { %v22151_v54 = vpop.f32.mrb[20].mxu1  ;;  %v22153_v55 = vpop.f32.mrb[29].mxu0 }
 0x743   :  { %v22155_v51 = vpop.f32.mrb[21].mxu1  ;;  %v13267_v57 = vpop.f32.mrb[30].mxu0  ;;  %13650 = vmatpush1.bf16.msra.mxu0 %v21108_v38  ;;  %v21149_v38 = vld [vmem:[#allocation7 + $0x2704] ss:$84 sps:$4 sm:$0xff]  }
 0x744   :  { %v13513_v59 = vpop.f32.mrb[22].mxu1  ;;  %13896 = vmatpush1.bf16.msra.mxu1 %v21111_v53  ;;  %v13268_v62 = vpop.f32.mrb[31].mxu0  ;;  %13651 = vmatprep.subr.bf16.mxu0 %v21116_v40  ;;  %v21144_v53 = vld [vmem:[#allocation7 + $0x26f8] ss:$84 sps:$4 sm:$0xff]   ;;  %v21147_v40 = vld [vmem:[#allocation7 + $0x2700] ss:$84 sps:$4 sm:$0xff]  }
 0x745   :  { %v13514_v7 = vpop.f32.mrb[23].mxu1  ;;  %13897 = vmatprep.subr.bf16.mxu1 %v21119_v12  ;;  %v21152_v12 = vld [vmem:[#allocation7 + $0x27a4] ss:$84 sps:$4 sm:$0xff]   ;;  %v21155_v57 = vld [vmem:[#allocation7 + $0x27ac] ss:$84 sps:$4 sm:$0xff]  }
 0x746   :  { %v21153_v59 = vld [vmem:[#allocation7 + $0x27a8] ss:$84 sps:$4 sm:$0xff]   ;;  %v21158_v62 = vld [vmem:[#allocation7 + $0x284c] ss:$84 sps:$4 sm:$0xff]   ;;  %v21159_v7 = vld [vmem:[#allocation7 + $0x2850] ss:$84 sps:$4 sm:$0xff]  }
 0x747   :  { %13652 = vmatpush1.bf16.msra.mxu0 %v21114_v49  ;;  %v21150_v49 = vld [vmem:[#allocation7 + $0x27a0] ss:$84 sps:$4 sm:$0xff]  }
 0x748   :  { %13898 = vmatpush1.bf16.msra.mxu1 %v21117_v5  ;;  %13653 = vmatprep.subr.bf16.mxu0 %v21122_v6  ;;  %v21161_v5 = vld [vmem:[#allocation7 + $0x2854] ss:$84 sps:$4 sm:$0xff]  }
 0x749   :  { %13899 = vmatprep.subr.bf16.mxu1 %v21125_v8  ;;  %v21156_v6 = vld [vmem:[#allocation7 + $0x2848] ss:$84 sps:$4 sm:$0xff]  }
 0x74a   :  { %v21164_v8 = vld [vmem:[#allocation7 + $0x28f4] ss:$84 sps:$4 sm:$0xff]  }
 0x74b   :  { %13654 = vmatpush1.bf16.msra.mxu0 %v21120_v13  ;;  %v21167_v13 = vld [vmem:[#allocation7 + $0x28fc] ss:$84 sps:$4 sm:$0xff]  }
 0x74c   :  { %13900 = vmatpush1.bf16.msra.mxu1 %v21123_v15  ;;  %13655 = vmatprep.subr.bf16.mxu0 %v21128_v19  ;;  %v21162_v15 = vld [vmem:[#allocation7 + $0x28f0] ss:$84 sps:$4 sm:$0xff]   ;;  %v21165_v19 = vld [vmem:[#allocation7 + $0x28f8] ss:$84 sps:$4 sm:$0xff]  }
 0x74d   :  { %13901 = vmatprep.subr.bf16.mxu1 %v21131_v20  ;;  %v21170_v20 = vld [vmem:[#allocation7 + $0x299c] ss:$84 sps:$4 sm:$0xff]  }
 0x74f   :  { %13656 = vmatpush1.bf16.msra.mxu0 %v21126_v22  ;;  %v21173_v22 = vld [vmem:[#allocation7 + $0x29a4] ss:$84 sps:$4 sm:$0xff]  }
 0x750   :  { %13902 = vmatpush1.bf16.msra.mxu1 %v21129_v23  ;;  %13657 = vmatprep.subr.bf16.mxu0 %v21134_v25  ;;  %v21168_v23 = vld [vmem:[#allocation7 + $0x2998] ss:$84 sps:$4 sm:$0xff]   ;;  %v21171_v25 = vld [vmem:[#allocation7 + $0x29a0] ss:$84 sps:$4 sm:$0xff]  }
 0x751   :  { %13903 = vmatprep.subr.bf16.mxu1 %v21137_v26  ;;  %v21176_v26 = vld [vmem:[#allocation7 + $0x2a44] ss:$84 sps:$4 sm:$0xff]  }
 0x753   :  { %13658 = vmatpush1.bf16.msra.mxu0 %v21132_v27  ;;  %v21179_v27 = vld [vmem:[#allocation7 + $0x2a4c] ss:$84 sps:$4 sm:$0xff]  }
 0x754   :  { %13904 = vmatpush1.bf16.msra.mxu1 %v21135_v28  ;;  %13659 = vmatprep.subr.bf16.mxu0 %v21140_v29  ;;  %v21174_v28 = vld [vmem:[#allocation7 + $0x2a40] ss:$84 sps:$4 sm:$0xff]   ;;  %v21177_v29 = vld [vmem:[#allocation7 + $0x2a48] ss:$84 sps:$4 sm:$0xff]  }
 0x755   :  { %13905 = vmatprep.subr.bf16.mxu1 %v21143_v34  ;;  %v21182_v34 = vld [vmem:[#allocation7 + $0x2aec] ss:$84 sps:$4 sm:$0xff]  }
 0x757   :  { %13660 = vmatpush1.bf16.msra.mxu0 %v21138_v35  ;;  %v21185_v35 = vld [vmem:[#allocation7 + $0x2af4] ss:$84 sps:$4 sm:$0xff]  }
 0x758   :  { %13906 = vmatpush1.bf16.msra.mxu1 %v21141_v32  ;;  %13661 = vmatprep.subr.bf16.mxu0 %v21146_v37  ;;  %v21180_v32 = vld [vmem:[#allocation7 + $0x2ae8] ss:$84 sps:$4 sm:$0xff]   ;;  %v21183_v37 = vld [vmem:[#allocation7 + $0x2af0] ss:$84 sps:$4 sm:$0xff]  }
 0x759   :  { %13907 = vmatprep.subr.bf16.mxu1 %v21149_v38  ;;  %v21188_v38 = vld [vmem:[#allocation7 + $0x2b94] ss:$84 sps:$4 sm:$0xff]  }
 0x75b   :  { %13662 = vmatpush1.bf16.msra.mxu0 %v21144_v53  ;;  %v21191_v53 = vld [vmem:[#allocation7 + $0x2b9c] ss:$84 sps:$4 sm:$0xff]  }
 0x75c   :  { %13908 = vmatpush1.bf16.msra.mxu1 %v21147_v40  ;;  %13663 = vmatprep.subr.bf16.mxu0 %v21152_v12  ;;  %v21186_v40 = vld [vmem:[#allocation7 + $0x2b90] ss:$84 sps:$4 sm:$0xff]   ;;  %v21189_v12 = vld [vmem:[#allocation7 + $0x2b98] ss:$84 sps:$4 sm:$0xff]  }
 0x75d   :  { %13909 = vmatprep.subr.bf16.mxu1 %v21155_v57  ;;  %v21194_v57 = vld [vmem:[#allocation7 + $0x2c3c] ss:$84 sps:$4 sm:$0xff]  }
 0x75f   :  { %13664 = vmatpush1.bf16.msra.mxu0 %v21150_v49  ;;  %v21197_v49 = vld [vmem:[#allocation7 + $0x2c44] ss:$84 sps:$4 sm:$0xff]  }
 0x760   :  { %13910 = vmatpush1.bf16.msra.mxu1 %v21153_v59  ;;  %13665 = vmatprep.subr.bf16.mxu0 %v21158_v62  ;;  %v21192_v59 = vld [vmem:[#allocation7 + $0x2c38] ss:$84 sps:$4 sm:$0xff]   ;;  %v21195_v62 = vld [vmem:[#allocation7 + $0x2c40] ss:$84 sps:$4 sm:$0xff]  }
 0x761   :  { %13911 = vmatprep.subr.bf16.mxu1 %v21161_v5  ;;  %v21200_v5 = vld [vmem:[#allocation7 + $0x2ce4] ss:$84 sps:$4 sm:$0xff]  }
 0x763   :  { %13666 = vmatpush1.bf16.msra.mxu0 %v21156_v6  ;;  %v21203_v6 = vld [vmem:[#allocation7 + $0x2cec] ss:$84 sps:$4 sm:$0xff]  }
 0x764   :  { %13912 = vmatpush1.bf16.msra.mxu1 %v21159_v7  ;;  %13667 = vmatprep.subr.bf16.mxu0 %v21164_v8  ;;  %v21198_v7 = vld [vmem:[#allocation7 + $0x2ce0] ss:$84 sps:$4 sm:$0xff]   ;;  %v21201_v8 = vld [vmem:[#allocation7 + $0x2ce8] ss:$84 sps:$4 sm:$0xff]  }
 0x765   :  { %13913 = vmatprep.subr.bf16.mxu1 %v21167_v13  ;;  %v21206_v13 = vld [vmem:[#allocation7 + $0x2d8c] ss:$84 sps:$4 sm:$0xff]  }
 0x767   :  { %13668 = vmatpush1.bf16.msra.mxu0 %v21162_v15  ;;  %v21209_v15 = vld [vmem:[#allocation7 + $0x2d94] ss:$84 sps:$4 sm:$0xff]  }
 0x768   :  { %13914 = vmatpush1.bf16.msra.mxu1 %v21165_v19  ;;  %13669 = vmatprep.subr.bf16.mxu0 %v21170_v20  ;;  %v21204_v19 = vld [vmem:[#allocation7 + $0x2d88] ss:$84 sps:$4 sm:$0xff]   ;;  %v21207_v20 = vld [vmem:[#allocation7 + $0x2d90] ss:$84 sps:$4 sm:$0xff]  }
 0x769   :  { %13915 = vmatprep.subr.bf16.mxu1 %v21173_v22  ;;  %v21212_v22 = vld [vmem:[#allocation7 + $0x2e34] ss:$84 sps:$4 sm:$0xff]  }
 0x76b   :  { %13670 = vmatpush1.bf16.msra.mxu0 %v21168_v23  ;;  %v21215_v23 = vld [vmem:[#allocation7 + $0x2e3c] ss:$84 sps:$4 sm:$0xff]  }
 0x76c   :  { %13916 = vmatpush1.bf16.msra.mxu1 %v21171_v25  ;;  %13680 = vmatprep.subr.bf16.mxu0 %v21176_v26  ;;  %v21210_v25 = vld [vmem:[#allocation7 + $0x2e30] ss:$84 sps:$4 sm:$0xff]   ;;  %v21213_v26 = vld [vmem:[#allocation7 + $0x2e38] ss:$84 sps:$4 sm:$0xff]  }
 0x76d   :  { %13926 = vmatprep.subr.bf16.mxu1 %v21179_v27  ;;  %v21218_v27 = vld [vmem:[#allocation7 + $0x2edc] ss:$84 sps:$4 sm:$0xff]  }
 0x76e   :  { %13672 = vmatmul.mubr.bf16.vlgmr.msra.gmra.mrb[32].mxu0 %v22009_v46 }
 0x76f   :  { %13918 = vmatmul.mubr.bf16.vlgmr.msra.gmra.mrb[24].mxu1 %v22009_v46  ;;  %13681 = vmatpush1.bf16.msra.mxu0 %v21174_v28  ;;  %v21221_v28 = vld [vmem:[#allocation7 + $0x2ee4] ss:$84 sps:$4 sm:$0xff]  }
 0x770   :  { %13712 = vmatprep.mubr.bf16.mxu0 %v22011_v56  ;;  %13927 = vmatpush1.bf16.msra.mxu1 %v21177_v29  ;;  %v21216_v29 = vld [vmem:[#allocation7 + $0x2ed8] ss:$84 sps:$4 sm:$0xff]  }
 0x771   :  { %13958 = vmatprep.mubr.bf16.mxu1 %v22011_v56  ;;  %13682 = vmatprep.subr.bf16.mxu0 %v21182_v34  ;;  %v21219_v34 = vld [vmem:[#allocation7 + $0x2ee0] ss:$84 sps:$4 sm:$0xff]  }
 0x772   :  { %13928 = vmatprep.subr.bf16.mxu1 %v21185_v35  ;;  %v21224_v35 = vld [vmem:[#allocation7 + $0x2f84] ss:$84 sps:$4 sm:$0xff]  }
 0x773   :  { %13683 = vmatpush1.bf16.msra.mxu0 %v21180_v32  ;;  %v21227_v32 = vld [vmem:[#allocation7 + $0x2f8c] ss:$84 sps:$4 sm:$0xff]  }
 0x774   :  { %13929 = vmatpush1.bf16.msra.mxu1 %v21183_v37  ;;  %13684 = vmatprep.subr.bf16.mxu0 %v21188_v38  ;;  %v21222_v37 = vld [vmem:[#allocation7 + $0x2f80] ss:$84 sps:$4 sm:$0xff]   ;;  %v21225_v38 = vld [vmem:[#allocation7 + $0x2f88] ss:$84 sps:$4 sm:$0xff]  }
 0x775   :  { %13930 = vmatprep.subr.bf16.mxu1 %v21191_v53  ;;  %v21230_v53 = vld [vmem:[#allocation7 + $0x302c] ss:$84 sps:$4 sm:$0xff]  }
 0x777   :  { %13685 = vmatpush1.bf16.msra.mxu0 %v21186_v40  ;;  %v21233_v40 = vld [vmem:[#allocation7 + $0x3034] ss:$84 sps:$4 sm:$0xff]  }
 0x778   :  { %13931 = vmatpush1.bf16.msra.mxu1 %v21189_v12  ;;  %13686 = vmatprep.subr.bf16.mxu0 %v21194_v57  ;;  %v21228_v12 = vld [vmem:[#allocation7 + $0x3028] ss:$84 sps:$4 sm:$0xff]   ;;  %v21231_v57 = vld [vmem:[#allocation7 + $0x3030] ss:$84 sps:$4 sm:$0xff]  }
 0x779   :  { %13932 = vmatprep.subr.bf16.mxu1 %v21197_v49  ;;  %v21236_v49 = vld [vmem:[#allocation7 + $0x30d4] ss:$84 sps:$4 sm:$0xff]  }
 0x77b   :  { %13687 = vmatpush1.bf16.msra.mxu0 %v21192_v59  ;;  %v21239_v59 = vld [vmem:[#allocation7 + $0x30dc] ss:$84 sps:$4 sm:$0xff]  }
 0x77c   :  { %13933 = vmatpush1.bf16.msra.mxu1 %v21195_v62  ;;  %13688 = vmatprep.subr.bf16.mxu0 %v21200_v5  ;;  %v21234_v62 = vld [vmem:[#allocation7 + $0x30d0] ss:$84 sps:$4 sm:$0xff]   ;;  %v21237_v5 = vld [vmem:[#allocation7 + $0x30d8] ss:$84 sps:$4 sm:$0xff]  }
 0x77d   :  { %13934 = vmatprep.subr.bf16.mxu1 %v21203_v6  ;;  %v21242_v6 = vld [vmem:[#allocation7 + $0x317c] ss:$84 sps:$4 sm:$0xff]  }
 0x77f   :  { %13689 = vmatpush1.bf16.msra.mxu0 %v21198_v7  ;;  %v21245_v7 = vld [vmem:[#allocation7 + $0x3184] ss:$84 sps:$4 sm:$0xff]  }
 0x780   :  { %13935 = vmatpush1.bf16.msra.mxu1 %v21201_v8  ;;  %13690 = vmatprep.subr.bf16.mxu0 %v21206_v13  ;;  %v21240_v8 = vld [vmem:[#allocation7 + $0x3178] ss:$84 sps:$4 sm:$0xff]   ;;  %v21243_v13 = vld [vmem:[#allocation7 + $0x3180] ss:$84 sps:$4 sm:$0xff]  }
 0x781   :  { %13936 = vmatprep.subr.bf16.mxu1 %v21209_v15  ;;  %v21248_v15 = vld [vmem:[#allocation7 + $0x3224] ss:$84 sps:$4 sm:$0xff]  }
 0x783   :  { %13691 = vmatpush1.bf16.msra.mxu0 %v21204_v19  ;;  %v21251_v19 = vld [vmem:[#allocation7 + $0x322c] ss:$84 sps:$4 sm:$0xff]  }
 0x784   :  { %13937 = vmatpush1.bf16.msra.mxu1 %v21207_v20  ;;  %13692 = vmatprep.subr.bf16.mxu0 %v21212_v22  ;;  %v21246_v20 = vld [vmem:[#allocation7 + $0x3220] ss:$84 sps:$4 sm:$0xff]   ;;  %v21249_v22 = vld [vmem:[#allocation7 + $0x3228] ss:$84 sps:$4 sm:$0xff]  }
 0x785   :  { %13938 = vmatprep.subr.bf16.mxu1 %v21215_v23  ;;  %v21254_v23 = vld [vmem:[#allocation7 + $0x32cc] ss:$84 sps:$4 sm:$0xff]  }
 0x787   :  { %13693 = vmatpush1.bf16.msra.mxu0 %v21210_v25  ;;  %v21257_v25 = vld [vmem:[#allocation7 + $0x32d4] ss:$84 sps:$4 sm:$0xff]  }
 0x788   :  { %13939 = vmatpush1.bf16.msra.mxu1 %v21213_v26  ;;  %13694 = vmatprep.subr.bf16.mxu0 %v21218_v27  ;;  %v21252_v26 = vld [vmem:[#allocation7 + $0x32c8] ss:$84 sps:$4 sm:$0xff]   ;;  %v21255_v27 = vld [vmem:[#allocation7 + $0x32d0] ss:$84 sps:$4 sm:$0xff]  }
 0x789   :  { %13940 = vmatprep.subr.bf16.mxu1 %v21221_v28  ;;  %v21260_v28 = vld [vmem:[#allocation7 + $0x3374] ss:$84 sps:$4 sm:$0xff]  }
 0x78b   :  { %13695 = vmatpush1.bf16.msra.mxu0 %v21216_v29  ;;  %v21263_v29 = vld [vmem:[#allocation7 + $0x337c] ss:$84 sps:$4 sm:$0xff]  }
 0x78c   :  { %13941 = vmatpush1.bf16.msra.mxu1 %v21219_v34  ;;  %13696 = vmatprep.subr.bf16.mxu0 %v21224_v35  ;;  %v21258_v34 = vld [vmem:[#allocation7 + $0x3370] ss:$84 sps:$4 sm:$0xff]   ;;  %v21261_v35 = vld [vmem:[#allocation7 + $0x3378] ss:$84 sps:$4 sm:$0xff]  }
 0x78d   :  { %13942 = vmatprep.subr.bf16.mxu1 %v21227_v32  ;;  %v21266_v32 = vld [vmem:[#allocation7 + $0x341c] ss:$84 sps:$4 sm:$0xff]  }
 0x78f   :  { %13697 = vmatpush1.bf16.msra.mxu0 %v21222_v37  ;;  %v21269_v37 = vld [vmem:[#allocation7 + $0x3424] ss:$84 sps:$4 sm:$0xff]  }
 0x790   :  { %13943 = vmatpush1.bf16.msra.mxu1 %v21225_v38  ;;  %13698 = vmatprep.subr.bf16.mxu0 %v21230_v53  ;;  %v21264_v38 = vld [vmem:[#allocation7 + $0x3418] ss:$84 sps:$4 sm:$0xff]   ;;  %v21267_v53 = vld [vmem:[#allocation7 + $0x3420] ss:$84 sps:$4 sm:$0xff]  }
 0x791   :  { %13944 = vmatprep.subr.bf16.mxu1 %v21233_v40  ;;  %v21272_v40 = vld [vmem:[#allocation7 + $0x34c4] ss:$84 sps:$4 sm:$0xff]  }
 0x793   :  { %13699 = vmatpush1.bf16.msra.mxu0 %v21228_v12  ;;  %v21275_v12 = vld [vmem:[#allocation7 + $0x34cc] ss:$84 sps:$4 sm:$0xff]  }
 0x794   :  { %13945 = vmatpush1.bf16.msra.mxu1 %v21231_v57  ;;  %13700 = vmatprep.subr.bf16.mxu0 %v21236_v49  ;;  %v21270_v57 = vld [vmem:[#allocation7 + $0x34c0] ss:$84 sps:$4 sm:$0xff]   ;;  %v21273_v49 = vld [vmem:[#allocation7 + $0x34c8] ss:$84 sps:$4 sm:$0xff]  }
 0x795   :  { %13946 = vmatprep.subr.bf16.mxu1 %v21239_v59  ;;  %v21278_v59 = vld [vmem:[#allocation7 + $0x356c] ss:$84 sps:$4 sm:$0xff]  }
 0x797   :  { %13701 = vmatpush1.bf16.msra.mxu0 %v21234_v62  ;;  %v21281_v62 = vld [vmem:[#allocation7 + $0x3574] ss:$84 sps:$4 sm:$0xff]  }
 0x798   :  { %13947 = vmatpush1.bf16.msra.mxu1 %v21237_v5  ;;  %13702 = vmatprep.subr.bf16.mxu0 %v21242_v6  ;;  %v21276_v5 = vld [vmem:[#allocation7 + $0x3568] ss:$84 sps:$4 sm:$0xff]   ;;  %v21279_v6 = vld [vmem:[#allocation7 + $0x3570] ss:$84 sps:$4 sm:$0xff]  }
 0x799   :  { %13948 = vmatprep.subr.bf16.mxu1 %v21245_v7  ;;  %v21284_v7 = vld [vmem:[#allocation7 + $0x3614] ss:$84 sps:$4 sm:$0xff]  }
 0x79b   :  { %13703 = vmatpush1.bf16.msra.mxu0 %v21240_v8  ;;  %v21287_v8 = vld [vmem:[#allocation7 + $0x361c] ss:$84 sps:$4 sm:$0xff]  }
 0x79c   :  { %13949 = vmatpush1.bf16.msra.mxu1 %v21243_v13  ;;  %13704 = vmatprep.subr.bf16.mxu0 %v21248_v15  ;;  %v21282_v13 = vld [vmem:[#allocation7 + $0x3610] ss:$84 sps:$4 sm:$0xff]   ;;  %v21285_v15 = vld [vmem:[#allocation7 + $0x3618] ss:$84 sps:$4 sm:$0xff]  }
 0x79d   :  { %13950 = vmatprep.subr.bf16.mxu1 %v21251_v19  ;;  %v21290_v19 = vld [vmem:[#allocation7 + $0x36bc] ss:$84 sps:$4 sm:$0xff]  }
 0x79f   :  { %13705 = vmatpush1.bf16.msra.mxu0 %v21246_v20  ;;  %v21293_v20 = vld [vmem:[#allocation7 + $0x36c4] ss:$84 sps:$4 sm:$0xff]  }
 0x7a0   :  { %13951 = vmatpush1.bf16.msra.mxu1 %v21249_v22  ;;  %13706 = vmatprep.subr.bf16.mxu0 %v21254_v23  ;;  %v21288_v22 = vld [vmem:[#allocation7 + $0x36b8] ss:$84 sps:$4 sm:$0xff]   ;;  %v21291_v23 = vld [vmem:[#allocation7 + $0x36c0] ss:$84 sps:$4 sm:$0xff]  }
 0x7a1   :  { %13952 = vmatprep.subr.bf16.mxu1 %v21257_v25  ;;  %v21294_v25 = vld [vmem:[#allocation7 + $0x590] ss:$84 sps:$4 sm:$0xff]  }
 0x7a3   :  { %13707 = vmatpush1.bf16.msra.mxu0 %v21252_v26  ;;  %v21295_v26 = vld [vmem:[#allocation7 + $0x1010] ss:$84 sps:$4 sm:$0xff]  }
 0x7a4   :  { %13953 = vmatpush1.bf16.msra.mxu1 %v21255_v27  ;;  %13708 = vmatprep.subr.bf16.mxu0 %v21260_v28  ;;  %v21296_v27 = vld [vmem:[#allocation7 + $0x50] ss:$84 sps:$4 sm:$0xff]   ;;  %v21298_v28 = vld [vmem:[#allocation7 + $0x638] ss:$84 sps:$4 sm:$0xff]  }
 0x7a5   :  { %13954 = vmatprep.subr.bf16.mxu1 %v21263_v29  ;;  %v21299_v29 = vld [vmem:[#allocation7 + $0x10b8] ss:$84 sps:$4 sm:$0xff]  }
 0x7a7   :  { %13709 = vmatpush1.bf16.msra.mxu0 %v21258_v34  ;;  %v21300_v34 = vld [vmem:[#allocation7 + $0xf8] ss:$84 sps:$4 sm:$0xff]  }
 0x7a8   :  { %13955 = vmatpush1.bf16.msra.mxu1 %v21261_v35  ;;  %13710 = vmatprep.subr.bf16.mxu0 %v21266_v32  ;;  %v21301_v35 = vld [vmem:[#allocation7 + $0xb78] ss:$84 sps:$4 sm:$0xff]   ;;  %v21302_v32 = vld [vmem:[#allocation7 + $0x6e0] ss:$84 sps:$4 sm:$0xff]  }
 0x7a9   :  { %13956 = vmatprep.subr.bf16.mxu1 %v21269_v37  ;;  %v21303_v37 = vld [vmem:[#allocation7 + $0x1160] ss:$84 sps:$4 sm:$0xff]  }
 0x7ab   :  { %13711 = vmatpush1.bf16.msra.mxu0 %v21264_v38  ;;  %v21304_v38 = vld [vmem:[#allocation7 + $0x1a0] ss:$84 sps:$4 sm:$0xff]  }
 0x7ac   :  { %13957 = vmatpush1.bf16.msra.mxu1 %v21267_v53  ;;  %13721 = vmatprep.subr.bf16.mxu0 %v21272_v40  ;;  %v21305_v53 = vld [vmem:[#allocation7 + $0xc20] ss:$84 sps:$4 sm:$0xff]   ;;  %v21306_v40 = vld [vmem:[#allocation7 + $0x788] ss:$84 sps:$4 sm:$0xff]  }
 0x7ad   :  { %13967 = vmatprep.subr.bf16.mxu1 %v21275_v12  ;;  %v21307_v12 = vld [vmem:[#allocation7 + $0x1208] ss:$84 sps:$4 sm:$0xff]  }
 0x7ae   :  { %13713 = vmatmul.mubr.bf16.vlgmr.msra.gmra.mrb[32].mxu0 %v22020_v48 }
 0x7af   :  { %13959 = vmatmul.mubr.bf16.vlgmr.msra.gmra.mrb[24].mxu1 %v22020_v48  ;;  %13722 = vmatpush1.bf16.msra.mxu0 %v21270_v57  ;;  %v21308_v57 = vld [vmem:[#allocation7 + $0x248] ss:$84 sps:$4 sm:$0xff]  }
 0x7b0   :  { %13968 = vmatpush1.bf16.msra.mxu1 %v21273_v49  ;;  %13723 = vmatprep.subr.bf16.mxu0 %v21278_v59  ;;  %v21310_v49 = vld [vmem:[#allocation7 + $0x830] ss:$84 sps:$4 sm:$0xff]  }
 0x7b1   :  { %13969 = vmatprep.subr.bf16.mxu1 %v21281_v62  ;;  %13753 = vmatprep.mubr.bf16.mxu0 %v21723_v1  ;;  %v21311_v59 = vld [vmem:[#allocation7 + $0x12b0] ss:$84 sps:$4 sm:$0xff]  }
 0x7b2   :  { %13999 = vmatprep.mubr.bf16.mxu1 %v21723_v1  ;;  %v21297_v1 = vld [vmem:[#allocation7 + $0xad0] ss:$84 sps:$4 sm:$0xff]  }
 0x7b3   :  { %13724 = vmatpush1.bf16.msra.mxu0 %v21276_v5  ;;  %v21313_v62 = vld [vmem:[#allocation7 + $0xd70] ss:$84 sps:$4 sm:$0xff]   ;;  %v21314_v5 = vld [vmem:[#allocation7 + $0x8d8] ss:$84 sps:$4 sm:$0xff]  }
 0x7b4   :  { %13970 = vmatpush1.bf16.msra.mxu1 %v21279_v6  ;;  %13725 = vmatprep.subr.bf16.mxu0 %v21284_v7  ;;  %v21315_v6 = vld [vmem:[#allocation7 + $0x1358] ss:$84 sps:$4 sm:$0xff]  }
 0x7b5   :  { %13971 = vmatprep.subr.bf16.mxu1 %v21287_v8  ;;  %v21316_v7 = vld [vmem:[#allocation7 + $0x398] ss:$84 sps:$4 sm:$0xff]  }
 0x7b6   :  { %v21317_v8 = vld [vmem:[#allocation7 + $0xe18] ss:$84 sps:$4 sm:$0xff]  }
 0x7b7   :  { %13726 = vmatpush1.bf16.msra.mxu0 %v21282_v13  ;;  %v21318_v13 = vld [vmem:[#allocation7 + $0x980] ss:$84 sps:$4 sm:$0xff]  }
 0x7b8   :  { %13972 = vmatpush1.bf16.msra.mxu1 %v21285_v15  ;;  %13727 = vmatprep.subr.bf16.mxu0 %v21290_v19  ;;  %v21319_v15 = vld [vmem:[#allocation7 + $0x1400] ss:$84 sps:$4 sm:$0xff]  }
 0x7b9   :  { %13973 = vmatprep.subr.bf16.mxu1 %v21293_v20  ;;  %v21320_v19 = vld [vmem:[#allocation7 + $0x440] ss:$84 sps:$4 sm:$0xff]  }
 0x7ba   :  { %v21321_v20 = vld [vmem:[#allocation7 + $0xec0] ss:$84 sps:$4 sm:$0xff]  }
 0x7bb   :  { %13728 = vmatpush1.bf16.msra.mxu0 %v21288_v22  ;;  %v21322_v22 = vld [vmem:[#allocation7 + $0xa28] ss:$84 sps:$4 sm:$0xff]  }
 0x7bc   :  { %13974 = vmatpush1.bf16.msra.mxu1 %v21291_v23  ;;  %18104 = vmatprep.subr.bf16.mxu0 %v21294_v25  ;;  %v21323_v23 = vld [vmem:[#allocation7 + $0x14a8] ss:$84 sps:$4 sm:$0xff]  }
 0x7bd   :  { %18126 = vmatprep.subr.bf16.mxu1 %v21295_v26  ;;  %v21324_v25 = vld [vmem:[#allocation7 + $0x4e8] ss:$84 sps:$4 sm:$0xff]  }
 0x7be   :  { %17926 = vmatmul.mubr.msk.bf16.vlgmr.msra.gmra.mrb[32].mxu0 %vm11544_vm3, %v22027_v17  ;;  %v21325_v26 = vld [vmem:[#allocation7 + $0xf68] ss:$84 sps:$4 sm:$0xff]  }
 0x7bf   :  { %17927 = vmatmul.mubr.msk.bf16.vlgmr.msra.gmra.mrb[24].mxu1 %vm11544_vm3, %v22027_v17  ;;  %18105 = vmatpush3.bf16.msra.mxu0 %v21296_v27  ;;  %v21326_v27 = vld [vmem:[#allocation7 + $0x1a90] ss:$84 sps:$4 sm:$0xff]  }
 0x7c0   :  { %14040 = vmatprep.mubr.bf16.mxu0 %v21922_v2  ;;  %18127 = vmatpush3.bf16.msra.mxu1 %v21297_v1  ;;  %v21309_v2 = vld [vmem:[#allocation7 + $0xcc8] ss:$84 sps:$4 sm:$0xff]   ;;  %v21327_v1 = vld [vmem:[#allocation7 + $0x2510] ss:$84 sps:$4 sm:$0xff]  }
 0x7c1   :  { %14080 = vmatprep.mubr.bf16.mxu1 %v21937_v24  ;;  %18106 = vmatprep.subr.bf16.mxu0 %v21298_v28  ;;  %v21312_v24 = vld [vmem:[#allocation7 + $0x2f0] ss:$84 sps:$4 sm:$0xff]  }
 0x7c2   :  { %18128 = vmatprep.subr.bf16.mxu1 %v21299_v29  ;;  %v21328_v28 = vld [vmem:[#allocation7 + $0x1550] ss:$84 sps:$4 sm:$0xff]  }
 0x7c3   :  { %18107 = vmatpush3.bf16.msra.mxu0 %v21300_v34  ;;  %v21329_v29 = vld [vmem:[#allocation7 + $0x1fd0] ss:$84 sps:$4 sm:$0xff]   ;;  %v21330_v34 = vld [vmem:[#allocation7 + $0x1b38] ss:$84 sps:$4 sm:$0xff]  }
 0x7c4   :  { %18129 = vmatpush3.bf16.msra.mxu1 %v21301_v35  ;;  %18108 = vmatprep.subr.bf16.mxu0 %v21302_v32  ;;  %v21331_v35 = vld [vmem:[#allocation7 + $0x25b8] ss:$84 sps:$4 sm:$0xff]  }
 0x7c5   :  { %18130 = vmatprep.subr.bf16.mxu1 %v21303_v37  ;;  %v21332_v32 = vld [vmem:[#allocation7 + $0x15f8] ss:$84 sps:$4 sm:$0xff]  }
 0x7c6   :  { %v21333_v37 = vld [vmem:[#allocation7 + $0x2078] ss:$84 sps:$4 sm:$0xff]  }
 0x7c7   :  { %18109 = vmatpush3.bf16.msra.mxu0 %v21304_v38  ;;  %v21334_v38 = vld [vmem:[#allocation7 + $0x1be0] ss:$84 sps:$4 sm:$0xff]  }
 0x7c8   :  { %18131 = vmatpush3.bf16.msra.mxu1 %v21305_v53  ;;  %18110 = vmatprep.subr.bf16.mxu0 %v21306_v40  ;;  %v21335_v53 = vld [vmem:[#allocation7 + $0x2660] ss:$84 sps:$4 sm:$0xff]  }
 0x7c9   :  { %18132 = vmatprep.subr.bf16.mxu1 %v21307_v12  ;;  %v21336_v40 = vld [vmem:[#allocation7 + $0x16a0] ss:$84 sps:$4 sm:$0xff]   ;;  %v21338_v12 = vld [vmem:[#allocation7 + $0x1c88] ss:$84 sps:$4 sm:$0xff]  }
 0x7cb   :  { %18111 = vmatpush3.bf16.msra.mxu0 %v21308_v57  ;;  %v21340_v57 = vld [vmem:[#allocation7 + $0x1748] ss:$84 sps:$4 sm:$0xff]  }
 0x7cc   :  { %18133 = vmatpush3.bf16.msra.mxu1 %v21309_v2  ;;  %18112 = vmatprep.subr.bf16.mxu0 %v21310_v49  ;;  %v21342_v2 = vld [vmem:[#allocation7 + $0x1d30] ss:$84 sps:$4 sm:$0xff]  }
 0x7cd   :  { %18134 = vmatprep.subr.bf16.mxu1 %v21311_v59  ;;  %v21343_v49 = vld [vmem:[#allocation7 + $0x27b0] ss:$84 sps:$4 sm:$0xff]  }
 0x7ce   :  { %v21345_v59 = vld [vmem:[#allocation7 + $0x2270] ss:$84 sps:$4 sm:$0xff]  }
 0x7cf   :  { %18113 = vmatpush3.bf16.msra.mxu0 %v21312_v24  ;;  %v21346_v24 = vld [vmem:[#allocation7 + $0x1dd8] ss:$84 sps:$4 sm:$0xff]  }
 0x7d0   :  { %18135 = vmatpush3.bf16.msra.mxu1 %v21313_v62  ;;  %18114 = vmatprep.subr.bf16.mxu0 %v21314_v5  ;;  %v21347_v62 = vld [vmem:[#allocation7 + $0x2858] ss:$84 sps:$4 sm:$0xff]  }
 0x7d1   :  { %18136 = vmatprep.subr.bf16.mxu1 %v21315_v6  ;;  %v21348_v5 = vld [vmem:[#allocation7 + $0x1898] ss:$84 sps:$4 sm:$0xff]  }
 0x7d2   :  { %v21349_v6 = vld [vmem:[#allocation7 + $0x2318] ss:$84 sps:$4 sm:$0xff]  }
 0x7d3   :  { %18115 = vmatpush3.bf16.msra.mxu0 %v21316_v7  ;;  %v21350_v7 = vld [vmem:[#allocation7 + $0x1e80] ss:$84 sps:$4 sm:$0xff]  }
 0x7d4   :  { %18137 = vmatpush3.bf16.msra.mxu1 %v21317_v8  ;;  %18116 = vmatprep.subr.bf16.mxu0 %v21318_v13  ;;  %v21351_v8 = vld [vmem:[#allocation7 + $0x2900] ss:$84 sps:$4 sm:$0xff]  }
 0x7d5   :  { %18138 = vmatprep.subr.bf16.mxu1 %v21319_v15  ;;  %v21352_v13 = vld [vmem:[#allocation7 + $0x1940] ss:$84 sps:$4 sm:$0xff]  }
 0x7d6   :  { %v21353_v15 = vld [vmem:[#allocation7 + $0x23c0] ss:$84 sps:$4 sm:$0xff]  }
 0x7d7   :  { %18117 = vmatpush3.bf16.msra.mxu0 %v21320_v19  ;;  %v21354_v19 = vld [vmem:[#allocation7 + $0x1f28] ss:$84 sps:$4 sm:$0xff]  }
 0x7d8   :  { %18139 = vmatpush3.bf16.msra.mxu1 %v21321_v20  ;;  %18118 = vmatprep.subr.bf16.mxu0 %v21322_v22  ;;  %v21355_v20 = vld [vmem:[#allocation7 + $0x29a8] ss:$84 sps:$4 sm:$0xff]  }
 0x7d9   :  { %18140 = vmatprep.subr.bf16.mxu1 %v21323_v23  ;;  %v21356_v22 = vld [vmem:[#allocation7 + $0x19e8] ss:$84 sps:$4 sm:$0xff]  }
 0x7da   :  { %v21357_v23 = vld [vmem:[#allocation7 + $0x2468] ss:$84 sps:$4 sm:$0xff]  }
 0x7db   :  { %18119 = vmatpush3.bf16.msra.mxu0 %v21324_v25  ;;  %v21358_v25 = vld [vmem:[#allocation7 + $0x2f90] ss:$84 sps:$4 sm:$0xff]  }
 0x7dc   :  { %18141 = vmatpush3.bf16.msra.mxu1 %v21325_v26  ;;  %18148 = vmatprep.subr.bf16.mxu0 %v21326_v27  ;;  %v21359_v26 = vld [vmem:[#allocation7 + $0x2a50] ss:$84 sps:$4 sm:$0xff]  }
 0x7dd   :  { %18170 = vmatprep.subr.bf16.mxu1 %v21327_v1  ;;  %v21360_v27 = vld [vmem:[#allocation7 + $0x34d0] ss:$84 sps:$4 sm:$0xff]   ;;  %v21361_v1 = vld [vmem:[#allocation7 + $0x3038] ss:$84 sps:$4 sm:$0xff]  }
 0x7de   :  { %14041 = vmatmul.mubr.bf16.vlgmr.msra.gmra.mrb[36].mxu0 %v21927_v4  ;;  %v21337_v4 = vld [vmem:[#allocation7 + $0x2120] ss:$84 sps:$4 sm:$0xff]  }
 0x7df   :  { %14081 = vmatmul.mubr.bf16.vlgmr.msra.gmra.mrb[28].mxu1 %v21968_v60  ;;  %18149 = vmatpush3.bf16.msra.mxu0 %v21328_v28  ;;  %v21339_v60 = vld [vmem:[#allocation7 + $0x2708] ss:$84 sps:$4 sm:$0xff]   ;;  %v22177_v28 = vld [vmem:[#allocation8] sm:$0xff] }
 0x7e0   :  { %14120 = vmatprep.mubr.bf16.mxu0 %v21970_v0  ;;  %18171 = vmatpush3.bf16.msra.mxu1 %v21329_v29  ;;  %v21341_v0 = vld [vmem:[#allocation7 + $0x21c8] ss:$84 sps:$4 sm:$0xff]   ;;  %v21362_v29 = vld [vmem:[#allocation7 + $0x2af8] ss:$84 sps:$4 sm:$0xff]  }
 0x7e1   :  { %14160 = vmatprep.mubr.bf16.mxu1 %v21992_v39  ;;  %18150 = vmatprep.subr.bf16.mxu0 %v21330_v34  ;;  %v21344_v39 = vld [vmem:[#allocation7 + $0x17f0] ss:$84 sps:$4 sm:$0xff]   ;;  %v21363_v34 = vld [vmem:[#allocation7 + $0x3578] ss:$84 sps:$4 sm:$0xff]  }
 0x7e2   :  { %18172 = vmatprep.subr.bf16.mxu1 %v21331_v35  ;;  %v21364_v35 = vld [vmem:[#allocation7 + $0x30e0] ss:$84 sps:$4 sm:$0xff]  }
 0x7e3   :  { %18151 = vmatpush3.bf16.msra.mxu0 %v21332_v32  ;;  %v2542_v32 = vrot.slane %v22177_v28, %v21916_v52 }
 0x7e4   :  { %18173 = vmatpush3.bf16.msra.mxu1 %v21333_v37  ;;  %18152 = vmatprep.subr.bf16.mxu0 %v21334_v38  ;;  %v21367_v37 = vld [vmem:[#allocation7 + $0x3188] ss:$84 sps:$4 sm:$0xff]  }
 0x7e5   :  { %18174 = vmatprep.subr.bf16.mxu1 %v21335_v53  ;;  %v21368_v38 = vld [vmem:[#allocation7 + $0x2c48] ss:$84 sps:$4 sm:$0xff]  }
 0x7e6   :  { %v21369_v53 = vld [vmem:[#allocation7 + $0x36c8] ss:$84 sps:$4 sm:$0xff]  }
 0x7e7   :  { %18153 = vmatpush3.bf16.msra.mxu0 %v21336_v40  ;;  %v21370_v40 = vld [vmem:[#allocation7 + $0x3230] ss:$84 sps:$4 sm:$0xff]  }
 0x7e8   :  { %18175 = vmatpush3.bf16.msra.mxu1 %v21337_v4  ;;  %18154 = vmatprep.subr.bf16.mxu0 %v21338_v12  ;;  %v21371_v4 = vld [vmem:[#allocation10 + $0x40] sm:$0xff]  }
 0x7e9   :  { %18176 = vmatprep.subr.bf16.mxu1 %v21339_v60  ;;  %v21372_v60 = vld [vmem:[#allocation7 + $0x2cf0] ss:$84 sps:$4 sm:$0xff]  }
 0x7eb   :  { %18155 = vmatpush3.bf16.msra.mxu0 %v21340_v57  ;;  %v21373_v57 = vld [vmem:[#allocation10] sm:$0xff]  }
 0x7ec   :  { %18177 = vmatpush3.bf16.msra.mxu1 %v21341_v0  ;;  %18156 = vmatprep.subr.bf16.mxu0 %v21342_v2  ;;  %v21374_v0 = vld [vmem:[#allocation7 + $0x32d8] ss:$84 sps:$4 sm:$0xff]   ;;  %v21375_v2 = vld [vmem:[#allocation10 + $0x48] sm:$0xff]  }
 0x7ed   :  { %18178 = vmatprep.subr.bf16.mxu1 %v21343_v49 }
 0x7ef   :  { %18157 = vmatpush3.bf16.msra.mxu0 %v21344_v39  ;;  %v21377_v39 = vld [vmem:[#allocation10 + $0x8] sm:$0xff]  }
 0x7f0   :  { %18179 = vmatpush3.bf16.msra.mxu1 %v21345_v59  ;;  %18158 = vmatprep.subr.bf16.mxu0 %v21346_v24  ;;  %v21378_v59 = vld [vmem:[#allocation7 + $0x3380] ss:$84 sps:$4 sm:$0xff]   ;;  %v2550_v24 = vrot.slane %v22177_v28, %v21925_v3 }
 0x7f1   :  { %18180 = vmatprep.subr.bf16.mxu1 %v21347_v62  ;;  %v21379_v62 = vld [vmem:[#allocation10 + $0x50] sm:$0xff]  }
 0x7f3   :  { %18159 = vmatpush3.bf16.msra.mxu0 %v21348_v5  ;;  %v21380_v5 = vld [vmem:[#allocation7 + $0x2e40] ss:$84 sps:$4 sm:$0xff]  }
 0x7f4   :  { %18181 = vmatpush3.bf16.msra.mxu1 %v21349_v6  ;;  %18160 = vmatprep.subr.bf16.mxu0 %v21350_v7  ;;  %v21381_v6 = vld [vmem:[#allocation10 + $0x10] sm:$0xff]  }
 0x7f5   :  { %18182 = vmatprep.subr.bf16.mxu1 %v21351_v8  ;;  %v21382_v7 = vld [vmem:[#allocation7 + $0x3428] ss:$84 sps:$4 sm:$0xff]   ;;  %v21383_v8 = vld [vmem:[#allocation10 + $0x58] sm:$0xff]  }
 0x7f7   :  { %18161 = vmatpush3.bf16.msra.mxu0 %v21352_v13  ;;  %v21384_v13 = vld [vmem:[#allocation7 + $0x2ee8] ss:$84 sps:$4 sm:$0xff]  }
 0x7f8   :  { %18183 = vmatpush3.bf16.msra.mxu1 %v21353_v15  ;;  %18162 = vmatprep.subr.bf16.mxu0 %v21354_v19  ;;  %v21385_v15 = vld [vmem:[#allocation10 + $0x18] sm:$0xff]   ;;  %v21387_v19 = vld [vmem:[#allocation10 + $0xc0] sm:$0xff]  }
 0x7f9   :  { %18184 = vmatprep.subr.bf16.mxu1 %v21355_v20 }
 0x7fb   :  { %18163 = vmatpush3.bf16.msra.mxu0 %v21356_v22  ;;  %v21386_v22 = vld [vmem:[#allocation10 + $0x60] sm:$0xff]  }
 0x7fc   :  { %18185 = vmatpush3.bf16.msra.mxu1 %v21357_v23  ;;  %18192 = vmatprep.subr.bf16.mxu0 %v21358_v25  ;;  %v21389_v23 = vld [vmem:[#allocation10 + $0x80] sm:$0xff]  }
 0x7fd   :  { %18458 = vmatprep.subr.bf16.mxu1 %v21724_v30  ;;  %v21388_v25 = vld [vmem:[#allocation10 + $0x20] sm:$0xff]  }
 0x7fe   :  { %14121 = vmatmul.mubr.bf16.vlgmr.msra.gmra.mrb[40].mxu0 %v21990_v36  ;;  %v21365_v36 = vld [vmem:[#allocation7 + $0x2ba0] ss:$84 sps:$4 sm:$0xff]  }
 0x7ff   :  { %14161 = vmatmul.mubr.bf16.vlgmr.msra.gmra.mrb[32].mxu1 %v22009_v46  ;;  %18193 = vmatpush3.bf16.msra.mxu0 %v21359_v26  ;;  %v21366_v46 = vld [vmem:[#allocation7 + $0x3620] ss:$84 sps:$4 sm:$0xff]  }
 0x800   :  { %14200 = vmatprep.mubr.bf16.mxu0 %v22011_v56  ;;  %18459 = vmatpush3.bf16.msra.mxu1 %v21360_v27  ;;  %v18491_v56 = vadd.f32 %v22051_v18, %v2542_v32  ;;  %v21376_v18 = vld [vmem:[#allocation7 + $0x2d98] ss:$84 sps:$4 sm:$0xff]   ;;  %v21391_v26 = vld [vmem:[#allocation10 + $0xc8] sm:$0xff]  }
 0x801   :  { %18194 = vmatprep.subr.bf16.mxu0 %v21361_v1  ;;  %18460 = vmatprep.subr.bf16.mxu1 %v21724_v30  ;;  %v21393_v1 = vld [vmem:[#allocation10 + $0x88] sm:$0xff]   ;;  %v21394_v32 = vld [vmem:[#allocation10 + $0x70] sm:$0xff]  }
 0x802   :  { %18466 = vmatprep.mubr.msk.bf16.mxu1 %vm21725_vm2, %v21724_v30  ;;  %v14249_v12 = vmax.f32 %v18491_v56, 0.0 }
 0x803   :  { %18195 = vmatpush3.bf16.msra.mxu0 %v21362_v29  ;;  %v21392_v29 = vld [vmem:[#allocation10 + $0x28] sm:$0xff]  }
 0x804   :  { %18461 = vmatpush3.bf16.msra.mxu1 %v21363_v34  ;;  %18196 = vmatprep.subr.bf16.mxu0 %v21364_v35  ;;  %v14270_v49 = vpack.c.bf16 %v14249_v12, %v14249_v12  ;;  %v21395_v34 = vld [vmem:[#allocation10 + $0xd0] sm:$0xff]   ;;  %v2538_v35 = vrot.slane %v22177_v28, %v21911_v50  ;;  %v21402_v12 = vld [vmem:[#allocation10 + $0xe0] sm:$0xff]  }
 0x805   :  { %18462 = vmatprep.subr.bf16.mxu1 %v21724_v30 }
 0x806   :  { %v18490_v56 = vadd.f32 %v22047_v14, %v2538_v35  ;;  %v21422_v35 = vld [vmem:[#allocation10 + $0x168] sm:$0xff]  }
 0x807   :  { %18197 = vmatpush3.bf16.msra.mxu0 %v21365_v36  ;;  %v2558_v36 = vrot.slane %v22177_v28, %v21960_v31 }
 0x808   :  { %18463 = vmatpush3.bf16.msra.mxu1 %v21366_v46  ;;  %18198 = vmatprep.subr.bf16.mxu0 %v21367_v37  ;;  %v21397_v46 = vld [vmem:[#allocation10 + $0x90] sm:$0xff]   ;;  %v21399_v37 = vld [vmem:[#allocation10 + $0xd8] sm:$0xff]  }
 0x809   :  { %18464 = vmatprep.subr.bf16.mxu1 %v21724_v30 }
 0x80b   :  { %18199 = vmatpush3.bf16.msra.mxu0 %v21368_v38  ;;  %v21398_v38 = vld [vmem:[#allocation10 + $0x78] sm:$0xff]  }
 0x80c   :  { %18465 = vmatpush3.bf16.msra.mxu1 %v21369_v53  ;;  %18200 = vmatprep.subr.bf16.mxu0 %v21370_v40  ;;  %v18495_v53 = vadd.f32 %v22085_v33, %v2558_v36  ;;  %v21401_v40 = vld [vmem:[#allocation10 + $0x98] sm:$0xff]   ;;  %v21425_v36 = vld [vmem:[#allocation10 + $0x188] sm:$0xff]  }
 0x80d   :  { %18219 = vmatprep.subr.bf16.mxu1 %v21371_v4  ;;  %v21400_v4 = vld [vmem:[#allocation10 + $0x38] sm:$0xff]  }
 0x80f   :  { %18467 = vmatmul.mubr.msk.bf16.vlgmr.msra.gmra.mrb[36].mxu1 %vm11544_vm3, %v22027_v17  ;;  %18201 = vmatpush3.bf16.msra.mxu0 %v21372_v60  ;;  %v18493_v17 = vadd.f32 %v22053_v21, %v2550_v24  ;;  %v21390_v21 = vld [vmem:[#allocation10 + $0x68] sm:$0xff]   ;;  %v14248_v60 = vmax.f32 %v18490_v56, 0.0  ;;  %v2546_v24 = vrot.slane %v22177_v28, %v21954_v9  ;;  %v21426_v56 = vld [vmem:[#allocation10 + $0x170] sm:$0xff]  }
 0x810   :  { %18220 = vmatpush3.bf16.msra.mxu1 %v21373_v57  ;;  %15673 = vmatprep.mubr.bf16.mxu1 %v14270_v49  ;;  %v21403_v57 = vld [vmem:[#allocation10 + $0x140] sm:$0xff]  }
 0x811   :  { %18202 = vmatprep.subr.bf16.mxu0 %v21374_v0  ;;  %18221 = vmatprep.subr.bf16.mxu1 %v21375_v2  ;;  %v14251_v20 = vmax.f32 %v18493_v17, 0.0  ;;  %v14253_v0 = vmax.f32 %v18495_v53, 0.0  ;;  %v21404_v2 = vld [vmem:[#allocation10 + $0xa0] sm:$0xff]   ;;  %v14269_v14 = vpack.c.bf16 %v14248_v60, %v14248_v60  ;;  %v21412_v17 = vld [vmem:[#allocation10 + $0xb0] sm:$0xff]   ;;  %v21430_v60 = vld [vmem:[#allocation10 + $0x178] sm:$0xff]  }
 0x812   :  { %v21405_v49 = vld [vmem:[#allocation10 + $0x100] sm:$0xff]   ;;  %v21429_v53 = vld [vmem:[#allocation10 + $0x190] sm:$0xff]  }
 0x813   :  { %18203 = vmatpush3.bf16.msra.mxu0 %v21376_v18  ;;  %v14272_v27 = vpack.c.bf16 %v14251_v20, %v14251_v20  ;;  %v21406_v18 = vld [vmem:[#allocation10 + $0xe8] sm:$0xff]   ;;  %v14274_v33 = vpack.c.bf16 %v14253_v0, %v14253_v0  ;;  %v21415_v20 = vld [vmem:[#allocation10 + $0x158] sm:$0xff]  }
 0x814   :  { %18222 = vmatpush3.bf16.msra.mxu1 %v21377_v39  ;;  %18204 = vmatprep.subr.bf16.mxu0 %v21378_v59  ;;  %v21407_v39 = vld [vmem:[#allocation10 + $0x148] sm:$0xff]   ;;  %v21433_v0 = vld [vmem:[#allocation10 + $0x198] sm:$0xff]  }
 0x815   :  { %18223 = vmatprep.subr.bf16.mxu1 %v21379_v62  ;;  %v21408_v59 = vld [vmem:[#allocation10 + $0xa8] sm:$0xff]  }
 0x816   :  { %v21409_v62 = vld [vmem:[#allocation10 + $0x108] sm:$0xff]  }
 0x817   :  { %18205 = vmatpush3.bf16.msra.mxu0 %v21380_v5  ;;  %v21410_v5 = vld [vmem:[#allocation10 + $0xf0] sm:$0xff]  }
 0x818   :  { %18224 = vmatpush3.bf16.msra.mxu1 %v21381_v6  ;;  %18206 = vmatprep.subr.bf16.mxu0 %v21382_v7  ;;  %v2566_v6 = vrot.slane %v22177_v28, %v21980_v10  ;;  %v21411_v7 = vld [vmem:[#allocation10 + $0x150] sm:$0xff]  }
 0x819   :  { %18225 = vmatprep.subr.bf16.mxu1 %v21383_v8  ;;  %v18492_v8 = vadd.f32 %v22049_v16, %v2546_v24  ;;  %v21421_v16 = vld [vmem:[#allocation10 + $0x180] sm:$0xff]   ;;  %v21438_v24 = vld [vmem:[#allocation10 + $0x1e8] sm:$0xff]  }
 0x81b   :  { %18207 = vmatpush3.bf16.msra.mxu0 %v21384_v13  ;;  %v21413_v13 = vld [vmem:[#allocation10 + $0x110] sm:$0xff]  }
 0x81c   :  { %18226 = vmatpush3.bf16.msra.mxu1 %v21385_v15  ;;  %18241 = vmatprep.subr.bf16.mxu0 %v21387_v19  ;;  %v21414_v15 = vld [vmem:[#allocation10 + $0xf8] sm:$0xff]   ;;  %v18497_v19 = vadd.f32 %v22087_v11, %v2566_v6  ;;  %v2562_v6 = vrot.slane %v22177_v28, %v21999_v43 }
 0x81d   :  { %18227 = vmatprep.subr.bf16.mxu1 %v21386_v22  ;;  %v21416_v22 = vld [vmem:[#allocation10 + $0xb8] sm:$0xff]  }
 0x81e   :  { %14201 = vmatmul.mubr.bf16.vlgmr.msra.gmra.mrb[44].mxu0 %v22020_v48  ;;  %v21396_v48 = vld [vmem:[#allocation10 + $0x30] sm:$0xff]  }
 0x81f   :  { %18242 = vmatpush3.bf16.msra.mxu0 %v21389_v23  ;;  %15713 = vmatprep.mubr.bf16.mxu0 %v14272_v27  ;;  %v14250_v23 = vmax.f32 %v18492_v8, 0.0  ;;  %v14255_v27 = vmax.f32 %v18497_v19, 0.0  ;;  %v18496_v19 = vadd.f32 %v22083_v61, %v2562_v6  ;;  %v21453_v61 = vld [vmem:[#allocation10 + $0x280] sm:$0xff]  }
 0x820   :  { %18228 = vmatpush3.bf16.msra.mxu1 %v21388_v25  ;;  %18243 = vmatprep.subr.bf16.mxu0 %v21391_v26  ;;  %v21417_v25 = vld [vmem:[#allocation10 + $0x118] sm:$0xff]   ;;  %v21419_v26 = vld [vmem:[#allocation10 + $0x1c0] sm:$0xff]  }
 0x821   :  { %18229 = vmatprep.subr.bf16.mxu1 %v21390_v21  ;;  %v21418_v21 = vld [vmem:[#allocation10 + $0x160] sm:$0xff]   ;;  %v14276_v11 = vpack.c.bf16 %v14255_v27, %v14255_v27  ;;  %v21449_v27 = vld [vmem:[#allocation10 + $0x218] sm:$0xff]  }
 0x823   :  { %18244 = vmatpush3.bf16.msra.mxu0 %v21393_v1  ;;  %v14271_v1 = vpack.c.bf16 %v14250_v23, %v14250_v23  ;;  %v21447_v23 = vld [vmem:[#allocation10 + $0x258] sm:$0xff]  }
 0x824   :  { %18230 = vmatpush3.bf16.msra.mxu1 %v21392_v29  ;;  %18245 = vmatprep.subr.bf16.mxu0 %v21395_v34  ;;  %v21420_v29 = vld [vmem:[#allocation10 + $0x120] sm:$0xff]   ;;  %v21423_v34 = vld [vmem:[#allocation10 + $0x1c8] sm:$0xff]  }
 0x825   :  { %18231 = vmatprep.subr.bf16.mxu1 %v21394_v32  ;;  %v22207_v32 = vld [vmem:[#allocation8 + $0x8] sm:$0xff] }
 0x826   :  { %v2582_v8 = vrot.slane %v22207_v32, %v21925_v3  ;;  %v2598_v6 = vrot.slane %v22207_v32, %v21980_v10  ;;  %v21481_v10 = vld [vmem:[#allocation10 + $0x318] sm:$0xff]  }
 0x827   :  { %18246 = vmatpush3.bf16.msra.mxu0 %v21397_v46  ;;  %v21424_v46 = vld [vmem:[#allocation10 + $0x128] sm:$0xff]  }
 0x828   :  { %18232 = vmatpush3.bf16.msra.mxu1 %v21396_v48  ;;  %18247 = vmatprep.subr.bf16.mxu0 %v21399_v37  ;;  %v21427_v48 = vld [vmem:[#allocation10 + $0x1d0] sm:$0xff]   ;;  %v2554_v37 = vrot.slane %v22177_v28, %v21977_v63  ;;  %v18501_v28 = vadd.f32 %v22121_v47, %v2582_v8 }
 0x829   :  { %18233 = vmatprep.subr.bf16.mxu1 %v21398_v38  ;;  %v2574_v38 = vrot.slane %v22207_v32, %v21916_v52 }
 0x82b   :  { %18248 = vmatpush3.bf16.msra.mxu0 %v21401_v40  ;;  %v21428_v40 = vld [vmem:[#allocation10 + $0x130] sm:$0xff]  }
 0x82c   :  { %18234 = vmatpush3.bf16.msra.mxu1 %v21400_v4  ;;  %18249 = vmatprep.subr.bf16.mxu0 %v21402_v12  ;;  %v21431_v4 = vld [vmem:[#allocation10 + $0x1d8] sm:$0xff]   ;;  %v18494_v12 = vadd.f32 %v22081_v58, %v2554_v37  ;;  %v2570_v37 = vrot.slane %v22207_v32, %v21911_v50 }
 0x82d   :  { %18263 = vmatprep.subr.bf16.mxu1 %v21403_v57  ;;  %v18499_v57 = vadd.f32 %v22119_v45, %v2574_v38  ;;  %v2590_v38 = vrot.slane %v22207_v32, %v21960_v31  ;;  %v21467_v31 = vld [vmem:[#allocation10 + $0x340] sm:$0xff]  }
 0x82f   :  { %15674 = vmatmul.mubr.bf16.vlgmr.msra.gmra.mrb[40].mxu1 %v14269_v14  ;;  %18250 = vmatpush3.bf16.msra.mxu0 %v21404_v2  ;;  %v21432_v2 = vld [vmem:[#allocation10 + $0x138] sm:$0xff]   ;;  %v14252_v14 = vmax.f32 %v18494_v12, 0.0  ;;  %v18498_v12 = vadd.f32 %v22115_v42, %v2570_v37 }
 0x830   :  { %18264 = vmatpush3.bf16.msra.mxu1 %v21405_v49  ;;  %15753 = vmatprep.mubr.bf16.mxu1 %v14274_v33  ;;  %v21434_v49 = vld [vmem:[#allocation10 + $0x1e0] sm:$0xff]   ;;  %v21494_v37 = vld [vmem:[#allocation10 + $0x378] sm:$0xff]  }
 0x831   :  { %18251 = vmatprep.subr.bf16.mxu0 %v21406_v18  ;;  %18265 = vmatprep.subr.bf16.mxu1 %v21407_v39  ;;  %v21435_v18 = vld [vmem:[#allocation10 + $0x240] sm:$0xff]   ;;  %v14257_v39 = vmax.f32 %v18499_v57, 0.0  ;;  %v14273_v58 = vpack.c.bf16 %v14252_v14, %v14252_v14  ;;  %v18503_v57 = vadd.f32 %v22153_v55, %v2590_v38  ;;  %v14256_v14 = vmax.f32 %v18498_v12, 0.0  ;;  %v21496_v38 = vld [vmem:[#allocation10 + $0x338] sm:$0xff]  }
 0x832   :  { %v21436_v33 = vld [vmem:[#allocation10 + $0x1a0] sm:$0xff]  }
 0x833   :  { %18252 = vmatpush3.bf16.msra.mxu0 %v21408_v59  ;;  %v21437_v59 = vld [vmem:[#allocation10 + $0x200] sm:$0xff]   ;;  %v14278_v45 = vpack.c.bf16 %v14257_v39, %v14257_v39  ;;  %v14277_v42 = vpack.c.bf16 %v14256_v14, %v14256_v14  ;;  %v21504_v14 = vld [vmem:[#allocation10 + $0x3a8] sm:$0xff]  }
 0x834   :  { %18266 = vmatpush3.bf16.msra.mxu1 %v21409_v62  ;;  %18253 = vmatprep.subr.bf16.mxu0 %v21410_v5  ;;  %v21439_v62 = vld [vmem:[#allocation10 + $0x248] sm:$0xff]   ;;  %v21468_v39 = vld [vmem:[#allocation10 + $0x2a0] sm:$0xff]  }
 0x835   :  { %18267 = vmatprep.subr.bf16.mxu1 %v21411_v7  ;;  %v21440_v5 = vld [vmem:[#allocation10 + $0x1a8] sm:$0xff]   ;;  %v21500_v12 = vld [vmem:[#allocation10 + $0x3a0] sm:$0xff]  }
 0x836   :  { %v21441_v7 = vld [vmem:[#allocation10 + $0x208] sm:$0xff]  }
 0x837   :  { %18254 = vmatpush3.bf16.msra.mxu0 %v21412_v17  ;;  %v21442_v17 = vld [vmem:[#allocation10 + $0x1f0] sm:$0xff]  }
 0x838   :  { %18268 = vmatpush3.bf16.msra.mxu1 %v21413_v13  ;;  %18255 = vmatprep.subr.bf16.mxu0 %v21414_v15  ;;  %v21443_v13 = vld [vmem:[#allocation10 + $0x250] sm:$0xff]  }
 0x839   :  { %18269 = vmatprep.subr.bf16.mxu1 %v21415_v20  ;;  %v21444_v15 = vld [vmem:[#allocation10 + $0x1b0] sm:$0xff]  }
 0x83a   :  { %v21445_v20 = vld [vmem:[#allocation10 + $0x210] sm:$0xff]  }
 0x83b   :  { %18256 = vmatpush3.bf16.msra.mxu0 %v21416_v22  ;;  %v21446_v22 = vld [vmem:[#allocation10 + $0x1f8] sm:$0xff]  }
 0x83c   :  { %18270 = vmatpush3.bf16.msra.mxu1 %v21417_v25  ;;  %18285 = vmatprep.subr.bf16.mxu0 %v21419_v26  ;;  %v21448_v25 = vld [vmem:[#allocation10 + $0x1b8] sm:$0xff]   ;;  %v14254_v26 = vmax.f32 %v18496_v19, 0.0  ;;  %v18505_v19 = vadd.f32 %v22155_v51, %v2598_v6  ;;  %v21509_v6 = vld [vmem:[#allocation10 + $0x410] sm:$0xff]  }
 0x83d   :  { %18271 = vmatprep.subr.bf16.mxu1 %v21418_v21  ;;  %v21451_v21 = vld [vmem:[#allocation10 + $0x2c0] sm:$0xff]  }
 0x83e   :  { %15714 = vmatmul.mubr.bf16.vlgmr.msra.gmra.mrb[48].mxu0 %v14271_v1  ;;  %v21450_v1 = vld [vmem:[#allocation10 + $0x260] sm:$0xff]  }
 0x83f   :  { %18286 = vmatpush3.bf16.msra.mxu0 %v21421_v16  ;;  %15793 = vmatprep.mubr.bf16.mxu0 %v14276_v11  ;;  %v14259_v16 = vmax.f32 %v18501_v28, 0.0  ;;  %v21455_v11 = vld [vmem:[#allocation10 + $0x2c8] sm:$0xff]  }
 0x840   :  { %18272 = vmatpush3.bf16.msra.mxu1 %v21420_v29  ;;  %18287 = vmatprep.subr.bf16.mxu0 %v21423_v34  ;;  %v14275_v29 = vpack.c.bf16 %v14254_v26, %v14254_v26  ;;  %v21452_v34 = vld [vmem:[#allocation10 + $0x220] sm:$0xff]  }
 0x841   :  { %18273 = vmatprep.subr.bf16.mxu1 %v21422_v35  ;;  %v14280_v47 = vpack.c.bf16 %v14259_v16, %v14259_v16  ;;  %v21454_v35 = vld [vmem:[#allocation10 + $0x268] sm:$0xff]   ;;  %v21482_v26 = vld [vmem:[#allocation10 + $0x360] sm:$0xff]  }
 0x842   :  { %v21487_v16 = vld [vmem:[#allocation10 + $0x3c8] sm:$0xff]  }
 0x843   :  { %18288 = vmatpush3.bf16.msra.mxu0 %v21425_v36  ;;  %v21457_v36 = vld [vmem:[#allocation10 + $0x288] sm:$0xff]  }
 0x844   :  { %18274 = vmatpush3.bf16.msra.mxu1 %v21424_v46  ;;  %18289 = vmatprep.subr.bf16.mxu0 %v21427_v48  ;;  %v21456_v46 = vld [vmem:[#allocation10 + $0x228] sm:$0xff]   ;;  %v21459_v48 = vld [vmem:[#allocation10 + $0x2d0] sm:$0xff]  }
 0x845   :  { %18275 = vmatprep.subr.bf16.mxu1 %v21426_v56  ;;  %v21458_v56 = vld [vmem:[#allocation10 + $0x270] sm:$0xff]  }
 0x847   :  { %18290 = vmatpush3.bf16.msra.mxu0 %v21429_v53  ;;  %v21461_v53 = vld [vmem:[#allocation10 + $0x290] sm:$0xff]  }
 0x848   :  { %18276 = vmatpush3.bf16.msra.mxu1 %v21428_v40  ;;  %18291 = vmatprep.subr.bf16.mxu0 %v21431_v4  ;;  %v21460_v40 = vld [vmem:[#allocation10 + $0x230] sm:$0xff]   ;;  %v21463_v4 = vld [vmem:[#allocation10 + $0x2d8] sm:$0xff]  }
 0x849   :  { %18277 = vmatprep.subr.bf16.mxu1 %v21430_v60  ;;  %v21462_v60 = vld [vmem:[#allocation10 + $0x278] sm:$0xff]  }
 0x84b   :  { %18292 = vmatpush3.bf16.msra.mxu0 %v21433_v0  ;;  %v21465_v0 = vld [vmem:[#allocation10 + $0x298] sm:$0xff]  }
 0x84c   :  { %18278 = vmatpush3.bf16.msra.mxu1 %v21432_v2  ;;  %18293 = vmatprep.subr.bf16.mxu0 %v21434_v49  ;;  %v21464_v2 = vld [vmem:[#allocation10 + $0x238] sm:$0xff]   ;;  %v21466_v49 = vld [vmem:[#allocation10 + $0x2e0] sm:$0xff]  }
 0x84d   :  { %18307 = vmatprep.subr.bf16.mxu1 %v21435_v18  ;;  %v14261_v18 = vmax.f32 %v18503_v57, 0.0  ;;  %v22236_v57 = vld [vmem:[#allocation8 + $0x10] sm:$0x1f] }
 0x84f   :  { %15754 = vmatmul.mubr.bf16.vlgmr.msra.gmra.mrb[44].mxu1 %v14273_v58  ;;  %18294 = vmatpush3.bf16.msra.mxu0 %v21436_v33  ;;  %v21469_v33 = vld [vmem:[#allocation10 + $0x300] sm:$0xff]   ;;  %v21471_v58 = vld [vmem:[#allocation10 + $0x348] sm:$0xff]   ;;  %v14282_v55 = vpack.c.bf16 %v14261_v18, %v14261_v18 }
 0x850   :  { %18308 = vmatpush3.bf16.msra.mxu1 %v21437_v59  ;;  %15833 = vmatprep.mubr.bf16.mxu1 %v14278_v45  ;;  %v21470_v59 = vld [vmem:[#allocation10 + $0x2e8] sm:$0xff]  }
 0x851   :  { %18295 = vmatprep.subr.bf16.mxu0 %v21438_v24  ;;  %18309 = vmatprep.subr.bf16.mxu1 %v21439_v62  ;;  %v21472_v24 = vld [vmem:[#allocation10 + $0x2a8] sm:$0xff]   ;;  %v2578_v62 = vrot.slane %v22207_v32, %v21954_v9 }
 0x852   :  { %v21473_v45 = vld [vmem:[#allocation10 + $0x308] sm:$0xff]  }
 0x853   :  { %18296 = vmatpush3.bf16.msra.mxu0 %v21440_v5  ;;  %v21474_v5 = vld [vmem:[#allocation10 + $0x2f0] sm:$0xff]   ;;  %v18500_v8 = vadd.f32 %v22117_v44, %v2578_v62  ;;  %v21485_v44 = vld [vmem:[#allocation10 + $0x380] sm:$0xff]   ;;  %v21505_v18 = vld [vmem:[#allocation10 + $0x408] sm:$0xff]  }
 0x854   :  { %18310 = vmatpush3.bf16.msra.mxu1 %v21441_v7  ;;  %18297 = vmatprep.subr.bf16.mxu0 %v21442_v17  ;;  %v21475_v7 = vld [vmem:[#allocation10 + $0x350] sm:$0xff]  }
 0x855   :  { %18311 = vmatprep.subr.bf16.mxu1 %v21443_v13  ;;  %v21476_v17 = vld [vmem:[#allocation10 + $0x2b0] sm:$0xff]   ;;  %v14258_v28 = vmax.f32 %v18500_v8, 0.0 }
 0x856   :  { %v21477_v13 = vld [vmem:[#allocation10 + $0x310] sm:$0xff]  }
 0x857   :  { %18298 = vmatpush3.bf16.msra.mxu0 %v21444_v15  ;;  %v21478_v15 = vld [vmem:[#allocation10 + $0x2f8] sm:$0xff]  }
 0x858   :  { %18312 = vmatpush3.bf16.msra.mxu1 %v21445_v20  ;;  %18299 = vmatprep.subr.bf16.mxu0 %v21446_v22  ;;  %v21479_v20 = vld [vmem:[#allocation10 + $0x358] sm:$0xff]  }
 0x859   :  { %18313 = vmatprep.subr.bf16.mxu1 %v21447_v23  ;;  %v21480_v22 = vld [vmem:[#allocation10 + $0x2b8] sm:$0xff]   ;;  %v21483_v23 = vld [vmem:[#allocation10 + $0x3c0] sm:$0xff]  }
 0x85b   :  { %18300 = vmatpush3.bf16.msra.mxu0 %v21448_v25  ;;  %v14263_v25 = vmax.f32 %v18505_v19, 0.0  ;;  %v21512_v19 = vld [vmem:[#allocation10 + $0x3b8] sm:$0xff]  }
 0x85c   :  { %18314 = vmatpush3.bf16.msra.mxu1 %v21449_v27  ;;  %18329 = vmatprep.subr.bf16.mxu0 %v21451_v21  ;;  %v14279_v27 = vpack.c.bf16 %v14258_v28, %v14258_v28  ;;  %v21484_v21 = vld [vmem:[#allocation10 + $0x320] sm:$0xff]  }
 0x85d   :  { %18315 = vmatprep.subr.bf16.mxu1 %v21450_v1  ;;  %v14284_v51 = vpack.c.bf16 %v14263_v25, %v14263_v25  ;;  %v21486_v1 = vld [vmem:[#allocation10 + $0x368] sm:$0xff]   ;;  %v21515_v28 = vld [vmem:[#allocation10 + $0x4c0] sm:$0xff]  }
 0x85e   :  { %15794 = vmatmul.mubr.bf16.vlgmr.msra.gmra.mrb[52].mxu0 %v14275_v29  ;;  %v21488_v29 = vld [vmem:[#allocation10 + $0x328] sm:$0xff]  }
 0x85f   :  { %18330 = vmatpush3.bf16.msra.mxu0 %v21453_v61  ;;  %15873 = vmatprep.mubr.bf16.mxu0 %v14280_v47  ;;  %v21489_v61 = vld [vmem:[#allocation10 + $0x388] sm:$0xff]   ;;  %v21490_v47 = vld [vmem:[#allocation10 + $0x370] sm:$0xff]  }
 0x860   :  { %18316 = vmatpush3.bf16.msra.mxu1 %v21452_v34  ;;  %18331 = vmatprep.subr.bf16.mxu0 %v21455_v11  ;;  %v21491_v34 = vld [vmem:[#allocation10 + $0x3d0] sm:$0xff]   ;;  %v2586_v11 = vrot.slane %v22207_v32, %v21977_v63 }
 0x861   :  { %18317 = vmatprep.subr.bf16.mxu1 %v21454_v35  ;;  %v21493_v35 = vld [vmem:[#allocation10 + $0x390] sm:$0xff]  }
 0x863   :  { %18332 = vmatpush3.bf16.msra.mxu0 %v21457_v36  ;;  %v21492_v36 = vld [vmem:[#allocation10 + $0x330] sm:$0xff]  }
 0x864   :  { %18318 = vmatpush3.bf16.msra.mxu1 %v21456_v46  ;;  %18333 = vmatprep.subr.bf16.mxu0 %v21459_v48  ;;  %v21495_v46 = vld [vmem:[#allocation10 + $0x3d8] sm:$0xff]   ;;  %v18502_v48 = vadd.f32 %v22149_v41, %v2586_v11  ;;  %v21524_v11 = vld [vmem:[#allocation10 + $0x430] sm:$0xff]  }
 0x865   :  { %18319 = vmatprep.subr.bf16.mxu1 %v21458_v56  ;;  %v21497_v56 = vld [vmem:[#allocation10 + $0x398] sm:$0xff]  }
 0x867   :  { %18334 = vmatpush3.bf16.msra.mxu0 %v21461_v53  ;;  %v21498_v53 = vld [vmem:[#allocation10 + $0x3e0] sm:$0xff]  }
 0x868   :  { %18320 = vmatpush3.bf16.msra.mxu1 %v21460_v40  ;;  %18335 = vmatprep.subr.bf16.mxu0 %v21463_v4  ;;  %v14260_v40 = vmax.f32 %v18502_v48, 0.0  ;;  %v21499_v4 = vld [vmem:[#allocation10 + $0x440] sm:$0xff]   ;;  %v21528_v48 = vld [vmem:[#allocation10 + $0x438] sm:$0xff]  }
 0x869   :  { %18321 = vmatprep.subr.bf16.mxu1 %v21462_v60  ;;  %v21501_v60 = vld [vmem:[#allocation10 + $0x400] sm:$0xff]  }
 0x86a   :  { %v14281_v41 = vpack.c.bf16 %v14260_v40, %v14260_v40 }
 0x86b   :  { %18336 = vmatpush3.bf16.msra.mxu0 %v21465_v0  ;;  %v21502_v0 = vld [vmem:[#allocation10 + $0x3e8] sm:$0xff]  }
 0x86c   :  { %18322 = vmatpush3.bf16.msra.mxu1 %v21464_v2  ;;  %18337 = vmatprep.subr.bf16.mxu0 %v21466_v49  ;;  %v21503_v2 = vld [vmem:[#allocation10 + $0x448] sm:$0xff]   ;;  %v2606_v49 = vrot.slane %v22236_v57, %v21916_v52 }
 0x86d   :  { %18351 = vmatprep.subr.bf16.mxu1 %v21467_v31  ;;  %v2594_v31 = vrot.slane %v22207_v32, %v21999_v43 }
 0x86f   :  { %15834 = vmatmul.mubr.bf16.vlgmr.msra.gmra.mrb[48].mxu1 %v14277_v42  ;;  %18338 = vmatpush3.bf16.msra.mxu0 %v21468_v39  ;;  %v21506_v39 = vld [vmem:[#allocation10 + $0x3f0] sm:$0xff]   ;;  %v2614_v42 = vrot.slane %v22236_v57, %v21925_v3  ;;  %v18504_v43 = vadd.f32 %v22151_v54, %v2594_v31 }
 0x870   :  { %18352 = vmatpush3.bf16.msra.mxu1 %v21469_v33  ;;  %15913 = vmatprep.mubr.bf16.mxu1 %v14282_v55 }
 0x871   :  { %18339 = vmatprep.subr.bf16.mxu0 %v21470_v59  ;;  %18353 = vmatprep.subr.bf16.mxu1 %v21471_v58  ;;  %v21507_v59 = vld [vmem:[#allocation10 + $0x450] sm:$0xff]  }
 0x873   :  { %18340 = vmatpush3.bf16.msra.mxu0 %v21472_v24 }
 0x874   :  { %18354 = vmatpush3.bf16.msra.mxu1 %v21473_v45  ;;  %18341 = vmatprep.subr.bf16.mxu0 %v21474_v5  ;;  %v21508_v45 = vld [vmem:[#allocation10 + $0x3b0] sm:$0xff]  }
 0x875   :  { %18355 = vmatprep.subr.bf16.mxu1 %v21475_v7  ;;  %v21510_v7 = vld [vmem:[#allocation10 + $0x3f8] sm:$0xff]  }
 0x877   :  { %18342 = vmatpush3.bf16.msra.mxu0 %v21476_v17 }
 0x878   :  { %18356 = vmatpush3.bf16.msra.mxu1 %v21477_v13  ;;  %18343 = vmatprep.subr.bf16.mxu0 %v21478_v15  ;;  %v21511_v13 = vld [vmem:[#allocation10 + $0x458] sm:$0xff]  }
 0x879   :  { %18357 = vmatprep.subr.bf16.mxu1 %v21479_v20  ;;  %v14262_v20 = vmax.f32 %v18504_v43, 0.0 }
 0x87b   :  { %18344 = vmatpush3.bf16.msra.mxu0 %v21480_v22  ;;  %v21513_v22 = vld [vmem:[#allocation10 + $0x418] sm:$0xff]   ;;  %v14283_v25 = vpack.c.bf16 %v14262_v20, %v14262_v20 }
 0x87c   :  { %18358 = vmatpush3.bf16.msra.mxu1 %v21481_v10  ;;  %18373 = vmatprep.subr.bf16.mxu0 %v21483_v23  ;;  %v21514_v10 = vld [vmem:[#allocation10 + $0x460] sm:$0xff]  }
 0x87d   :  { %18359 = vmatprep.subr.bf16.mxu1 %v21482_v26  ;;  %v21517_v23 = vld [vmem:[#allocation10 + $0x480] sm:$0xff]  }
 0x87e   :  { %15874 = vmatmul.mubr.bf16.vlgmr.msra.gmra.mrb[56].mxu0 %v14279_v27  ;;  %v21516_v26 = vld [vmem:[#allocation10 + $0x420] sm:$0xff]  }
 0x87f   :  { %18374 = vmatpush3.bf16.msra.mxu0 %v21485_v44  ;;  %15953 = vmatprep.mubr.bf16.mxu0 %v14284_v51  ;;  %v21519_v44 = vld [vmem:[#allocation10 + $0x4c8] sm:$0xff]  }
 0x880   :  { %18360 = vmatpush3.bf16.msra.mxu1 %v21484_v21  ;;  %18375 = vmatprep.subr.bf16.mxu0 %v21487_v16  ;;  %v21518_v21 = vld [vmem:[#allocation10 + $0x468] sm:$0xff]  }
 0x881   :  { %18361 = vmatprep.subr.bf16.mxu1 %v21486_v1  ;;  %v21521_v16 = vld [vmem:[#allocation10 + $0x488] sm:$0xff]   ;;  %v21523_v1 = vld [vmem:[#allocation10 + $0x4d0] sm:$0xff]  }
 0x882   :  { %v21520_v51 = vld [vmem:[#allocation10 + $0x428] sm:$0xff]  }
 0x883   :  { %18376 = vmatpush3.bf16.msra.mxu0 %v21489_v61  ;;  %v2602_v61 = vrot.slane %v22236_v57, %v21911_v50  ;;  %v21531_v50 = vld [vmem:[#allocation10 + $0x4a0] sm:$0xff]  }
 0x884   :  { %18362 = vmatpush3.bf16.msra.mxu1 %v21488_v29  ;;  %18377 = vmatprep.subr.bf16.mxu0 %v21491_v34  ;;  %v21522_v29 = vld [vmem:[#allocation10 + $0x470] sm:$0xff]  }
 0x885   :  { %18363 = vmatprep.subr.bf16.mxu1 %v21490_v47  ;;  %v21525_v34 = vld [vmem:[#allocation10 + $0x490] sm:$0xff]   ;;  %v21527_v47 = vld [vmem:[#allocation10 + $0x4d8] sm:$0xff]  }
 0x887   :  { %18378 = vmatpush3.bf16.msra.mxu0 %v21493_v35 }
 0x888   :  { %18364 = vmatpush3.bf16.msra.mxu1 %v21492_v36  ;;  %18379 = vmatprep.subr.bf16.mxu0 %v21495_v46  ;;  %v21526_v36 = vld [vmem:[#allocation10 + $0x478] sm:$0xff]  }
 0x889   :  { %18365 = vmatprep.subr.bf16.mxu1 %v21494_v37  ;;  %v21529_v46 = vld [vmem:[#allocation10 + $0x498] sm:$0xff]   ;;  %v21530_v37 = vld [vmem:[#allocation10 + $0x4e0] sm:$0xff]  }
 0x88b   :  { %18380 = vmatpush3.bf16.msra.mxu0 %v21497_v56 }
 0x88c   :  { %18366 = vmatpush3.bf16.msra.mxu1 %v21496_v38  ;;  %18381 = vmatprep.subr.bf16.mxu0 %v21498_v53  ;;  %v21532_v38 = vld [vmem:[#allocation10 + $0x4e8] sm:$0xff]   ;;  %v21538_v53 = vld [vmem:[#allocation10 + $0x500] sm:$0xff]  }
 0x88d   :  { %18395 = vmatprep.subr.bf16.mxu1 %v21499_v4  ;;  %v21533_v4 = vld [vmem:[#allocation10 + $0x4a8] sm:$0xff]  }
 0x88f   :  { %15914 = vmatmul.mubr.bf16.vlgmr.msra.gmra.mrb[52].mxu1 %v14281_v41  ;;  %18382 = vmatpush3.bf16.msra.mxu0 %v21500_v12  ;;  %v2610_v12 = vrot.slane %v22236_v57, %v21954_v9  ;;  %v21535_v9 = vld [vmem:[#allocation10 + $0x4b0] sm:$0xff]  }
 0x890   :  { %18396 = vmatpush3.bf16.msra.mxu1 %v21501_v60  ;;  %18383 = vmatprep.subr.bf16.mxu0 %v21502_v0  ;;  %v21534_v60 = vld [vmem:[#allocation10 + $0x4f0] sm:$0xff]   ;;  %v21539_v0 = vld [vmem:[#allocation10 + $0x508] sm:$0xff]  }
 0x891   :  { %v13755_v33 = vpop.f32.mrb[32].mxu0  ;;  %18397 = vmatprep.subr.bf16.mxu1 %v21503_v2  ;;  %v2618_v2 = vrot.slane %v22236_v57, %v21977_v63  ;;  %v21540_v63 = vld [vmem:[#allocation10 + $0x510] sm:$0xff]  }
 0x892   :  { %v22244_v58 = vpop.f32.mrb[24].mxu1  ;;  %v13757_v55 = vpop.f32.mrb[33].mxu0  ;;  %v18506_v35 = vadd.f32 %v13755_v33, %v2602_v61 }
 0x893   :  { %v18507_v24 = vadd.f32 %v13757_v55, %v2606_v49  ;;  %v14003_v62 = vpop.f32.mrb[25].mxu1  ;;  %v13759_v52 = vpop.f32.mrb[34].mxu0  ;;  %18384 = vmatpush3.bf16.msra.mxu0 %v21504_v14  ;;  %v18508_v33 = vadd.f32 %v22244_v58, %v2610_v12 }
 0x894   :  { %v14005_v32 = vpop.f32.mrb[26].mxu1  ;;  %18398 = vmatpush3.bf16.msra.mxu1 %v21505_v18  ;;  %v13760_v5 = vpop.f32.mrb[35].mxu0  ;;  %18385 = vmatprep.subr.bf16.mxu0 %v21506_v39  ;;  %v18509_v3 = vadd.f32 %v14003_v62, %v2614_v42  ;;  %v14264_v56 = vmax.f32 %v18506_v35, 0.0 }
 0x895   :  { %v14265_v17 = vmax.f32 %v18507_v24, 0.0  ;;  %v14006_v8 = vpop.f32.mrb[27].mxu1  ;;  %18399 = vmatprep.subr.bf16.mxu1 %v21507_v59  ;;  %v21536_v24 = vld [vmem:[#allocation10 + $0x4f8] sm:$0xff]   ;;  %v14266_v43 = vmax.f32 %v18508_v33, 0.0  ;;  %v21542_v5 = vld [vmem:[#allocation10 + $0x520] sm:$0xff]  }
 0x896   :  { %v14267_v54 = vmax.f32 %v18509_v3, 0.0  ;;  %v14285_v40 = vpack.c.bf16 %v14264_v56, %v14264_v56  ;;  %v21541_v32 = vld [vmem:[#allocation10 + $0x518] sm:$0xff]   ;;  %v17929_v56 = vld [vmem:[#allocation11] ss:$0 sm:$0xff] }
 0x897   :  { %v14286_v15 = vpack.c.bf16 %v14265_v17, %v14265_v17  ;;  %18386 = vmatpush3.bf16.msra.mxu0 %v21508_v45  ;;  %v21537_v45 = vld [vmem:[#allocation10 + $0x4b8] sm:$0xff]   ;;  %v14287_v58 = vpack.c.bf16 %v14266_v43, %v14266_v43 }
 0x898   :  { %18400 = vmatpush3.bf16.msra.mxu1 %v21509_v6  ;;  %18387 = vmatprep.subr.bf16.mxu0 %v21510_v7  ;;  %v14288_v27 = vpack.c.bf16 %v14267_v54, %v14267_v54  ;;  %v21543_v6 = vld [vmem:[#allocation10 + $0x528] sm:$0xff]   ;;  %v21544_v7 = vld [vmem:[#allocation10 + $0x530] sm:$0xff]   ;;  %v21545_v17 = vld [vmem:[#allocation10 + $0x538] sm:$0xff]  }
 0x899   :  { %15993 = vmatprep.mubr.bf16.mxu1 %v14286_v15  ;;  %18401 = vmatprep.subr.bf16.mxu1 %v21511_v13 }
 0x89b   :  { %18388 = vmatpush3.bf16.msra.mxu0 %v21512_v19 }
 0x89c   :  { %18402 = vmatpush3.bf16.msra.mxu1 %v21513_v22  ;;  %18417 = vmatprep.subr.bf16.mxu0 %v21515_v28 }
 0x89d   :  { %18403 = vmatprep.subr.bf16.mxu1 %v21514_v10 }
 0x89e   :  { %15954 = vmatmul.mubr.bf16.vlgmr.msra.gmra.mrb[60].mxu0 %v14283_v25 }
 0x89f   :  { %18418 = vmatpush3.bf16.msra.mxu0 %v21517_v23  ;;  %16033 = vmatprep.mubr.bf16.mxu0 %v14288_v27 }
 0x8a0   :  { %18404 = vmatpush3.bf16.msra.mxu1 %v21516_v26  ;;  %18419 = vmatprep.subr.bf16.mxu0 %v21519_v44 }
 0x8a1   :  { %18405 = vmatprep.subr.bf16.mxu1 %v21518_v21 }
 0x8a3   :  { %18420 = vmatpush3.bf16.msra.mxu0 %v21521_v16 }
 0x8a4   :  { %18406 = vmatpush3.bf16.msra.mxu1 %v21520_v51  ;;  %18421 = vmatprep.subr.bf16.mxu0 %v21523_v1 }
 0x8a5   :  { %18407 = vmatprep.subr.bf16.mxu1 %v21522_v29 }
 0x8a7   :  { %18422 = vmatpush3.bf16.msra.mxu0 %v21525_v34 }
 0x8a8   :  { %18408 = vmatpush3.bf16.msra.mxu1 %v21524_v11  ;;  %18423 = vmatprep.subr.bf16.mxu0 %v21527_v47 }
 0x8a9   :  { %18409 = vmatprep.subr.bf16.mxu1 %v21526_v36 }
 0x8ab   :  { %18424 = vmatpush3.bf16.msra.mxu0 %v21529_v46 }
 0x8ac   :  { %18410 = vmatpush3.bf16.msra.mxu1 %v21528_v48  ;;  %18425 = vmatprep.subr.bf16.mxu0 %v21530_v37 }
 0x8ad   :  { %18470 = vmatprep.subr.bf16.mxu1 %v21724_v30 }
 0x8af   :  { %15994 = vmatmul.mubr.bf16.vlgmr.msra.gmra.mrb[56].mxu1 %v14285_v40  ;;  %18426 = vmatpush3.bf16.msra.mxu0 %v21531_v50 }
 0x8b0   :  { %18427 = vmatprep.subr.bf16.mxu0 %v21532_v38  ;;  %18471 = vmatpush3.bf16.msra.mxu1 %v21538_v53 }
 0x8b1   :  { %v18120_v41 = vpop.f32.mrb[36].mxu0  ;;  %18472 = vmatprep.subr.bf16.mxu1 %v21724_v30  ;;  %18486 = vmatprep.mubr.msk.bf16.mxu1 %vm21725_vm2, %v21724_v30 }
 0x8b2   :  { %v18142_v49 = vpop.f32.mrb[28].mxu1  ;;  %v18121_v14 = vpop.f32.mrb[37].mxu0 }
 0x8b3   :  { %v18122_v31 = vadd.f32 %v18121_v14, %v18120_v41  ;;  %v18143_v18 = vpop.f32.mrb[29].mxu1  ;;  %v18123_v39 = vpop.f32.mrb[38].mxu0  ;;  %18428 = vmatpush3.bf16.msra.mxu0 %v21533_v4 }
 0x8b4   :  { %v18144_v42 = vadd.f32 %v18143_v18, %v18142_v49  ;;  %v18145_v59 = vpop.f32.mrb[30].mxu1  ;;  %v18124_v55 = vpop.f32.mrb[39].mxu0  ;;  %18429 = vmatprep.subr.bf16.mxu0 %v21534_v60  ;;  %18473 = vmatpush3.bf16.msra.mxu1 %v21539_v0 }
 0x8b5   :  { %v14043_v57 = vadd.f32 %v18122_v31, %v2618_v2  ;;  %v18146_v62 = vpop.f32.mrb[31].mxu1  ;;  %18474 = vmatprep.subr.bf16.mxu1 %v21724_v30 }
 0x8b7   :  { %v14083_v52 = vadd.f32 %v18144_v42, %v14043_v57  ;;  %18430 = vmatpush3.bf16.msra.mxu0 %v21535_v9 }
 0x8b8   :  { %18431 = vmatprep.subr.bf16.mxu0 %v21536_v24  ;;  %18475 = vmatpush3.bf16.msra.mxu1 %v21540_v63 }
 0x8b9   :  { %18476 = vmatprep.subr.bf16.mxu1 %v21724_v30 }
 0x8bb   :  { %18432 = vmatpush3.bf16.msra.mxu0 %v21537_v45 }
 0x8bc   :  { %18477 = vmatpush3.bf16.msra.mxu1 %v21541_v32 }
 0x8bd   :  { %18478 = vmatprep.subr.bf16.mxu1 %v21724_v30 }
 0x8be   :  { %16034 = vmatmul.mubr.bf16.vlgmr.msra.gmra.mrb[64].mxu0 %v14287_v58 }
 0x8c0   :  { %18479 = vmatpush3.bf16.msra.mxu1 %v21542_v5 }
 0x8c1   :  { %18480 = vmatprep.subr.bf16.mxu1 %v21724_v30 }
 0x8c4   :  { %18481 = vmatpush3.bf16.msra.mxu1 %v21543_v6 }
 0x8c5   :  { %18482 = vmatprep.subr.bf16.mxu1 %v21724_v30 }
 0x8c8   :  { %18483 = vmatpush3.bf16.msra.mxu1 %v21544_v7 }
 0x8c9   :  { %18484 = vmatprep.subr.bf16.mxu1 %v21724_v30 }
 0x8cc   :  { %18485 = vmatpush3.bf16.msra.mxu1 %v21545_v17 }
 0x8d1   :  { %v18164_v3 = vpop.f32.mrb[40].mxu0 }
 0x8d2   :  { %v18186_v8 = vpop.f32.mrb[32].mxu1  ;;  %v18165_v13 = vpop.f32.mrb[41].mxu0 }
 0x8d3   :  { %v18166_v15 = vadd.f32 %v18165_v13, %v18164_v3  ;;  %v18187_v19 = vpop.f32.mrb[33].mxu1  ;;  %v18167_v20 = vpop.f32.mrb[42].mxu0 }
 0x8d4   :  { %v18188_v22 = vadd.f32 %v18187_v19, %v18186_v8  ;;  %v18189_v28 = vpop.f32.mrb[34].mxu1  ;;  %v18168_v54 = vpop.f32.mrb[43].mxu0 }
 0x8d5   :  { %v14123_v10 = vadd.f32 %v18166_v15, %v14083_v52  ;;  %v18190_v23 = vpop.f32.mrb[35].mxu1 }
 0x8d7   :  { %v14163_v25 = vadd.f32 %v18188_v22, %v14123_v10 }
 0x8e2   :  { %v14242_v26 = vpop.f32.mrb[36].mxu1 }
 0x8e3   :  { %v18468_v44 = vpop.f32.mrb[37].mxu1 }
 0x8e4   :  { %v14245_v27 = vpop.f32.mrb[38].mxu1 }
 0x8e5   :  { %v18469_v21 = vpop.f32.mrb[39].mxu1 }
 0x8f1   :  { %v18208_v16 = vpop.f32.mrb[44].mxu0 }
 0x8f2   :  { %v18209_v51 = vpop.f32.mrb[45].mxu0 }
 0x8f3   :  { %v18210_v30 = vadd.f32 %v18209_v51, %v18208_v16  ;;  %v18211_v1 = vpop.f32.mrb[46].mxu0 }
 0x8f4   :  { %v18212_v61 = vpop.f32.mrb[47].mxu0 }
 0x8f5   :  { %v14203_v29 = vadd.f32 %v18210_v30, %v14163_v25 }
 0x8f7   :  { %v14243_v34 = vadd.f32 %v14242_v26, %v14203_v29 }
 0x8f9   :  { %v14268_v11 = vmax.f32 %v14243_v34, 0.0 }
 0x8fb   :  { %v14289_v47 = vpack.c.bf16 %v14268_v11, %v14268_v11 }
 0x8fd   :  { %18487 = vmatmul.mubr.bf16.vlgmr.msra.gmra.mrb[60].mxu1 %v14289_v47 }
 0x902   :  { %v18235_v35 = vpop.f32.mrb[40].mxu1 }
 0x903   :  { %v18236_v36 = vpop.f32.mrb[41].mxu1 }
 0x904   :  { %v18237_v46 = vadd.f32 %v18236_v36, %v18235_v35  ;;  %v18238_v48 = vpop.f32.mrb[42].mxu1  ;;  %v18098_v36 = vld [vmem:[#allocation13] ss:$0 sm:$0xff] }
 0x905   :  { %v18239_v37 = vpop.f32.mrb[43].mxu1 }
 0x906   :  { %v15676_v53 = vadd.f32 %v18237_v46, %v17929_v56  ;;  %v18099_v56 = vld [vmem:[#allocation2] ss:$0 sm:$0xff] }
 0x911   :  { %v18257_v50 = vpop.f32.mrb[48].mxu0 }
 0x912   :  { %v18258_v38 = vpop.f32.mrb[49].mxu0 }
 0x913   :  { %v18259_v40 = vadd.f32 %v18258_v38, %v18257_v50  ;;  %v18260_v4 = vpop.f32.mrb[50].mxu0 }
 0x914   :  { %v18261_v12 = vpop.f32.mrb[51].mxu0 }
 0x915   :  { %v15716_v60 = vadd.f32 %v18259_v40, %v15676_v53 }
 0x922   :  { %v18279_v0 = vpop.f32.mrb[44].mxu1 }
 0x923   :  { %v18280_v41 = vpop.f32.mrb[45].mxu1 }
 0x924   :  { %v18281_v2 = vadd.f32 %v18280_v41, %v18279_v0  ;;  %v18282_v49 = vpop.f32.mrb[46].mxu1 }
 0x925   :  { %v18283_v14 = vpop.f32.mrb[47].mxu1 }
 0x926   :  { %v15756_v31 = vadd.f32 %v18281_v2, %v15716_v60 }
 0x931   :  { %v18301_v18 = vpop.f32.mrb[52].mxu0 }
 0x932   :  { %v18302_v39 = vpop.f32.mrb[53].mxu0 }
 0x933   :  { %v18303_v9 = vadd.f32 %v18302_v39, %v18301_v18  ;;  %v18304_v33 = vpop.f32.mrb[54].mxu0 }
 0x934   :  { %v18305_v42 = vpop.f32.mrb[55].mxu0 }
 0x935   :  { %v15796_v59 = vadd.f32 %v18303_v9, %v15756_v31 }
 0x942   :  { %v18323_v55 = vpop.f32.mrb[48].mxu1 }
 0x943   :  { %v18324_v24 = vpop.f32.mrb[49].mxu1 }
 0x944   :  { %v18325_v63 = vadd.f32 %v18324_v24, %v18323_v55  ;;  %v18326_v57 = vpop.f32.mrb[50].mxu1 }
 0x945   :  { %v18327_v62 = vpop.f32.mrb[51].mxu1 }
 0x946   :  { %v15836_v52 = vadd.f32 %v18325_v63, %v15796_v59 }
 0x951   :  { %v18345_v45 = vpop.f32.mrb[56].mxu0 }
 0x952   :  { %v18346_v43 = vpop.f32.mrb[57].mxu0 }
 0x953   :  { %v18347_v32 = vadd.f32 %v18346_v43, %v18345_v45  ;;  %v18348_v58 = vpop.f32.mrb[58].mxu0 }
 0x954   :  { %v18349_v5 = vpop.f32.mrb[59].mxu0 }
 0x955   :  { %v15876_v6 = vadd.f32 %v18347_v32, %v15836_v52 }
 0x962   :  { %v18367_v7 = vpop.f32.mrb[52].mxu1 }
 0x963   :  { %v18368_v17 = vpop.f32.mrb[53].mxu1 }
 0x964   :  { %v18369_v3 = vadd.f32 %v18368_v17, %v18367_v7  ;;  %v18370_v8 = vpop.f32.mrb[54].mxu1 }
 0x965   :  { %v18371_v13 = vpop.f32.mrb[55].mxu1 }
 0x966   :  { %v15916_v15 = vadd.f32 %v18369_v3, %v15876_v6 }
 0x971   :  { %v18389_v19 = vpop.f32.mrb[60].mxu0 }
 0x972   :  { %v18390_v20 = vpop.f32.mrb[61].mxu0 }
 0x973   :  { %v18391_v22 = vadd.f32 %v18390_v20, %v18389_v19  ;;  %v18392_v28 = vpop.f32.mrb[62].mxu0 }
 0x974   :  { %v18393_v54 = vpop.f32.mrb[63].mxu0 }
 0x975   :  { %v15956_v10 = vadd.f32 %v18391_v22, %v15916_v15 }
 0x982   :  { %v18411_v23 = vpop.f32.mrb[56].mxu1 }
 0x983   :  { %v18412_v25 = vpop.f32.mrb[57].mxu1 }
 0x984   :  { %v18413_v26 = vadd.f32 %v18412_v25, %v18411_v23  ;;  %v18414_v44 = vpop.f32.mrb[58].mxu1 }
 0x985   :  { %v18415_v27 = vpop.f32.mrb[59].mxu1 }
 0x986   :  { %v15996_v21 = vadd.f32 %v18413_v26, %v15956_v10 }
 0x991   :  { %v18433_v16 = vpop.f32.mrb[64].mxu0 }
 0x992   :  { %v18434_v51 = vpop.f32.mrb[65].mxu0 }
 0x993   :  { %v18435_v30 = vadd.f32 %v18434_v51, %v18433_v16  ;;  %v18436_v1 = vpop.f32.mrb[66].mxu0 }
 0x994   :  { %v18437_v61 = vpop.f32.mrb[67].mxu0 }
 0x995   :  { %v16036_v29 = vadd.f32 %v18435_v30, %v15996_v21 }
 0x9d0   :  { %v16075_v34 = vpop.f32.mrb[60].mxu1 }
 0x9d1   :  { %v16076_v11 = vadd.f32 %v16075_v34, %v16036_v29  ;;  %v18488_v47 = vpop.f32.mrb[61].mxu1 }
 0x9d2   :  { %v16078_v35 = vpop.f32.mrb[62].mxu1 }
 0x9d3   :  { %v16081_v46 = vmax.f32 %v16076_v11, 0.0  ;;  %v18489_v48 = vpop.f32.mrb[63].mxu1 }
 0x9d5   :  { %v16089_v37 = vmul.f32 %v18098_v36, %v16081_v46 }
 0x9d7   :  { %16090 = vadd.xlane.f32.xlu0 %v16089_v37 }
 0xa64   :  { %v16091_v50 = vpop.xlane.xlu0 %16090 }
 0xa65   :  { %v16099_v38 = vadd.f32 %v18099_v56, %v16091_v50 }
 0xa67   :  { %16101 = vst.msk [vmem:[%s22276_s9] sm:$0xff] %vm16100_vm4, %v16099_v38 }
 0xa68   :  { %16106 = vsyncpa [#allocation4], 1 }
 0xa69   :  { %16107 = vsyncpa [#allocation6], 1 }
 0xa6a   :  { %16108 = vsyncpa [#allocation9], 1 }
 0xa6b   :  { %16109 = vsyncpa [#allocation12], 1 }

</bundles_post_ra>
